<compile_context>
chip_gen: v7x
topology: tpu7x:2x2x1
jax: 0.10.0
libtpu: 0.0.40
codegen_flags: <defaults>
</compile_context>

<pallas_src>
import jax
import jax.numpy as jnp
from jax import lax
from jax.experimental import pallas as pl
from jax.experimental.pallas import tpu as pltpu

LEAKY_SLOPE = 0.2
BN_EPS = 1e-5
TM_MAX = 1024          # max rows per grid step; (1024, K<=2048) bf16 tile <= 4 MiB


# --------------------------------------------------------------------------
# Pallas kernel: (rows, K) @ (K, Cout) with optional fused BN+LeakyReLU on the
# input patches, optional per-step batch-stat partials, optional activation.
# --------------------------------------------------------------------------
def _make_conv_kernel(activation, fuse_prescale, need_stats):
    def kernel(*refs):
        it = iter(refs)
        p_ref = next(it)
        w_ref = next(it)
        scale_ref = next(it) if fuse_prescale else None
        shift_ref = next(it) if fuse_prescale else None
        y_ref = next(it)
        sum_ref = next(it) if need_stats else None
        ssq_ref = next(it) if need_stats else None

        p = p_ref[...]
        if fuse_prescale:
            # Previous layer's BatchNorm (scale/shift tiled to K) + LeakyReLU,
            # applied to the patch tile; VPU work, hidden under the MXU.
            z = p.astype(jnp.float32) * scale_ref[...] + shift_ref[...]
            z = jnp.where(z >= 0, z, LEAKY_SLOPE * z)
            p = z.astype(jnp.bfloat16)

        y = jnp.dot(p, w_ref[...], preferred_element_type=jnp.float32)  # MXU bf16

        if need_stats:
            # Per-grid-step partial sums -> reduced in JAX (keeps grid "parallel").
            sum_ref[...] = jnp.sum(y, axis=0, keepdims=True).reshape(1, 1, -1)
            ssq_ref[...] = jnp.sum(y * y, axis=0, keepdims=True).reshape(1, 1, -1)

        if activation == "leaky":
            y = jnp.where(y >= 0, y, LEAKY_SLOPE * y)
        elif activation == "sigmoid":
            y = 1.0 / (1.0 + jnp.exp(-y))           # EUP exp + VPU recip
        y_ref[...] = y.astype(y_ref.dtype)

    return kernel


def conv_rows_pallas(patches, wmat, scale=None, shift=None, activation=None,
                     need_stats=False, out_dtype=jnp.bfloat16):
    """patches: (M, K) bf16, wmat: (K, Cout) bf16 -> (y, sum_partials, ssq_partials)."""
    M, K = patches.shape
    Cout = wmat.shape[1]

    tm = min(M, TM_MAX)
    while M % tm:          # M is always a nice multiple at these shapes
        tm //= 2
    nt = M // tm
    fuse = scale is not None

    in_specs = [pl.BlockSpec((tm, K), lambda i: (i, 0)),
                pl.BlockSpec((K, Cout), lambda i: (0, 0))]
    inputs = [patches, wmat]
    if fuse:
        in_specs += [pl.BlockSpec((1, K), lambda i: (0, 0)),
                     pl.BlockSpec((1, K), lambda i: (0, 0))]
        inputs += [scale.reshape(1, K).astype(jnp.float32),
                   shift.reshape(1, K).astype(jnp.float32)]

    if need_stats:
        out_shape = (jax.ShapeDtypeStruct((M, Cout), out_dtype),
                     jax.ShapeDtypeStruct((nt, 1, Cout), jnp.float32),
                     jax.ShapeDtypeStruct((nt, 1, Cout), jnp.float32))
        out_specs = (pl.BlockSpec((tm, Cout), lambda i: (i, 0)),
                     pl.BlockSpec((1, 1, Cout), lambda i: (i, 0, 0)),
                     pl.BlockSpec((1, 1, Cout), lambda i: (i, 0, 0)))
    else:
        out_shape = jax.ShapeDtypeStruct((M, Cout), out_dtype)
        out_specs = pl.BlockSpec((tm, Cout), lambda i: (i, 0))

    outs = pl.pallas_call(
        _make_conv_kernel(activation, fuse, need_stats),
        out_shape=out_shape,
        grid=(nt,),
        in_specs=in_specs,
        out_specs=out_specs,
        compiler_params=pltpu.CompilerParams(
            dimension_semantics=("parallel",)),   # no resident accumulators
    )(*inputs)

    if need_stats:
        y, s, ss = outs
        return y, s, ss
    return outs, None, None


# --------------------------------------------------------------------------
# JAX glue: im2col (layout only), BN affine folding, parameter setup
# --------------------------------------------------------------------------
def extract_patches_rows(x, kh, kw, stride, pad, pad_value=None):
    """x: (N,H,W,C) -> (rows (N*Ho*Wo, kh*kw*C), Ho, Wo).  Pure layout glue.

    pad_value (per-channel, shape (C,)) is used when the padded tensor is a
    raw pre-BN activation: it is chosen so BN+LeakyReLU maps pads back to 0."""
    N, H, W, C = x.shape
    if pad:
        Hp, Wp = H + 2 * pad, W + 2 * pad
        if pad_value is None:
            x = jnp.pad(x, ((0, 0), (pad, pad), (pad, pad), (0, 0)))
        else:
            xp = jnp.broadcast_to(pad_value.astype(x.dtype).reshape(1, 1, 1, C),
                                  (N, Hp, Wp, C))
            x = xp.at[:, pad:pad + H, pad:pad + W, :].set(x)
    N, Hp, Wp, C = x.shape
    Ho = (Hp - kh) // stride + 1
    Wo = (Wp - kw) // stride + 1
    cols = []
    for i in range(kh):
        for j in range(kw):
            cols.append(x[:, i::stride, j::stride, :][:, :Ho, :Wo, :])
    p = jnp.stack(cols, axis=3)                     # (N, Ho, Wo, kh*kw, C)
    return p.reshape(N * Ho * Wo, kh * kw * C), Ho, Wo


def bn_scale_shift(sum_part, ssq_part, cnt, gamma, beta):
    """Fold training-mode BatchNorm (biased variance) into per-channel scale/shift."""
    s = jnp.sum(sum_part, axis=(0, 1))
    ss = jnp.sum(ssq_part, axis=(0, 1))
    mean = s / cnt
    var = ss / cnt - mean * mean                    # biased, like BN training
    scale = gamma / jnp.sqrt(var + BN_EPS)
    shift = beta - mean * scale
    return scale, shift


def init_params(key, nc=3, ndf=8):
    """Deterministic synthetic parameters.  Conv weights stored HWIO
    (== PyTorch (Cout,Cin,KH,KW).transpose(2,3,1,0)); BN has affine gamma/beta."""
    chans = [nc, ndf, ndf * 2, ndf * 4, ndf * 8, ndf * 16, 1]
    params = {}
    keys = jax.random.split(key, 16)
    ki = 0
    for li in range(1, 7):
        cin, cout = chans[li - 1], chans[li]
        params[f"w{li}"] = 0.05 * jax.random.normal(keys[ki], (4, 4, cin, cout),
                                                    jnp.float32)
        ki += 1
        if 2 <= li <= 5:
            params[f"gamma{li}"] = 1.0 + 0.1 * jax.random.normal(
                keys[ki], (cout,), jnp.float32); ki += 1
            params[f"beta{li}"] = 0.1 * jax.random.normal(
                keys[ki], (cout,), jnp.float32); ki += 1
    return params


@jax.jit
def netD_forward(x_nchw, params):
    x = jnp.transpose(x_nchw, (0, 2, 3, 1)).astype(jnp.float32)  # NCHW -> NHWC
    N = x.shape[0]

    def wmat(li):
        w = params[f"w{li}"]
        return w.reshape(-1, w.shape[-1]).astype(jnp.bfloat16)

    # Layer 1: Conv(nc -> ndf, 4, 2, 1) + LeakyReLU (no BN, no stats).
    p, Ho, Wo = extract_patches_rows(x.astype(jnp.bfloat16), 4, 4, 2, 1)
    y1, _, _ = conv_rows_pallas(p, wmat(1), activation="leaky")
    x1 = y1.reshape(N, Ho, Wo, -1)                  # post-activation, bf16

    # Layer 2: Conv + batch stats (its BN+LeakyReLU is fused into layer 3).
    p, Ho, Wo = extract_patches_rows(x1, 4, 4, 2, 1)
    y, s_p, ss_p = conv_rows_pallas(p, wmat(2), need_stats=True)
    prev_raw = y.reshape(N, Ho, Wo, -1)             # raw pre-BN conv output
    scale_c, shift_c = bn_scale_shift(s_p, ss_p, N * Ho * Wo,
                                      params["gamma2"], params["beta2"])

    # Layers 3..5: fused (prev BN + LeakyReLU on patches) -> Conv -> stats.
    for li in range(3, 6):
        pad_val = -shift_c / scale_c                # maps pads back to 0 post BN+leaky
        scale_k = jnp.tile(scale_c, 16)             # channel pattern repeated kh*kw
        shift_k = jnp.tile(shift_c, 16)
        p, Ho, Wo = extract_patches_rows(prev_raw, 4, 4, 2, 1, pad_value=pad_val)
        y, s_p, ss_p = conv_rows_pallas(p, wmat(li), scale=scale_k, shift=shift_k,
                                        need_stats=True)
        prev_raw = y.reshape(N, Ho, Wo, -1)
        scale_c, shift_c = bn_scale_shift(s_p, ss_p, N * Ho * Wo,
                                          params[f"gamma{li}"], params[f"beta{li}"])

    # Layer 6: fused (layer-5 BN + LeakyReLU) -> Conv(16ndf -> 1, 4, 1, 0) -> Sigmoid.
    # Single grid step: (N, 2048) @ (2048, 1).
    scale_k = jnp.tile(scale_c, 16)
    shift_k = jnp.tile(shift_c, 16)
    p, Ho, Wo = extract_patches_rows(prev_raw, 4, 4, 1, 0)
    y6, _, _ = conv_rows_pallas(p, wmat(6), scale=scale_k, shift=shift_k,
                                activation="sigmoid", out_dtype=jnp.float32)
    return y6.reshape(N)                            # == output.view(-1, 1).squeeze(1)


# --------------------------------------------------------------------------
# Pure-JAX reference mirroring the kernel precision policy (bf16 operands on
# the conv, f32 accumulation / BN), for a correctness check.
# --------------------------------------------------------------------------
def ref_forward(x_nchw, params):
    dn = ("NCHW", "OIHW", "NCHW")

    def conv(x, w_hwio, stride, pad):
        w = jnp.transpose(w_hwio, (3, 2, 0, 1)).astype(jnp.bfloat16)
        return lax.conv_general_dilated(
            x.astype(jnp.bfloat16), w, (stride, stride),
            [(pad, pad), (pad, pad)], dimension_numbers=dn,
            preferred_element_type=jnp.float32)

    leaky = lambda t: jnp.where(t >= 0, t, LEAKY_SLOPE * t)

    def bn(t, g, b):
        m = jnp.mean(t, axis=(0, 2, 3), keepdims=True)
        v = jnp.mean((t - m) ** 2, axis=(0, 2, 3), keepdims=True)
        return ((t - m) / jnp.sqrt(v + BN_EPS)) * g[None, :, None, None] \
            + b[None, :, None, None]

    x = leaky(conv(x_nchw, params["w1"], 2, 1))
    for li in range(2, 6):
        x = leaky(bn(conv(x, params[f"w{li}"], 2, 1),
                     params[f"gamma{li}"], params[f"beta{li}"]))
    x = jax.nn.sigmoid(conv(x, params["w6"], 1, 0))
    return x.reshape(-1)


if __name__ == "__main__":
    # Spatial size 128 is forced by the fixed 6-conv stack (128->64->...->4->1);
    # batch and ndf are shrunk for a small synthetic test.
    N, NC, IMG, NDF = 2, 3, 128, 8
    key = jax.random.PRNGKey(0)
    kx, kp = jax.random.split(key)
    params = init_params(kp, nc=NC, ndf=NDF)
    x = jax.random.normal(kx, (N, NC, IMG, IMG), jnp.float32)

    out = netD_forward(x, params)
    out = jax.block_until_ready(out)
    assert out.shape == (N,)
    assert out.dtype == jnp.float32

    ref = jax.block_until_ready(ref_forward(x, params))
    err = float(jnp.max(jnp.abs(out - ref)))
    assert err < 3e-2, f"mismatch vs JAX reference: {err}"

    print("KERNEL_OK")
</pallas_src>

<mosaic_0001>
module attributes {stable_mosaic.version = 11 : i64} {
  func.func @kernel(%arg0: i32, %arg1: memref<1024x48xbf16, #tpu.memory_space<vmem>>, %arg2: memref<48x8xbf16, #tpu.memory_space<vmem>>, %arg3: memref<1024x8xbf16, #tpu.memory_space<vmem>>) attributes {dimension_semantics = [#tpu.dimension_semantics<parallel>], iteration_bounds = array<i64: 8>, scalar_prefetch = 0 : i64, scratch_operands = 0 : i64, tpu.core_type = #tpu.core_type<tc>, window_params = [{transform_indices = @transform_0, window_bounds = array<i64: 1024, 48>}, {pipeline_mode = #tpu.pipeline_mode<synchronous>, transform_indices = @transform_1, window_bounds = array<i64: 48, 8>}, {transform_indices = @transform_2, window_bounds = array<i64: 1024, 8>}]} {
    %c0 = arith.constant 0 : index
    %c0_0 = arith.constant 0 : index
    %0 = vector.load %arg1[%c0, %c0_0] : memref<1024x48xbf16, #tpu.memory_space<vmem>>, vector<1024x48xbf16>
    %c0_1 = arith.constant 0 : index
    %c0_2 = arith.constant 0 : index
    %1 = vector.load %arg2[%c0_1, %c0_2] : memref<48x8xbf16, #tpu.memory_space<vmem>>, vector<48x8xbf16>
    %cst = arith.constant dense<0.000000e+00> : vector<1024x8xf32>
    %2 = tpu.matmul %0, %1, %cst {dimension_numbers = #tpu.dot_dimension_numbers<[1], [0], [0], [1], [0, 0, 1, 1], [], []>} : vector<1024x48xbf16>, vector<48x8xbf16>, vector<1024x8xf32> -> vector<1024x8xf32>
    %cst_3 = arith.constant 0.000000e+00 : f32
    %3 = vector.broadcast %cst_3 : f32 to vector<1024x8xf32>
    %4 = arith.cmpf oge, %2, %3 : vector<1024x8xf32>
    %cst_4 = arith.constant 2.000000e-01 : f32
    %5 = vector.broadcast %cst_4 : f32 to vector<1024x8xf32>
    %6 = arith.mulf %5, %2 : vector<1024x8xf32>
    %7 = arith.select %4, %2, %6 : vector<1024x8xi1>, vector<1024x8xf32>
    %8 = arith.truncf %7 : vector<1024x8xf32> to vector<1024x8xbf16>
    %c0_5 = arith.constant 0 : index
    %c0_6 = arith.constant 0 : index
    %9 = vector.load %arg3[%c0_5, %c0_6] : memref<1024x8xbf16, #tpu.memory_space<vmem>>, vector<1024x8xbf16>
    tpu.vector_store %arg3[%c0_5, %c0_6], %8 {strides = array<i32>} : memref<1024x8xbf16, #tpu.memory_space<vmem>>, vector<1024x8xbf16>,
    return
  }
  func.func @transform_0(%arg0: i32) -> (i32, i32) {
    %c0_i32 = arith.constant 0 : i32
    %c0_i32_0 = arith.constant 0 : i32
    return %arg0, %c0_i32 : i32, i32
  }
  func.func @transform_1(%arg0: i32) -> (i32, i32) {
    %c0_i32 = arith.constant 0 : i32
    %c0_i32_0 = arith.constant 0 : i32
    %c0_i32_1 = arith.constant 0 : i32
    return %c0_i32, %c0_i32_0 : i32, i32
  }
  func.func @transform_2(%arg0: i32) -> (i32, i32) {
    %c0_i32 = arith.constant 0 : i32
    %c0_i32_0 = arith.constant 0 : i32
    return %arg0, %c0_i32 : i32, i32
  }
}

module attributes {stable_mosaic.version = 11 : i64} {
  func.func @kernel(%arg0: i32, %arg1: memref<1024x128xbf16, #tpu.memory_space<vmem>>, %arg2: memref<128x16xbf16, #tpu.memory_space<vmem>>, %arg3: memref<1024x16xbf16, #tpu.memory_space<vmem>>, %arg4: memref<1x1x16xf32, #tpu.memory_space<vmem>>, %arg5: memref<1x1x16xf32, #tpu.memory_space<vmem>>) attributes {dimension_semantics = [#tpu.dimension_semantics<parallel>], iteration_bounds = array<i64: 2>, scalar_prefetch = 0 : i64, scratch_operands = 0 : i64, tpu.core_type = #tpu.core_type<tc>, window_params = [{transform_indices = @transform_0, window_bounds = array<i64: 1024, 128>}, {pipeline_mode = #tpu.pipeline_mode<synchronous>, transform_indices = @transform_1, window_bounds = array<i64: 128, 16>}, {transform_indices = @transform_2, window_bounds = array<i64: 1024, 16>}, {transform_indices = @transform_3, window_bounds = array<i64: 1, 1, 16>}, {transform_indices = @transform_4, window_bounds = array<i64: 1, 1, 16>}]} {
    %c0 = arith.constant 0 : index
    %c0_0 = arith.constant 0 : index
    %0 = vector.load %arg1[%c0, %c0_0] : memref<1024x128xbf16, #tpu.memory_space<vmem>>, vector<1024x128xbf16>
    %c0_1 = arith.constant 0 : index
    %c0_2 = arith.constant 0 : index
    %1 = vector.load %arg2[%c0_1, %c0_2] : memref<128x16xbf16, #tpu.memory_space<vmem>>, vector<128x16xbf16>
    %cst = arith.constant dense<0.000000e+00> : vector<1024x16xf32>
    %2 = tpu.matmul %0, %1, %cst {dimension_numbers = #tpu.dot_dimension_numbers<[1], [0], [0], [1], [0, 0, 1, 1], [], []>} : vector<1024x128xbf16>, vector<128x16xbf16>, vector<1024x16xf32> -> vector<1024x16xf32>
    %cst_3 = arith.constant dense<0.000000e+00> : vector<16xf32>
    %3 = vector.multi_reduction <add>, %2, %cst_3 [0] : vector<1024x16xf32> to vector<16xf32>
    %4 = vector.shape_cast %3 : vector<16xf32> to vector<1x16xf32>
    %5 = vector.shape_cast %4 : vector<1x16xf32> to vector<1x1x16xf32>
    %c0_4 = arith.constant 0 : index
    %c0_5 = arith.constant 0 : index
    %c0_6 = arith.constant 0 : index
    %6 = vector.load %arg4[%c0_4, %c0_5, %c0_6] : memref<1x1x16xf32, #tpu.memory_space<vmem>>, vector<1x1x16xf32>
    tpu.vector_store %arg4[%c0_4, %c0_5, %c0_6], %5 {strides = array<i32>} : memref<1x1x16xf32, #tpu.memory_space<vmem>>, vector<1x1x16xf32>,
    %7 = arith.mulf %2, %2 : vector<1024x16xf32>
    %cst_7 = arith.constant dense<0.000000e+00> : vector<16xf32>
    %8 = vector.multi_reduction <add>, %7, %cst_7 [0] : vector<1024x16xf32> to vector<16xf32>
    %9 = vector.shape_cast %8 : vector<16xf32> to vector<1x16xf32>
    %10 = vector.shape_cast %9 : vector<1x16xf32> to vector<1x1x16xf32>
    %c0_8 = arith.constant 0 : index
    %c0_9 = arith.constant 0 : index
    %c0_10 = arith.constant 0 : index
    %11 = vector.load %arg5[%c0_8, %c0_9, %c0_10] : memref<1x1x16xf32, #tpu.memory_space<vmem>>, vector<1x1x16xf32>
    tpu.vector_store %arg5[%c0_8, %c0_9, %c0_10], %10 {strides = array<i32>} : memref<1x1x16xf32, #tpu.memory_space<vmem>>, vector<1x1x16xf32>,
    %12 = arith.truncf %2 : vector<1024x16xf32> to vector<1024x16xbf16>
    %c0_11 = arith.constant 0 : index
    %c0_12 = arith.constant 0 : index
    %13 = vector.load %arg3[%c0_11, %c0_12] : memref<1024x16xbf16, #tpu.memory_space<vmem>>, vector<1024x16xbf16>
    tpu.vector_store %arg3[%c0_11, %c0_12], %12 {strides = array<i32>} : memref<1024x16xbf16, #tpu.memory_space<vmem>>, vector<1024x16xbf16>,
    return
  }
  func.func @transform_0(%arg0: i32) -> (i32, i32) {
    %c0_i32 = arith.constant 0 : i32
    %c0_i32_0 = arith.constant 0 : i32
    return %arg0, %c0_i32 : i32, i32
  }
  func.func @transform_1(%arg0: i32) -> (i32, i32) {
    %c0_i32 = arith.constant 0 : i32
    %c0_i32_0 = arith.constant 0 : i32
    %c0_i32_1 = arith.constant 0 : i32
    return %c0_i32, %c0_i32_0 : i32, i32
  }
  func.func @transform_2(%arg0: i32) -> (i32, i32) {
    %c0_i32 = arith.constant 0 : i32
    %c0_i32_0 = arith.constant 0 : i32
    return %arg0, %c0_i32 : i32, i32
  }
  func.func @transform_3(%arg0: i32) -> (i32, i32, i32) {
    %c0_i32 = arith.constant 0 : i32
    %c0_i32_0 = arith.constant 0 : i32
    %c0_i32_1 = arith.constant 0 : i32
    return %arg0, %c0_i32, %c0_i32_0 : i32, i32, i32
  }
  func.func @transform_4(%arg0: i32) -> (i32, i32, i32) {
    %c0_i32 = arith.constant 0 : i32
    %c0_i32_0 = arith.constant 0 : i32
    %c0_i32_1 = arith.constant 0 : i32
    return %arg0, %c0_i32, %c0_i32_0 : i32, i32, i32
  }
}

module attributes {stable_mosaic.version = 11 : i64} {
  func.func @kernel(%arg0: i32, %arg1: memref<512x256xbf16, #tpu.memory_space<vmem>>, %arg2: memref<256x32xbf16, #tpu.memory_space<vmem>>, %arg3: memref<1x256xf32, #tpu.memory_space<vmem>>, %arg4: memref<1x256xf32, #tpu.memory_space<vmem>>, %arg5: memref<512x32xbf16, #tpu.memory_space<vmem>>, %arg6: memref<1x1x32xf32, #tpu.memory_space<vmem>>, %arg7: memref<1x1x32xf32, #tpu.memory_space<vmem>>) attributes {dimension_semantics = [#tpu.dimension_semantics<parallel>], iteration_bounds = array<i64: 1>, scalar_prefetch = 0 : i64, scratch_operands = 0 : i64, tpu.core_type = #tpu.core_type<tc>, window_params = [{transform_indices = @transform_0, window_bounds = array<i64: 512, 256>}, {pipeline_mode = #tpu.pipeline_mode<synchronous>, transform_indices = @transform_1, window_bounds = array<i64: 256, 32>}, {pipeline_mode = #tpu.pipeline_mode<synchronous>, transform_indices = @transform_2, window_bounds = array<i64: 1, 256>}, {pipeline_mode = #tpu.pipeline_mode<synchronous>, transform_indices = @transform_3, window_bounds = array<i64: 1, 256>}, {transform_indices = @transform_4, window_bounds = array<i64: 512, 32>}, {transform_indices = @transform_5, window_bounds = array<i64: 1, 1, 32>}, {transform_indices = @transform_6, window_bounds = array<i64: 1, 1, 32>}]} {
    %c0 = arith.constant 0 : index
    %c0_0 = arith.constant 0 : index
    %0 = vector.load %arg1[%c0, %c0_0] : memref<512x256xbf16, #tpu.memory_space<vmem>>, vector<512x256xbf16>
    %1 = arith.extf %0 : vector<512x256xbf16> to vector<512x256xf32>
    %c0_1 = arith.constant 0 : index
    %c0_2 = arith.constant 0 : index
    %2 = vector.load %arg3[%c0_1, %c0_2] : memref<1x256xf32, #tpu.memory_space<vmem>>, vector<1x256xf32>
    %3 = vector.broadcast %2 : vector<1x256xf32> to vector<512x256xf32>
    %4 = arith.mulf %1, %3 : vector<512x256xf32>
    %c0_3 = arith.constant 0 : index
    %c0_4 = arith.constant 0 : index
    %5 = vector.load %arg4[%c0_3, %c0_4] : memref<1x256xf32, #tpu.memory_space<vmem>>, vector<1x256xf32>
    %6 = vector.broadcast %5 : vector<1x256xf32> to vector<512x256xf32>
    %7 = arith.addf %4, %6 : vector<512x256xf32>
    %cst = arith.constant 0.000000e+00 : f32
    %8 = vector.broadcast %cst : f32 to vector<512x256xf32>
    %9 = arith.cmpf oge, %7, %8 : vector<512x256xf32>
    %cst_5 = arith.constant 2.000000e-01 : f32
    %10 = vector.broadcast %cst_5 : f32 to vector<512x256xf32>
    %11 = arith.mulf %10, %7 : vector<512x256xf32>
    %12 = arith.select %9, %7, %11 : vector<512x256xi1>, vector<512x256xf32>
    %13 = arith.truncf %12 : vector<512x256xf32> to vector<512x256xbf16>
    %c0_6 = arith.constant 0 : index
    %c0_7 = arith.constant 0 : index
    %14 = vector.load %arg2[%c0_6, %c0_7] : memref<256x32xbf16, #tpu.memory_space<vmem>>, vector<256x32xbf16>
    %cst_8 = arith.constant dense<0.000000e+00> : vector<512x32xf32>
    %15 = tpu.matmul %13, %14, %cst_8 {dimension_numbers = #tpu.dot_dimension_numbers<[1], [0], [0], [1], [0, 0, 1, 1], [], []>} : vector<512x256xbf16>, vector<256x32xbf16>, vector<512x32xf32> -> vector<512x32xf32>
    %cst_9 = arith.constant dense<0.000000e+00> : vector<32xf32>
    %16 = vector.multi_reduction <add>, %15, %cst_9 [0] : vector<512x32xf32> to vector<32xf32>
    %17 = vector.shape_cast %16 : vector<32xf32> to vector<1x32xf32>
    %18 = vector.shape_cast %17 : vector<1x32xf32> to vector<1x1x32xf32>
    %c0_10 = arith.constant 0 : index
    %c0_11 = arith.constant 0 : index
    %c0_12 = arith.constant 0 : index
    %19 = vector.load %arg6[%c0_10, %c0_11, %c0_12] : memref<1x1x32xf32, #tpu.memory_space<vmem>>, vector<1x1x32xf32>
    tpu.vector_store %arg6[%c0_10, %c0_11, %c0_12], %18 {strides = array<i32>} : memref<1x1x32xf32, #tpu.memory_space<vmem>>, vector<1x1x32xf32>,
    %20 = arith.mulf %15, %15 : vector<512x32xf32>
    %cst_13 = arith.constant dense<0.000000e+00> : vector<32xf32>
    %21 = vector.multi_reduction <add>, %20, %cst_13 [0] : vector<512x32xf32> to vector<32xf32>
    %22 = vector.shape_cast %21 : vector<32xf32> to vector<1x32xf32>
    %23 = vector.shape_cast %22 : vector<1x32xf32> to vector<1x1x32xf32>
    %c0_14 = arith.constant 0 : index
    %c0_15 = arith.constant 0 : index
    %c0_16 = arith.constant 0 : index
    %24 = vector.load %arg7[%c0_14, %c0_15, %c0_16] : memref<1x1x32xf32, #tpu.memory_space<vmem>>, vector<1x1x32xf32>
    tpu.vector_store %arg7[%c0_14, %c0_15, %c0_16], %23 {strides = array<i32>} : memref<1x1x32xf32, #tpu.memory_space<vmem>>, vector<1x1x32xf32>,
    %25 = arith.truncf %15 : vector<512x32xf32> to vector<512x32xbf16>
    %c0_17 = arith.constant 0 : index
    %c0_18 = arith.constant 0 : index
    %26 = vector.load %arg5[%c0_17, %c0_18] : memref<512x32xbf16, #tpu.memory_space<vmem>>, vector<512x32xbf16>
    tpu.vector_store %arg5[%c0_17, %c0_18], %25 {strides = array<i32>} : memref<512x32xbf16, #tpu.memory_space<vmem>>, vector<512x32xbf16>,
    return
  }
  func.func @transform_0(%arg0: i32) -> (i32, i32) {
    %c0_i32 = arith.constant 0 : i32
    %c0_i32_0 = arith.constant 0 : i32
    return %arg0, %c0_i32 : i32, i32
  }
  func.func @transform_1(%arg0: i32) -> (i32, i32) {
    %c0_i32 = arith.constant 0 : i32
    %c0_i32_0 = arith.constant 0 : i32
    %c0_i32_1 = arith.constant 0 : i32
    return %c0_i32, %c0_i32_0 : i32, i32
  }
  func.func @transform_2(%arg0: i32) -> (i32, i32) {
    %c0_i32 = arith.constant 0 : i32
    %c0_i32_0 = arith.constant 0 : i32
    %c0_i32_1 = arith.constant 0 : i32
    return %c0_i32, %c0_i32_0 : i32, i32
  }
  func.func @transform_3(%arg0: i32) -> (i32, i32) {
    %c0_i32 = arith.constant 0 : i32
    %c0_i32_0 = arith.constant 0 : i32
    %c0_i32_1 = arith.constant 0 : i32
    return %c0_i32, %c0_i32_0 : i32, i32
  }
  func.func @transform_4(%arg0: i32) -> (i32, i32) {
    %c0_i32 = arith.constant 0 : i32
    %c0_i32_0 = arith.constant 0 : i32
    return %arg0, %c0_i32 : i32, i32
  }
  func.func @transform_5(%arg0: i32) -> (i32, i32, i32) {
    %c0_i32 = arith.constant 0 : i32
    %c0_i32_0 = arith.constant 0 : i32
    %c0_i32_1 = arith.constant 0 : i32
    return %arg0, %c0_i32, %c0_i32_0 : i32, i32, i32
  }
  func.func @transform_6(%arg0: i32) -> (i32, i32, i32) {
    %c0_i32 = arith.constant 0 : i32
    %c0_i32_0 = arith.constant 0 : i32
    %c0_i32_1 = arith.constant 0 : i32
    return %arg0, %c0_i32, %c0_i32_0 : i32, i32, i32
  }
}

module attributes {stable_mosaic.version = 11 : i64} {
  func.func @kernel(%arg0: i32, %arg1: memref<128x512xbf16, #tpu.memory_space<vmem>>, %arg2: memref<512x64xbf16, #tpu.memory_space<vmem>>, %arg3: memref<1x512xf32, #tpu.memory_space<vmem>>, %arg4: memref<1x512xf32, #tpu.memory_space<vmem>>, %arg5: memref<128x64xbf16, #tpu.memory_space<vmem>>, %arg6: memref<1x1x64xf32, #tpu.memory_space<vmem>>, %arg7: memref<1x1x64xf32, #tpu.memory_space<vmem>>) attributes {dimension_semantics = [#tpu.dimension_semantics<parallel>], iteration_bounds = array<i64: 1>, scalar_prefetch = 0 : i64, scratch_operands = 0 : i64, tpu.core_type = #tpu.core_type<tc>, window_params = [{transform_indices = @transform_0, window_bounds = array<i64: 128, 512>}, {pipeline_mode = #tpu.pipeline_mode<synchronous>, transform_indices = @transform_1, window_bounds = array<i64: 512, 64>}, {pipeline_mode = #tpu.pipeline_mode<synchronous>, transform_indices = @transform_2, window_bounds = array<i64: 1, 512>}, {pipeline_mode = #tpu.pipeline_mode<synchronous>, transform_indices = @transform_3, window_bounds = array<i64: 1, 512>}, {transform_indices = @transform_4, window_bounds = array<i64: 128, 64>}, {transform_indices = @transform_5, window_bounds = array<i64: 1, 1, 64>}, {transform_indices = @transform_6, window_bounds = array<i64: 1, 1, 64>}]} {
    %c0 = arith.constant 0 : index
    %c0_0 = arith.constant 0 : index
    %0 = vector.load %arg1[%c0, %c0_0] : memref<128x512xbf16, #tpu.memory_space<vmem>>, vector<128x512xbf16>
    %1 = arith.extf %0 : vector<128x512xbf16> to vector<128x512xf32>
    %c0_1 = arith.constant 0 : index
    %c0_2 = arith.constant 0 : index
    %2 = vector.load %arg3[%c0_1, %c0_2] : memref<1x512xf32, #tpu.memory_space<vmem>>, vector<1x512xf32>
    %3 = vector.broadcast %2 : vector<1x512xf32> to vector<128x512xf32>
    %4 = arith.mulf %1, %3 : vector<128x512xf32>
    %c0_3 = arith.constant 0 : index
    %c0_4 = arith.constant 0 : index
    %5 = vector.load %arg4[%c0_3, %c0_4] : memref<1x512xf32, #tpu.memory_space<vmem>>, vector<1x512xf32>
    %6 = vector.broadcast %5 : vector<1x512xf32> to vector<128x512xf32>
    %7 = arith.addf %4, %6 : vector<128x512xf32>
    %cst = arith.constant 0.000000e+00 : f32
    %8 = vector.broadcast %cst : f32 to vector<128x512xf32>
    %9 = arith.cmpf oge, %7, %8 : vector<128x512xf32>
    %cst_5 = arith.constant 2.000000e-01 : f32
    %10 = vector.broadcast %cst_5 : f32 to vector<128x512xf32>
    %11 = arith.mulf %10, %7 : vector<128x512xf32>
    %12 = arith.select %9, %7, %11 : vector<128x512xi1>, vector<128x512xf32>
    %13 = arith.truncf %12 : vector<128x512xf32> to vector<128x512xbf16>
    %c0_6 = arith.constant 0 : index
    %c0_7 = arith.constant 0 : index
    %14 = vector.load %arg2[%c0_6, %c0_7] : memref<512x64xbf16, #tpu.memory_space<vmem>>, vector<512x64xbf16>
    %cst_8 = arith.constant dense<0.000000e+00> : vector<128x64xf32>
    %15 = tpu.matmul %13, %14, %cst_8 {dimension_numbers = #tpu.dot_dimension_numbers<[1], [0], [0], [1], [0, 0, 1, 1], [], []>} : vector<128x512xbf16>, vector<512x64xbf16>, vector<128x64xf32> -> vector<128x64xf32>
    %cst_9 = arith.constant dense<0.000000e+00> : vector<64xf32>
    %16 = vector.multi_reduction <add>, %15, %cst_9 [0] : vector<128x64xf32> to vector<64xf32>
    %17 = vector.shape_cast %16 : vector<64xf32> to vector<1x64xf32>
    %18 = vector.shape_cast %17 : vector<1x64xf32> to vector<1x1x64xf32>
    %c0_10 = arith.constant 0 : index
    %c0_11 = arith.constant 0 : index
    %c0_12 = arith.constant 0 : index
    %19 = vector.load %arg6[%c0_10, %c0_11, %c0_12] : memref<1x1x64xf32, #tpu.memory_space<vmem>>, vector<1x1x64xf32>
    tpu.vector_store %arg6[%c0_10, %c0_11, %c0_12], %18 {strides = array<i32>} : memref<1x1x64xf32, #tpu.memory_space<vmem>>, vector<1x1x64xf32>,
    %20 = arith.mulf %15, %15 : vector<128x64xf32>
    %cst_13 = arith.constant dense<0.000000e+00> : vector<64xf32>
    %21 = vector.multi_reduction <add>, %20, %cst_13 [0] : vector<128x64xf32> to vector<64xf32>
    %22 = vector.shape_cast %21 : vector<64xf32> to vector<1x64xf32>
    %23 = vector.shape_cast %22 : vector<1x64xf32> to vector<1x1x64xf32>
    %c0_14 = arith.constant 0 : index
    %c0_15 = arith.constant 0 : index
    %c0_16 = arith.constant 0 : index
    %24 = vector.load %arg7[%c0_14, %c0_15, %c0_16] : memref<1x1x64xf32, #tpu.memory_space<vmem>>, vector<1x1x64xf32>
    tpu.vector_store %arg7[%c0_14, %c0_15, %c0_16], %23 {strides = array<i32>} : memref<1x1x64xf32, #tpu.memory_space<vmem>>, vector<1x1x64xf32>,
    %25 = arith.truncf %15 : vector<128x64xf32> to vector<128x64xbf16>
    %c0_17 = arith.constant 0 : index
    %c0_18 = arith.constant 0 : index
    %26 = vector.load %arg5[%c0_17, %c0_18] : memref<128x64xbf16, #tpu.memory_space<vmem>>, vector<128x64xbf16>
    tpu.vector_store %arg5[%c0_17, %c0_18], %25 {strides = array<i32>} : memref<128x64xbf16, #tpu.memory_space<vmem>>, vector<128x64xbf16>,
    return
  }
  func.func @transform_0(%arg0: i32) -> (i32, i32) {
    %c0_i32 = arith.constant 0 : i32
    %c0_i32_0 = arith.constant 0 : i32
    return %arg0, %c0_i32 : i32, i32
  }
  func.func @transform_1(%arg0: i32) -> (i32, i32) {
    %c0_i32 = arith.constant 0 : i32
    %c0_i32_0 = arith.constant 0 : i32
    %c0_i32_1 = arith.constant 0 : i32
    return %c0_i32, %c0_i32_0 : i32, i32
  }
  func.func @transform_2(%arg0: i32) -> (i32, i32) {
    %c0_i32 = arith.constant 0 : i32
    %c0_i32_0 = arith.constant 0 : i32
    %c0_i32_1 = arith.constant 0 : i32
    return %c0_i32, %c0_i32_0 : i32, i32
  }
  func.func @transform_3(%arg0: i32) -> (i32, i32) {
    %c0_i32 = arith.constant 0 : i32
    %c0_i32_0 = arith.constant 0 : i32
    %c0_i32_1 = arith.constant 0 : i32
    return %c0_i32, %c0_i32_0 : i32, i32
  }
  func.func @transform_4(%arg0: i32) -> (i32, i32) {
    %c0_i32 = arith.constant 0 : i32
    %c0_i32_0 = arith.constant 0 : i32
    return %arg0, %c0_i32 : i32, i32
  }
  func.func @transform_5(%arg0: i32) -> (i32, i32, i32) {
    %c0_i32 = arith.constant 0 : i32
    %c0_i32_0 = arith.constant 0 : i32
    %c0_i32_1 = arith.constant 0 : i32
    return %arg0, %c0_i32, %c0_i32_0 : i32, i32, i32
  }
  func.func @transform_6(%arg0: i32) -> (i32, i32, i32) {
    %c0_i32 = arith.constant 0 : i32
    %c0_i32_0 = arith.constant 0 : i32
    %c0_i32_1 = arith.constant 0 : i32
    return %arg0, %c0_i32, %c0_i32_0 : i32, i32, i32
  }
}

module attributes {stable_mosaic.version = 11 : i64} {
  func.func @kernel(%arg0: i32, %arg1: memref<32x1024xbf16, #tpu.memory_space<vmem>>, %arg2: memref<1024x128xbf16, #tpu.memory_space<vmem>>, %arg3: memref<1x1024xf32, #tpu.memory_space<vmem>>, %arg4: memref<1x1024xf32, #tpu.memory_space<vmem>>, %arg5: memref<32x128xbf16, #tpu.memory_space<vmem>>, %arg6: memref<1x1x128xf32, #tpu.memory_space<vmem>>, %arg7: memref<1x1x128xf32, #tpu.memory_space<vmem>>) attributes {dimension_semantics = [#tpu.dimension_semantics<parallel>], iteration_bounds = array<i64: 1>, scalar_prefetch = 0 : i64, scratch_operands = 0 : i64, tpu.core_type = #tpu.core_type<tc>, window_params = [{transform_indices = @transform_0, window_bounds = array<i64: 32, 1024>}, {pipeline_mode = #tpu.pipeline_mode<synchronous>, transform_indices = @transform_1, window_bounds = array<i64: 1024, 128>}, {pipeline_mode = #tpu.pipeline_mode<synchronous>, transform_indices = @transform_2, window_bounds = array<i64: 1, 1024>}, {pipeline_mode = #tpu.pipeline_mode<synchronous>, transform_indices = @transform_3, window_bounds = array<i64: 1, 1024>}, {transform_indices = @transform_4, window_bounds = array<i64: 32, 128>}, {transform_indices = @transform_5, window_bounds = array<i64: 1, 1, 128>}, {transform_indices = @transform_6, window_bounds = array<i64: 1, 1, 128>}]} {
    %c0 = arith.constant 0 : index
    %c0_0 = arith.constant 0 : index
    %0 = vector.load %arg1[%c0, %c0_0] : memref<32x1024xbf16, #tpu.memory_space<vmem>>, vector<32x1024xbf16>
    %1 = arith.extf %0 : vector<32x1024xbf16> to vector<32x1024xf32>
    %c0_1 = arith.constant 0 : index
    %c0_2 = arith.constant 0 : index
    %2 = vector.load %arg3[%c0_1, %c0_2] : memref<1x1024xf32, #tpu.memory_space<vmem>>, vector<1x1024xf32>
    %3 = vector.broadcast %2 : vector<1x1024xf32> to vector<32x1024xf32>
    %4 = arith.mulf %1, %3 : vector<32x1024xf32>
    %c0_3 = arith.constant 0 : index
    %c0_4 = arith.constant 0 : index
    %5 = vector.load %arg4[%c0_3, %c0_4] : memref<1x1024xf32, #tpu.memory_space<vmem>>, vector<1x1024xf32>
    %6 = vector.broadcast %5 : vector<1x1024xf32> to vector<32x1024xf32>
    %7 = arith.addf %4, %6 : vector<32x1024xf32>
    %cst = arith.constant 0.000000e+00 : f32
    %8 = vector.broadcast %cst : f32 to vector<32x1024xf32>
    %9 = arith.cmpf oge, %7, %8 : vector<32x1024xf32>
    %cst_5 = arith.constant 2.000000e-01 : f32
    %10 = vector.broadcast %cst_5 : f32 to vector<32x1024xf32>
    %11 = arith.mulf %10, %7 : vector<32x1024xf32>
    %12 = arith.select %9, %7, %11 : vector<32x1024xi1>, vector<32x1024xf32>
    %13 = arith.truncf %12 : vector<32x1024xf32> to vector<32x1024xbf16>
    %c0_6 = arith.constant 0 : index
    %c0_7 = arith.constant 0 : index
    %14 = vector.load %arg2[%c0_6, %c0_7] : memref<1024x128xbf16, #tpu.memory_space<vmem>>, vector<1024x128xbf16>
    %cst_8 = arith.constant dense<0.000000e+00> : vector<32x128xf32>
    %15 = tpu.matmul %13, %14, %cst_8 {dimension_numbers = #tpu.dot_dimension_numbers<[1], [0], [0], [1], [0, 0, 1, 1], [], []>} : vector<32x1024xbf16>, vector<1024x128xbf16>, vector<32x128xf32> -> vector<32x128xf32>
    %cst_9 = arith.constant dense<0.000000e+00> : vector<128xf32>
    %16 = vector.multi_reduction <add>, %15, %cst_9 [0] : vector<32x128xf32> to vector<128xf32>
    %17 = vector.shape_cast %16 : vector<128xf32> to vector<1x128xf32>
    %18 = vector.shape_cast %17 : vector<1x128xf32> to vector<1x1x128xf32>
    %c0_10 = arith.constant 0 : index
    %c0_11 = arith.constant 0 : index
    %c0_12 = arith.constant 0 : index
    %19 = vector.load %arg6[%c0_10, %c0_11, %c0_12] : memref<1x1x128xf32, #tpu.memory_space<vmem>>, vector<1x1x128xf32>
    tpu.vector_store %arg6[%c0_10, %c0_11, %c0_12], %18 {strides = array<i32>} : memref<1x1x128xf32, #tpu.memory_space<vmem>>, vector<1x1x128xf32>,
    %20 = arith.mulf %15, %15 : vector<32x128xf32>
    %cst_13 = arith.constant dense<0.000000e+00> : vector<128xf32>
    %21 = vector.multi_reduction <add>, %20, %cst_13 [0] : vector<32x128xf32> to vector<128xf32>
    %22 = vector.shape_cast %21 : vector<128xf32> to vector<1x128xf32>
    %23 = vector.shape_cast %22 : vector<1x128xf32> to vector<1x1x128xf32>
    %c0_14 = arith.constant 0 : index
    %c0_15 = arith.constant 0 : index
    %c0_16 = arith.constant 0 : index
    %24 = vector.load %arg7[%c0_14, %c0_15, %c0_16] : memref<1x1x128xf32, #tpu.memory_space<vmem>>, vector<1x1x128xf32>
    tpu.vector_store %arg7[%c0_14, %c0_15, %c0_16], %23 {strides = array<i32>} : memref<1x1x128xf32, #tpu.memory_space<vmem>>, vector<1x1x128xf32>,
    %25 = arith.truncf %15 : vector<32x128xf32> to vector<32x128xbf16>
    %c0_17 = arith.constant 0 : index
    %c0_18 = arith.constant 0 : index
    %26 = vector.load %arg5[%c0_17, %c0_18] : memref<32x128xbf16, #tpu.memory_space<vmem>>, vector<32x128xbf16>
    tpu.vector_store %arg5[%c0_17, %c0_18], %25 {strides = array<i32>} : memref<32x128xbf16, #tpu.memory_space<vmem>>, vector<32x128xbf16>,
    return
  }
  func.func @transform_0(%arg0: i32) -> (i32, i32) {
    %c0_i32 = arith.constant 0 : i32
    %c0_i32_0 = arith.constant 0 : i32
    return %arg0, %c0_i32 : i32, i32
  }
  func.func @transform_1(%arg0: i32) -> (i32, i32) {
    %c0_i32 = arith.constant 0 : i32
    %c0_i32_0 = arith.constant 0 : i32
    %c0_i32_1 = arith.constant 0 : i32
    return %c0_i32, %c0_i32_0 : i32, i32
  }
  func.func @transform_2(%arg0: i32) -> (i32, i32) {
    %c0_i32 = arith.constant 0 : i32
    %c0_i32_0 = arith.constant 0 : i32
    %c0_i32_1 = arith.constant 0 : i32
    return %c0_i32, %c0_i32_0 : i32, i32
  }
  func.func @transform_3(%arg0: i32) -> (i32, i32) {
    %c0_i32 = arith.constant 0 : i32
    %c0_i32_0 = arith.constant 0 : i32
    %c0_i32_1 = arith.constant 0 : i32
    return %c0_i32, %c0_i32_0 : i32, i32
  }
  func.func @transform_4(%arg0: i32) -> (i32, i32) {
    %c0_i32 = arith.constant 0 : i32
    %c0_i32_0 = arith.constant 0 : i32
    return %arg0, %c0_i32 : i32, i32
  }
  func.func @transform_5(%arg0: i32) -> (i32, i32, i32) {
    %c0_i32 = arith.constant 0 : i32
    %c0_i32_0 = arith.constant 0 : i32
    %c0_i32_1 = arith.constant 0 : i32
    return %arg0, %c0_i32, %c0_i32_0 : i32, i32, i32
  }
  func.func @transform_6(%arg0: i32) -> (i32, i32, i32) {
    %c0_i32 = arith.constant 0 : i32
    %c0_i32_0 = arith.constant 0 : i32
    %c0_i32_1 = arith.constant 0 : i32
    return %arg0, %c0_i32, %c0_i32_0 : i32, i32, i32
  }
}

module attributes {stable_mosaic.version = 11 : i64} {
  func.func @kernel(%arg0: i32, %arg1: memref<2x2048xbf16, #tpu.memory_space<vmem>>, %arg2: memref<2048x1xbf16, #tpu.memory_space<vmem>>, %arg3: memref<1x2048xf32, #tpu.memory_space<vmem>>, %arg4: memref<1x2048xf32, #tpu.memory_space<vmem>>, %arg5: memref<2x1xf32, #tpu.memory_space<vmem>>) attributes {dimension_semantics = [#tpu.dimension_semantics<parallel>], iteration_bounds = array<i64: 1>, scalar_prefetch = 0 : i64, scratch_operands = 0 : i64, tpu.core_type = #tpu.core_type<tc>, window_params = [{transform_indices = @transform_0, window_bounds = array<i64: 2, 2048>}, {pipeline_mode = #tpu.pipeline_mode<synchronous>, transform_indices = @transform_1, window_bounds = array<i64: 2048, 1>}, {pipeline_mode = #tpu.pipeline_mode<synchronous>, transform_indices = @transform_2, window_bounds = array<i64: 1, 2048>}, {pipeline_mode = #tpu.pipeline_mode<synchronous>, transform_indices = @transform_3, window_bounds = array<i64: 1, 2048>}, {transform_indices = @transform_4, window_bounds = array<i64: 2, 1>}]} {
    %c0 = arith.constant 0 : index
    %c0_0 = arith.constant 0 : index
    %0 = vector.load %arg1[%c0, %c0_0] : memref<2x2048xbf16, #tpu.memory_space<vmem>>, vector<2x2048xbf16>
    %1 = arith.extf %0 : vector<2x2048xbf16> to vector<2x2048xf32>
    %c0_1 = arith.constant 0 : index
    %c0_2 = arith.constant 0 : index
    %2 = vector.load %arg3[%c0_1, %c0_2] : memref<1x2048xf32, #tpu.memory_space<vmem>>, vector<1x2048xf32>
    %3 = vector.broadcast %2 : vector<1x2048xf32> to vector<2x2048xf32>
    %4 = arith.mulf %1, %3 : vector<2x2048xf32>
    %c0_3 = arith.constant 0 : index
    %c0_4 = arith.constant 0 : index
    %5 = vector.load %arg4[%c0_3, %c0_4] : memref<1x2048xf32, #tpu.memory_space<vmem>>, vector<1x2048xf32>
    %6 = vector.broadcast %5 : vector<1x2048xf32> to vector<2x2048xf32>
    %7 = arith.addf %4, %6 : vector<2x2048xf32>
    %cst = arith.constant 0.000000e+00 : f32
    %8 = vector.broadcast %cst : f32 to vector<2x2048xf32>
    %9 = arith.cmpf oge, %7, %8 : vector<2x2048xf32>
    %cst_5 = arith.constant 2.000000e-01 : f32
    %10 = vector.broadcast %cst_5 : f32 to vector<2x2048xf32>
    %11 = arith.mulf %10, %7 : vector<2x2048xf32>
    %12 = arith.select %9, %7, %11 : vector<2x2048xi1>, vector<2x2048xf32>
    %13 = arith.truncf %12 : vector<2x2048xf32> to vector<2x2048xbf16>
    %c0_6 = arith.constant 0 : index
    %c0_7 = arith.constant 0 : index
    %14 = vector.load %arg2[%c0_6, %c0_7] : memref<2048x1xbf16, #tpu.memory_space<vmem>>, vector<2048x1xbf16>
    %cst_8 = arith.constant dense<0.000000e+00> : vector<2x1xf32>
    %15 = tpu.matmul %13, %14, %cst_8 {dimension_numbers = #tpu.dot_dimension_numbers<[1], [0], [0], [1], [0, 0, 1, 1], [], []>} : vector<2x2048xbf16>, vector<2048x1xbf16>, vector<2x1xf32> -> vector<2x1xf32>
    %cst_9 = arith.constant 0.000000e+00 : f32
    %16 = vector.broadcast %cst_9 : f32 to vector<2x1xf32>
    %17 = arith.subf %16, %15 : vector<2x1xf32>
    %18 = math.exp %17 : vector<2x1xf32>
    %cst_10 = arith.constant 1.000000e+00 : f32
    %19 = vector.broadcast %cst_10 : f32 to vector<2x1xf32>
    %20 = arith.addf %19, %18 : vector<2x1xf32>
    %cst_11 = arith.constant 1.000000e+00 : f32
    %21 = vector.broadcast %cst_11 : f32 to vector<2x1xf32>
    %22 = arith.divf %21, %20 : vector<2x1xf32>
    %c0_12 = arith.constant 0 : index
    %c0_13 = arith.constant 0 : index
    %23 = vector.load %arg5[%c0_12, %c0_13] : memref<2x1xf32, #tpu.memory_space<vmem>>, vector<2x1xf32>
    tpu.vector_store %arg5[%c0_12, %c0_13], %22 {strides = array<i32>} : memref<2x1xf32, #tpu.memory_space<vmem>>, vector<2x1xf32>,
    return
  }
  func.func @transform_0(%arg0: i32) -> (i32, i32) {
    %c0_i32 = arith.constant 0 : i32
    %c0_i32_0 = arith.constant 0 : i32
    return %arg0, %c0_i32 : i32, i32
  }
  func.func @transform_1(%arg0: i32) -> (i32, i32) {
    %c0_i32 = arith.constant 0 : i32
    %c0_i32_0 = arith.constant 0 : i32
    %c0_i32_1 = arith.constant 0 : i32
    return %c0_i32, %c0_i32_0 : i32, i32
  }
  func.func @transform_2(%arg0: i32) -> (i32, i32) {
    %c0_i32 = arith.constant 0 : i32
    %c0_i32_0 = arith.constant 0 : i32
    %c0_i32_1 = arith.constant 0 : i32
    return %c0_i32, %c0_i32_0 : i32, i32
  }
  func.func @transform_3(%arg0: i32) -> (i32, i32) {
    %c0_i32 = arith.constant 0 : i32
    %c0_i32_0 = arith.constant 0 : i32
    %c0_i32_1 = arith.constant 0 : i32
    return %c0_i32, %c0_i32_0 : i32, i32
  }
  func.func @transform_4(%arg0: i32) -> (i32, i32) {
    %c0_i32 = arith.constant 0 : i32
    %c0_i32_0 = arith.constant 0 : i32
    return %arg0, %c0_i32 : i32, i32
  }
}

</mosaic_0001>

<bundles_post_ra>
// kernel: netD_forward.6
= control target key start
LH: loop header
LB: loop body
LE: loop exit
PB: predicated region body
PF: predicated region fallthrough
CT: control target
= control target key end

     0   :  { %s3142_s9 = smov 0   ;;  %s3564_s0 = inlined_call_operand.vmem [shape: bf16[8192,48], index: 0, kind: input, shape index: {}]   ;;  %s3565_s1 = inlined_call_operand.vmem [shape: bf16[48,8], index: 1, kind: input, shape index: {}]   ;;  %s3566_s2 = inlined_call_operand.vmem [shape: bf16[8192,8], index: 2, kind: output, shape index: {}]  }
   0x1 LB: > { %s2439_s10 = sadd.s32 4294967295, %s3125_s9   ;;  %p2443_p0 = scmp.ge.s32.totalorder %s3125_s9, 1  ;;  %s3125_s9 = sphi %s3142_s9, %s12_s9  }
   0x2   : > { %p113_p1 = scmp.lt.s32.totalorder %s3125_s9, 9 }
   0x4   : > { %p114_p2 = pnand %p2443_p0, %p113_p1 }
   0x5   : > { %v3052_v0 = vld [vmem:[%s3565_s1] sm:$0xff] (!%p114_p2)   ;;  %s2444_s13 = sshll.u32 (!%p114_p2), %s2439_s10, 7  ;;  %v3053_v1 = vld [vmem:[%s3565_s1 + $0x8] sm:$0xff] (!%p114_p2)   ;;  %v3054_v2 = vld [vmem:[%s3565_s1 + $0x10] sm:$0xff] (!%p114_p2)   ;;  %vm620_vm0 = vcmask (!%p114_p2), 392192   ;;  %vm2254_vm3 = vcmask (!%p114_p2), 60416  }
   0x6   : > { %117 = sbr.rel (%p114_p2) target bundleno = 366 (0x16e), region = 28  ;;  %p136_p3 = scmp.lt.s32.totalorder (!%p114_p2), %s2444_s13, 1023  ;;  %2904 = vmatprep.subr.bf16.mxu0 (!%p114_p2), %v3052_v0  ;;  %3038 = vmatprep.subr.bf16.mxu1 (!%p114_p2), %v3052_v0 }
   0x7   : > { %2905 = vmatpush3.bf16.msra.mxu0 (!%p114_p2), %v3052_v0  ;;  %3041 = vmatpush3.bf16.msra.mxu1 (!%p114_p2), %v3052_v0 }
   0x8   : > { %2906 = vmatprep.subr.bf16.mxu0 (!%p114_p2), %v3053_v1  ;;  %3039 = vmatprep.subr.bf16.mxu1 (!%p114_p2), %v3053_v1 }
   0xb   : > { %2907 = vmatpush3.bf16.msra.mxu0 (!%p114_p2), %v3053_v1  ;;  %3042 = vmatpush3.bf16.msra.mxu1 (!%p114_p2), %v3053_v1 }
   0xc   : > { %2908 = vmatprep.subr.bf16.mxu0 (!%p114_p2), %v3054_v2  ;;  %3040 = vmatprep.subr.bf16.mxu1 (!%p114_p2), %v3054_v2 }
   0xd   : > { %s3568_s13 = smov (!%p136_p3, %s2444_s13), 1023 }
   0xe   : > { %s2445_s18 = sshll.u32 %s3568_s13, 2 }
   0xf   : > { %s3167_s21 = scalar_lea.vmem %s3564_s0, %s2445_s18  ;;  %2909 = vmatpush3.bf16.msra.mxu0 %v3054_v2  ;;  %3043 = vmatpush3.bf16.msra.mxu1 %v3054_v2  ;;  %s3302_s24 = scalar_lea.vmem %s3566_s2, %s2445_s18 }
  0x10   : > { %v3055_v3 = vld [vmem:[%s3167_s21] sm:$0xff]   ;;  %v3057_v5 = vld [vmem:[%s3167_s21 + $0x8] sm:$0xff]   ;;  %v3059_v7 = vld [vmem:[%s3167_s21 + $0x10] sm:$0xff]  }
  0x11   : > { %v3056_v4 = vld [vmem:[%s3167_s21 + $0x100] sm:$0xff]   ;;  %2910 = vmatprep.mubr.msk.bf16.mxu0 %vm620_vm0, %v3055_v3  ;;  %v3058_v6 = vld [vmem:[%s3167_s21 + $0x108] sm:$0xff]   ;;  %v3060_v8 = vld [vmem:[%s3167_s21 + $0x110] sm:$0xff]  }
  0x12   : > { %2974 = vmatprep.mubr.msk.bf16.mxu1 %vm620_vm0, %v3056_v4  ;;  %2911 = vmatmul.mubr.msk.bf16.vlgmr.msra.gmra.mrb[0].mxu0 %vm620_vm0, %v3057_v5  ;;  %v3061_v9 = vld [vmem:[%s3167_s21 + $0x18] sm:$0xff]   ;;  %v3063_v11 = vld [vmem:[%s3167_s21 + $0x20] sm:$0xff]   ;;  %v3065_v13 = vld [vmem:[%s3167_s21 + $0x28] sm:$0xff]  }
  0x13   : > { %2975 = vmatmul.mubr.msk.bf16.vlgmr.msra.gmra.mrb[0].mxu1 %vm620_vm0, %v3058_v6  ;;  %2914 = vmatprep.mubr.msk.bf16.mxu0 %vm620_vm0, %v3059_v7  ;;  %v3062_v10 = vld [vmem:[%s3167_s21 + $0x118] sm:$0xff]   ;;  %v3064_v12 = vld [vmem:[%s3167_s21 + $0x120] sm:$0xff]   ;;  %v3066_v14 = vld [vmem:[%s3167_s21 + $0x128] sm:$0xff]  }
  0x14   : > { %2978 = vmatprep.mubr.msk.bf16.mxu1 %vm620_vm0, %v3060_v8  ;;  %v3067_v15 = vld [vmem:[%s3167_s21 + $0x30] sm:$0xff]   ;;  %v3069_v17 = vld [vmem:[%s3167_s21 + $0x38] sm:$0xff]   ;;  %v3071_v19 = vld [vmem:[%s3167_s21 + $0x40] sm:$0xff]  }
  0x15   : > { %v3068_v16 = vld [vmem:[%s3167_s21 + $0x130] sm:$0xff]   ;;  %v3070_v18 = vld [vmem:[%s3167_s21 + $0x138] sm:$0xff]   ;;  %v3072_v20 = vld [vmem:[%s3167_s21 + $0x140] sm:$0xff]  }
  0x16   : > { %v3073_v21 = vld [vmem:[%s3167_s21 + $0x48] sm:$0xff]   ;;  %v3075_v23 = vld [vmem:[%s3167_s21 + $0x50] sm:$0xff]   ;;  %v3077_v25 = vld [vmem:[%s3167_s21 + $0x58] sm:$0xff]  }
  0x17   : > { %v3074_v22 = vld [vmem:[%s3167_s21 + $0x148] sm:$0xff]   ;;  %v3076_v24 = vld [vmem:[%s3167_s21 + $0x150] sm:$0xff]   ;;  %v3078_v26 = vld [vmem:[%s3167_s21 + $0x158] sm:$0xff]  }
  0x18   : > { %v3079_v27 = vld [vmem:[%s3167_s21 + $0x60] sm:$0xff]   ;;  %v3081_v29 = vld [vmem:[%s3167_s21 + $0x68] sm:$0xff]   ;;  %v3083_v31 = vld [vmem:[%s3167_s21 + $0x70] sm:$0xff]  }
  0x19   : > { %v3080_v28 = vld [vmem:[%s3167_s21 + $0x160] sm:$0xff]   ;;  %v3082_v30 = vld [vmem:[%s3167_s21 + $0x168] sm:$0xff]   ;;  %v3084_v32 = vld [vmem:[%s3167_s21 + $0x170] sm:$0xff]  }
  0x1a   : > { %2915 = vmatmul.mubr.msk.bf16.gmra.mrb[4].mxu0 %vm620_vm0, %v3061_v9  ;;  %v3085_v33 = vld [vmem:[%s3167_s21 + $0x78] sm:$0xff]   ;;  %v3087_v35 = vld [vmem:[%s3167_s21 + $0x80] sm:$0xff]   ;;  %v3089_v37 = vld [vmem:[%s3167_s21 + $0x88] sm:$0xff]  }
  0x1b   : > { %2979 = vmatmul.mubr.msk.bf16.gmra.mrb[4].mxu1 %vm620_vm0, %v3062_v10  ;;  %2918 = vmatprep.mubr.msk.bf16.mxu0 %vm620_vm0, %v3063_v11  ;;  %v3086_v34 = vld [vmem:[%s3167_s21 + $0x178] sm:$0xff]   ;;  %v3088_v36 = vld [vmem:[%s3167_s21 + $0x180] sm:$0xff]   ;;  %v3090_v38 = vld [vmem:[%s3167_s21 + $0x188] sm:$0xff]  }
  0x1c   : > { %2982 = vmatprep.mubr.msk.bf16.mxu1 %vm620_vm0, %v3064_v12  ;;  %v3091_v39 = vld [vmem:[%s3167_s21 + $0x90] sm:$0xff]   ;;  %v3093_v41 = vld [vmem:[%s3167_s21 + $0x98] sm:$0xff]   ;;  %v3095_v43 = vld [vmem:[%s3167_s21 + $0xa0] sm:$0xff]  }
  0x1d   : > { %v3092_v40 = vld [vmem:[%s3167_s21 + $0x190] sm:$0xff]   ;;  %v3094_v42 = vld [vmem:[%s3167_s21 + $0x198] sm:$0xff]   ;;  %v3096_v44 = vld [vmem:[%s3167_s21 + $0x1a0] sm:$0xff]  }
  0x1e   : > { %v3097_v45 = vld [vmem:[%s3167_s21 + $0xa8] sm:$0xff]   ;;  %v3099_v47 = vld [vmem:[%s3167_s21 + $0xb0] sm:$0xff]   ;;  %v3101_v49 = vld [vmem:[%s3167_s21 + $0xb8] sm:$0xff]  }
  0x1f   : > { %v3098_v46 = vld [vmem:[%s3167_s21 + $0x1a8] sm:$0xff]   ;;  %v3100_v48 = vld [vmem:[%s3167_s21 + $0x1b0] sm:$0xff]   ;;  %v3102_v50 = vld [vmem:[%s3167_s21 + $0x1b8] sm:$0xff]  }
  0x20   : > { %v3103_v51 = vld [vmem:[%s3167_s21 + $0xc0] sm:$0xff]   ;;  %v3105_v53 = vld [vmem:[%s3167_s21 + $0xc8] sm:$0xff]   ;;  %v3107_v55 = vld [vmem:[%s3167_s21 + $0xd0] sm:$0xff]  }
  0x21   : > { %v3104_v52 = vld [vmem:[%s3167_s21 + $0x1c0] sm:$0xff]   ;;  %v3106_v54 = vld [vmem:[%s3167_s21 + $0x1c8] sm:$0xff]   ;;  %v3108_v56 = vld [vmem:[%s3167_s21 + $0x1d0] sm:$0xff]  }
  0x22   : > { %2919 = vmatmul.mubr.msk.bf16.gmra.mrb[8].mxu0 %vm620_vm0, %v3065_v13  ;;  %v3109_v57 = vld [vmem:[%s3167_s21 + $0xd8] sm:$0xff]   ;;  %v3111_v59 = vld [vmem:[%s3167_s21 + $0xe0] sm:$0xff]   ;;  %v3113_v61 = vld [vmem:[%s3167_s21 + $0xe8] sm:$0xff]  }
  0x23   : > { %2983 = vmatmul.mubr.msk.bf16.gmra.mrb[8].mxu1 %vm620_vm0, %v3066_v14  ;;  %2922 = vmatprep.mubr.msk.bf16.mxu0 %vm620_vm0, %v3067_v15  ;;  %v3110_v58 = vld [vmem:[%s3167_s21 + $0x1d8] sm:$0xff]   ;;  %v3112_v60 = vld [vmem:[%s3167_s21 + $0x1e0] sm:$0xff]   ;;  %v3114_v62 = vld [vmem:[%s3167_s21 + $0x1e8] sm:$0xff]  }
  0x24   : > { %2986 = vmatprep.mubr.msk.bf16.mxu1 %vm620_vm0, %v3068_v16  ;;  %v3115_v63 = vld [vmem:[%s3167_s21 + $0xf0] sm:$0xff]   ;;  %v3117_v1 = vld [vmem:[%s3167_s21 + $0xf8] sm:$0xff]  }
  0x25   : > { %v3116_v0 = vld [vmem:[%s3167_s21 + $0x1f0] sm:$0xff]   ;;  %v3118_v2 = vld [vmem:[%s3167_s21 + $0x1f8] sm:$0xff]  }
  0x2a   : > { %2923 = vmatmul.mubr.msk.bf16.gmra.mrb[12].mxu0 %vm620_vm0, %v3069_v17 }
  0x2b   : > { %2987 = vmatmul.mubr.msk.bf16.gmra.mrb[12].mxu1 %vm620_vm0, %v3070_v18  ;;  %2926 = vmatprep.mubr.msk.bf16.mxu0 %vm620_vm0, %v3071_v19 }
  0x2c   : > { %2990 = vmatprep.mubr.msk.bf16.mxu1 %vm620_vm0, %v3072_v20 }
  0x32   : > { %2927 = vmatmul.mubr.msk.bf16.gmra.mrb[16].mxu0 %vm620_vm0, %v3073_v21 }
  0x33   : > { %2991 = vmatmul.mubr.msk.bf16.gmra.mrb[16].mxu1 %vm620_vm0, %v3074_v22  ;;  %2930 = vmatprep.mubr.msk.bf16.mxu0 %vm620_vm0, %v3075_v23 }
  0x34   : > { %2994 = vmatprep.mubr.msk.bf16.mxu1 %vm620_vm0, %v3076_v24 }
  0x3a   : > { %2931 = vmatmul.mubr.msk.bf16.gmra.mrb[20].mxu0 %vm620_vm0, %v3077_v25 }
  0x3b   : > { %2995 = vmatmul.mubr.msk.bf16.gmra.mrb[20].mxu1 %vm620_vm0, %v3078_v26  ;;  %2934 = vmatprep.mubr.msk.bf16.mxu0 %vm620_vm0, %v3079_v27 }
  0x3c   : > { %2998 = vmatprep.mubr.msk.bf16.mxu1 %vm620_vm0, %v3080_v28 }
  0x42   : > { %2935 = vmatmul.mubr.msk.bf16.gmra.mrb[24].mxu0 %vm620_vm0, %v3081_v29 }
  0x43   : > { %2999 = vmatmul.mubr.msk.bf16.gmra.mrb[24].mxu1 %vm620_vm0, %v3082_v30  ;;  %2938 = vmatprep.mubr.msk.bf16.mxu0 %vm620_vm0, %v3083_v31 }
  0x44   : > { %3002 = vmatprep.mubr.msk.bf16.mxu1 %vm620_vm0, %v3084_v32 }
  0x4a   : > { %2939 = vmatmul.mubr.msk.bf16.gmra.mrb[28].mxu0 %vm620_vm0, %v3085_v33 }
  0x4b   : > { %3003 = vmatmul.mubr.msk.bf16.gmra.mrb[28].mxu1 %vm620_vm0, %v3086_v34  ;;  %2942 = vmatprep.mubr.msk.bf16.mxu0 %vm620_vm0, %v3087_v35 }
  0x4c   : > { %3006 = vmatprep.mubr.msk.bf16.mxu1 %vm620_vm0, %v3088_v36 }
  0x52   : > { %2943 = vmatmul.mubr.msk.bf16.gmra.mrb[32].mxu0 %vm620_vm0, %v3089_v37 }
  0x53   : > { %3007 = vmatmul.mubr.msk.bf16.gmra.mrb[32].mxu1 %vm620_vm0, %v3090_v38  ;;  %2946 = vmatprep.mubr.msk.bf16.mxu0 %vm620_vm0, %v3091_v39 }
  0x54   : > { %3010 = vmatprep.mubr.msk.bf16.mxu1 %vm620_vm0, %v3092_v40 }
  0x5a   : > { %2947 = vmatmul.mubr.msk.bf16.gmra.mrb[36].mxu0 %vm620_vm0, %v3093_v41 }
  0x5b   : > { %3011 = vmatmul.mubr.msk.bf16.gmra.mrb[36].mxu1 %vm620_vm0, %v3094_v42  ;;  %2950 = vmatprep.mubr.msk.bf16.mxu0 %vm620_vm0, %v3095_v43 }
  0x5c   : > { %3014 = vmatprep.mubr.msk.bf16.mxu1 %vm620_vm0, %v3096_v44 }
  0x62   : > { %2951 = vmatmul.mubr.msk.bf16.gmra.mrb[40].mxu0 %vm620_vm0, %v3097_v45 }
  0x63   : > { %3015 = vmatmul.mubr.msk.bf16.gmra.mrb[40].mxu1 %vm620_vm0, %v3098_v46  ;;  %2954 = vmatprep.mubr.msk.bf16.mxu0 %vm620_vm0, %v3099_v47 }
  0x64   : > { %3018 = vmatprep.mubr.msk.bf16.mxu1 %vm620_vm0, %v3100_v48 }
  0x6a   : > { %2955 = vmatmul.mubr.msk.bf16.gmra.mrb[44].mxu0 %vm620_vm0, %v3101_v49 }
  0x6b   : > { %3019 = vmatmul.mubr.msk.bf16.gmra.mrb[44].mxu1 %vm620_vm0, %v3102_v50  ;;  %2958 = vmatprep.mubr.msk.bf16.mxu0 %vm620_vm0, %v3103_v51 }
  0x6c   : > { %3022 = vmatprep.mubr.msk.bf16.mxu1 %vm620_vm0, %v3104_v52 }
  0x72   : > { %2959 = vmatmul.mubr.msk.bf16.gmra.mrb[48].mxu0 %vm620_vm0, %v3105_v53 }
  0x73   : > { %3023 = vmatmul.mubr.msk.bf16.gmra.mrb[48].mxu1 %vm620_vm0, %v3106_v54  ;;  %2962 = vmatprep.mubr.msk.bf16.mxu0 %vm620_vm0, %v3107_v55 }
  0x74   : > { %3026 = vmatprep.mubr.msk.bf16.mxu1 %vm620_vm0, %v3108_v56 }
  0x7a   : > { %2963 = vmatmul.mubr.msk.bf16.gmra.mrb[52].mxu0 %vm620_vm0, %v3109_v57 }
  0x7b   : > { %3027 = vmatmul.mubr.msk.bf16.gmra.mrb[52].mxu1 %vm620_vm0, %v3110_v58  ;;  %2966 = vmatprep.mubr.msk.bf16.mxu0 %vm620_vm0, %v3111_v59 }
  0x7c   : > { %3030 = vmatprep.mubr.msk.bf16.mxu1 %vm620_vm0, %v3112_v60 }
  0x82   : > { %2967 = vmatmul.mubr.msk.bf16.gmra.mrb[56].mxu0 %vm620_vm0, %v3113_v61 }
  0x83   : > { %3031 = vmatmul.mubr.msk.bf16.gmra.mrb[56].mxu1 %vm620_vm0, %v3114_v62  ;;  %2970 = vmatprep.mubr.msk.bf16.mxu0 %vm620_vm0, %v3115_v63 }
  0x84   : > { %3034 = vmatprep.mubr.msk.bf16.mxu1 %vm620_vm0, %v3116_v0 }
  0x8a   : > { %2971 = vmatmul.mubr.msk.bf16.gmra.mrb[60].mxu0 %vm620_vm0, %v3117_v1 }
  0x8b   : > { %3035 = vmatmul.mubr.msk.bf16.gmra.mrb[60].mxu1 %vm620_vm0, %v3118_v2 }
  0xe5   : > { %v2912_v3 = vpop.f32.mrb[0].mxu0 }
  0xe6   : > { %v2976_v4 = vpop.f32.mrb[0].mxu1  ;;  %vm1360_vm1 = vcmp.ge.f32.partialorder %v2912_v3, 0.0  ;;  %v1488_v5 = vmul.f32 0.2, %v2912_v3  ;;  %v847_v7 = vpop.f32.mrb[1].mxu0 }
  0xe7   : > { %vm1424_vm2 = vcmp.ge.f32.partialorder %v2976_v4, 0.0  ;;  %v1552_v6 = vmul.f32 0.2, %v2976_v4  ;;  %v1103_v8 = vpop.f32.mrb[1].mxu1  ;;  %vm1358_vm4 = vcmp.ge.f32.partialorder %v847_v7, 0.0  ;;  %v2913_v12 = vpop.f32.mrb[2].mxu0 }
  0xe8   : > { %v1616_v9 = vsel %vm1360_vm1, %v2912_v3, %v1488_v5  ;;  %v1486_v11 = vmul.f32 0.2, %v847_v7  ;;  %v2977_v13 = vpop.f32.mrb[2].mxu1  ;;  %vm1422_vm5 = vcmp.ge.f32.partialorder %v1103_v8, 0.0  ;;  %v1550_v16 = vmul.f32 0.2, %v1103_v8 }
  0xe9   : > { %v1680_v10 = vsel %vm1424_vm2, %v2976_v4, %v1552_v6  ;;  %v2711_v14 = vpack.c.bf16 %v1616_v9, %v1616_v9  ;;  %v850_v17 = vpop.f32.mrb[3].mxu0  ;;  %v1106_v18 = vpop.f32.mrb[3].mxu1  ;;  %vm1361_vm6 = vcmp.ge.f32.partialorder %v2913_v12, 0.0  ;;  %v1489_v20 = vmul.f32 0.2, %v2913_v12 }
  0xea   : > { %v2775_v15 = vpack.c.bf16 %v1680_v10, %v1680_v10  ;;  %v1614_v19 = vsel %vm1358_vm4, %v847_v7, %v1486_v11  ;;  %vm1425_vm7 = vcmp.ge.f32.partialorder %v2977_v13, 0.0  ;;  %v1678_v22 = vsel %vm1422_vm5, %v1103_v8, %v1550_v16 }
  0xeb   : > { %2257 = vst.msk [vmem:[%s3302_s24 + $0x8] sm:$0xf] %vm2254_vm3, %v2711_v14  ;;  %v2709_v21 = vpack.c.bf16 %v1614_v19, %v1614_v19  ;;  %v1553_v23 = vmul.f32 0.2, %v2977_v13  ;;  %vm1359_vm8 = vcmp.ge.f32.partialorder %v850_v17, 0.0  ;;  %v2773_v24 = vpack.c.bf16 %v1678_v22, %v1678_v22 }
  0xec   : > { %2321 = vst.msk [vmem:[%s3302_s24 + $0x108] sm:$0xf] %vm2254_vm3, %v2775_v15  ;;  %v1617_v25 = vsel %vm1361_vm6, %v2913_v12, %v1489_v20  ;;  %v1487_v26 = vmul.f32 0.2, %v850_v17  ;;  %vm1423_vm9 = vcmp.ge.f32.partialorder %v1106_v18, 0.0 }
  0xed   : > { %2255 = vst.msk [vmem:[%s3302_s24] sm:$0xf] %vm2254_vm3, %v2709_v21  ;;  %v2712_v27 = vpack.c.bf16 %v1617_v25, %v1617_v25  ;;  %v1681_v28 = vsel %vm1425_vm7, %v2977_v13, %v1553_v23  ;;  %v1551_v29 = vmul.f32 0.2, %v1106_v18  ;;  %v2916_v30 = vpop.f32.mrb[4].mxu0 }
  0xee   : > { %v2980_v31 = vpop.f32.mrb[4].mxu1  ;;  %2319 = vst.msk [vmem:[%s3302_s24 + $0x100] sm:$0xf] %vm2254_vm3, %v2773_v24  ;;  %v2776_v32 = vpack.c.bf16 %v1681_v28, %v1681_v28  ;;  %v1615_v33 = vsel %vm1359_vm8, %v850_v17, %v1487_v26  ;;  %vm1364_vm10 = vcmp.ge.f32.partialorder %v2916_v30, 0.0  ;;  %v1492_v34 = vmul.f32 0.2, %v2916_v30 }
  0xef   : > { %v863_v35 = vpop.f32.mrb[5].mxu0  ;;  %v1119_v36 = vpop.f32.mrb[5].mxu1  ;;  %2258 = vst.msk [vmem:[%s3302_s24 + $0xc] sm:$0xf] %vm2254_vm3, %v2712_v27  ;;  %v2710_v37 = vpack.c.bf16 %v1615_v33, %v1615_v33  ;;  %v1679_v38 = vsel %vm1423_vm9, %v1106_v18, %v1551_v29  ;;  %vm1428_vm11 = vcmp.ge.f32.partialorder %v2980_v31, 0.0 }
  0xf0   : > { %v1556_v39 = vmul.f32 0.2, %v2980_v31  ;;  %v2917_v40 = vpop.f32.mrb[6].mxu0  ;;  %v2981_v41 = vpop.f32.mrb[6].mxu1  ;;  %2322 = vst.msk [vmem:[%s3302_s24 + $0x10c] sm:$0xf] %vm2254_vm3, %v2776_v32  ;;  %v2774_v42 = vpack.c.bf16 %v1679_v38, %v1679_v38  ;;  %v1620_v43 = vsel %vm1364_vm10, %v2916_v30, %v1492_v34 }
  0xf1   : > { %vm1362_vm12 = vcmp.ge.f32.partialorder %v863_v35, 0.0  ;;  %v1490_v44 = vmul.f32 0.2, %v863_v35  ;;  %v866_v45 = vpop.f32.mrb[7].mxu0  ;;  %v1122_v46 = vpop.f32.mrb[7].mxu1  ;;  %v2715_v47 = vpack.c.bf16 %v1620_v43, %v1620_v43  ;;  %vm1426_vm13 = vcmp.ge.f32.partialorder %v1119_v36, 0.0 }
  0xf2   : > { %2256 = vst.msk [vmem:[%s3302_s24 + $0x4] sm:$0xf] %vm2254_vm3, %v2710_v37  ;;  %v1684_v48 = vsel %vm1428_vm11, %v2980_v31, %v1556_v39  ;;  %v1554_v49 = vmul.f32 0.2, %v1119_v36  ;;  %2320 = vst.msk [vmem:[%s3302_s24 + $0x104] sm:$0xf] %vm2254_vm3, %v2774_v42 }
  0xf3   : > { %v2779_v50 = vpack.c.bf16 %v1684_v48, %v1684_v48  ;;  %v1618_v51 = vsel %vm1362_vm12, %v863_v35, %v1490_v44  ;;  %vm1365_vm14 = vcmp.ge.f32.partialorder %v2917_v40, 0.0  ;;  %v1493_v52 = vmul.f32 0.2, %v2917_v40  ;;  %2261 = vst.msk [vmem:[%s3302_s24 + $0x18] sm:$0xf] %vm2254_vm3, %v2715_v47 }
  0xf4   : > { %v2713_v53 = vpack.c.bf16 %v1618_v51, %v1618_v51  ;;  %v1682_v54 = vsel %vm1426_vm13, %v1119_v36, %v1554_v49  ;;  %vm1429_vm15 = vcmp.ge.f32.partialorder %v2981_v41, 0.0  ;;  %v1557_v55 = vmul.f32 0.2, %v2981_v41 }
  0xf5   : > { %2325 = vst.msk [vmem:[%s3302_s24 + $0x118] sm:$0xf] %vm2254_vm3, %v2779_v50  ;;  %v2777_v56 = vpack.c.bf16 %v1682_v54, %v1682_v54  ;;  %v1621_v57 = vsel %vm1365_vm14, %v2917_v40, %v1493_v52  ;;  %vm1363_vm0 = vcmp.ge.f32.partialorder %v866_v45, 0.0  ;;  %v1491_v58 = vmul.f32 0.2, %v866_v45  ;;  %v2920_v62 = vpop.f32.mrb[8].mxu0 }
  0xf6   : > { %2259 = vst.msk [vmem:[%s3302_s24 + $0x10] sm:$0xf] %vm2254_vm3, %v2713_v53  ;;  %v2716_v59 = vpack.c.bf16 %v1621_v57, %v1621_v57  ;;  %v1685_v60 = vsel %vm1429_vm15, %v2981_v41, %v1557_v55  ;;  %vm1427_vm1 = vcmp.ge.f32.partialorder %v1122_v46, 0.0  ;;  %v1555_v61 = vmul.f32 0.2, %v1122_v46  ;;  %v2984_v63 = vpop.f32.mrb[8].mxu1 }
  0xf7   : > { %2323 = vst.msk [vmem:[%s3302_s24 + $0x110] sm:$0xf] %vm2254_vm3, %v2777_v56  ;;  %v2780_v0 = vpack.c.bf16 %v1685_v60, %v1685_v60  ;;  %v1619_v1 = vsel %vm1363_vm0, %v866_v45, %v1491_v58  ;;  %vm1368_vm2 = vcmp.ge.f32.partialorder %v2920_v62, 0.0  ;;  %v1496_v2 = vmul.f32 0.2, %v2920_v62  ;;  %v879_v3 = vpop.f32.mrb[9].mxu0 }
  0xf8   : > { %v1135_v4 = vpop.f32.mrb[9].mxu1  ;;  %2262 = vst.msk [vmem:[%s3302_s24 + $0x1c] sm:$0xf] %vm2254_vm3, %v2716_v59  ;;  %v2714_v5 = vpack.c.bf16 %v1619_v1, %v1619_v1  ;;  %v1683_v6 = vsel %vm1427_vm1, %v1122_v46, %v1555_v61  ;;  %vm1432_vm4 = vcmp.ge.f32.partialorder %v2984_v63, 0.0  ;;  %v1560_v7 = vmul.f32 0.2, %v2984_v63 }
  0xf9   : > { %v2921_v8 = vpop.f32.mrb[10].mxu0  ;;  %v2985_v9 = vpop.f32.mrb[10].mxu1  ;;  %2326 = vst.msk [vmem:[%s3302_s24 + $0x11c] sm:$0xf] %vm2254_vm3, %v2780_v0  ;;  %v2778_v10 = vpack.c.bf16 %v1683_v6, %v1683_v6  ;;  %v1624_v11 = vsel %vm1368_vm2, %v2920_v62, %v1496_v2  ;;  %vm1366_vm5 = vcmp.ge.f32.partialorder %v879_v3, 0.0  ;;  %vm1430_vm6 = vcmp.ge.f32.partialorder %v1135_v4, 0.0 }
  0xfa   : > { %v1494_v12 = vmul.f32 0.2, %v879_v3  ;;  %v882_v13 = vpop.f32.mrb[11].mxu0  ;;  %v1138_v14 = vpop.f32.mrb[11].mxu1  ;;  %2260 = vst.msk [vmem:[%s3302_s24 + $0x14] sm:$0xf] %vm2254_vm3, %v2714_v5  ;;  %v2719_v15 = vpack.c.bf16 %v1624_v11, %v1624_v11  ;;  %v1688_v16 = vsel %vm1432_vm4, %v2984_v63, %v1560_v7 }
  0xfb   : > { %v1558_v17 = vmul.f32 0.2, %v1135_v4  ;;  %2324 = vst.msk [vmem:[%s3302_s24 + $0x114] sm:$0xf] %vm2254_vm3, %v2778_v10  ;;  %v2783_v18 = vpack.c.bf16 %v1688_v16, %v1688_v16  ;;  %vm1369_vm7 = vcmp.ge.f32.partialorder %v2921_v8, 0.0  ;;  %vm1433_vm8 = vcmp.ge.f32.partialorder %v2985_v9, 0.0 }
  0xfc   : > { %v1622_v19 = vsel %vm1366_vm5, %v879_v3, %v1494_v12  ;;  %v1497_v20 = vmul.f32 0.2, %v2921_v8  ;;  %2265 = vst.msk [vmem:[%s3302_s24 + $0x28] sm:$0xf] %vm2254_vm3, %v2719_v15  ;;  %v1561_v23 = vmul.f32 0.2, %v2985_v9 }
  0xfd   : > { %v2717_v21 = vpack.c.bf16 %v1622_v19, %v1622_v19  ;;  %v1686_v22 = vsel %vm1430_vm6, %v1135_v4, %v1558_v17  ;;  %2329 = vst.msk [vmem:[%s3302_s24 + $0x128] sm:$0xf] %vm2254_vm3, %v2783_v18  ;;  %vm1367_vm9 = vcmp.ge.f32.partialorder %v882_v13, 0.0  ;;  %v1495_v26 = vmul.f32 0.2, %v882_v13  ;;  %v2924_v30 = vpop.f32.mrb[12].mxu0 }
  0xfe   : > { %v2781_v24 = vpack.c.bf16 %v1686_v22, %v1686_v22  ;;  %v1625_v25 = vsel %vm1369_vm7, %v2921_v8, %v1497_v20  ;;  %v1689_v28 = vsel %vm1433_vm8, %v2985_v9, %v1561_v23  ;;  %vm1431_vm10 = vcmp.ge.f32.partialorder %v1138_v14, 0.0  ;;  %v2988_v31 = vpop.f32.mrb[12].mxu1  ;;  %v895_v35 = vpop.f32.mrb[13].mxu0 }
  0xff   : > { %2263 = vst.msk [vmem:[%s3302_s24 + $0x20] sm:$0xf] %vm2254_vm3, %v2717_v21  ;;  %v2720_v27 = vpack.c.bf16 %v1625_v25, %v1625_v25  ;;  %v1559_v29 = vmul.f32 0.2, %v1138_v14  ;;  %v2784_v32 = vpack.c.bf16 %v1689_v28, %v1689_v28  ;;  %v1623_v33 = vsel %vm1367_vm9, %v882_v13, %v1495_v26  ;;  %v1151_v36 = vpop.f32.mrb[13].mxu1  ;;  %v2925_v40 = vpop.f32.mrb[14].mxu0 }
 0x100   : > { %2327 = vst.msk [vmem:[%s3302_s24 + $0x120] sm:$0xf] %vm2254_vm3, %v2781_v24  ;;  %vm1372_vm11 = vcmp.ge.f32.partialorder %v2924_v30, 0.0  ;;  %v1500_v34 = vmul.f32 0.2, %v2924_v30  ;;  %v2718_v37 = vpack.c.bf16 %v1623_v33, %v1623_v33  ;;  %vm1436_vm12 = vcmp.ge.f32.partialorder %v2988_v31, 0.0 }
 0x101   : > { %2266 = vst.msk [vmem:[%s3302_s24 + $0x2c] sm:$0xf] %vm2254_vm3, %v2720_v27  ;;  %v1687_v38 = vsel %vm1431_vm10, %v1138_v14, %v1559_v29  ;;  %v1564_v39 = vmul.f32 0.2, %v2988_v31  ;;  %v2989_v41 = vpop.f32.mrb[14].mxu1  ;;  %vm1370_vm13 = vcmp.ge.f32.partialorder %v895_v35, 0.0 }
 0x102   : > { %2330 = vst.msk [vmem:[%s3302_s24 + $0x12c] sm:$0xf] %vm2254_vm3, %v2784_v32  ;;  %v2782_v42 = vpack.c.bf16 %v1687_v38, %v1687_v38  ;;  %v1628_v43 = vsel %vm1372_vm11, %v2924_v30, %v1500_v34  ;;  %v1498_v44 = vmul.f32 0.2, %v895_v35  ;;  %v898_v45 = vpop.f32.mrb[15].mxu0  ;;  %v1154_v46 = vpop.f32.mrb[15].mxu1 }
 0x103   : > { %2264 = vst.msk [vmem:[%s3302_s24 + $0x24] sm:$0xf] %vm2254_vm3, %v2718_v37  ;;  %v2723_v47 = vpack.c.bf16 %v1628_v43, %v1628_v43  ;;  %v1692_v48 = vsel %vm1436_vm12, %v2988_v31, %v1564_v39  ;;  %vm1434_vm14 = vcmp.ge.f32.partialorder %v1151_v36, 0.0  ;;  %v1562_v49 = vmul.f32 0.2, %v1151_v36 }
 0x104   : > { %2328 = vst.msk [vmem:[%s3302_s24 + $0x124] sm:$0xf] %vm2254_vm3, %v2782_v42  ;;  %v2787_v50 = vpack.c.bf16 %v1692_v48, %v1692_v48  ;;  %v1626_v51 = vsel %vm1370_vm13, %v895_v35, %v1498_v44  ;;  %vm1373_vm15 = vcmp.ge.f32.partialorder %v2925_v40, 0.0  ;;  %v1501_v52 = vmul.f32 0.2, %v2925_v40 }
 0x105   : > { %2269 = vst.msk [vmem:[%s3302_s24 + $0x38] sm:$0xf] %vm2254_vm3, %v2723_v47  ;;  %v2721_v53 = vpack.c.bf16 %v1626_v51, %v1626_v51  ;;  %v1690_v54 = vsel %vm1434_vm14, %v1151_v36, %v1562_v49  ;;  %vm1437_vm0 = vcmp.ge.f32.partialorder %v2989_v41, 0.0  ;;  %v1565_v55 = vmul.f32 0.2, %v2989_v41  ;;  %v2928_v62 = vpop.f32.mrb[16].mxu0 }
 0x106   : > { %2333 = vst.msk [vmem:[%s3302_s24 + $0x138] sm:$0xf] %vm2254_vm3, %v2787_v50  ;;  %v2785_v56 = vpack.c.bf16 %v1690_v54, %v1690_v54  ;;  %v1629_v57 = vsel %vm1373_vm15, %v2925_v40, %v1501_v52  ;;  %vm1371_vm1 = vcmp.ge.f32.partialorder %v898_v45, 0.0  ;;  %v1499_v58 = vmul.f32 0.2, %v898_v45  ;;  %v2992_v63 = vpop.f32.mrb[16].mxu1 }
 0x107   : > { %2267 = vst.msk [vmem:[%s3302_s24 + $0x30] sm:$0xf] %vm2254_vm3, %v2721_v53  ;;  %v2724_v59 = vpack.c.bf16 %v1629_v57, %v1629_v57  ;;  %v1693_v60 = vsel %vm1437_vm0, %v2989_v41, %v1565_v55  ;;  %vm1435_vm2 = vcmp.ge.f32.partialorder %v1154_v46, 0.0  ;;  %v1563_v61 = vmul.f32 0.2, %v1154_v46  ;;  %v911_v3 = vpop.f32.mrb[17].mxu0 }
 0x108   : > { %2331 = vst.msk [vmem:[%s3302_s24 + $0x130] sm:$0xf] %vm2254_vm3, %v2785_v56  ;;  %v2788_v0 = vpack.c.bf16 %v1693_v60, %v1693_v60  ;;  %v1627_v1 = vsel %vm1371_vm1, %v898_v45, %v1499_v58  ;;  %vm1376_vm4 = vcmp.ge.f32.partialorder %v2928_v62, 0.0  ;;  %v1504_v2 = vmul.f32 0.2, %v2928_v62  ;;  %v1167_v4 = vpop.f32.mrb[17].mxu1 }
 0x109   : > { %2270 = vst.msk [vmem:[%s3302_s24 + $0x3c] sm:$0xf] %vm2254_vm3, %v2724_v59  ;;  %v2722_v5 = vpack.c.bf16 %v1627_v1, %v1627_v1  ;;  %v1691_v6 = vsel %vm1435_vm2, %v1154_v46, %v1563_v61  ;;  %vm1440_vm5 = vcmp.ge.f32.partialorder %v2992_v63, 0.0  ;;  %v1568_v7 = vmul.f32 0.2, %v2992_v63  ;;  %v2929_v8 = vpop.f32.mrb[18].mxu0 }
 0x10a   : > { %v2993_v9 = vpop.f32.mrb[18].mxu1  ;;  %2334 = vst.msk [vmem:[%s3302_s24 + $0x13c] sm:$0xf] %vm2254_vm3, %v2788_v0  ;;  %v2786_v10 = vpack.c.bf16 %v1691_v6, %v1691_v6  ;;  %v1632_v11 = vsel %vm1376_vm4, %v2928_v62, %v1504_v2  ;;  %vm1374_vm6 = vcmp.ge.f32.partialorder %v911_v3, 0.0  ;;  %v1502_v12 = vmul.f32 0.2, %v911_v3 }
 0x10b   : > { %v914_v13 = vpop.f32.mrb[19].mxu0  ;;  %v1170_v14 = vpop.f32.mrb[19].mxu1  ;;  %2268 = vst.msk [vmem:[%s3302_s24 + $0x34] sm:$0xf] %vm2254_vm3, %v2722_v5  ;;  %v2727_v15 = vpack.c.bf16 %v1632_v11, %v1632_v11  ;;  %v1696_v16 = vsel %vm1440_vm5, %v2992_v63, %v1568_v7  ;;  %vm1438_vm7 = vcmp.ge.f32.partialorder %v1167_v4, 0.0  ;;  %vm1377_vm8 = vcmp.ge.f32.partialorder %v2929_v8, 0.0 }
 0x10c   : > { %v1566_v17 = vmul.f32 0.2, %v1167_v4  ;;  %2332 = vst.msk [vmem:[%s3302_s24 + $0x134] sm:$0xf] %vm2254_vm3, %v2786_v10  ;;  %v2791_v18 = vpack.c.bf16 %v1696_v16, %v1696_v16  ;;  %v1630_v19 = vsel %vm1374_vm6, %v911_v3, %v1502_v12  ;;  %v1505_v20 = vmul.f32 0.2, %v2929_v8 }
 0x10d   : > { %2273 = vst.msk [vmem:[%s3302_s24 + $0x48] sm:$0xf] %vm2254_vm3, %v2727_v15  ;;  %v2725_v21 = vpack.c.bf16 %v1630_v19, %v1630_v19  ;;  %vm1441_vm9 = vcmp.ge.f32.partialorder %v2993_v9, 0.0  ;;  %v1569_v23 = vmul.f32 0.2, %v2993_v9  ;;  %vm1375_vm10 = vcmp.ge.f32.partialorder %v914_v13, 0.0 }
 0x10e   : > { %v1694_v22 = vsel %vm1438_vm7, %v1167_v4, %v1566_v17  ;;  %2337 = vst.msk [vmem:[%s3302_s24 + $0x148] sm:$0xf] %vm2254_vm3, %v2791_v18  ;;  %v1633_v25 = vsel %vm1377_vm8, %v2929_v8, %v1505_v20  ;;  %v1503_v26 = vmul.f32 0.2, %v914_v13  ;;  %vm1439_vm11 = vcmp.ge.f32.partialorder %v1170_v14, 0.0  ;;  %v2932_v30 = vpop.f32.mrb[20].mxu0 }
 0x10f   : > { %v2789_v24 = vpack.c.bf16 %v1694_v22, %v1694_v22  ;;  %2271 = vst.msk [vmem:[%s3302_s24 + $0x40] sm:$0xf] %vm2254_vm3, %v2725_v21  ;;  %v2728_v27 = vpack.c.bf16 %v1633_v25, %v1633_v25  ;;  %v1697_v28 = vsel %vm1441_vm9, %v2993_v9, %v1569_v23  ;;  %v1567_v29 = vmul.f32 0.2, %v1170_v14  ;;  %v2996_v31 = vpop.f32.mrb[20].mxu1  ;;  %v927_v35 = vpop.f32.mrb[21].mxu0 }
 0x110   : > { %v2792_v32 = vpack.c.bf16 %v1697_v28, %v1697_v28  ;;  %v1631_v33 = vsel %vm1375_vm10, %v914_v13, %v1503_v26  ;;  %vm1380_vm12 = vcmp.ge.f32.partialorder %v2932_v30, 0.0  ;;  %v1508_v34 = vmul.f32 0.2, %v2932_v30  ;;  %v1183_v36 = vpop.f32.mrb[21].mxu1  ;;  %v2933_v40 = vpop.f32.mrb[22].mxu0 }
 0x111   : > { %2335 = vst.msk [vmem:[%s3302_s24 + $0x140] sm:$0xf] %vm2254_vm3, %v2789_v24  ;;  %2274 = vst.msk [vmem:[%s3302_s24 + $0x4c] sm:$0xf] %vm2254_vm3, %v2728_v27  ;;  %v2726_v37 = vpack.c.bf16 %v1631_v33, %v1631_v33  ;;  %v1695_v38 = vsel %vm1439_vm11, %v1170_v14, %v1567_v29  ;;  %vm1444_vm13 = vcmp.ge.f32.partialorder %v2996_v31, 0.0  ;;  %v2997_v41 = vpop.f32.mrb[22].mxu1 }
 0x112   : > { %v1572_v39 = vmul.f32 0.2, %v2996_v31  ;;  %2338 = vst.msk [vmem:[%s3302_s24 + $0x14c] sm:$0xf] %vm2254_vm3, %v2792_v32  ;;  %v2790_v42 = vpack.c.bf16 %v1695_v38, %v1695_v38  ;;  %v1636_v43 = vsel %vm1380_vm12, %v2932_v30, %v1508_v34  ;;  %vm1378_vm14 = vcmp.ge.f32.partialorder %v927_v35, 0.0  ;;  %v930_v45 = vpop.f32.mrb[23].mxu0 }
 0x113   : > { %v1506_v44 = vmul.f32 0.2, %v927_v35  ;;  %v1186_v46 = vpop.f32.mrb[23].mxu1  ;;  %2272 = vst.msk [vmem:[%s3302_s24 + $0x44] sm:$0xf] %vm2254_vm3, %v2726_v37  ;;  %v2731_v47 = vpack.c.bf16 %v1636_v43, %v1636_v43  ;;  %vm1442_vm15 = vcmp.ge.f32.partialorder %v1183_v36, 0.0 }
 0x114   : > { %v1700_v48 = vsel %vm1444_vm13, %v2996_v31, %v1572_v39  ;;  %v1570_v49 = vmul.f32 0.2, %v1183_v36  ;;  %2336 = vst.msk [vmem:[%s3302_s24 + $0x144] sm:$0xf] %vm2254_vm3, %v2790_v42  ;;  %vm1381_vm0 = vcmp.ge.f32.partialorder %v2933_v40, 0.0  ;;  %vm1445_vm1 = vcmp.ge.f32.partialorder %v2997_v41, 0.0 }
 0x115   : > { %v2795_v50 = vpack.c.bf16 %v1700_v48, %v1700_v48  ;;  %v1634_v51 = vsel %vm1378_vm14, %v927_v35, %v1506_v44  ;;  %v1509_v52 = vmul.f32 0.2, %v2933_v40  ;;  %2277 = vst.msk [vmem:[%s3302_s24 + $0x58] sm:$0xf] %vm2254_vm3, %v2731_v47  ;;  %v1573_v55 = vmul.f32 0.2, %v2997_v41 }
 0x116   : > { %v2729_v53 = vpack.c.bf16 %v1634_v51, %v1634_v51  ;;  %v1698_v54 = vsel %vm1442_vm15, %v1183_v36, %v1570_v49  ;;  %vm1379_vm2 = vcmp.ge.f32.partialorder %v930_v45, 0.0  ;;  %v1507_v58 = vmul.f32 0.2, %v930_v45  ;;  %v2936_v62 = vpop.f32.mrb[24].mxu0  ;;  %v3000_v63 = vpop.f32.mrb[24].mxu1 }
 0x117   : > { %2341 = vst.msk [vmem:[%s3302_s24 + $0x158] sm:$0xf] %vm2254_vm3, %v2795_v50  ;;  %v2793_v56 = vpack.c.bf16 %v1698_v54, %v1698_v54  ;;  %v1637_v57 = vsel %vm1381_vm0, %v2933_v40, %v1509_v52  ;;  %v1701_v60 = vsel %vm1445_vm1, %v2997_v41, %v1573_v55  ;;  %vm1443_vm4 = vcmp.ge.f32.partialorder %v1186_v46, 0.0  ;;  %v943_v3 = vpop.f32.mrb[25].mxu0  ;;  %v1199_v4 = vpop.f32.mrb[25].mxu1 }
 0x118   : > { %2275 = vst.msk [vmem:[%s3302_s24 + $0x50] sm:$0xf] %vm2254_vm3, %v2729_v53  ;;  %v2732_v59 = vpack.c.bf16 %v1637_v57, %v1637_v57  ;;  %v1571_v61 = vmul.f32 0.2, %v1186_v46  ;;  %v2796_v0 = vpack.c.bf16 %v1701_v60, %v1701_v60  ;;  %v1635_v1 = vsel %vm1379_vm2, %v930_v45, %v1507_v58  ;;  %v2937_v8 = vpop.f32.mrb[26].mxu0  ;;  %v3001_v9 = vpop.f32.mrb[26].mxu1 }
 0x119   : > { %2339 = vst.msk [vmem:[%s3302_s24 + $0x150] sm:$0xf] %vm2254_vm3, %v2793_v56  ;;  %vm1384_vm5 = vcmp.ge.f32.partialorder %v2936_v62, 0.0  ;;  %v1512_v2 = vmul.f32 0.2, %v2936_v62  ;;  %v2730_v5 = vpack.c.bf16 %v1635_v1, %v1635_v1  ;;  %vm1448_vm6 = vcmp.ge.f32.partialorder %v3000_v63, 0.0 }
 0x11a   : > { %2278 = vst.msk [vmem:[%s3302_s24 + $0x5c] sm:$0xf] %vm2254_vm3, %v2732_v59  ;;  %v1699_v6 = vsel %vm1443_vm4, %v1186_v46, %v1571_v61  ;;  %v1576_v7 = vmul.f32 0.2, %v3000_v63  ;;  %2342 = vst.msk [vmem:[%s3302_s24 + $0x15c] sm:$0xf] %vm2254_vm3, %v2796_v0 }
 0x11b   : > { %v2794_v10 = vpack.c.bf16 %v1699_v6, %v1699_v6  ;;  %v1640_v11 = vsel %vm1384_vm5, %v2936_v62, %v1512_v2  ;;  %vm1382_vm7 = vcmp.ge.f32.partialorder %v943_v3, 0.0  ;;  %v1510_v12 = vmul.f32 0.2, %v943_v3  ;;  %v946_v13 = vpop.f32.mrb[27].mxu0  ;;  %v1202_v14 = vpop.f32.mrb[27].mxu1 }
 0x11c   : > { %2276 = vst.msk [vmem:[%s3302_s24 + $0x54] sm:$0xf] %vm2254_vm3, %v2730_v5  ;;  %v2735_v15 = vpack.c.bf16 %v1640_v11, %v1640_v11  ;;  %v1704_v16 = vsel %vm1448_vm6, %v3000_v63, %v1576_v7  ;;  %vm1446_vm8 = vcmp.ge.f32.partialorder %v1199_v4, 0.0  ;;  %v1574_v17 = vmul.f32 0.2, %v1199_v4 }
 0x11d   : > { %2340 = vst.msk [vmem:[%s3302_s24 + $0x154] sm:$0xf] %vm2254_vm3, %v2794_v10  ;;  %v2799_v18 = vpack.c.bf16 %v1704_v16, %v1704_v16  ;;  %v1638_v19 = vsel %vm1382_vm7, %v943_v3, %v1510_v12  ;;  %vm1385_vm9 = vcmp.ge.f32.partialorder %v2937_v8, 0.0  ;;  %v1513_v20 = vmul.f32 0.2, %v2937_v8  ;;  %v2940_v30 = vpop.f32.mrb[28].mxu0 }
 0x11e   : > { %2281 = vst.msk [vmem:[%s3302_s24 + $0x68] sm:$0xf] %vm2254_vm3, %v2735_v15  ;;  %v2733_v21 = vpack.c.bf16 %v1638_v19, %v1638_v19  ;;  %v1702_v22 = vsel %vm1446_vm8, %v1199_v4, %v1574_v17  ;;  %vm1449_vm10 = vcmp.ge.f32.partialorder %v3001_v9, 0.0  ;;  %v1577_v23 = vmul.f32 0.2, %v3001_v9  ;;  %v3004_v31 = vpop.f32.mrb[28].mxu1 }
 0x11f   : > { %2345 = vst.msk [vmem:[%s3302_s24 + $0x168] sm:$0xf] %vm2254_vm3, %v2799_v18  ;;  %v2797_v24 = vpack.c.bf16 %v1702_v22, %v1702_v22  ;;  %v1641_v25 = vsel %vm1385_vm9, %v2937_v8, %v1513_v20  ;;  %vm1383_vm11 = vcmp.ge.f32.partialorder %v946_v13, 0.0  ;;  %v1511_v26 = vmul.f32 0.2, %v946_v13  ;;  %v959_v35 = vpop.f32.mrb[29].mxu0 }
 0x120   : > { %2279 = vst.msk [vmem:[%s3302_s24 + $0x60] sm:$0xf] %vm2254_vm3, %v2733_v21  ;;  %v2736_v27 = vpack.c.bf16 %v1641_v25, %v1641_v25  ;;  %v1705_v28 = vsel %vm1449_vm10, %v3001_v9, %v1577_v23  ;;  %vm1447_vm12 = vcmp.ge.f32.partialorder %v1202_v14, 0.0  ;;  %v1575_v29 = vmul.f32 0.2, %v1202_v14  ;;  %v1215_v36 = vpop.f32.mrb[29].mxu1 }
 0x121   : > { %2343 = vst.msk [vmem:[%s3302_s24 + $0x160] sm:$0xf] %vm2254_vm3, %v2797_v24  ;;  %v2800_v32 = vpack.c.bf16 %v1705_v28, %v1705_v28  ;;  %v1639_v33 = vsel %vm1383_vm11, %v946_v13, %v1511_v26  ;;  %vm1388_vm13 = vcmp.ge.f32.partialorder %v2940_v30, 0.0  ;;  %v1516_v34 = vmul.f32 0.2, %v2940_v30  ;;  %v2941_v40 = vpop.f32.mrb[30].mxu0 }
 0x122   : > { %2282 = vst.msk [vmem:[%s3302_s24 + $0x6c] sm:$0xf] %vm2254_vm3, %v2736_v27  ;;  %v2734_v37 = vpack.c.bf16 %v1639_v33, %v1639_v33  ;;  %v1703_v38 = vsel %vm1447_vm12, %v1202_v14, %v1575_v29  ;;  %vm1452_vm14 = vcmp.ge.f32.partialorder %v3004_v31, 0.0  ;;  %v1580_v39 = vmul.f32 0.2, %v3004_v31  ;;  %v3005_v41 = vpop.f32.mrb[30].mxu1 }
 0x123   : > { %2346 = vst.msk [vmem:[%s3302_s24 + $0x16c] sm:$0xf] %vm2254_vm3, %v2800_v32  ;;  %v2798_v42 = vpack.c.bf16 %v1703_v38, %v1703_v38  ;;  %v1644_v43 = vsel %vm1388_vm13, %v2940_v30, %v1516_v34  ;;  %vm1386_vm15 = vcmp.ge.f32.partialorder %v959_v35, 0.0  ;;  %v1514_v44 = vmul.f32 0.2, %v959_v35  ;;  %v962_v45 = vpop.f32.mrb[31].mxu0 }
 0x124   : > { %v1218_v46 = vpop.f32.mrb[31].mxu1  ;;  %2280 = vst.msk [vmem:[%s3302_s24 + $0x64] sm:$0xf] %vm2254_vm3, %v2734_v37  ;;  %v2739_v47 = vpack.c.bf16 %v1644_v43, %v1644_v43  ;;  %v1708_v48 = vsel %vm1452_vm14, %v3004_v31, %v1580_v39  ;;  %vm1450_vm0 = vcmp.ge.f32.partialorder %v1215_v36, 0.0  ;;  %v1578_v49 = vmul.f32 0.2, %v1215_v36 }
 0x125   : > { %2344 = vst.msk [vmem:[%s3302_s24 + $0x164] sm:$0xf] %vm2254_vm3, %v2798_v42  ;;  %v2803_v50 = vpack.c.bf16 %v1708_v48, %v1708_v48  ;;  %v1642_v51 = vsel %vm1386_vm15, %v959_v35, %v1514_v44  ;;  %vm1389_vm1 = vcmp.ge.f32.partialorder %v2941_v40, 0.0  ;;  %v1517_v52 = vmul.f32 0.2, %v2941_v40  ;;  %v2944_v62 = vpop.f32.mrb[32].mxu0 }
 0x126   : > { %2285 = vst.msk [vmem:[%s3302_s24 + $0x78] sm:$0xf] %vm2254_vm3, %v2739_v47  ;;  %v2737_v53 = vpack.c.bf16 %v1642_v51, %v1642_v51  ;;  %v1706_v54 = vsel %vm1450_vm0, %v1215_v36, %v1578_v49  ;;  %vm1453_vm2 = vcmp.ge.f32.partialorder %v3005_v41, 0.0  ;;  %v1581_v55 = vmul.f32 0.2, %v3005_v41  ;;  %v3008_v63 = vpop.f32.mrb[32].mxu1 }
 0x127   : > { %2349 = vst.msk [vmem:[%s3302_s24 + $0x178] sm:$0xf] %vm2254_vm3, %v2803_v50  ;;  %v2801_v56 = vpack.c.bf16 %v1706_v54, %v1706_v54  ;;  %v1645_v57 = vsel %vm1389_vm1, %v2941_v40, %v1517_v52  ;;  %vm1387_vm4 = vcmp.ge.f32.partialorder %v962_v45, 0.0  ;;  %v1515_v58 = vmul.f32 0.2, %v962_v45  ;;  %v975_v3 = vpop.f32.mrb[33].mxu0 }
 0x128   : > { %2283 = vst.msk [vmem:[%s3302_s24 + $0x70] sm:$0xf] %vm2254_vm3, %v2737_v53  ;;  %v2740_v59 = vpack.c.bf16 %v1645_v57, %v1645_v57  ;;  %v1709_v60 = vsel %vm1453_vm2, %v3005_v41, %v1581_v55  ;;  %vm1451_vm5 = vcmp.ge.f32.partialorder %v1218_v46, 0.0  ;;  %v1579_v61 = vmul.f32 0.2, %v1218_v46  ;;  %v1231_v4 = vpop.f32.mrb[33].mxu1 }
 0x129   : > { %2347 = vst.msk [vmem:[%s3302_s24 + $0x170] sm:$0xf] %vm2254_vm3, %v2801_v56  ;;  %v2804_v0 = vpack.c.bf16 %v1709_v60, %v1709_v60  ;;  %v1643_v1 = vsel %vm1387_vm4, %v962_v45, %v1515_v58  ;;  %vm1392_vm6 = vcmp.ge.f32.partialorder %v2944_v62, 0.0  ;;  %v1520_v2 = vmul.f32 0.2, %v2944_v62  ;;  %v2945_v8 = vpop.f32.mrb[34].mxu0 }
 0x12a   : > { %2286 = vst.msk [vmem:[%s3302_s24 + $0x7c] sm:$0xf] %vm2254_vm3, %v2740_v59  ;;  %v2738_v5 = vpack.c.bf16 %v1643_v1, %v1643_v1  ;;  %v1707_v6 = vsel %vm1451_vm5, %v1218_v46, %v1579_v61  ;;  %vm1456_vm7 = vcmp.ge.f32.partialorder %v3008_v63, 0.0  ;;  %v1584_v7 = vmul.f32 0.2, %v3008_v63  ;;  %v3009_v9 = vpop.f32.mrb[34].mxu1 }
 0x12b   : > { %2350 = vst.msk [vmem:[%s3302_s24 + $0x17c] sm:$0xf] %vm2254_vm3, %v2804_v0  ;;  %v2802_v10 = vpack.c.bf16 %v1707_v6, %v1707_v6  ;;  %v1648_v11 = vsel %vm1392_vm6, %v2944_v62, %v1520_v2  ;;  %vm1390_vm8 = vcmp.ge.f32.partialorder %v975_v3, 0.0  ;;  %v1518_v12 = vmul.f32 0.2, %v975_v3  ;;  %v978_v13 = vpop.f32.mrb[35].mxu0 }
 0x12c   : > { %v1234_v14 = vpop.f32.mrb[35].mxu1  ;;  %2284 = vst.msk [vmem:[%s3302_s24 + $0x74] sm:$0xf] %vm2254_vm3, %v2738_v5  ;;  %v2743_v15 = vpack.c.bf16 %v1648_v11, %v1648_v11  ;;  %v1712_v16 = vsel %vm1456_vm7, %v3008_v63, %v1584_v7  ;;  %vm1454_vm9 = vcmp.ge.f32.partialorder %v1231_v4, 0.0  ;;  %v1582_v17 = vmul.f32 0.2, %v1231_v4 }
 0x12d   : > { %2348 = vst.msk [vmem:[%s3302_s24 + $0x174] sm:$0xf] %vm2254_vm3, %v2802_v10  ;;  %v2807_v18 = vpack.c.bf16 %v1712_v16, %v1712_v16  ;;  %v1646_v19 = vsel %vm1390_vm8, %v975_v3, %v1518_v12  ;;  %vm1393_vm10 = vcmp.ge.f32.partialorder %v2945_v8, 0.0  ;;  %v1521_v20 = vmul.f32 0.2, %v2945_v8  ;;  %v2948_v30 = vpop.f32.mrb[36].mxu0 }
 0x12e   : > { %2289 = vst.msk [vmem:[%s3302_s24 + $0x88] sm:$0xf] %vm2254_vm3, %v2743_v15  ;;  %v2741_v21 = vpack.c.bf16 %v1646_v19, %v1646_v19  ;;  %v1710_v22 = vsel %vm1454_vm9, %v1231_v4, %v1582_v17  ;;  %vm1457_vm11 = vcmp.ge.f32.partialorder %v3009_v9, 0.0  ;;  %v1585_v23 = vmul.f32 0.2, %v3009_v9  ;;  %v3012_v31 = vpop.f32.mrb[36].mxu1 }
 0x12f   : > { %2353 = vst.msk [vmem:[%s3302_s24 + $0x188] sm:$0xf] %vm2254_vm3, %v2807_v18  ;;  %v2805_v24 = vpack.c.bf16 %v1710_v22, %v1710_v22  ;;  %v1649_v25 = vsel %vm1393_vm10, %v2945_v8, %v1521_v20  ;;  %vm1391_vm12 = vcmp.ge.f32.partialorder %v978_v13, 0.0  ;;  %v1519_v26 = vmul.f32 0.2, %v978_v13  ;;  %v991_v35 = vpop.f32.mrb[37].mxu0 }
 0x130   : > { %2287 = vst.msk [vmem:[%s3302_s24 + $0x80] sm:$0xf] %vm2254_vm3, %v2741_v21  ;;  %v2744_v27 = vpack.c.bf16 %v1649_v25, %v1649_v25  ;;  %v1713_v28 = vsel %vm1457_vm11, %v3009_v9, %v1585_v23  ;;  %vm1455_vm13 = vcmp.ge.f32.partialorder %v1234_v14, 0.0  ;;  %v1583_v29 = vmul.f32 0.2, %v1234_v14  ;;  %v1247_v36 = vpop.f32.mrb[37].mxu1 }
 0x131   : > { %2351 = vst.msk [vmem:[%s3302_s24 + $0x180] sm:$0xf] %vm2254_vm3, %v2805_v24  ;;  %v2808_v32 = vpack.c.bf16 %v1713_v28, %v1713_v28  ;;  %v1647_v33 = vsel %vm1391_vm12, %v978_v13, %v1519_v26  ;;  %vm1396_vm14 = vcmp.ge.f32.partialorder %v2948_v30, 0.0  ;;  %v1524_v34 = vmul.f32 0.2, %v2948_v30  ;;  %v2949_v40 = vpop.f32.mrb[38].mxu0 }
 0x132   : > { %2290 = vst.msk [vmem:[%s3302_s24 + $0x8c] sm:$0xf] %vm2254_vm3, %v2744_v27  ;;  %v2742_v37 = vpack.c.bf16 %v1647_v33, %v1647_v33  ;;  %v1711_v38 = vsel %vm1455_vm13, %v1234_v14, %v1583_v29  ;;  %vm1460_vm15 = vcmp.ge.f32.partialorder %v3012_v31, 0.0  ;;  %v1588_v39 = vmul.f32 0.2, %v3012_v31  ;;  %v3013_v41 = vpop.f32.mrb[38].mxu1 }
 0x133   : > { %2354 = vst.msk [vmem:[%s3302_s24 + $0x18c] sm:$0xf] %vm2254_vm3, %v2808_v32  ;;  %v2806_v42 = vpack.c.bf16 %v1711_v38, %v1711_v38  ;;  %v1652_v43 = vsel %vm1396_vm14, %v2948_v30, %v1524_v34  ;;  %vm1394_vm0 = vcmp.ge.f32.partialorder %v991_v35, 0.0  ;;  %v1522_v44 = vmul.f32 0.2, %v991_v35  ;;  %v994_v45 = vpop.f32.mrb[39].mxu0 }
 0x134   : > { %v1250_v46 = vpop.f32.mrb[39].mxu1  ;;  %2288 = vst.msk [vmem:[%s3302_s24 + $0x84] sm:$0xf] %vm2254_vm3, %v2742_v37  ;;  %v2747_v47 = vpack.c.bf16 %v1652_v43, %v1652_v43  ;;  %v1716_v48 = vsel %vm1460_vm15, %v3012_v31, %v1588_v39  ;;  %vm1458_vm1 = vcmp.ge.f32.partialorder %v1247_v36, 0.0  ;;  %v1586_v49 = vmul.f32 0.2, %v1247_v36 }
 0x135   : > { %2352 = vst.msk [vmem:[%s3302_s24 + $0x184] sm:$0xf] %vm2254_vm3, %v2806_v42  ;;  %v2811_v50 = vpack.c.bf16 %v1716_v48, %v1716_v48  ;;  %v1650_v51 = vsel %vm1394_vm0, %v991_v35, %v1522_v44  ;;  %vm1397_vm2 = vcmp.ge.f32.partialorder %v2949_v40, 0.0  ;;  %v1525_v52 = vmul.f32 0.2, %v2949_v40  ;;  %v2952_v62 = vpop.f32.mrb[40].mxu0 }
 0x136   : > { %2293 = vst.msk [vmem:[%s3302_s24 + $0x98] sm:$0xf] %vm2254_vm3, %v2747_v47  ;;  %v2745_v53 = vpack.c.bf16 %v1650_v51, %v1650_v51  ;;  %v1714_v54 = vsel %vm1458_vm1, %v1247_v36, %v1586_v49  ;;  %vm1461_vm4 = vcmp.ge.f32.partialorder %v3013_v41, 0.0  ;;  %v1589_v55 = vmul.f32 0.2, %v3013_v41  ;;  %v3016_v63 = vpop.f32.mrb[40].mxu1 }
 0x137   : > { %2357 = vst.msk [vmem:[%s3302_s24 + $0x198] sm:$0xf] %vm2254_vm3, %v2811_v50  ;;  %v2809_v56 = vpack.c.bf16 %v1714_v54, %v1714_v54  ;;  %v1653_v57 = vsel %vm1397_vm2, %v2949_v40, %v1525_v52  ;;  %vm1395_vm5 = vcmp.ge.f32.partialorder %v994_v45, 0.0  ;;  %v1523_v58 = vmul.f32 0.2, %v994_v45  ;;  %v1007_v3 = vpop.f32.mrb[41].mxu0 }
 0x138   : > { %2291 = vst.msk [vmem:[%s3302_s24 + $0x90] sm:$0xf] %vm2254_vm3, %v2745_v53  ;;  %v2748_v59 = vpack.c.bf16 %v1653_v57, %v1653_v57  ;;  %v1717_v60 = vsel %vm1461_vm4, %v3013_v41, %v1589_v55  ;;  %vm1459_vm6 = vcmp.ge.f32.partialorder %v1250_v46, 0.0  ;;  %v1587_v61 = vmul.f32 0.2, %v1250_v46  ;;  %v1263_v4 = vpop.f32.mrb[41].mxu1 }
 0x139   : > { %2355 = vst.msk [vmem:[%s3302_s24 + $0x190] sm:$0xf] %vm2254_vm3, %v2809_v56  ;;  %v2812_v0 = vpack.c.bf16 %v1717_v60, %v1717_v60  ;;  %v1651_v1 = vsel %vm1395_vm5, %v994_v45, %v1523_v58  ;;  %vm1400_vm7 = vcmp.ge.f32.partialorder %v2952_v62, 0.0  ;;  %v1528_v2 = vmul.f32 0.2, %v2952_v62  ;;  %v2953_v8 = vpop.f32.mrb[42].mxu0 }
 0x13a   : > { %2294 = vst.msk [vmem:[%s3302_s24 + $0x9c] sm:$0xf] %vm2254_vm3, %v2748_v59  ;;  %v2746_v5 = vpack.c.bf16 %v1651_v1, %v1651_v1  ;;  %v1715_v6 = vsel %vm1459_vm6, %v1250_v46, %v1587_v61  ;;  %vm1464_vm8 = vcmp.ge.f32.partialorder %v3016_v63, 0.0  ;;  %v1592_v7 = vmul.f32 0.2, %v3016_v63  ;;  %v3017_v9 = vpop.f32.mrb[42].mxu1 }
 0x13b   : > { %2358 = vst.msk [vmem:[%s3302_s24 + $0x19c] sm:$0xf] %vm2254_vm3, %v2812_v0  ;;  %v2810_v10 = vpack.c.bf16 %v1715_v6, %v1715_v6  ;;  %v1656_v11 = vsel %vm1400_vm7, %v2952_v62, %v1528_v2  ;;  %vm1398_vm9 = vcmp.ge.f32.partialorder %v1007_v3, 0.0  ;;  %v1526_v12 = vmul.f32 0.2, %v1007_v3  ;;  %v1010_v13 = vpop.f32.mrb[43].mxu0 }
 0x13c   : > { %v1266_v14 = vpop.f32.mrb[43].mxu1  ;;  %2292 = vst.msk [vmem:[%s3302_s24 + $0x94] sm:$0xf] %vm2254_vm3, %v2746_v5  ;;  %v2751_v15 = vpack.c.bf16 %v1656_v11, %v1656_v11  ;;  %v1720_v16 = vsel %vm1464_vm8, %v3016_v63, %v1592_v7  ;;  %vm1462_vm10 = vcmp.ge.f32.partialorder %v1263_v4, 0.0  ;;  %v1590_v17 = vmul.f32 0.2, %v1263_v4 }
 0x13d   : > { %2356 = vst.msk [vmem:[%s3302_s24 + $0x194] sm:$0xf] %vm2254_vm3, %v2810_v10  ;;  %v2815_v18 = vpack.c.bf16 %v1720_v16, %v1720_v16  ;;  %v1654_v19 = vsel %vm1398_vm9, %v1007_v3, %v1526_v12  ;;  %vm1401_vm11 = vcmp.ge.f32.partialorder %v2953_v8, 0.0  ;;  %v1529_v20 = vmul.f32 0.2, %v2953_v8  ;;  %v2956_v30 = vpop.f32.mrb[44].mxu0 }
 0x13e   : > { %2297 = vst.msk [vmem:[%s3302_s24 + $0xa8] sm:$0xf] %vm2254_vm3, %v2751_v15  ;;  %v2749_v21 = vpack.c.bf16 %v1654_v19, %v1654_v19  ;;  %v1718_v22 = vsel %vm1462_vm10, %v1263_v4, %v1590_v17  ;;  %vm1465_vm12 = vcmp.ge.f32.partialorder %v3017_v9, 0.0  ;;  %v1593_v23 = vmul.f32 0.2, %v3017_v9  ;;  %v3020_v31 = vpop.f32.mrb[44].mxu1 }
 0x13f   : > { %2361 = vst.msk [vmem:[%s3302_s24 + $0x1a8] sm:$0xf] %vm2254_vm3, %v2815_v18  ;;  %v2813_v24 = vpack.c.bf16 %v1718_v22, %v1718_v22  ;;  %v1657_v25 = vsel %vm1401_vm11, %v2953_v8, %v1529_v20  ;;  %vm1399_vm13 = vcmp.ge.f32.partialorder %v1010_v13, 0.0  ;;  %v1527_v26 = vmul.f32 0.2, %v1010_v13  ;;  %v1023_v35 = vpop.f32.mrb[45].mxu0 }
 0x140   : > { %2295 = vst.msk [vmem:[%s3302_s24 + $0xa0] sm:$0xf] %vm2254_vm3, %v2749_v21  ;;  %v2752_v27 = vpack.c.bf16 %v1657_v25, %v1657_v25  ;;  %v1721_v28 = vsel %vm1465_vm12, %v3017_v9, %v1593_v23  ;;  %vm1463_vm14 = vcmp.ge.f32.partialorder %v1266_v14, 0.0  ;;  %v1591_v29 = vmul.f32 0.2, %v1266_v14  ;;  %v1279_v36 = vpop.f32.mrb[45].mxu1 }
 0x141   : > { %2359 = vst.msk [vmem:[%s3302_s24 + $0x1a0] sm:$0xf] %vm2254_vm3, %v2813_v24  ;;  %v2816_v32 = vpack.c.bf16 %v1721_v28, %v1721_v28  ;;  %v1655_v33 = vsel %vm1399_vm13, %v1010_v13, %v1527_v26  ;;  %vm1404_vm15 = vcmp.ge.f32.partialorder %v2956_v30, 0.0  ;;  %v1532_v34 = vmul.f32 0.2, %v2956_v30  ;;  %v2957_v40 = vpop.f32.mrb[46].mxu0 }
 0x142   : > { %2298 = vst.msk [vmem:[%s3302_s24 + $0xac] sm:$0xf] %vm2254_vm3, %v2752_v27  ;;  %v2750_v37 = vpack.c.bf16 %v1655_v33, %v1655_v33  ;;  %v1719_v38 = vsel %vm1463_vm14, %v1266_v14, %v1591_v29  ;;  %vm1468_vm0 = vcmp.ge.f32.partialorder %v3020_v31, 0.0  ;;  %v1596_v39 = vmul.f32 0.2, %v3020_v31  ;;  %v3021_v41 = vpop.f32.mrb[46].mxu1 }
 0x143   : > { %2362 = vst.msk [vmem:[%s3302_s24 + $0x1ac] sm:$0xf] %vm2254_vm3, %v2816_v32  ;;  %v2814_v42 = vpack.c.bf16 %v1719_v38, %v1719_v38  ;;  %v1660_v43 = vsel %vm1404_vm15, %v2956_v30, %v1532_v34  ;;  %vm1402_vm1 = vcmp.ge.f32.partialorder %v1023_v35, 0.0  ;;  %v1530_v44 = vmul.f32 0.2, %v1023_v35  ;;  %v1026_v45 = vpop.f32.mrb[47].mxu0 }
 0x144   : > { %v1282_v46 = vpop.f32.mrb[47].mxu1  ;;  %2296 = vst.msk [vmem:[%s3302_s24 + $0xa4] sm:$0xf] %vm2254_vm3, %v2750_v37  ;;  %v2755_v47 = vpack.c.bf16 %v1660_v43, %v1660_v43  ;;  %v1724_v48 = vsel %vm1468_vm0, %v3020_v31, %v1596_v39  ;;  %vm1466_vm2 = vcmp.ge.f32.partialorder %v1279_v36, 0.0  ;;  %v1594_v49 = vmul.f32 0.2, %v1279_v36 }
 0x145   : > { %2360 = vst.msk [vmem:[%s3302_s24 + $0x1a4] sm:$0xf] %vm2254_vm3, %v2814_v42  ;;  %v2819_v50 = vpack.c.bf16 %v1724_v48, %v1724_v48  ;;  %v1658_v51 = vsel %vm1402_vm1, %v1023_v35, %v1530_v44  ;;  %vm1405_vm4 = vcmp.ge.f32.partialorder %v2957_v40, 0.0  ;;  %v1533_v52 = vmul.f32 0.2, %v2957_v40  ;;  %v2960_v62 = vpop.f32.mrb[48].mxu0 }
 0x146   : > { %2301 = vst.msk [vmem:[%s3302_s24 + $0xb8] sm:$0xf] %vm2254_vm3, %v2755_v47  ;;  %v2753_v53 = vpack.c.bf16 %v1658_v51, %v1658_v51  ;;  %v1722_v54 = vsel %vm1466_vm2, %v1279_v36, %v1594_v49  ;;  %vm1469_vm5 = vcmp.ge.f32.partialorder %v3021_v41, 0.0  ;;  %v1597_v55 = vmul.f32 0.2, %v3021_v41  ;;  %v3024_v63 = vpop.f32.mrb[48].mxu1 }
 0x147   : > { %2365 = vst.msk [vmem:[%s3302_s24 + $0x1b8] sm:$0xf] %vm2254_vm3, %v2819_v50  ;;  %v2817_v56 = vpack.c.bf16 %v1722_v54, %v1722_v54  ;;  %v1661_v57 = vsel %vm1405_vm4, %v2957_v40, %v1533_v52  ;;  %vm1403_vm6 = vcmp.ge.f32.partialorder %v1026_v45, 0.0  ;;  %v1531_v58 = vmul.f32 0.2, %v1026_v45  ;;  %v1039_v3 = vpop.f32.mrb[49].mxu0 }
 0x148   : > { %2299 = vst.msk [vmem:[%s3302_s24 + $0xb0] sm:$0xf] %vm2254_vm3, %v2753_v53  ;;  %v2756_v59 = vpack.c.bf16 %v1661_v57, %v1661_v57  ;;  %v1725_v60 = vsel %vm1469_vm5, %v3021_v41, %v1597_v55  ;;  %vm1467_vm7 = vcmp.ge.f32.partialorder %v1282_v46, 0.0  ;;  %v1595_v61 = vmul.f32 0.2, %v1282_v46  ;;  %v1295_v4 = vpop.f32.mrb[49].mxu1 }
 0x149   : > { %2363 = vst.msk [vmem:[%s3302_s24 + $0x1b0] sm:$0xf] %vm2254_vm3, %v2817_v56  ;;  %v2820_v0 = vpack.c.bf16 %v1725_v60, %v1725_v60  ;;  %v1659_v1 = vsel %vm1403_vm6, %v1026_v45, %v1531_v58  ;;  %vm1408_vm8 = vcmp.ge.f32.partialorder %v2960_v62, 0.0  ;;  %v1536_v2 = vmul.f32 0.2, %v2960_v62  ;;  %v2961_v8 = vpop.f32.mrb[50].mxu0 }
 0x14a   : > { %2302 = vst.msk [vmem:[%s3302_s24 + $0xbc] sm:$0xf] %vm2254_vm3, %v2756_v59  ;;  %v2754_v5 = vpack.c.bf16 %v1659_v1, %v1659_v1  ;;  %v1723_v6 = vsel %vm1467_vm7, %v1282_v46, %v1595_v61  ;;  %vm1472_vm9 = vcmp.ge.f32.partialorder %v3024_v63, 0.0  ;;  %v1600_v7 = vmul.f32 0.2, %v3024_v63  ;;  %v3025_v9 = vpop.f32.mrb[50].mxu1 }
 0x14b   : > { %2366 = vst.msk [vmem:[%s3302_s24 + $0x1bc] sm:$0xf] %vm2254_vm3, %v2820_v0  ;;  %v2818_v10 = vpack.c.bf16 %v1723_v6, %v1723_v6  ;;  %v1664_v11 = vsel %vm1408_vm8, %v2960_v62, %v1536_v2  ;;  %vm1406_vm10 = vcmp.ge.f32.partialorder %v1039_v3, 0.0  ;;  %v1534_v12 = vmul.f32 0.2, %v1039_v3  ;;  %v1042_v13 = vpop.f32.mrb[51].mxu0 }
 0x14c   : > { %v1298_v14 = vpop.f32.mrb[51].mxu1  ;;  %2300 = vst.msk [vmem:[%s3302_s24 + $0xb4] sm:$0xf] %vm2254_vm3, %v2754_v5  ;;  %v2759_v15 = vpack.c.bf16 %v1664_v11, %v1664_v11  ;;  %v1728_v16 = vsel %vm1472_vm9, %v3024_v63, %v1600_v7  ;;  %vm1470_vm11 = vcmp.ge.f32.partialorder %v1295_v4, 0.0  ;;  %v1598_v17 = vmul.f32 0.2, %v1295_v4 }
 0x14d   : > { %2364 = vst.msk [vmem:[%s3302_s24 + $0x1b4] sm:$0xf] %vm2254_vm3, %v2818_v10  ;;  %v2823_v18 = vpack.c.bf16 %v1728_v16, %v1728_v16  ;;  %v1662_v19 = vsel %vm1406_vm10, %v1039_v3, %v1534_v12  ;;  %vm1409_vm12 = vcmp.ge.f32.partialorder %v2961_v8, 0.0  ;;  %v1537_v20 = vmul.f32 0.2, %v2961_v8  ;;  %v2964_v30 = vpop.f32.mrb[52].mxu0 }
 0x14e   : > { %2305 = vst.msk [vmem:[%s3302_s24 + $0xc8] sm:$0xf] %vm2254_vm3, %v2759_v15  ;;  %v2757_v21 = vpack.c.bf16 %v1662_v19, %v1662_v19  ;;  %v1726_v22 = vsel %vm1470_vm11, %v1295_v4, %v1598_v17  ;;  %vm1473_vm13 = vcmp.ge.f32.partialorder %v3025_v9, 0.0  ;;  %v1601_v23 = vmul.f32 0.2, %v3025_v9  ;;  %v3028_v31 = vpop.f32.mrb[52].mxu1 }
 0x14f   : > { %2369 = vst.msk [vmem:[%s3302_s24 + $0x1c8] sm:$0xf] %vm2254_vm3, %v2823_v18  ;;  %v2821_v24 = vpack.c.bf16 %v1726_v22, %v1726_v22  ;;  %v1665_v25 = vsel %vm1409_vm12, %v2961_v8, %v1537_v20  ;;  %vm1407_vm14 = vcmp.ge.f32.partialorder %v1042_v13, 0.0  ;;  %v1535_v26 = vmul.f32 0.2, %v1042_v13  ;;  %v1055_v35 = vpop.f32.mrb[53].mxu0 }
 0x150   : > { %2303 = vst.msk [vmem:[%s3302_s24 + $0xc0] sm:$0xf] %vm2254_vm3, %v2757_v21  ;;  %v2760_v27 = vpack.c.bf16 %v1665_v25, %v1665_v25  ;;  %v1729_v28 = vsel %vm1473_vm13, %v3025_v9, %v1601_v23  ;;  %vm1471_vm15 = vcmp.ge.f32.partialorder %v1298_v14, 0.0  ;;  %v1599_v29 = vmul.f32 0.2, %v1298_v14  ;;  %v1311_v36 = vpop.f32.mrb[53].mxu1 }
 0x151   : > { %2367 = vst.msk [vmem:[%s3302_s24 + $0x1c0] sm:$0xf] %vm2254_vm3, %v2821_v24  ;;  %v2824_v32 = vpack.c.bf16 %v1729_v28, %v1729_v28  ;;  %v1663_v33 = vsel %vm1407_vm14, %v1042_v13, %v1535_v26  ;;  %vm1412_vm0 = vcmp.ge.f32.partialorder %v2964_v30, 0.0  ;;  %v1540_v34 = vmul.f32 0.2, %v2964_v30  ;;  %v2965_v40 = vpop.f32.mrb[54].mxu0 }
 0x152   : > { %2306 = vst.msk [vmem:[%s3302_s24 + $0xcc] sm:$0xf] %vm2254_vm3, %v2760_v27  ;;  %v2758_v37 = vpack.c.bf16 %v1663_v33, %v1663_v33  ;;  %v1727_v38 = vsel %vm1471_vm15, %v1298_v14, %v1599_v29  ;;  %vm1476_vm1 = vcmp.ge.f32.partialorder %v3028_v31, 0.0  ;;  %v1604_v39 = vmul.f32 0.2, %v3028_v31  ;;  %v3029_v41 = vpop.f32.mrb[54].mxu1 }
 0x153   : > { %2370 = vst.msk [vmem:[%s3302_s24 + $0x1cc] sm:$0xf] %vm2254_vm3, %v2824_v32  ;;  %v2822_v42 = vpack.c.bf16 %v1727_v38, %v1727_v38  ;;  %v1668_v43 = vsel %vm1412_vm0, %v2964_v30, %v1540_v34  ;;  %vm1410_vm2 = vcmp.ge.f32.partialorder %v1055_v35, 0.0  ;;  %v1538_v44 = vmul.f32 0.2, %v1055_v35  ;;  %v1058_v45 = vpop.f32.mrb[55].mxu0 }
 0x154   : > { %v1314_v46 = vpop.f32.mrb[55].mxu1  ;;  %2304 = vst.msk [vmem:[%s3302_s24 + $0xc4] sm:$0xf] %vm2254_vm3, %v2758_v37  ;;  %v2763_v47 = vpack.c.bf16 %v1668_v43, %v1668_v43  ;;  %v1732_v48 = vsel %vm1476_vm1, %v3028_v31, %v1604_v39  ;;  %vm1474_vm4 = vcmp.ge.f32.partialorder %v1311_v36, 0.0  ;;  %v1602_v49 = vmul.f32 0.2, %v1311_v36 }
 0x155   : > { %2368 = vst.msk [vmem:[%s3302_s24 + $0x1c4] sm:$0xf] %vm2254_vm3, %v2822_v42  ;;  %v2827_v50 = vpack.c.bf16 %v1732_v48, %v1732_v48  ;;  %v1666_v51 = vsel %vm1410_vm2, %v1055_v35, %v1538_v44  ;;  %vm1413_vm5 = vcmp.ge.f32.partialorder %v2965_v40, 0.0  ;;  %v1541_v52 = vmul.f32 0.2, %v2965_v40  ;;  %v2968_v62 = vpop.f32.mrb[56].mxu0 }
 0x156   : > { %2309 = vst.msk [vmem:[%s3302_s24 + $0xd8] sm:$0xf] %vm2254_vm3, %v2763_v47  ;;  %v2761_v53 = vpack.c.bf16 %v1666_v51, %v1666_v51  ;;  %v1730_v54 = vsel %vm1474_vm4, %v1311_v36, %v1602_v49  ;;  %vm1477_vm6 = vcmp.ge.f32.partialorder %v3029_v41, 0.0  ;;  %v1605_v55 = vmul.f32 0.2, %v3029_v41  ;;  %v3032_v63 = vpop.f32.mrb[56].mxu1 }
 0x157   : > { %2373 = vst.msk [vmem:[%s3302_s24 + $0x1d8] sm:$0xf] %vm2254_vm3, %v2827_v50  ;;  %v2825_v56 = vpack.c.bf16 %v1730_v54, %v1730_v54  ;;  %v1669_v57 = vsel %vm1413_vm5, %v2965_v40, %v1541_v52  ;;  %vm1411_vm7 = vcmp.ge.f32.partialorder %v1058_v45, 0.0  ;;  %v1539_v58 = vmul.f32 0.2, %v1058_v45  ;;  %v1071_v3 = vpop.f32.mrb[57].mxu0 }
 0x158   : > { %2307 = vst.msk [vmem:[%s3302_s24 + $0xd0] sm:$0xf] %vm2254_vm3, %v2761_v53  ;;  %v2764_v59 = vpack.c.bf16 %v1669_v57, %v1669_v57  ;;  %v1733_v60 = vsel %vm1477_vm6, %v3029_v41, %v1605_v55  ;;  %vm1475_vm8 = vcmp.ge.f32.partialorder %v1314_v46, 0.0  ;;  %v1603_v61 = vmul.f32 0.2, %v1314_v46  ;;  %v1327_v4 = vpop.f32.mrb[57].mxu1 }
 0x159   : > { %2371 = vst.msk [vmem:[%s3302_s24 + $0x1d0] sm:$0xf] %vm2254_vm3, %v2825_v56  ;;  %v2828_v0 = vpack.c.bf16 %v1733_v60, %v1733_v60  ;;  %v1667_v1 = vsel %vm1411_vm7, %v1058_v45, %v1539_v58  ;;  %vm1416_vm9 = vcmp.ge.f32.partialorder %v2968_v62, 0.0  ;;  %v1544_v2 = vmul.f32 0.2, %v2968_v62  ;;  %v2969_v8 = vpop.f32.mrb[58].mxu0 }
 0x15a   : > { %2310 = vst.msk [vmem:[%s3302_s24 + $0xdc] sm:$0xf] %vm2254_vm3, %v2764_v59  ;;  %v2762_v5 = vpack.c.bf16 %v1667_v1, %v1667_v1  ;;  %v1731_v6 = vsel %vm1475_vm8, %v1314_v46, %v1603_v61  ;;  %vm1480_vm10 = vcmp.ge.f32.partialorder %v3032_v63, 0.0  ;;  %v1608_v7 = vmul.f32 0.2, %v3032_v63  ;;  %v3033_v9 = vpop.f32.mrb[58].mxu1 }
 0x15b   : > { %2374 = vst.msk [vmem:[%s3302_s24 + $0x1dc] sm:$0xf] %vm2254_vm3, %v2828_v0  ;;  %v2826_v10 = vpack.c.bf16 %v1731_v6, %v1731_v6  ;;  %v1672_v11 = vsel %vm1416_vm9, %v2968_v62, %v1544_v2  ;;  %vm1414_vm11 = vcmp.ge.f32.partialorder %v1071_v3, 0.0  ;;  %v1542_v12 = vmul.f32 0.2, %v1071_v3  ;;  %v1074_v13 = vpop.f32.mrb[59].mxu0 }
 0x15c   : > { %v1330_v14 = vpop.f32.mrb[59].mxu1  ;;  %2308 = vst.msk [vmem:[%s3302_s24 + $0xd4] sm:$0xf] %vm2254_vm3, %v2762_v5  ;;  %v2767_v15 = vpack.c.bf16 %v1672_v11, %v1672_v11  ;;  %v1736_v16 = vsel %vm1480_vm10, %v3032_v63, %v1608_v7  ;;  %vm1478_vm12 = vcmp.ge.f32.partialorder %v1327_v4, 0.0  ;;  %v1606_v17 = vmul.f32 0.2, %v1327_v4 }
 0x15d   : > { %2372 = vst.msk [vmem:[%s3302_s24 + $0x1d4] sm:$0xf] %vm2254_vm3, %v2826_v10  ;;  %v2831_v18 = vpack.c.bf16 %v1736_v16, %v1736_v16  ;;  %v1670_v19 = vsel %vm1414_vm11, %v1071_v3, %v1542_v12  ;;  %vm1417_vm13 = vcmp.ge.f32.partialorder %v2969_v8, 0.0  ;;  %v1545_v20 = vmul.f32 0.2, %v2969_v8  ;;  %v2972_v30 = vpop.f32.mrb[60].mxu0 }
 0x15e   : > { %2313 = vst.msk [vmem:[%s3302_s24 + $0xe8] sm:$0xf] %vm2254_vm3, %v2767_v15  ;;  %v2765_v21 = vpack.c.bf16 %v1670_v19, %v1670_v19  ;;  %v1734_v22 = vsel %vm1478_vm12, %v1327_v4, %v1606_v17  ;;  %vm1481_vm14 = vcmp.ge.f32.partialorder %v3033_v9, 0.0  ;;  %v1609_v23 = vmul.f32 0.2, %v3033_v9  ;;  %v3036_v31 = vpop.f32.mrb[60].mxu1 }
 0x15f   : > { %2377 = vst.msk [vmem:[%s3302_s24 + $0x1e8] sm:$0xf] %vm2254_vm3, %v2831_v18  ;;  %v2829_v24 = vpack.c.bf16 %v1734_v22, %v1734_v22  ;;  %v1673_v25 = vsel %vm1417_vm13, %v2969_v8, %v1545_v20  ;;  %vm1415_vm15 = vcmp.ge.f32.partialorder %v1074_v13, 0.0  ;;  %v1543_v26 = vmul.f32 0.2, %v1074_v13  ;;  %v1087_v35 = vpop.f32.mrb[61].mxu0 }
 0x160   : > { %2311 = vst.msk [vmem:[%s3302_s24 + $0xe0] sm:$0xf] %vm2254_vm3, %v2765_v21  ;;  %v2768_v27 = vpack.c.bf16 %v1673_v25, %v1673_v25  ;;  %v1737_v28 = vsel %vm1481_vm14, %v3033_v9, %v1609_v23  ;;  %vm1479_vm0 = vcmp.ge.f32.partialorder %v1330_v14, 0.0  ;;  %v1607_v29 = vmul.f32 0.2, %v1330_v14  ;;  %v1343_v36 = vpop.f32.mrb[61].mxu1 }
 0x161   : > { %2375 = vst.msk [vmem:[%s3302_s24 + $0x1e0] sm:$0xf] %vm2254_vm3, %v2829_v24  ;;  %v2832_v32 = vpack.c.bf16 %v1737_v28, %v1737_v28  ;;  %v1671_v33 = vsel %vm1415_vm15, %v1074_v13, %v1543_v26  ;;  %vm1420_vm1 = vcmp.ge.f32.partialorder %v2972_v30, 0.0  ;;  %v1548_v34 = vmul.f32 0.2, %v2972_v30  ;;  %v2973_v40 = vpop.f32.mrb[62].mxu0 }
 0x162   : > { %2314 = vst.msk [vmem:[%s3302_s24 + $0xec] sm:$0xf] %vm2254_vm3, %v2768_v27  ;;  %v2766_v37 = vpack.c.bf16 %v1671_v33, %v1671_v33  ;;  %v1735_v38 = vsel %vm1479_vm0, %v1330_v14, %v1607_v29  ;;  %vm1484_vm2 = vcmp.ge.f32.partialorder %v3036_v31, 0.0  ;;  %v1612_v39 = vmul.f32 0.2, %v3036_v31  ;;  %v3037_v41 = vpop.f32.mrb[62].mxu1 }
 0x163   : > { %2378 = vst.msk [vmem:[%s3302_s24 + $0x1ec] sm:$0xf] %vm2254_vm3, %v2832_v32  ;;  %v2830_v42 = vpack.c.bf16 %v1735_v38, %v1735_v38  ;;  %v1676_v43 = vsel %vm1420_vm1, %v2972_v30, %v1548_v34  ;;  %vm1418_vm4 = vcmp.ge.f32.partialorder %v1087_v35, 0.0  ;;  %v1546_v44 = vmul.f32 0.2, %v1087_v35  ;;  %v1090_v45 = vpop.f32.mrb[63].mxu0 }
 0x164   : > { %v1346_v46 = vpop.f32.mrb[63].mxu1  ;;  %2312 = vst.msk [vmem:[%s3302_s24 + $0xe4] sm:$0xf] %vm2254_vm3, %v2766_v37  ;;  %v2771_v47 = vpack.c.bf16 %v1676_v43, %v1676_v43  ;;  %v1740_v48 = vsel %vm1484_vm2, %v3036_v31, %v1612_v39  ;;  %vm1482_vm5 = vcmp.ge.f32.partialorder %v1343_v36, 0.0  ;;  %v1610_v49 = vmul.f32 0.2, %v1343_v36 }
 0x165   : > { %2376 = vst.msk [vmem:[%s3302_s24 + $0x1e4] sm:$0xf] %vm2254_vm3, %v2830_v42  ;;  %v2835_v50 = vpack.c.bf16 %v1740_v48, %v1740_v48  ;;  %v1674_v51 = vsel %vm1418_vm4, %v1087_v35, %v1546_v44  ;;  %vm1421_vm6 = vcmp.ge.f32.partialorder %v2973_v40, 0.0  ;;  %v1549_v52 = vmul.f32 0.2, %v2973_v40 }
 0x166   : > { %2317 = vst.msk [vmem:[%s3302_s24 + $0xf8] sm:$0xf] %vm2254_vm3, %v2771_v47  ;;  %v2769_v53 = vpack.c.bf16 %v1674_v51, %v1674_v51  ;;  %v1738_v54 = vsel %vm1482_vm5, %v1343_v36, %v1610_v49  ;;  %vm1485_vm7 = vcmp.ge.f32.partialorder %v3037_v41, 0.0  ;;  %v1613_v55 = vmul.f32 0.2, %v3037_v41 }
 0x167   : > { %2381 = vst.msk [vmem:[%s3302_s24 + $0x1f8] sm:$0xf] %vm2254_vm3, %v2835_v50  ;;  %v2833_v56 = vpack.c.bf16 %v1738_v54, %v1738_v54  ;;  %v1677_v57 = vsel %vm1421_vm6, %v2973_v40, %v1549_v52  ;;  %vm1419_vm8 = vcmp.ge.f32.partialorder %v1090_v45, 0.0  ;;  %v1547_v58 = vmul.f32 0.2, %v1090_v45 }
 0x168   : > { %2315 = vst.msk [vmem:[%s3302_s24 + $0xf0] sm:$0xf] %vm2254_vm3, %v2769_v53  ;;  %v2772_v59 = vpack.c.bf16 %v1677_v57, %v1677_v57  ;;  %v1741_v60 = vsel %vm1485_vm7, %v3037_v41, %v1613_v55  ;;  %vm1483_vm9 = vcmp.ge.f32.partialorder %v1346_v46, 0.0  ;;  %v1611_v61 = vmul.f32 0.2, %v1346_v46 }
 0x169   : > { %2379 = vst.msk [vmem:[%s3302_s24 + $0x1f0] sm:$0xf] %vm2254_vm3, %v2833_v56  ;;  %v2836_v62 = vpack.c.bf16 %v1741_v60, %v1741_v60  ;;  %v1675_v63 = vsel %vm1419_vm8, %v1090_v45, %v1547_v58 }
 0x16a   : > { %2318 = vst.msk [vmem:[%s3302_s24 + $0xfc] sm:$0xf] %vm2254_vm3, %v2772_v59  ;;  %v2770_v0 = vpack.c.bf16 %v1675_v63, %v1675_v63  ;;  %v1739_v1 = vsel %vm1483_vm9, %v1346_v46, %v1611_v61 }
 0x16b   : > { %2382 = vst.msk [vmem:[%s3302_s24 + $0x1fc] sm:$0xf] %vm2254_vm3, %v2836_v62  ;;  %v2834_v2 = vpack.c.bf16 %v1739_v1, %v1739_v1 }
 0x16c   : > { %2316 = vst.msk [vmem:[%s3302_s24 + $0xf4] sm:$0xf] %vm2254_vm3, %v2770_v0 }
 0x16d   : > { %2380 = vst.msk [vmem:[%s3302_s24 + $0x1f4] sm:$0xf] %vm2254_vm3, %v2834_v2 }
 0x16e PF: > { %s12_s9 = sadd.s32 1, %s3125_s9  }
 0x16f   : > { %p9_p4 = scmp.ge.s32.totalorder %s12_s9, 10  }
 0x171   :  { %11 = sbr.rel (!%p9_p4) target bundleno = 1 (0x1), region = 58 }

// kernel: netD_forward.7
= control target key start
LH: loop header
LB: loop body
LE: loop exit
PB: predicated region body
PF: predicated region fallthrough
CT: control target
= control target key end

     0   :  { %s3425_s15 = smov 0   ;;  %s4512_s0 = inlined_call_operand.vmem [shape: bf16[2048,128], index: 0, kind: input, shape index: {}]   ;;  %s4513_s1 = inlined_call_operand.vmem [shape: bf16[128,16], index: 1, kind: input, shape index: {}]   ;;  %s4514_s2 = inlined_call_operand.vmem [shape: bf16[2048,16], index: 2, kind: output, shape index: {0}]   ;;  %s4515_s3 = inlined_call_operand.vmem [shape: f32[2,1,16], index: 3, kind: output, shape index: {1}]   ;;  %s4516_s4 = inlined_call_operand.vmem [shape: f32[2,1,16], index: 4, kind: output, shape index: {2}]  }
   0x1 LB: > { %s3431_s16 = sadd.s32 4294967295, %s3398_s15   ;;  %p2745_p0 = scmp.ge.s32.totalorder %s3398_s15, 1  ;;  %s3398_s15 = sphi %s3425_s15, %s15_s15  }
   0x2   : > { %p168_p1 = scmp.lt.s32.totalorder %s3398_s15, 3 }
   0x4   : > { %p169_p2 = pnand %p2745_p0, %p168_p1 }
   0x6   : > { %172 = sbr.rel (%p169_p2) target bundleno = 531 (0x213), region = 28 }
   0xd   : > { %v3320_v0 = vld [vmem:[%s4513_s1] sm:$0xff]   ;;  %s2746_s19 = sshll.u32 %s3431_s16, 7  ;;  %v3321_v1 = vld [vmem:[%s4513_s1 + $0x8] sm:$0xff]   ;;  %v3322_v2 = vld [vmem:[%s4513_s1 + $0x10] sm:$0xff]   ;;  %vm2506_vm0 = vcmask 125952   ;;  %vm1340_vm1 = vcmask 130048  }
   0xe   : > { %p201_p3 = scmp.lt.s32.totalorder %s2746_s19, 255  ;;  %3152 = vmatprep.subr.bf16.mxu0 %v3320_v0  ;;  %3296 = vmatprep.subr.bf16.mxu1 %v3320_v0  ;;  %v3323_v3 = vld [vmem:[%s4513_s1 + $0x18] sm:$0xff]   ;;  %v3324_v5 = vld [vmem:[%s4513_s1 + $0x20] sm:$0xff]   ;;  %v3325_v6 = vld [vmem:[%s4513_s1 + $0x28] sm:$0xff]   ;;  %p212_p4 = scmp.lt.s32.totalorder %s3431_s16, 1  ;;  %vm1602_vm2 = vcmask 122880  }
   0xf   : > { %3153 = vmatpush3.bf16.msra.mxu0 %v3320_v0  ;;  %3304 = vmatpush3.bf16.msra.mxu1 %v3320_v0  ;;  %v3326_v7 = vld [vmem:[%s4513_s1 + $0x30] sm:$0xff]   ;;  %v3327_v8 = vld [vmem:[%s4513_s1 + $0x38] sm:$0xff]  }
  0x10   : > { %s4571_s19 = smov (!%p201_p3, %s2746_s19), 255  ;;  %3154 = vmatprep.subr.bf16.mxu0 %v3321_v1  ;;  %3297 = vmatprep.subr.bf16.mxu1 %v3321_v1  ;;  %s4573_s16 = smov (!%p212_p4, %s3431_s16), 1 }
  0x11   : > { %s2747_s24 = sshll.u32 %s4571_s19, 2  ;;  %s214_s19 = scalar_lea.vmem %s4515_s3, %s4573_s16 }
  0x12   : > { %s3453_s27 = scalar_lea.vmem %s4512_s0, %s2747_s24  ;;  %s3539_s14 = scalar_lea.vmem %s4514_s2, %s2747_s24 }
  0x13   : > { %3155 = vmatpush3.bf16.msra.mxu0 %v3321_v1  ;;  %3305 = vmatpush3.bf16.msra.mxu1 %v3321_v1  ;;  %v3328_v4 = vld [vmem:[%s3453_s27] sm:$0xff]   ;;  %v3329_v9 = vld [vmem:[%s3453_s27 + $0x8] sm:$0xff]   ;;  %v3330_v10 = vld [vmem:[%s3453_s27 + $0x10] sm:$0xff]   ;;  %s217_s22 = scalar_lea.vmem %s4516_s4, %s4573_s16 }
  0x14   : > { %3156 = vmatprep.subr.bf16.mxu0 %v3322_v2  ;;  %3298 = vmatprep.subr.bf16.mxu1 %v3322_v2  ;;  %v3331_v11 = vld [vmem:[%s3453_s27 + $0x18] sm:$0xff]   ;;  %v3332_v12 = vld [vmem:[%s3453_s27 + $0x20] sm:$0xff]   ;;  %v3361_v14 = vld [vmem:[%s3453_s27 + $0x108] sm:$0xff]  }
  0x15   : > { %3168 = vmatprep.mubr.bf16.mxu0 %v3328_v4  ;;  %v3360_v13 = vld [vmem:[%s3453_s27 + $0x100] sm:$0xff]   ;;  %v3362_v15 = vld [vmem:[%s3453_s27 + $0x110] sm:$0xff]   ;;  %v3333_v16 = vld [vmem:[%s3453_s27 + $0x28] sm:$0xff]  }
  0x16   : > { %3232 = vmatprep.mubr.bf16.mxu1 %v3360_v13  ;;  %v3334_v17 = vld [vmem:[%s3453_s27 + $0x30] sm:$0xff]   ;;  %v3363_v18 = vld [vmem:[%s3453_s27 + $0x118] sm:$0xff]   ;;  %v3364_v19 = vld [vmem:[%s3453_s27 + $0x120] sm:$0xff]  }
  0x17   : > { %3157 = vmatpush3.bf16.msra.mxu0 %v3322_v2  ;;  %3306 = vmatpush3.bf16.msra.mxu1 %v3322_v2  ;;  %v3335_v20 = vld [vmem:[%s3453_s27 + $0x38] sm:$0xff]   ;;  %v3336_v21 = vld [vmem:[%s3453_s27 + $0x40] sm:$0xff]   ;;  %v3365_v22 = vld [vmem:[%s3453_s27 + $0x128] sm:$0xff]  }
  0x18   : > { %3158 = vmatprep.subr.bf16.mxu0 %v3323_v3  ;;  %3299 = vmatprep.subr.bf16.mxu1 %v3323_v3  ;;  %v3366_v23 = vld [vmem:[%s3453_s27 + $0x130] sm:$0xff]   ;;  %v3337_v24 = vld [vmem:[%s3453_s27 + $0x48] sm:$0xff]   ;;  %v3367_v26 = vld [vmem:[%s3453_s27 + $0x138] sm:$0xff]  }
  0x19   : > { %v3338_v25 = vld [vmem:[%s3453_s27 + $0x50] sm:$0xff]   ;;  %v3368_v27 = vld [vmem:[%s3453_s27 + $0x140] sm:$0xff]   ;;  %v3339_v28 = vld [vmem:[%s3453_s27 + $0x58] sm:$0xff]  }
  0x1a   : > { %v3340_v29 = vld [vmem:[%s3453_s27 + $0x60] sm:$0xff]   ;;  %v3369_v30 = vld [vmem:[%s3453_s27 + $0x148] sm:$0xff]   ;;  %v3370_v31 = vld [vmem:[%s3453_s27 + $0x150] sm:$0xff]  }
  0x1b   : > { %3159 = vmatpush3.bf16.msra.mxu0 %v3323_v3  ;;  %3307 = vmatpush3.bf16.msra.mxu1 %v3323_v3  ;;  %v3341_v32 = vld [vmem:[%s3453_s27 + $0x68] sm:$0xff]   ;;  %v3342_v33 = vld [vmem:[%s3453_s27 + $0x70] sm:$0xff]   ;;  %v3371_v34 = vld [vmem:[%s3453_s27 + $0x158] sm:$0xff]  }
  0x1c   : > { %3160 = vmatprep.subr.bf16.mxu0 %v3324_v5  ;;  %3300 = vmatprep.subr.bf16.mxu1 %v3324_v5  ;;  %v3372_v35 = vld [vmem:[%s3453_s27 + $0x160] sm:$0xff]   ;;  %v3343_v36 = vld [vmem:[%s3453_s27 + $0x78] sm:$0xff]   ;;  %v3373_v38 = vld [vmem:[%s3453_s27 + $0x168] sm:$0xff]  }
  0x1d   : > { %v3344_v37 = vld [vmem:[%s3453_s27 + $0x80] sm:$0xff]   ;;  %v3374_v39 = vld [vmem:[%s3453_s27 + $0x170] sm:$0xff]   ;;  %v3345_v40 = vld [vmem:[%s3453_s27 + $0x88] sm:$0xff]  }
  0x1e   : > { %v3346_v41 = vld [vmem:[%s3453_s27 + $0x90] sm:$0xff]   ;;  %v3375_v42 = vld [vmem:[%s3453_s27 + $0x178] sm:$0xff]   ;;  %v3376_v43 = vld [vmem:[%s3453_s27 + $0x180] sm:$0xff]  }
  0x1f   : > { %3161 = vmatpush3.bf16.msra.mxu0 %v3324_v5  ;;  %3308 = vmatpush3.bf16.msra.mxu1 %v3324_v5  ;;  %v3347_v44 = vld [vmem:[%s3453_s27 + $0x98] sm:$0xff]   ;;  %v3348_v45 = vld [vmem:[%s3453_s27 + $0xa0] sm:$0xff]   ;;  %v3377_v46 = vld [vmem:[%s3453_s27 + $0x188] sm:$0xff]  }
  0x20   : > { %3162 = vmatprep.subr.bf16.mxu0 %v3325_v6  ;;  %3301 = vmatprep.subr.bf16.mxu1 %v3325_v6  ;;  %v3378_v47 = vld [vmem:[%s3453_s27 + $0x190] sm:$0xff]   ;;  %v3349_v48 = vld [vmem:[%s3453_s27 + $0xa8] sm:$0xff]   ;;  %v3379_v50 = vld [vmem:[%s3453_s27 + $0x198] sm:$0xff]  }
  0x21   : > { %v3350_v49 = vld [vmem:[%s3453_s27 + $0xb0] sm:$0xff]   ;;  %v3380_v51 = vld [vmem:[%s3453_s27 + $0x1a0] sm:$0xff]   ;;  %v3351_v52 = vld [vmem:[%s3453_s27 + $0xb8] sm:$0xff]  }
  0x22   : > { %v3352_v53 = vld [vmem:[%s3453_s27 + $0xc0] sm:$0xff]   ;;  %v3381_v54 = vld [vmem:[%s3453_s27 + $0x1a8] sm:$0xff]   ;;  %v3382_v55 = vld [vmem:[%s3453_s27 + $0x1b0] sm:$0xff]  }
  0x23   : > { %3163 = vmatpush3.bf16.msra.mxu0 %v3325_v6  ;;  %3309 = vmatpush3.bf16.msra.mxu1 %v3325_v6  ;;  %v3353_v56 = vld [vmem:[%s3453_s27 + $0xc8] sm:$0xff]   ;;  %v3354_v57 = vld [vmem:[%s3453_s27 + $0xd0] sm:$0xff]   ;;  %v3383_v58 = vld [vmem:[%s3453_s27 + $0x1b8] sm:$0xff]  }
  0x24   : > { %3164 = vmatprep.subr.bf16.mxu0 %v3326_v7  ;;  %3302 = vmatprep.subr.bf16.mxu1 %v3326_v7  ;;  %v3384_v59 = vld [vmem:[%s3453_s27 + $0x1c0] sm:$0xff]   ;;  %v3355_v60 = vld [vmem:[%s3453_s27 + $0xd8] sm:$0xff]   ;;  %v3385_v62 = vld [vmem:[%s3453_s27 + $0x1c8] sm:$0xff]  }
  0x25   : > { %v3356_v61 = vld [vmem:[%s3453_s27 + $0xe0] sm:$0xff]   ;;  %v3386_v63 = vld [vmem:[%s3453_s27 + $0x1d0] sm:$0xff]   ;;  %v3357_v0 = vld [vmem:[%s3453_s27 + $0xe8] sm:$0xff]  }
  0x26   : > { %v3358_v1 = vld [vmem:[%s3453_s27 + $0xf0] sm:$0xff]   ;;  %v3387_v2 = vld [vmem:[%s3453_s27 + $0x1d8] sm:$0xff]   ;;  %v3388_v3 = vld [vmem:[%s3453_s27 + $0x1e0] sm:$0xff]  }
  0x27   : > { %3165 = vmatpush3.bf16.msra.mxu0 %v3326_v7  ;;  %3310 = vmatpush3.bf16.msra.mxu1 %v3326_v7  ;;  %v3359_v4 = vld [vmem:[%s3453_s27 + $0xf8] sm:$0xff]   ;;  %v3389_v5 = vld [vmem:[%s3453_s27 + $0x1e8] sm:$0xff]   ;;  %v3390_v6 = vld [vmem:[%s3453_s27 + $0x1f0] sm:$0xff]  }
  0x28   : > { %3166 = vmatprep.subr.bf16.mxu0 %v3327_v8  ;;  %3303 = vmatprep.subr.bf16.mxu1 %v3327_v8  ;;  %v3391_v7 = vld [vmem:[%s3453_s27 + $0x1f8] sm:$0xff]  }
  0x2b   : > { %3167 = vmatpush3.bf16.msra.mxu0 %v3327_v8  ;;  %3311 = vmatpush3.bf16.msra.mxu1 %v3327_v8 }
  0x2e   : > { %3169 = vmatmul.mubr.bf16.vlgmr.msra.gmra.mrb[0].mxu0 %v3329_v9  ;;  %3233 = vmatmul.mubr.bf16.vlgmr.msra.gmra.mrb[0].mxu1 %v3361_v14 }
  0x2f   : > { %3172 = vmatprep.mubr.bf16.mxu0 %v3330_v10  ;;  %3236 = vmatprep.mubr.bf16.mxu1 %v3362_v15 }
  0x36   : > { %3173 = vmatmul.mubr.bf16.gmra.mrb[4].mxu0 %v3331_v11  ;;  %3237 = vmatmul.mubr.bf16.gmra.mrb[4].mxu1 %v3363_v18 }
  0x37   : > { %3176 = vmatprep.mubr.bf16.mxu0 %v3332_v12  ;;  %3240 = vmatprep.mubr.bf16.mxu1 %v3364_v19 }
  0x3e   : > { %3177 = vmatmul.mubr.bf16.gmra.mrb[8].mxu0 %v3333_v16  ;;  %3241 = vmatmul.mubr.bf16.gmra.mrb[8].mxu1 %v3365_v22 }
  0x3f   : > { %3180 = vmatprep.mubr.bf16.mxu0 %v3334_v17  ;;  %3244 = vmatprep.mubr.bf16.mxu1 %v3366_v23 }
  0x46   : > { %3181 = vmatmul.mubr.bf16.gmra.mrb[12].mxu0 %v3335_v20  ;;  %3245 = vmatmul.mubr.bf16.gmra.mrb[12].mxu1 %v3367_v26 }
  0x47   : > { %3184 = vmatprep.mubr.bf16.mxu0 %v3336_v21  ;;  %3248 = vmatprep.mubr.bf16.mxu1 %v3368_v27 }
  0x4e   : > { %3185 = vmatmul.mubr.bf16.gmra.mrb[16].mxu0 %v3337_v24  ;;  %3249 = vmatmul.mubr.bf16.gmra.mrb[16].mxu1 %v3369_v30 }
  0x4f   : > { %3188 = vmatprep.mubr.bf16.mxu0 %v3338_v25  ;;  %3252 = vmatprep.mubr.bf16.mxu1 %v3370_v31 }
  0x56   : > { %3189 = vmatmul.mubr.bf16.gmra.mrb[20].mxu0 %v3339_v28  ;;  %3253 = vmatmul.mubr.bf16.gmra.mrb[20].mxu1 %v3371_v34 }
  0x57   : > { %3192 = vmatprep.mubr.bf16.mxu0 %v3340_v29  ;;  %3256 = vmatprep.mubr.bf16.mxu1 %v3372_v35 }
  0x5e   : > { %3193 = vmatmul.mubr.bf16.gmra.mrb[24].mxu0 %v3341_v32  ;;  %3257 = vmatmul.mubr.bf16.gmra.mrb[24].mxu1 %v3373_v38 }
  0x5f   : > { %3196 = vmatprep.mubr.bf16.mxu0 %v3342_v33  ;;  %3260 = vmatprep.mubr.bf16.mxu1 %v3374_v39 }
  0x66   : > { %3197 = vmatmul.mubr.bf16.gmra.mrb[28].mxu0 %v3343_v36  ;;  %3261 = vmatmul.mubr.bf16.gmra.mrb[28].mxu1 %v3375_v42 }
  0x67   : > { %3200 = vmatprep.mubr.bf16.mxu0 %v3344_v37  ;;  %3264 = vmatprep.mubr.bf16.mxu1 %v3376_v43 }
  0x6e   : > { %3201 = vmatmul.mubr.bf16.gmra.mrb[32].mxu0 %v3345_v40  ;;  %3265 = vmatmul.mubr.bf16.gmra.mrb[32].mxu1 %v3377_v46 }
  0x6f   : > { %3204 = vmatprep.mubr.bf16.mxu0 %v3346_v41  ;;  %3268 = vmatprep.mubr.bf16.mxu1 %v3378_v47 }
  0x76   : > { %3205 = vmatmul.mubr.bf16.gmra.mrb[36].mxu0 %v3347_v44  ;;  %3269 = vmatmul.mubr.bf16.gmra.mrb[36].mxu1 %v3379_v50 }
  0x77   : > { %3208 = vmatprep.mubr.bf16.mxu0 %v3348_v45  ;;  %3272 = vmatprep.mubr.bf16.mxu1 %v3380_v51 }
  0x7e   : > { %3209 = vmatmul.mubr.bf16.gmra.mrb[40].mxu0 %v3349_v48  ;;  %3273 = vmatmul.mubr.bf16.gmra.mrb[40].mxu1 %v3381_v54 }
  0x7f   : > { %3212 = vmatprep.mubr.bf16.mxu0 %v3350_v49  ;;  %3276 = vmatprep.mubr.bf16.mxu1 %v3382_v55 }
  0x86   : > { %3213 = vmatmul.mubr.bf16.gmra.mrb[44].mxu0 %v3351_v52  ;;  %3277 = vmatmul.mubr.bf16.gmra.mrb[44].mxu1 %v3383_v58 }
  0x87   : > { %3216 = vmatprep.mubr.bf16.mxu0 %v3352_v53  ;;  %3280 = vmatprep.mubr.bf16.mxu1 %v3384_v59 }
  0x8e   : > { %3217 = vmatmul.mubr.bf16.gmra.mrb[48].mxu0 %v3353_v56  ;;  %3281 = vmatmul.mubr.bf16.gmra.mrb[48].mxu1 %v3385_v62 }
  0x8f   : > { %3220 = vmatprep.mubr.bf16.mxu0 %v3354_v57  ;;  %3284 = vmatprep.mubr.bf16.mxu1 %v3386_v63 }
  0x96   : > { %3221 = vmatmul.mubr.bf16.gmra.mrb[52].mxu0 %v3355_v60  ;;  %3285 = vmatmul.mubr.bf16.gmra.mrb[52].mxu1 %v3387_v2 }
  0x97   : > { %3224 = vmatprep.mubr.bf16.mxu0 %v3356_v61  ;;  %3288 = vmatprep.mubr.bf16.mxu1 %v3388_v3 }
  0x9e   : > { %3225 = vmatmul.mubr.bf16.gmra.mrb[56].mxu0 %v3357_v0  ;;  %3289 = vmatmul.mubr.bf16.gmra.mrb[56].mxu1 %v3389_v5 }
  0x9f   : > { %3228 = vmatprep.mubr.bf16.mxu0 %v3358_v1  ;;  %3292 = vmatprep.mubr.bf16.mxu1 %v3390_v6 }
  0xa6   : > { %3229 = vmatmul.mubr.bf16.gmra.mrb[60].mxu0 %v3359_v4  ;;  %3293 = vmatmul.mubr.bf16.gmra.mrb[60].mxu1 %v3391_v7 }
 0x101   : > { %v3170_v8 = vpop.f32.mrb[0].mxu0  ;;  %v3557_v35 = vpop.f32.mrb[0].mxu1 }
 0x102   : > { %v2954_v9 = vpack.c.bf16 %v3170_v8, %v3170_v8  ;;  %v829_v10 = vpop.f32.mrb[1].mxu0  ;;  %v1606_v14 = vmul.f32 %v3170_v8, %v3170_v8  ;;  %v1344_v23 = vsel %vm1340_vm1, %v3170_v8, 0.0  ;;  %v3560_v41 = vpop.f32.mrb[1].mxu1  ;;  %v3018_v55 = vpack.c.bf16 %v3557_v35, %v3557_v35 }
 0x103   : > { %v1604_v11 = vmul.f32 %v829_v10, %v829_v10  ;;  %v2952_v12 = vpack.c.bf16 %v829_v10, %v829_v10  ;;  %v3171_v13 = vpop.f32.mrb[2].mxu0  ;;  %v1341_v17 = vsel %vm1340_vm1, %v829_v10, 0.0  ;;  %v3564_v44 = vpop.f32.mrb[2].mxu1  ;;  %v3016_v59 = vpack.c.bf16 %v3560_v41, %v3560_v41 }
 0x104   : > { %2509 = vst.msk [vmem:[%s3539_s14 + $0x8] sm:$0xf] %vm2506_vm0, %v2954_v9  ;;  %v2955_v15 = vpack.c.bf16 %v3171_v13, %v3171_v13  ;;  %v832_v16 = vpop.f32.mrb[3].mxu0  ;;  %v1607_v21 = vmul.f32 %v3171_v13, %v3171_v13  ;;  %v1735_v28 = vsel %vm1340_vm1, %v1606_v14, 0.0  ;;  %v1346_v30 = vsel %vm1340_vm1, %v3171_v13, 0.0  ;;  %v3570_v49 = vpop.f32.mrb[3].mxu1 }
 0x105   : > { %2507 = vst.msk [vmem:[%s3539_s14] sm:$0xf] %vm2506_vm0, %v2952_v12  ;;  %v1342_v18 = vsel %vm1340_vm1, %v832_v16, 0.0  ;;  %v1605_v19 = vmul.f32 %v832_v16, %v832_v16  ;;  %v2953_v20 = vpack.c.bf16 %v832_v16, %v832_v16  ;;  %v1732_v24 = vsel %vm1340_vm1, %v1604_v11, 0.0  ;;  %2573 = vst.msk [vmem:[%s3539_s14 + $0x108] sm:$0xf] %vm2506_vm0, %v3018_v55 }
 0x106   : > { %2510 = vst.msk [vmem:[%s3539_s14 + $0xc] sm:$0xf] %vm2506_vm0, %v2955_v15  ;;  %v1343_v22 = vadd.f32 %v1342_v18, %v1341_v17  ;;  %v1737_v31 = vsel %vm1340_vm1, %v1607_v21, 0.0  ;;  %2571 = vst.msk [vmem:[%s3539_s14 + $0x100] sm:$0xf] %vm2506_vm0, %v3016_v59 }
 0x107   : > { %v1733_v25 = vsel %vm1340_vm1, %v1605_v19, 0.0  ;;  %2508 = vst.msk [vmem:[%s3539_s14 + $0x4] sm:$0xf] %vm2506_vm0, %v2953_v20 }
 0x108   : > { %v1345_v26 = vadd.f32 %v1344_v23, %v1343_v22  ;;  %v1734_v27 = vadd.f32 %v1733_v25, %v1732_v24  ;;  %v3019_v25 = vpack.c.bf16 %v3564_v44, %v3564_v44 }
 0x109   : > { %v3174_v29 = vpop.f32.mrb[4].mxu0  ;;  %v3588_v3 = vpop.f32.mrb[4].mxu1 }
 0x10a   : > { %v1736_v32 = vadd.f32 %v1735_v28, %v1734_v27  ;;  %v2958_v33 = vpack.c.bf16 %v3174_v29, %v3174_v29  ;;  %v845_v34 = vpop.f32.mrb[5].mxu0  ;;  %v1347_v36 = vadd.f32 %v1346_v30, %v1345_v26  ;;  %v1610_v50 = vmul.f32 %v3174_v29, %v3174_v29  ;;  %v3591_v9 = vpop.f32.mrb[5].mxu1  ;;  %2574 = vst.msk [vmem:[%s3539_s14 + $0x10c] sm:$0xf] %vm2506_vm0, %v3019_v25 }
 0x10b   : > { %v1348_v37 = vsel %vm1340_vm1, %v845_v34, 0.0  ;;  %v1608_v38 = vmul.f32 %v845_v34, %v845_v34  ;;  %v2956_v39 = vpack.c.bf16 %v845_v34, %v845_v34  ;;  %v3175_v40 = vpop.f32.mrb[6].mxu0  ;;  %v1352_v56 = vsel %vm1340_vm1, %v3174_v29, 0.0  ;;  %v3596_v13 = vpop.f32.mrb[6].mxu1 }
 0x10c   : > { %2513 = vst.msk [vmem:[%s3539_s14 + $0x18] sm:$0xf] %vm2506_vm0, %v2958_v33  ;;  %v1738_v42 = vadd.f32 %v1737_v31, %v1736_v32  ;;  %v848_v43 = vpop.f32.mrb[7].mxu0  ;;  %v1349_v45 = vadd.f32 %v1348_v37, %v1347_v36  ;;  %v2959_v47 = vpack.c.bf16 %v3175_v40, %v3175_v40  ;;  %v1611_v57 = vmul.f32 %v3175_v40, %v3175_v40  ;;  %v3599_v18 = vpop.f32.mrb[7].mxu1 }
 0x10d   : > { %v1739_v46 = vsel %vm1340_vm1, %v1608_v38, 0.0  ;;  %2511 = vst.msk [vmem:[%s3539_s14 + $0x10] sm:$0xf] %vm2506_vm0, %v2956_v39  ;;  %v1350_v48 = vsel %vm1340_vm1, %v848_v43, 0.0  ;;  %v1609_v52 = vmul.f32 %v848_v43, %v848_v43  ;;  %v2957_v53 = vpack.c.bf16 %v848_v43, %v848_v43 }
 0x10e   : > { %v1740_v51 = vadd.f32 %v1739_v46, %v1738_v42  ;;  %2514 = vst.msk [vmem:[%s3539_s14 + $0x1c] sm:$0xf] %vm2506_vm0, %v2959_v47  ;;  %v1351_v54 = vadd.f32 %v1350_v48, %v1349_v45  ;;  %v1743_v63 = vsel %vm1340_vm1, %v1610_v50, 0.0  ;;  %v1354_v0 = vsel %vm1340_vm1, %v3175_v40, 0.0 }
 0x10f   : > { %v1741_v58 = vsel %vm1340_vm1, %v1609_v52, 0.0  ;;  %2512 = vst.msk [vmem:[%s3539_s14 + $0x14] sm:$0xf] %vm2506_vm0, %v2957_v53  ;;  %v1745_v10 = vsel %vm1340_vm1, %v1611_v57, 0.0  ;;  %v3017_v29 = vpack.c.bf16 %v3570_v49, %v3570_v49 }
 0x110   : > { %v1353_v60 = vadd.f32 %v1352_v56, %v1351_v54  ;;  %v1742_v61 = vadd.f32 %v1741_v58, %v1740_v51 }
 0x111   : > { %v3178_v62 = vpop.f32.mrb[8].mxu0  ;;  %2572 = vst.msk [vmem:[%s3539_s14 + $0x104] sm:$0xf] %vm2506_vm0, %v3017_v29  ;;  %v3620_v38 = vpop.f32.mrb[8].mxu1 }
 0x112   : > { %v2962_v1 = vpack.c.bf16 %v3178_v62, %v3178_v62  ;;  %v861_v2 = vpop.f32.mrb[9].mxu0  ;;  %v1744_v4 = vadd.f32 %v1743_v63, %v1742_v61  ;;  %v1355_v5 = vadd.f32 %v1354_v0, %v1353_v60  ;;  %v1614_v19 = vmul.f32 %v3178_v62, %v3178_v62  ;;  %v3623_v46 = vpop.f32.mrb[9].mxu1 }
 0x113   : > { %v1356_v6 = vsel %vm1340_vm1, %v861_v2, 0.0  ;;  %v1612_v7 = vmul.f32 %v861_v2, %v861_v2  ;;  %v3179_v8 = vpop.f32.mrb[10].mxu0  ;;  %v2960_v11 = vpack.c.bf16 %v861_v2, %v861_v2  ;;  %v1360_v26 = vsel %vm1340_vm1, %v3178_v62, 0.0  ;;  %v3628_v51 = vpop.f32.mrb[10].mxu1 }
 0x114   : > { %2517 = vst.msk [vmem:[%s3539_s14 + $0x28] sm:$0xf] %vm2506_vm0, %v2962_v1  ;;  %v864_v12 = vpop.f32.mrb[11].mxu0  ;;  %v1357_v14 = vadd.f32 %v1356_v6, %v1355_v5  ;;  %v1746_v15 = vadd.f32 %v1745_v10, %v1744_v4  ;;  %v2963_v17 = vpack.c.bf16 %v3179_v8, %v3179_v8  ;;  %v1615_v27 = vmul.f32 %v3179_v8, %v3179_v8  ;;  %v3631_v56 = vpop.f32.mrb[11].mxu1 }
 0x115   : > { %v1747_v16 = vsel %vm1340_vm1, %v1612_v7, 0.0  ;;  %2515 = vst.msk [vmem:[%s3539_s14 + $0x20] sm:$0xf] %vm2506_vm0, %v2960_v11  ;;  %v1358_v20 = vsel %vm1340_vm1, %v864_v12, 0.0  ;;  %v1613_v21 = vmul.f32 %v864_v12, %v864_v12  ;;  %v2961_v22 = vpack.c.bf16 %v864_v12, %v864_v12 }
 0x116   : > { %v1748_v23 = vadd.f32 %v1747_v16, %v1746_v15  ;;  %2518 = vst.msk [vmem:[%s3539_s14 + $0x2c] sm:$0xf] %vm2506_vm0, %v2963_v17  ;;  %v1359_v24 = vadd.f32 %v1358_v20, %v1357_v14  ;;  %v1751_v33 = vsel %vm1340_vm1, %v1614_v19, 0.0  ;;  %v1362_v34 = vsel %vm1340_vm1, %v3179_v8, 0.0 }
 0x117   : > { %v1749_v28 = vsel %vm1340_vm1, %v1613_v21, 0.0  ;;  %2516 = vst.msk [vmem:[%s3539_s14 + $0x24] sm:$0xf] %vm2506_vm0, %v2961_v22  ;;  %v1753_v47 = vsel %vm1340_vm1, %v1615_v27, 0.0  ;;  %v3022_v63 = vpack.c.bf16 %v3588_v3, %v3588_v3  ;;  %v3020_v4 = vpack.c.bf16 %v3591_v9, %v3591_v9 }
 0x118   : > { %v1361_v30 = vadd.f32 %v1360_v26, %v1359_v24  ;;  %v1750_v31 = vadd.f32 %v1749_v28, %v1748_v23 }
 0x119   : > { %v3182_v32 = vpop.f32.mrb[12].mxu0  ;;  %2577 = vst.msk [vmem:[%s3539_s14 + $0x118] sm:$0xf] %vm2506_vm0, %v3022_v63  ;;  %2575 = vst.msk [vmem:[%s3539_s14 + $0x110] sm:$0xf] %vm2506_vm0, %v3020_v4  ;;  %v3652_v14 = vpop.f32.mrb[12].mxu1 }
 0x11a   : > { %v2966_v36 = vpack.c.bf16 %v3182_v32, %v3182_v32  ;;  %v877_v37 = vpop.f32.mrb[13].mxu0  ;;  %v1752_v39 = vadd.f32 %v1751_v33, %v1750_v31  ;;  %v1363_v40 = vadd.f32 %v1362_v34, %v1361_v30  ;;  %v1618_v57 = vmul.f32 %v3182_v32, %v3182_v32  ;;  %v3655_v21 = vpop.f32.mrb[13].mxu1 }
 0x11b   : > { %v1364_v42 = vsel %vm1340_vm1, %v877_v37, 0.0  ;;  %v1616_v43 = vmul.f32 %v877_v37, %v877_v37  ;;  %v3183_v45 = vpop.f32.mrb[14].mxu0  ;;  %v2964_v48 = vpack.c.bf16 %v877_v37, %v877_v37  ;;  %v1368_v0 = vsel %vm1340_vm1, %v3182_v32, 0.0  ;;  %v3660_v25 = vpop.f32.mrb[14].mxu1 }
 0x11c   : > { %2521 = vst.msk [vmem:[%s3539_s14 + $0x38] sm:$0xf] %vm2506_vm0, %v2966_v36  ;;  %v880_v50 = vpop.f32.mrb[15].mxu0  ;;  %v1365_v52 = vadd.f32 %v1364_v42, %v1363_v40  ;;  %v1754_v53 = vadd.f32 %v1753_v47, %v1752_v39  ;;  %v2967_v55 = vpack.c.bf16 %v3183_v45, %v3183_v45  ;;  %v1619_v1 = vmul.f32 %v3183_v45, %v3183_v45  ;;  %v3663_v30 = vpop.f32.mrb[15].mxu1 }
 0x11d   : > { %v1755_v54 = vsel %vm1340_vm1, %v1616_v43, 0.0  ;;  %2519 = vst.msk [vmem:[%s3539_s14 + $0x30] sm:$0xf] %vm2506_vm0, %v2964_v48  ;;  %v1366_v58 = vsel %vm1340_vm1, %v880_v50, 0.0  ;;  %v1617_v59 = vmul.f32 %v880_v50, %v880_v50  ;;  %v2965_v60 = vpack.c.bf16 %v880_v50, %v880_v50 }
 0x11e   : > { %v1756_v61 = vadd.f32 %v1755_v54, %v1754_v53  ;;  %2522 = vst.msk [vmem:[%s3539_s14 + $0x3c] sm:$0xf] %vm2506_vm0, %v2967_v55  ;;  %v1367_v62 = vadd.f32 %v1366_v58, %v1365_v52  ;;  %v1759_v8 = vsel %vm1340_vm1, %v1618_v57, 0.0  ;;  %v1370_v10 = vsel %vm1340_vm1, %v3183_v45, 0.0 }
 0x11f   : > { %v1757_v2 = vsel %vm1340_vm1, %v1617_v59, 0.0  ;;  %2520 = vst.msk [vmem:[%s3539_s14 + $0x34] sm:$0xf] %vm2506_vm0, %v2965_v60  ;;  %v1761_v22 = vsel %vm1340_vm1, %v1619_v1, 0.0  ;;  %v3023_v39 = vpack.c.bf16 %v3596_v13, %v3596_v13  ;;  %v3021_v45 = vpack.c.bf16 %v3599_v18, %v3599_v18 }
 0x120   : > { %v1369_v5 = vadd.f32 %v1368_v0, %v1367_v62  ;;  %v1758_v6 = vadd.f32 %v1757_v2, %v1756_v61 }
 0x121   : > { %v3186_v7 = vpop.f32.mrb[16].mxu0  ;;  %2578 = vst.msk [vmem:[%s3539_s14 + $0x11c] sm:$0xf] %vm2506_vm0, %v3023_v39  ;;  %2576 = vst.msk [vmem:[%s3539_s14 + $0x114] sm:$0xf] %vm2506_vm0, %v3021_v45  ;;  %v3684_v57 = vpop.f32.mrb[16].mxu1 }
 0x122   : > { %v2970_v11 = vpack.c.bf16 %v3186_v7, %v3186_v7  ;;  %v893_v12 = vpop.f32.mrb[17].mxu0  ;;  %v1760_v15 = vadd.f32 %v1759_v8, %v1758_v6  ;;  %v1371_v16 = vadd.f32 %v1370_v10, %v1369_v5  ;;  %v1622_v31 = vmul.f32 %v3186_v7, %v3186_v7  ;;  %4542 = vst [vmem:[#allocation2_spill] sm:$0xff] %v3684_v57  ;;  %v3687_v63 = vpop.f32.mrb[17].mxu1 }
 0x123   : > { %v1372_v17 = vsel %vm1340_vm1, %v893_v12, 0.0  ;;  %v1620_v19 = vmul.f32 %v893_v12, %v893_v12  ;;  %v3187_v20 = vpop.f32.mrb[18].mxu0  ;;  %v2968_v23 = vpack.c.bf16 %v893_v12, %v893_v12  ;;  %v1376_v40 = vsel %vm1340_vm1, %v3186_v7, 0.0  ;;  %v3692_v4 = vpop.f32.mrb[18].mxu1 }
 0x124   : > { %2525 = vst.msk [vmem:[%s3539_s14 + $0x48] sm:$0xf] %vm2506_vm0, %v2970_v11  ;;  %v896_v24 = vpop.f32.mrb[19].mxu0  ;;  %v1373_v26 = vadd.f32 %v1372_v17, %v1371_v16  ;;  %v1762_v27 = vadd.f32 %v1761_v22, %v1760_v15  ;;  %v2971_v29 = vpack.c.bf16 %v3187_v20, %v3187_v20  ;;  %v1623_v42 = vmul.f32 %v3187_v20, %v3187_v20  ;;  %v3695_v10 = vpop.f32.mrb[19].mxu1 }
 0x125   : > { %v1763_v28 = vsel %vm1340_vm1, %v1620_v19, 0.0  ;;  %2523 = vst.msk [vmem:[%s3539_s14 + $0x40] sm:$0xf] %vm2506_vm0, %v2968_v23  ;;  %v1374_v32 = vsel %vm1340_vm1, %v896_v24, 0.0  ;;  %v1621_v33 = vmul.f32 %v896_v24, %v896_v24  ;;  %v2969_v34 = vpack.c.bf16 %v896_v24, %v896_v24  ;;  %4543 = vst [vmem:[#allocation3_spill] sm:$0xff] %v3692_v4 }
 0x126   : > { %v1764_v36 = vadd.f32 %v1763_v28, %v1762_v27  ;;  %2526 = vst.msk [vmem:[%s3539_s14 + $0x4c] sm:$0xf] %vm2506_vm0, %v2971_v29  ;;  %v1375_v37 = vadd.f32 %v1374_v32, %v1373_v26  ;;  %v1767_v52 = vsel %vm1340_vm1, %v1622_v31, 0.0  ;;  %v1378_v53 = vsel %vm1340_vm1, %v3187_v20, 0.0  ;;  %4544 = vst [vmem:[#allocation4_spill] sm:$0xff] %v3695_v10 }
 0x127   : > { %v1765_v43 = vsel %vm1340_vm1, %v1621_v33, 0.0  ;;  %2524 = vst.msk [vmem:[%s3539_s14 + $0x44] sm:$0xf] %vm2506_vm0, %v2969_v34  ;;  %v1769_v0 = vsel %vm1340_vm1, %v1623_v42, 0.0  ;;  %v3026_v20 = vpack.c.bf16 %v3620_v38, %v3620_v38  ;;  %v3024_v26 = vpack.c.bf16 %v3623_v46, %v3623_v46 }
 0x128   : > { %v1377_v47 = vadd.f32 %v1376_v40, %v1375_v37  ;;  %v1766_v48 = vadd.f32 %v1765_v43, %v1764_v36 }
 0x129   : > { %v3190_v50 = vpop.f32.mrb[20].mxu0  ;;  %2581 = vst.msk [vmem:[%s3539_s14 + $0x128] sm:$0xf] %vm2506_vm0, %v3026_v20  ;;  %2579 = vst.msk [vmem:[%s3539_s14 + $0x120] sm:$0xf] %vm2506_vm0, %v3024_v26  ;;  %v3716_v36 = vpop.f32.mrb[20].mxu1 }
 0x12a   : > { %v2974_v54 = vpack.c.bf16 %v3190_v50, %v3190_v50  ;;  %v909_v55 = vpop.f32.mrb[21].mxu0  ;;  %v1768_v58 = vadd.f32 %v1767_v52, %v1766_v48  ;;  %v1379_v59 = vadd.f32 %v1378_v53, %v1377_v47  ;;  %v1626_v11 = vmul.f32 %v3190_v50, %v3190_v50  ;;  %4545 = vst [vmem:[#allocation5_spill] sm:$0xff] %v3716_v36  ;;  %v3719_v45 = vpop.f32.mrb[21].mxu1 }
 0x12b   : > { %v1380_v60 = vsel %vm1340_vm1, %v909_v55, 0.0  ;;  %v1624_v61 = vmul.f32 %v909_v55, %v909_v55  ;;  %v3191_v62 = vpop.f32.mrb[22].mxu0  ;;  %v2972_v1 = vpack.c.bf16 %v909_v55, %v909_v55  ;;  %v1384_v22 = vsel %vm1340_vm1, %v3190_v50, 0.0  ;;  %4546 = vst [vmem:[#allocation6_spill] sm:$0xff] %v3719_v45  ;;  %v3724_v52 = vpop.f32.mrb[22].mxu1 }
 0x12c   : > { %2529 = vst.msk [vmem:[%s3539_s14 + $0x58] sm:$0xf] %vm2506_vm0, %v2974_v54  ;;  %v912_v2 = vpop.f32.mrb[23].mxu0  ;;  %v1381_v5 = vadd.f32 %v1380_v60, %v1379_v59  ;;  %v1770_v6 = vadd.f32 %v1769_v0, %v1768_v58  ;;  %v2975_v8 = vpack.c.bf16 %v3191_v62, %v3191_v62  ;;  %v1627_v23 = vmul.f32 %v3191_v62, %v3191_v62  ;;  %v3727_v59 = vpop.f32.mrb[23].mxu1 }
 0x12d   : > { %v1771_v7 = vsel %vm1340_vm1, %v1624_v61, 0.0  ;;  %2527 = vst.msk [vmem:[%s3539_s14 + $0x50] sm:$0xf] %vm2506_vm0, %v2972_v1  ;;  %v1382_v12 = vsel %vm1340_vm1, %v912_v2, 0.0  ;;  %v1625_v15 = vmul.f32 %v912_v2, %v912_v2  ;;  %v2973_v16 = vpack.c.bf16 %v912_v2, %v912_v2  ;;  %4547 = vst [vmem:[#allocation7_spill] sm:$0xff] %v3724_v52 }
 0x12e   : > { %v1772_v17 = vadd.f32 %v1771_v7, %v1770_v6  ;;  %2530 = vst.msk [vmem:[%s3539_s14 + $0x5c] sm:$0xf] %vm2506_vm0, %v2975_v8  ;;  %v1383_v19 = vadd.f32 %v1382_v12, %v1381_v5  ;;  %v1775_v31 = vsel %vm1340_vm1, %v1626_v11, 0.0  ;;  %v1386_v32 = vsel %vm1340_vm1, %v3191_v62, 0.0  ;;  %4548 = vst [vmem:[#allocation8_spill] sm:$0xff] %v3727_v59 }
 0x12f   : > { %v1773_v24 = vsel %vm1340_vm1, %v1625_v15, 0.0  ;;  %2528 = vst.msk [vmem:[%s3539_s14 + $0x54] sm:$0xf] %vm2506_vm0, %v2973_v16  ;;  %v1777_v47 = vsel %vm1340_vm1, %v1627_v23, 0.0  ;;  %v3027_v5 = vpack.c.bf16 %v3628_v51, %v3628_v51  ;;  %v3025_v11 = vpack.c.bf16 %v3631_v56, %v3631_v56 }
 0x130   : > { %v1385_v27 = vadd.f32 %v1384_v22, %v1383_v19  ;;  %v1774_v28 = vadd.f32 %v1773_v24, %v1772_v17 }
 0x131   : > { %v3194_v29 = vpop.f32.mrb[24].mxu0  ;;  %2582 = vst.msk [vmem:[%s3539_s14 + $0x12c] sm:$0xf] %vm2506_vm0, %v3027_v5  ;;  %2580 = vst.msk [vmem:[%s3539_s14 + $0x124] sm:$0xf] %vm2506_vm0, %v3025_v11  ;;  %v3748_v23 = vpop.f32.mrb[24].mxu1 }
 0x132   : > { %v2978_v33 = vpack.c.bf16 %v3194_v29, %v3194_v29  ;;  %v925_v34 = vpop.f32.mrb[25].mxu0  ;;  %v1776_v37 = vadd.f32 %v1775_v31, %v1774_v28  ;;  %v1387_v39 = vadd.f32 %v1386_v32, %v1385_v27  ;;  %v1630_v60 = vmul.f32 %v3194_v29, %v3194_v29  ;;  %4549 = vst [vmem:[#allocation9_spill] sm:$0xff] %v3748_v23  ;;  %v3751_v31 = vpop.f32.mrb[25].mxu1 }
 0x133   : > { %v1388_v40 = vsel %vm1340_vm1, %v925_v34, 0.0  ;;  %v1628_v42 = vmul.f32 %v925_v34, %v925_v34  ;;  %v3195_v43 = vpop.f32.mrb[26].mxu0  ;;  %v2976_v48 = vpack.c.bf16 %v925_v34, %v925_v34  ;;  %v1392_v6 = vsel %vm1340_vm1, %v3194_v29, 0.0  ;;  %4550 = vst [vmem:[#allocation10_spill] sm:$0xff] %v3751_v31 }
 0x134   : > { %2533 = vst.msk [vmem:[%s3539_s14 + $0x68] sm:$0xf] %vm2506_vm0, %v2978_v33  ;;  %v928_v50 = vpop.f32.mrb[27].mxu0  ;;  %v1389_v53 = vadd.f32 %v1388_v40, %v1387_v39  ;;  %v1778_v54 = vadd.f32 %v1777_v47, %v1776_v37  ;;  %v2979_v58 = vpack.c.bf16 %v3195_v43, %v3195_v43  ;;  %v1631_v7 = vmul.f32 %v3195_v43, %v3195_v43  ;;  %v3756_v37 = vpop.f32.mrb[26].mxu1 }
 0x135   : > { %v1779_v55 = vsel %vm1340_vm1, %v1628_v42, 0.0  ;;  %2531 = vst.msk [vmem:[%s3539_s14 + $0x60] sm:$0xf] %vm2506_vm0, %v2976_v48  ;;  %v1390_v61 = vsel %vm1340_vm1, %v928_v50, 0.0  ;;  %v1629_v62 = vmul.f32 %v928_v50, %v928_v50  ;;  %v2977_v0 = vpack.c.bf16 %v928_v50, %v928_v50  ;;  %4551 = vst [vmem:[#allocation11_spill] sm:$0xff] %v3756_v37  ;;  %v3759_v47 = vpop.f32.mrb[27].mxu1 }
 0x136   : > { %v1780_v1 = vadd.f32 %v1779_v55, %v1778_v54  ;;  %2534 = vst.msk [vmem:[%s3539_s14 + $0x6c] sm:$0xf] %vm2506_vm0, %v2979_v58  ;;  %v1391_v2 = vadd.f32 %v1390_v61, %v1389_v53  ;;  %v1783_v17 = vsel %vm1340_vm1, %v1630_v60, 0.0  ;;  %v1394_v19 = vsel %vm1340_vm1, %v3195_v43, 0.0  ;;  %4552 = vst [vmem:[#allocation12_spill] sm:$0xff] %v3759_v47 }
 0x137   : > { %v1781_v8 = vsel %vm1340_vm1, %v1629_v62, 0.0  ;;  %2532 = vst.msk [vmem:[%s3539_s14 + $0x64] sm:$0xf] %vm2506_vm0, %v2977_v0  ;;  %v1785_v32 = vsel %vm1340_vm1, %v1631_v7, 0.0  ;;  %v3030_v60 = vpack.c.bf16 %v3652_v14, %v3652_v14 }
 0x138   : > { %v1393_v12 = vadd.f32 %v1392_v6, %v1391_v2  ;;  %v1782_v15 = vadd.f32 %v1781_v8, %v1780_v1  ;;  %v3028_v1 = vpack.c.bf16 %v3655_v21, %v3655_v21 }
 0x139   : > { %v3198_v16 = vpop.f32.mrb[28].mxu0  ;;  %2585 = vst.msk [vmem:[%s3539_s14 + $0x138] sm:$0xf] %vm2506_vm0, %v3030_v60 }
 0x13a   : > { %v2982_v20 = vpack.c.bf16 %v3198_v16, %v3198_v16  ;;  %v941_v22 = vpop.f32.mrb[29].mxu0  ;;  %v1784_v24 = vadd.f32 %v1783_v17, %v1782_v15  ;;  %v1395_v26 = vadd.f32 %v1394_v19, %v1393_v12  ;;  %v1634_v48 = vmul.f32 %v3198_v16, %v3198_v16  ;;  %2583 = vst.msk [vmem:[%s3539_s14 + $0x130] sm:$0xf] %vm2506_vm0, %v3028_v1  ;;  %v3780_v15 = vpop.f32.mrb[28].mxu1 }
 0x13b   : > { %v1396_v27 = vsel %vm1340_vm1, %v941_v22, 0.0  ;;  %v1632_v28 = vmul.f32 %v941_v22, %v941_v22  ;;  %v3199_v29 = vpop.f32.mrb[30].mxu0  ;;  %v2980_v33 = vpack.c.bf16 %v941_v22, %v941_v22  ;;  %v1400_v61 = vsel %vm1340_vm1, %v3198_v16, 0.0 }
 0x13c   : > { %2537 = vst.msk [vmem:[%s3539_s14 + $0x78] sm:$0xf] %vm2506_vm0, %v2982_v20  ;;  %v944_v34 = vpop.f32.mrb[31].mxu0  ;;  %v1397_v39 = vadd.f32 %v1396_v27, %v1395_v26  ;;  %v1786_v40 = vadd.f32 %v1785_v32, %v1784_v24  ;;  %v2983_v43 = vpack.c.bf16 %v3199_v29, %v3199_v29  ;;  %v1635_v62 = vmul.f32 %v3199_v29, %v3199_v29  ;;  %v3783_v24 = vpop.f32.mrb[29].mxu1 }
 0x13d   : > { %v1787_v42 = vsel %vm1340_vm1, %v1632_v28, 0.0  ;;  %2535 = vst.msk [vmem:[%s3539_s14 + $0x70] sm:$0xf] %vm2506_vm0, %v2980_v33  ;;  %v1398_v50 = vsel %vm1340_vm1, %v944_v34, 0.0  ;;  %v1633_v53 = vmul.f32 %v944_v34, %v944_v34  ;;  %v2981_v54 = vpack.c.bf16 %v944_v34, %v944_v34 }
 0x13e   : > { %v1788_v55 = vadd.f32 %v1787_v42, %v1786_v40  ;;  %2538 = vst.msk [vmem:[%s3539_s14 + $0x7c] sm:$0xf] %vm2506_vm0, %v2983_v43  ;;  %v1399_v58 = vadd.f32 %v1398_v50, %v1397_v39  ;;  %v1791_v7 = vsel %vm1340_vm1, %v1634_v48, 0.0  ;;  %v1402_v8 = vsel %vm1340_vm1, %v3199_v29, 0.0  ;;  %v3788_v29 = vpop.f32.mrb[30].mxu1 }
 0x13f   : > { %v1789_v0 = vsel %vm1340_vm1, %v1633_v53, 0.0  ;;  %2536 = vst.msk [vmem:[%s3539_s14 + $0x74] sm:$0xf] %vm2506_vm0, %v2981_v54  ;;  %v1793_v26 = vsel %vm1340_vm1, %v1635_v62, 0.0  ;;  %v3791_v40 = vpop.f32.mrb[31].mxu1  ;;  %v3029_v62 = vpack.c.bf16 %v3663_v30, %v3663_v30 }
 0x140   : > { %v1401_v2 = vadd.f32 %v1400_v61, %v1399_v58  ;;  %v1790_v5 = vadd.f32 %v1789_v0, %v1788_v55  ;;  %v3031_v55 = vpack.c.bf16 %v3660_v25, %v3660_v25 }
 0x141   : > { %v3202_v6 = vpop.f32.mrb[32].mxu0  ;;  %2584 = vst.msk [vmem:[%s3539_s14 + $0x134] sm:$0xf] %vm2506_vm0, %v3029_v62 }
 0x142   : > { %v2986_v11 = vpack.c.bf16 %v3202_v6, %v3202_v6  ;;  %v957_v12 = vpop.f32.mrb[33].mxu0  ;;  %v1792_v16 = vadd.f32 %v1791_v7, %v1790_v5  ;;  %v1403_v17 = vadd.f32 %v1402_v8, %v1401_v2  ;;  %v1638_v42 = vmul.f32 %v3202_v6, %v3202_v6  ;;  %2586 = vst.msk [vmem:[%s3539_s14 + $0x13c] sm:$0xf] %vm2506_vm0, %v3031_v55 }
 0x143   : > { %v1404_v19 = vsel %vm1340_vm1, %v957_v12, 0.0  ;;  %v1636_v20 = vmul.f32 %v957_v12, %v957_v12  ;;  %v3203_v22 = vpop.f32.mrb[34].mxu0  ;;  %v2984_v27 = vpack.c.bf16 %v957_v12, %v957_v12  ;;  %v1408_v58 = vsel %vm1340_vm1, %v3202_v6, 0.0 }
 0x144   : > { %2541 = vst.msk [vmem:[%s3539_s14 + $0x88] sm:$0xf] %vm2506_vm0, %v2986_v11  ;;  %v960_v28 = vpop.f32.mrb[35].mxu0  ;;  %v1405_v32 = vadd.f32 %v1404_v19, %v1403_v17  ;;  %v1794_v33 = vadd.f32 %v1793_v26, %v1792_v16  ;;  %v2987_v39 = vpack.c.bf16 %v3203_v22, %v3203_v22  ;;  %v1639_v60 = vmul.f32 %v3203_v22, %v3203_v22  ;;  %v3812_v11 = vpop.f32.mrb[32].mxu1 }
 0x145   : > { %v1795_v34 = vsel %vm1340_vm1, %v1636_v20, 0.0  ;;  %2539 = vst.msk [vmem:[%s3539_s14 + $0x80] sm:$0xf] %vm2506_vm0, %v2984_v27  ;;  %v1406_v43 = vsel %vm1340_vm1, %v960_v28, 0.0  ;;  %v1637_v48 = vmul.f32 %v960_v28, %v960_v28  ;;  %v2985_v50 = vpack.c.bf16 %v960_v28, %v960_v28  ;;  %v3815_v26 = vpop.f32.mrb[33].mxu1 }
 0x146   : > { %v1796_v53 = vadd.f32 %v1795_v34, %v1794_v33  ;;  %2542 = vst.msk [vmem:[%s3539_s14 + $0x8c] sm:$0xf] %vm2506_vm0, %v2987_v39  ;;  %v1407_v54 = vadd.f32 %v1406_v43, %v1405_v32  ;;  %v1799_v5 = vsel %vm1340_vm1, %v1638_v42, 0.0  ;;  %v1410_v7 = vsel %vm1340_vm1, %v3203_v22, 0.0  ;;  %v3820_v32 = vpop.f32.mrb[34].mxu1 }
 0x147   : > { %v1797_v61 = vsel %vm1340_vm1, %v1637_v48, 0.0  ;;  %2540 = vst.msk [vmem:[%s3539_s14 + $0x84] sm:$0xf] %vm2506_vm0, %v2985_v50  ;;  %v1801_v27 = vsel %vm1340_vm1, %v1639_v60, 0.0  ;;  %v3823_v43 = vpop.f32.mrb[35].mxu1  ;;  %v3034_v60 = vpack.c.bf16 %v3684_v57, %v3684_v57 }
 0x148   : > { %v1409_v0 = vadd.f32 %v1408_v58, %v1407_v54  ;;  %v1798_v1 = vadd.f32 %v1797_v61, %v1796_v53 }
 0x149   : > { %v3206_v2 = vpop.f32.mrb[36].mxu0  ;;  %2589 = vst.msk [vmem:[%s3539_s14 + $0x148] sm:$0xf] %vm2506_vm0, %v3034_v60 }
 0x14a   : > { %v2990_v8 = vpack.c.bf16 %v3206_v2, %v3206_v2  ;;  %v973_v6 = vpop.f32.mrb[37].mxu0  ;;  %v1800_v12 = vadd.f32 %v1799_v5, %v1798_v1  ;;  %v1411_v16 = vadd.f32 %v1410_v7, %v1409_v0  ;;  %v1642_v48 = vmul.f32 %v3206_v2, %v3206_v2 }
 0x14b   : > { %v1412_v17 = vsel %vm1340_vm1, %v973_v6, 0.0  ;;  %v1640_v19 = vmul.f32 %v973_v6, %v973_v6  ;;  %v3207_v20 = vpop.f32.mrb[38].mxu0  ;;  %v2988_v22 = vpack.c.bf16 %v973_v6, %v973_v6  ;;  %v1416_v61 = vsel %vm1340_vm1, %v3206_v2, 0.0 }
 0x14c   : > { %2545 = vst.msk [vmem:[%s3539_s14 + $0x98] sm:$0xf] %vm2506_vm0, %v2990_v8  ;;  %v976_v28 = vpop.f32.mrb[39].mxu0  ;;  %v1413_v33 = vadd.f32 %v1412_v17, %v1411_v16  ;;  %v1802_v34 = vadd.f32 %v1801_v27, %v1800_v12  ;;  %v2991_v42 = vpack.c.bf16 %v3207_v20, %v3207_v20  ;;  %v1643_v62 = vmul.f32 %v3207_v20, %v3207_v20  ;;  %v3844_v17 = vpop.f32.mrb[36].mxu1 }
 0x14d   : > { %v1803_v39 = vsel %vm1340_vm1, %v1640_v19, 0.0  ;;  %2543 = vst.msk [vmem:[%s3539_s14 + $0x90] sm:$0xf] %vm2506_vm0, %v2988_v22  ;;  %v1414_v50 = vsel %vm1340_vm1, %v976_v28, 0.0  ;;  %v1641_v53 = vmul.f32 %v976_v28, %v976_v28  ;;  %v2989_v54 = vpack.c.bf16 %v976_v28, %v976_v28 }
 0x14e   : > { %v1804_v55 = vadd.f32 %v1803_v39, %v1802_v34  ;;  %2546 = vst.msk [vmem:[%s3539_s14 + $0x9c] sm:$0xf] %vm2506_vm0, %v2991_v42  ;;  %v1415_v58 = vadd.f32 %v1414_v50, %v1413_v33  ;;  %v3032_v1 = vpack.c.bf16 %v3687_v63, %v3687_v63  ;;  %v1807_v6 = vsel %vm1340_vm1, %v1642_v48, 0.0  ;;  %v3847_v34 = vpop.f32.mrb[37].mxu1 }
 0x14f   : > { %v1805_v0 = vsel %vm1340_vm1, %v1641_v53, 0.0  ;;  %2544 = vst.msk [vmem:[%s3539_s14 + $0x94] sm:$0xf] %vm2506_vm0, %v2989_v54  ;;  %v1418_v12 = vsel %vm1340_vm1, %v3207_v20, 0.0  ;;  %v1809_v39 = vsel %vm1340_vm1, %v1643_v62, 0.0  ;;  %v3852_v48 = vpop.f32.mrb[38].mxu1 }
 0x150   : > { %v1417_v5 = vadd.f32 %v1416_v61, %v1415_v58  ;;  %v1806_v7 = vadd.f32 %v1805_v0, %v1804_v55  ;;  %2587 = vst.msk [vmem:[%s3539_s14 + $0x140] sm:$0xf] %vm2506_vm0, %v3032_v1  ;;  %v3855_v58 = vpop.f32.mrb[39].mxu1 }
 0x151   : > { %v3210_v8 = vpop.f32.mrb[40].mxu0 }
 0x152   : > { %v2994_v16 = vpack.c.bf16 %v3210_v8, %v3210_v8  ;;  %v989_v2 = vpop.f32.mrb[41].mxu0  ;;  %v1808_v19 = vadd.f32 %v1807_v6, %v1806_v7  ;;  %v1419_v27 = vadd.f32 %v1418_v12, %v1417_v5  ;;  %v1646_v60 = vmul.f32 %v3210_v8, %v3210_v8 }
 0x153   : > { %v1420_v22 = vsel %vm1340_vm1, %v989_v2, 0.0  ;;  %v1644_v28 = vmul.f32 %v989_v2, %v989_v2  ;;  %v3211_v33 = vpop.f32.mrb[42].mxu0  ;;  %v2992_v20 = vpack.c.bf16 %v989_v2, %v989_v2  ;;  %v3035_v7 = vpack.c.bf16 %v3692_v4, %v3692_v4 }
 0x154   : > { %2549 = vst.msk [vmem:[%s3539_s14 + $0xa8] sm:$0xf] %vm2506_vm0, %v2994_v16  ;;  %v992_v42 = vpop.f32.mrb[43].mxu0  ;;  %v1421_v50 = vadd.f32 %v1420_v22, %v1419_v27  ;;  %v1810_v53 = vadd.f32 %v1809_v39, %v1808_v19  ;;  %v2995_v55 = vpack.c.bf16 %v3211_v33, %v3211_v33  ;;  %v1424_v6 = vsel %vm1340_vm1, %v3210_v8, 0.0 }
 0x155   : > { %v1811_v54 = vsel %vm1340_vm1, %v1644_v28, 0.0  ;;  %2547 = vst.msk [vmem:[%s3539_s14 + $0xa0] sm:$0xf] %vm2506_vm0, %v2992_v20  ;;  %v1422_v61 = vsel %vm1340_vm1, %v992_v42, 0.0  ;;  %v1645_v62 = vmul.f32 %v992_v42, %v992_v42  ;;  %v2993_v0 = vpack.c.bf16 %v992_v42, %v992_v42  ;;  %2590 = vst.msk [vmem:[%s3539_s14 + $0x14c] sm:$0xf] %vm2506_vm0, %v3035_v7 }
 0x156   : > { %v1812_v1 = vadd.f32 %v1811_v54, %v1810_v53  ;;  %2550 = vst.msk [vmem:[%s3539_s14 + $0xac] sm:$0xf] %vm2506_vm0, %v2995_v55  ;;  %v1423_v5 = vadd.f32 %v1422_v61, %v1421_v50  ;;  %v1647_v12 = vmul.f32 %v3211_v33, %v3211_v33  ;;  %v3033_v2 = vpack.c.bf16 %v3695_v10, %v3695_v10  ;;  %v3876_v42 = vpop.f32.mrb[40].mxu1 }
 0x157   : > { %v1813_v16 = vsel %vm1340_vm1, %v1645_v62, 0.0  ;;  %2548 = vst.msk [vmem:[%s3539_s14 + $0xa4] sm:$0xf] %vm2506_vm0, %v2993_v0  ;;  %v1815_v28 = vsel %vm1340_vm1, %v1646_v60, 0.0  ;;  %v1426_v39 = vsel %vm1340_vm1, %v3211_v33, 0.0  ;;  %v3879_v62 = vpop.f32.mrb[41].mxu1 }
 0x158   : > { %v1425_v19 = vadd.f32 %v1424_v6, %v1423_v5  ;;  %v1814_v27 = vadd.f32 %v1813_v16, %v1812_v1  ;;  %2588 = vst.msk [vmem:[%s3539_s14 + $0x144] sm:$0xf] %vm2506_vm0, %v3033_v2  ;;  %v1817_v0 = vsel %vm1340_vm1, %v1647_v12, 0.0  ;;  %v3884_v1 = vpop.f32.mrb[42].mxu1 }
 0x159   : > { %v3214_v22 = vpop.f32.mrb[44].mxu0  ;;  %v3887_v2 = vpop.f32.mrb[43].mxu1 }
 0x15a   : > { %v2998_v20 = vpack.c.bf16 %v3214_v22, %v3214_v22  ;;  %v1005_v8 = vpop.f32.mrb[45].mxu0  ;;  %v1816_v50 = vadd.f32 %v1815_v28, %v1814_v27  ;;  %v1427_v53 = vadd.f32 %v1426_v39, %v1425_v19  ;;  %v1650_v19 = vmul.f32 %v3214_v22, %v3214_v22 }
 0x15b   : > { %v1428_v54 = vsel %vm1340_vm1, %v1005_v8, 0.0  ;;  %v1648_v55 = vmul.f32 %v1005_v8, %v1005_v8  ;;  %v3215_v61 = vpop.f32.mrb[46].mxu0  ;;  %v2996_v33 = vpack.c.bf16 %v1005_v8, %v1005_v8  ;;  %v3038_v8 = vpack.c.bf16 %v3716_v36, %v3716_v36 }
 0x15c   : > { %2553 = vst.msk [vmem:[%s3539_s14 + $0xb8] sm:$0xf] %vm2506_vm0, %v2998_v20  ;;  %v1008_v60 = vpop.f32.mrb[47].mxu0  ;;  %v1429_v5 = vadd.f32 %v1428_v54, %v1427_v53  ;;  %v1818_v7 = vadd.f32 %v1817_v0, %v1816_v50  ;;  %v2999_v16 = vpack.c.bf16 %v3215_v61, %v3215_v61  ;;  %v1432_v50 = vsel %vm1340_vm1, %v3214_v22, 0.0 }
 0x15d   : > { %v1819_v6 = vsel %vm1340_vm1, %v1648_v55, 0.0  ;;  %2551 = vst.msk [vmem:[%s3539_s14 + $0xb0] sm:$0xf] %vm2506_vm0, %v2996_v33  ;;  %v1430_v12 = vsel %vm1340_vm1, %v1008_v60, 0.0  ;;  %v1649_v27 = vmul.f32 %v1008_v60, %v1008_v60  ;;  %v2997_v28 = vpack.c.bf16 %v1008_v60, %v1008_v60  ;;  %2593 = vst.msk [vmem:[%s3539_s14 + $0x158] sm:$0xf] %vm2506_vm0, %v3038_v8 }
 0x15e   : > { %v1820_v39 = vadd.f32 %v1819_v6, %v1818_v7  ;;  %2554 = vst.msk [vmem:[%s3539_s14 + $0xbc] sm:$0xf] %vm2506_vm0, %v2999_v16  ;;  %v1431_v20 = vadd.f32 %v1430_v12, %v1429_v5  ;;  %v1651_v53 = vmul.f32 %v3215_v61, %v3215_v61  ;;  %v3036_v55 = vpack.c.bf16 %v3719_v45, %v3719_v45  ;;  %v3908_v16 = vpop.f32.mrb[44].mxu1 }
 0x15f   : > { %v1821_v54 = vsel %vm1340_vm1, %v1649_v27, 0.0  ;;  %2552 = vst.msk [vmem:[%s3539_s14 + $0xb4] sm:$0xf] %vm2506_vm0, %v2997_v28  ;;  %v1823_v5 = vsel %vm1340_vm1, %v1650_v19, 0.0  ;;  %v1434_v7 = vsel %vm1340_vm1, %v3215_v61, 0.0 }
 0x160   : > { %v1433_v0 = vadd.f32 %v1432_v50, %v1431_v20  ;;  %v1822_v33 = vadd.f32 %v1821_v54, %v1820_v39  ;;  %2591 = vst.msk [vmem:[%s3539_s14 + $0x150] sm:$0xf] %vm2506_vm0, %v3036_v55  ;;  %v3911_v50 = vpop.f32.mrb[45].mxu1  ;;  %v1825_v8 = vsel %vm1340_vm1, %v1651_v53, 0.0 }
 0x161   : > { %v3218_v60 = vpop.f32.mrb[48].mxu0  ;;  %v3916_v54 = vpop.f32.mrb[46].mxu1 }
 0x162   : > { %v3002_v6 = vpack.c.bf16 %v3218_v60, %v3218_v60  ;;  %v1021_v22 = vpop.f32.mrb[49].mxu0  ;;  %v1824_v12 = vadd.f32 %v1823_v5, %v1822_v33  ;;  %v1435_v27 = vadd.f32 %v1434_v7, %v1433_v0  ;;  %v3919_v5 = vpop.f32.mrb[47].mxu1  ;;  %v1654_v7 = vmul.f32 %v3218_v60, %v3218_v60 }
 0x163   : > { %v1436_v28 = vsel %vm1340_vm1, %v1021_v22, 0.0  ;;  %v1652_v39 = vmul.f32 %v1021_v22, %v1021_v22  ;;  %v3219_v20 = vpop.f32.mrb[50].mxu0  ;;  %v3000_v61 = vpack.c.bf16 %v1021_v22, %v1021_v22 }
 0x164   : > { %2557 = vst.msk [vmem:[%s3539_s14 + $0xc8] sm:$0xf] %vm2506_vm0, %v3002_v6  ;;  %v1024_v19 = vpop.f32.mrb[51].mxu0  ;;  %v1437_v55 = vadd.f32 %v1436_v28, %v1435_v27  ;;  %v1826_v36 = vadd.f32 %v1825_v8, %v1824_v12  ;;  %v3003_v33 = vpack.c.bf16 %v3219_v20, %v3219_v20  ;;  %v3039_v12 = vpack.c.bf16 %v3724_v52, %v3724_v52 }
 0x165   : > { %v1827_v0 = vsel %vm1340_vm1, %v1652_v39, 0.0  ;;  %2555 = vst.msk [vmem:[%s3539_s14 + $0xc0] sm:$0xf] %vm2506_vm0, %v3000_v61  ;;  %v1438_v53 = vsel %vm1340_vm1, %v1024_v19, 0.0  ;;  %v1653_v45 = vmul.f32 %v1024_v19, %v1024_v19  ;;  %v3001_v6 = vpack.c.bf16 %v1024_v19, %v1024_v19 }
 0x166   : > { %v1828_v22 = vadd.f32 %v1827_v0, %v1826_v36  ;;  %2558 = vst.msk [vmem:[%s3539_s14 + $0xcc] sm:$0xf] %vm2506_vm0, %v3003_v33  ;;  %v1439_v27 = vadd.f32 %v1438_v53, %v1437_v55  ;;  %v1440_v28 = vsel %vm1340_vm1, %v3218_v60, 0.0  ;;  %v1655_v39 = vmul.f32 %v3219_v20, %v3219_v20  ;;  %2594 = vst.msk [vmem:[%s3539_s14 + $0x15c] sm:$0xf] %vm2506_vm0, %v3039_v12 }
 0x167   : > { %v1829_v8 = vsel %vm1340_vm1, %v1653_v45, 0.0  ;;  %2556 = vst.msk [vmem:[%s3539_s14 + $0xc4] sm:$0xf] %vm2506_vm0, %v3001_v6  ;;  %v3037_v61 = vpack.c.bf16 %v3727_v59, %v3727_v59  ;;  %v1831_v55 = vsel %vm1340_vm1, %v1654_v7, 0.0  ;;  %v1442_v0 = vsel %vm1340_vm1, %v3219_v20, 0.0  ;;  %v3940_v45 = vpop.f32.mrb[48].mxu1 }
 0x168   : > { %v1441_v4 = vadd.f32 %v1440_v28, %v1439_v27  ;;  %v1830_v19 = vadd.f32 %v1829_v8, %v1828_v22  ;;  %v3943_v8 = vpop.f32.mrb[49].mxu1  ;;  %v1833_v12 = vsel %vm1340_vm1, %v1655_v39, 0.0 }
 0x169   : > { %v3222_v36 = vpop.f32.mrb[52].mxu0  ;;  %2592 = vst.msk [vmem:[%s3539_s14 + $0x154] sm:$0xf] %vm2506_vm0, %v3037_v61  ;;  %v3948_v52 = vpop.f32.mrb[50].mxu1 }
 0x16a   : > { %v3006_v33 = vpack.c.bf16 %v3222_v36, %v3222_v36  ;;  %v1037_v60 = vpop.f32.mrb[53].mxu0  ;;  %v1832_v53 = vadd.f32 %v1831_v55, %v1830_v19  ;;  %v1443_v6 = vadd.f32 %v1442_v0, %v1441_v4  ;;  %v3951_v55 = vpop.f32.mrb[51].mxu1  ;;  %v1658_v0 = vmul.f32 %v3222_v36, %v3222_v36 }
 0x16b   : > { %v1444_v27 = vsel %vm1340_vm1, %v1037_v60, 0.0  ;;  %v1656_v22 = vmul.f32 %v1037_v60, %v1037_v60  ;;  %v3223_v28 = vpop.f32.mrb[54].mxu0  ;;  %v3004_v20 = vpack.c.bf16 %v1037_v60, %v1037_v60 }
 0x16c   : > { %2561 = vst.msk [vmem:[%s3539_s14 + $0xd8] sm:$0xf] %vm2506_vm0, %v3006_v33  ;;  %v1040_v7 = vpop.f32.mrb[55].mxu0  ;;  %v1445_v61 = vadd.f32 %v1444_v27, %v1443_v6  ;;  %v1834_v59 = vadd.f32 %v1833_v12, %v1832_v53  ;;  %v3007_v19 = vpack.c.bf16 %v3223_v28, %v3223_v28  ;;  %v3042_v53 = vpack.c.bf16 %v3748_v23, %v3748_v23 }
 0x16d   : > { %v1835_v4 = vsel %vm1340_vm1, %v1656_v22, 0.0  ;;  %2559 = vst.msk [vmem:[%s3539_s14 + $0xd0] sm:$0xf] %vm2506_vm0, %v3004_v20  ;;  %v1446_v39 = vsel %vm1340_vm1, %v1040_v7, 0.0  ;;  %v1657_v57 = vmul.f32 %v1040_v7, %v1040_v7  ;;  %v3005_v33 = vpack.c.bf16 %v1040_v7, %v1040_v7 }
 0x16e   : > { %v1836_v60 = vadd.f32 %v1835_v4, %v1834_v59  ;;  %2562 = vst.msk [vmem:[%s3539_s14 + $0xdc] sm:$0xf] %vm2506_vm0, %v3007_v19  ;;  %v1447_v6 = vadd.f32 %v1446_v39, %v1445_v61  ;;  %v1448_v27 = vsel %vm1340_vm1, %v3222_v36, 0.0  ;;  %v1659_v22 = vmul.f32 %v3223_v28, %v3223_v28  ;;  %2597 = vst.msk [vmem:[%s3539_s14 + $0x168] sm:$0xf] %vm2506_vm0, %v3042_v53 }
 0x16f   : > { %v1837_v12 = vsel %vm1340_vm1, %v1657_v57, 0.0  ;;  %2560 = vst.msk [vmem:[%s3539_s14 + $0xd4] sm:$0xf] %vm2506_vm0, %v3005_v33  ;;  %v3040_v20 = vpack.c.bf16 %v3751_v31, %v3751_v31  ;;  %v1839_v61 = vsel %vm1340_vm1, %v1658_v0, 0.0  ;;  %v1450_v4 = vsel %vm1340_vm1, %v3223_v28, 0.0  ;;  %v3972_v57 = vpop.f32.mrb[52].mxu1 }
 0x170   : > { %v1449_v10 = vadd.f32 %v1448_v27, %v1447_v6  ;;  %v1838_v7 = vadd.f32 %v1837_v12, %v1836_v60  ;;  %v3975_v12 = vpop.f32.mrb[53].mxu1  ;;  %v1841_v53 = vsel %vm1340_vm1, %v1659_v22, 0.0 }
 0x171   : > { %v3226_v59 = vpop.f32.mrb[56].mxu0  ;;  %2595 = vst.msk [vmem:[%s3539_s14 + $0x160] sm:$0xf] %vm2506_vm0, %v3040_v20  ;;  %4553 = vst [vmem:[#allocation13_spill] sm:$0xff] %v3975_v12  ;;  %v3980_v23 = vpop.f32.mrb[54].mxu1 }
 0x172   : > { %v3010_v19 = vpack.c.bf16 %v3226_v59, %v3226_v59  ;;  %v1053_v36 = vpop.f32.mrb[57].mxu0  ;;  %v1840_v39 = vadd.f32 %v1839_v61, %v1838_v7  ;;  %v1451_v33 = vadd.f32 %v1450_v4, %v1449_v10  ;;  %v3983_v61 = vpop.f32.mrb[55].mxu1  ;;  %v1662_v4 = vmul.f32 %v3226_v59, %v3226_v59 }
 0x173   : > { %v1452_v6 = vsel %vm1340_vm1, %v1053_v36, 0.0  ;;  %v1660_v60 = vmul.f32 %v1053_v36, %v1053_v36  ;;  %v3227_v27 = vpop.f32.mrb[58].mxu0  ;;  %v3008_v28 = vpack.c.bf16 %v1053_v36, %v1053_v36  ;;  %4554 = vst [vmem:[#allocation14_spill] sm:$0xff] %v3983_v61 }
 0x174   : > { %2565 = vst.msk [vmem:[%s3539_s14 + $0xe8] sm:$0xf] %vm2506_vm0, %v3010_v19  ;;  %v1056_v0 = vpop.f32.mrb[59].mxu0  ;;  %v1453_v20 = vadd.f32 %v1452_v6, %v1451_v33  ;;  %v1842_v31 = vadd.f32 %v1841_v53, %v1840_v39  ;;  %v3011_v7 = vpack.c.bf16 %v3227_v27, %v3227_v27  ;;  %v3043_v39 = vpack.c.bf16 %v3756_v37, %v3756_v37 }
 0x175   : > { %v1843_v10 = vsel %vm1340_vm1, %v1660_v60, 0.0  ;;  %2563 = vst.msk [vmem:[%s3539_s14 + $0xe0] sm:$0xf] %vm2506_vm0, %v3008_v28  ;;  %v1454_v22 = vsel %vm1340_vm1, %v1056_v0, 0.0  ;;  %v1661_v12 = vmul.f32 %v1056_v0, %v1056_v0  ;;  %v3009_v19 = vpack.c.bf16 %v1056_v0, %v1056_v0 }
 0x176   : > { %v1844_v36 = vadd.f32 %v1843_v10, %v1842_v31  ;;  %2566 = vst.msk [vmem:[%s3539_s14 + $0xec] sm:$0xf] %vm2506_vm0, %v3011_v7  ;;  %v1455_v33 = vadd.f32 %v1454_v22, %v1453_v20  ;;  %v1456_v6 = vsel %vm1340_vm1, %v3226_v59, 0.0  ;;  %v1663_v60 = vmul.f32 %v3227_v27, %v3227_v27  ;;  %2598 = vst.msk [vmem:[%s3539_s14 + $0x16c] sm:$0xf] %vm2506_vm0, %v3043_v39 }
 0x177   : > { %v1845_v53 = vsel %vm1340_vm1, %v1661_v12, 0.0  ;;  %2564 = vst.msk [vmem:[%s3539_s14 + $0xe4] sm:$0xf] %vm2506_vm0, %v3009_v19  ;;  %v3041_v28 = vpack.c.bf16 %v3759_v47, %v3759_v47  ;;  %v1847_v20 = vsel %vm1340_vm1, %v1662_v4, 0.0  ;;  %v1458_v10 = vsel %vm1340_vm1, %v3227_v27, 0.0  ;;  %v4004_v12 = vpop.f32.mrb[56].mxu1 }
 0x178   : > { %v1457_v61 = vadd.f32 %v1456_v6, %v1455_v33  ;;  %v1846_v0 = vadd.f32 %v1845_v53, %v1844_v36  ;;  %v4007_v53 = vpop.f32.mrb[57].mxu1  ;;  %v1849_v39 = vsel %vm1340_vm1, %v1663_v60, 0.0 }
 0x179   : > { %v3230_v31 = vpop.f32.mrb[60].mxu0  ;;  %2596 = vst.msk [vmem:[%s3539_s14 + $0x164] sm:$0xf] %vm2506_vm0, %v3041_v28  ;;  %4555 = vst [vmem:[#allocation15_spill] sm:$0xff] %v4007_v53  ;;  %v4012_v37 = vpop.f32.mrb[58].mxu1 }
 0x17a   : > { %v3014_v7 = vpack.c.bf16 %v3230_v31, %v3230_v31  ;;  %v1069_v59 = vpop.f32.mrb[61].mxu0  ;;  %v1848_v22 = vadd.f32 %v1847_v20, %v1846_v0  ;;  %v1459_v19 = vadd.f32 %v1458_v10, %v1457_v61  ;;  %v4015_v20 = vpop.f32.mrb[59].mxu1  ;;  %v1666_v10 = vmul.f32 %v3230_v31, %v3230_v31 }
 0x17b   : > { %v1460_v33 = vsel %vm1340_vm1, %v1069_v59, 0.0  ;;  %v1664_v36 = vmul.f32 %v1069_v59, %v1069_v59  ;;  %v3231_v6 = vpop.f32.mrb[62].mxu0  ;;  %v3012_v27 = vpack.c.bf16 %v1069_v59, %v1069_v59 }
 0x17c   : > { %2569 = vst.msk [vmem:[%s3539_s14 + $0xf8] sm:$0xf] %vm2506_vm0, %v3014_v7  ;;  %v1072_v4 = vpop.f32.mrb[63].mxu0  ;;  %v1461_v28 = vadd.f32 %v1460_v33, %v1459_v19  ;;  %v1850_v47 = vadd.f32 %v1849_v39, %v1848_v22  ;;  %v3015_v0 = vpack.c.bf16 %v3231_v6, %v3231_v6  ;;  %v1668_v22 = vmul.f32 %v3560_v41, %v3560_v41 }
 0x17d   : > { %v1851_v61 = vsel %vm1340_vm1, %v1664_v36, 0.0  ;;  %2567 = vst.msk [vmem:[%s3539_s14 + $0xf0] sm:$0xf] %vm2506_vm0, %v3012_v27  ;;  %v1462_v60 = vsel %vm1340_vm1, %v1072_v4, 0.0  ;;  %v1665_v53 = vmul.f32 %v1072_v4, %v1072_v4  ;;  %v3013_v7 = vpack.c.bf16 %v1072_v4, %v1072_v4 }
 0x17e   : > { %v1852_v59 = vadd.f32 %v1851_v61, %v1850_v47  ;;  %2570 = vst.msk [vmem:[%s3539_s14 + $0xfc] sm:$0xf] %vm2506_vm0, %v3015_v0  ;;  %v1463_v19 = vadd.f32 %v1462_v60, %v1461_v28  ;;  %v3046_v33 = vpack.c.bf16 %v3780_v15, %v3780_v15  ;;  %v1464_v36 = vsel %vm1340_vm1, %v3230_v31, 0.0  ;;  %v4042_v60 = vpop.f32.mrb[60].mxu1 }
 0x17f   : > { %v1667_v39 = vmul.f32 %v3231_v6, %v3231_v6  ;;  %v1853_v27 = vsel %vm1340_vm1, %v1665_v53, 0.0  ;;  %2568 = vst.msk [vmem:[%s3539_s14 + $0xf4] sm:$0xf] %vm2506_vm0, %v3013_v7  ;;  %v3044_v47 = vpack.c.bf16 %v3783_v24, %v3783_v24  ;;  %v1855_v28 = vsel %vm1340_vm1, %v1666_v10, 0.0  ;;  %v4046_v10 = vpop.f32.mrb[61].mxu1 }
 0x180   : > { %v1465_v4 = vadd.f32 %v1464_v36, %v1463_v19  ;;  %v1854_v61 = vadd.f32 %v1853_v27, %v1852_v59  ;;  %2601 = vst.msk [vmem:[%s3539_s14 + $0x178] sm:$0xf] %vm2506_vm0, %v3046_v33  ;;  %v1466_v0 = vsel %vm1340_vm1, %v3231_v6, 0.0  ;;  %v1468_v31 = vsel %vm1340_vm1, %v3560_v41, 0.0  ;;  %v4056_v27 = vpop.f32.mrb[62].mxu1 }
 0x181   : > { %2599 = vst.msk [vmem:[%s3539_s14 + $0x170] sm:$0xf] %vm2506_vm0, %v3044_v47  ;;  %v3047_v53 = vpack.c.bf16 %v3788_v29, %v3788_v29  ;;  %v3045_v19 = vpack.c.bf16 %v3791_v40, %v3791_v40  ;;  %v1857_v6 = vsel %vm1340_vm1, %v1667_v39, 0.0  ;;  %v1859_v41 = vsel %vm1340_vm1, %v1668_v22, 0.0 }
 0x182   : > { %v1467_v7 = vadd.f32 %v1466_v0, %v1465_v4  ;;  %v1856_v59 = vadd.f32 %v1855_v28, %v1854_v61  ;;  %v1669_v33 = vmul.f32 %v3570_v49, %v3570_v49  ;;  %v3050_v36 = vpack.c.bf16 %v3812_v11, %v3812_v11  ;;  %v4060_v61 = vpop.f32.mrb[63].mxu1 }
 0x183   : > { %2602 = vst.msk [vmem:[%s3539_s14 + $0x17c] sm:$0xf] %vm2506_vm0, %v3047_v53  ;;  %2600 = vst.msk [vmem:[%s3539_s14 + $0x174] sm:$0xf] %vm2506_vm0, %v3045_v19  ;;  %v1670_v22 = vmul.f32 %v3557_v35, %v3557_v35  ;;  %v1470_v39 = vsel %vm1340_vm1, %v3570_v49, 0.0  ;;  %v3048_v28 = vpack.c.bf16 %v3815_v26, %v3815_v26  ;;  %v1472_v0 = vsel %vm1340_vm1, %v3557_v35, 0.0 }
 0x184   : > { %v1858_v47 = vadd.f32 %v1857_v6, %v1856_v59  ;;  %v1469_v4 = vadd.f32 %v1468_v31, %v1467_v7  ;;  %2605 = vst.msk [vmem:[%s3539_s14 + $0x188] sm:$0xf] %vm2506_vm0, %v3050_v36  ;;  %v3051_v7 = vpack.c.bf16 %v3820_v32, %v3820_v32  ;;  %v1671_v59 = vmul.f32 %v3564_v44, %v3564_v44 }
 0x185   : > { %v1861_v19 = vsel %vm1340_vm1, %v1669_v33, 0.0  ;;  %v1672_v49 = vmul.f32 %v3591_v9, %v3591_v9  ;;  %2603 = vst.msk [vmem:[%s3539_s14 + $0x180] sm:$0xf] %vm2506_vm0, %v3048_v28  ;;  %v3049_v6 = vpack.c.bf16 %v3823_v43, %v3823_v43  ;;  %v1863_v36 = vsel %vm1340_vm1, %v1670_v22, 0.0 }
 0x186   : > { %v1860_v31 = vadd.f32 %v1859_v41, %v1858_v47  ;;  %v1471_v53 = vadd.f32 %v1470_v39, %v1469_v4  ;;  %2606 = vst.msk [vmem:[%s3539_s14 + $0x18c] sm:$0xf] %vm2506_vm0, %v3051_v7  ;;  %v1474_v47 = vsel %vm1340_vm1, %v3564_v44, 0.0  ;;  %v1476_v33 = vsel %vm1340_vm1, %v3591_v9, 0.0 }
 0x187   : > { %2604 = vst.msk [vmem:[%s3539_s14 + $0x184] sm:$0xf] %vm2506_vm0, %v3049_v6  ;;  %v3054_v4 = vpack.c.bf16 %v3844_v17, %v3844_v17  ;;  %v1867_v22 = vsel %vm1340_vm1, %v1672_v49, 0.0  ;;  %v1673_v44 = vmul.f32 %v3599_v18, %v3599_v18  ;;  %v3055_v9 = vpack.c.bf16 %v3852_v48, %v3852_v48 }
 0x188   : > { %v1473_v35 = vadd.f32 %v1472_v0, %v1471_v53  ;;  %v1862_v41 = vadd.f32 %v1861_v19, %v1860_v31  ;;  %v3052_v0 = vpack.c.bf16 %v3847_v34, %v3847_v34  ;;  %v1865_v31 = vsel %vm1340_vm1, %v1671_v59, 0.0 }
 0x189   : > { %2609 = vst.msk [vmem:[%s3539_s14 + $0x198] sm:$0xf] %vm2506_vm0, %v3054_v4  ;;  %v1674_v19 = vmul.f32 %v3588_v3, %v3588_v3  ;;  %v1478_v59 = vsel %vm1340_vm1, %v3599_v18, 0.0  ;;  %2610 = vst.msk [vmem:[%s3539_s14 + $0x19c] sm:$0xf] %vm2506_vm0, %v3055_v9  ;;  %v3053_v49 = vpack.c.bf16 %v3855_v58, %v3855_v58  ;;  %v1480_v6 = vsel %vm1340_vm1, %v3588_v3, 0.0 }
 0x18a   : > { %v1864_v39 = vadd.f32 %v1863_v36, %v1862_v41  ;;  %v1475_v28 = vadd.f32 %v1474_v47, %v1473_v35  ;;  %2607 = vst.msk [vmem:[%s3539_s14 + $0x190] sm:$0xf] %vm2506_vm0, %v3052_v0  ;;  %v3058_v36 = vpack.c.bf16 %v3876_v42, %v3876_v42  ;;  %v1675_v47 = vmul.f32 %v3596_v13, %v3596_v13 }
 0x18b   : > { %v1676_v18 = vmul.f32 %v3623_v46, %v3623_v46  ;;  %2608 = vst.msk [vmem:[%s3539_s14 + $0x194] sm:$0xf] %vm2506_vm0, %v3053_v49  ;;  %v3056_v4 = vpack.c.bf16 %v3879_v62, %v3879_v62  ;;  %v1482_v0 = vsel %vm1340_vm1, %v3596_v13, 0.0  ;;  %v1677_v13 = vmul.f32 %v3631_v56, %v3631_v56 }
 0x18c   : > { %v1477_v53 = vadd.f32 %v1476_v33, %v1475_v28  ;;  %v1866_v7 = vadd.f32 %v1865_v31, %v1864_v39  ;;  %v1869_v33 = vsel %vm1340_vm1, %v1673_v44, 0.0  ;;  %2613 = vst.msk [vmem:[%s3539_s14 + $0x1a8] sm:$0xf] %vm2506_vm0, %v3058_v36  ;;  %v1871_v28 = vsel %vm1340_vm1, %v1674_v19, 0.0 }
 0x18d   : > { %v1484_v31 = vsel %vm1340_vm1, %v3623_v46, 0.0  ;;  %2611 = vst.msk [vmem:[%s3539_s14 + $0x1a0] sm:$0xf] %vm2506_vm0, %v3056_v4  ;;  %v1875_v19 = vsel %vm1340_vm1, %v1676_v18, 0.0  ;;  %v3062_v46 = vpack.c.bf16 %v3908_v16, %v3908_v16  ;;  %v1488_v36 = vsel %vm1340_vm1, %v3620_v38, 0.0 }
 0x18e   : > { %v1868_v35 = vadd.f32 %v1867_v22, %v1866_v7  ;;  %v1479_v41 = vadd.f32 %v1478_v59, %v1477_v53  ;;  %v3059_v22 = vpack.c.bf16 %v3884_v1, %v3884_v1  ;;  %v3057_v53 = vpack.c.bf16 %v3887_v2, %v3887_v2 }
 0x18f   : > { %v1873_v7 = vsel %vm1340_vm1, %v1675_v47, 0.0  ;;  %2617 = vst.msk [vmem:[%s3539_s14 + $0x1b8] sm:$0xf] %vm2506_vm0, %v3062_v46  ;;  %v3063_v18 = vpack.c.bf16 %v3916_v54, %v3916_v54  ;;  %v1679_v4 = vmul.f32 %v3628_v51, %v3628_v51 }
 0x190   : > { %v1481_v3 = vadd.f32 %v1480_v6, %v1479_v41  ;;  %v1870_v39 = vadd.f32 %v1869_v33, %v1868_v35  ;;  %2614 = vst.msk [vmem:[%s3539_s14 + $0x1ac] sm:$0xf] %vm2506_vm0, %v3059_v22  ;;  %2612 = vst.msk [vmem:[%s3539_s14 + $0x1a4] sm:$0xf] %vm2506_vm0, %v3057_v53  ;;  %v1678_v6 = vmul.f32 %v3620_v38, %v3620_v38  ;;  %v1486_v35 = vsel %vm1340_vm1, %v3631_v56, 0.0 }
 0x191   : > { %v3060_v41 = vpack.c.bf16 %v3911_v50, %v3911_v50  ;;  %v1680_v56 = vmul.f32 %v3655_v21, %v3655_v21  ;;  %2618 = vst.msk [vmem:[%s3539_s14 + $0x1bc] sm:$0xf] %vm2506_vm0, %v3063_v18  ;;  %v1492_v22 = vsel %vm1340_vm1, %v3655_v21, 0.0  ;;  %v3067_v21 = vpack.c.bf16 %v3948_v52, %v3948_v52 }
 0x192   : > { %v1872_v44 = vadd.f32 %v1871_v28, %v1870_v39  ;;  %v1483_v9 = vadd.f32 %v1482_v0, %v1481_v3  ;;  %v1877_v3 = vsel %vm1340_vm1, %v1677_v13, 0.0  ;;  %v3061_v39 = vpack.c.bf16 %v3919_v5, %v3919_v5 }
 0x193   : > { %2615 = vst.msk [vmem:[%s3539_s14 + $0x1b0] sm:$0xf] %vm2506_vm0, %v3060_v41  ;;  %v1879_v0 = vsel %vm1340_vm1, %v1678_v6, 0.0  ;;  %v1883_v13 = vsel %vm1340_vm1, %v1680_v56, 0.0  ;;  %v1494_v6 = vsel %vm1340_vm1, %v3663_v30, 0.0  ;;  %v1496_v41 = vsel %vm1340_vm1, %v3652_v14, 0.0 }
 0x194   : > { %v1485_v59 = vadd.f32 %v1484_v31, %v1483_v9  ;;  %v1874_v49 = vadd.f32 %v1873_v7, %v1872_v44  ;;  %v1490_v31 = vsel %vm1340_vm1, %v3628_v51, 0.0  ;;  %2616 = vst.msk [vmem:[%s3539_s14 + $0x1b4] sm:$0xf] %vm2506_vm0, %v3061_v39  ;;  %v3066_v44 = vpack.c.bf16 %v3940_v45, %v3940_v45  ;;  %2622 = vst.msk [vmem:[%s3539_s14 + $0x1cc] sm:$0xf] %vm2506_vm0, %v3067_v21 }
 0x195   : > { %v3064_v7 = vpack.c.bf16 %v3943_v8, %v3943_v8  ;;  %v1681_v51 = vmul.f32 %v3663_v30, %v3663_v30  ;;  %v1683_v18 = vmul.f32 %v3660_v25, %v3660_v25  ;;  %v1684_v30 = vmul.f32 %v3687_v63, %v3687_v63 }
 0x196   : > { %v1876_v47 = vadd.f32 %v1875_v19, %v1874_v49  ;;  %v1487_v33 = vadd.f32 %v1486_v35, %v1485_v59  ;;  %v1881_v19 = vsel %vm1340_vm1, %v1679_v4, 0.0  ;;  %2621 = vst.msk [vmem:[%s3539_s14 + $0x1c8] sm:$0xf] %vm2506_vm0, %v3066_v44  ;;  %v1682_v49 = vmul.f32 %v3652_v14, %v3652_v14 }
 0x197   : > { %2619 = vst.msk [vmem:[%s3539_s14 + $0x1c0] sm:$0xf] %vm2506_vm0, %v3064_v7  ;;  %v3065_v35 = vpack.c.bf16 %v3951_v55, %v3951_v55  ;;  %v1885_v4 = vsel %vm1340_vm1, %v1681_v51, 0.0  ;;  %v1889_v7 = vsel %vm1340_vm1, %v1683_v18, 0.0  ;;  %v4561_v18 = vld [vmem:[#allocation3_spill] sm:$0xff] }
 0x198   : > { %v1489_v38 = vadd.f32 %v1488_v36, %v1487_v33  ;;  %v1878_v28 = vadd.f32 %v1877_v3, %v1876_v47  ;;  %v3070_v33 = vpack.c.bf16 %v3972_v57, %v3972_v57  ;;  %v4556_v3 = vld [vmem:[#allocation13_spill] sm:$0xff] }
 0x199   : > { %2620 = vst.msk [vmem:[%s3539_s14 + $0x1c4] sm:$0xf] %vm2506_vm0, %v3065_v35  ;;  %v3068_v56 = vpack.c.bf16 %v4556_v3, %v4556_v3 }
 0x19a   : > { %v1880_v9 = vadd.f32 %v1879_v0, %v1878_v28  ;;  %v1491_v53 = vadd.f32 %v1490_v31, %v1489_v38  ;;  %2625 = vst.msk [vmem:[%s3539_s14 + $0x1d8] sm:$0xf] %vm2506_vm0, %v3070_v33  ;;  %v1887_v38 = vsel %vm1340_vm1, %v1682_v49, 0.0  ;;  %v1498_v28 = vsel %vm1340_vm1, %v3660_v25, 0.0 }
 0x19b   : > { %v1500_v0 = vsel %vm1340_vm1, %v3687_v63, 0.0  ;;  %2623 = vst.msk [vmem:[%s3539_s14 + $0x1d0] sm:$0xf] %vm2506_vm0, %v3068_v56  ;;  %v3071_v31 = vpack.c.bf16 %v3980_v23, %v3980_v23  ;;  %v3074_v63 = vpack.c.bf16 %v4004_v12, %v4004_v12  ;;  %v3075_v33 = vpack.c.bf16 %v4012_v37, %v4012_v37  ;;  %v4562_v56 = vld [vmem:[#allocation6_spill] sm:$0xff] }
 0x19c   : > { %v1493_v46 = vadd.f32 %v1492_v22, %v1491_v53  ;;  %v1882_v59 = vadd.f32 %v1881_v19, %v1880_v9  ;;  %v4557_v9 = vld [vmem:[#allocation14_spill] sm:$0xff]  ;;  %v1891_v19 = vsel %vm1340_vm1, %v1684_v30, 0.0 }
 0x19d   : > { %v3069_v53 = vpack.c.bf16 %v4557_v9, %v4557_v9  ;;  %2626 = vst.msk [vmem:[%s3539_s14 + $0x1dc] sm:$0xf] %vm2506_vm0, %v3071_v31  ;;  %2629 = vst.msk [vmem:[%s3539_s14 + $0x1e8] sm:$0xf] %vm2506_vm0, %v3074_v63  ;;  %v1506_v31 = vsel %vm1340_vm1, %v4561_v18, 0.0  ;;  %v4563_v63 = vld [vmem:[#allocation8_spill] sm:$0xff] }
 0x19e   : > { %v1884_v36 = vadd.f32 %v1883_v13, %v1882_v59  ;;  %v1495_v47 = vadd.f32 %v1494_v6, %v1493_v46  ;;  %v4558_v13 = vld [vmem:[#allocation4_spill] sm:$0xff]  ;;  %v4559_v46 = vld [vmem:[#allocation2_spill] sm:$0xff]  ;;  %v4560_v6 = vld [vmem:[#allocation15_spill] sm:$0xff]  ;;  %2630 = vst.msk [vmem:[%s3539_s14 + $0x1ec] sm:$0xf] %vm2506_vm0, %v3075_v33 }
 0x19f   : > { %v1685_v25 = vmul.f32 %v4558_v13, %v4558_v13  ;;  %2624 = vst.msk [vmem:[%s3539_s14 + $0x1d4] sm:$0xf] %vm2506_vm0, %v3069_v53  ;;  %v1686_v59 = vmul.f32 %v4559_v46, %v4559_v46  ;;  %v1502_v49 = vsel %vm1340_vm1, %v4558_v13, 0.0  ;;  %v3072_v35 = vpack.c.bf16 %v4560_v6, %v4560_v6 }
 0x1a0   : > { %v1497_v14 = vadd.f32 %v1496_v41, %v1495_v47  ;;  %v1886_v39 = vadd.f32 %v1885_v4, %v1884_v36  ;;  %v1504_v41 = vsel %vm1340_vm1, %v4559_v46, 0.0  ;;  %v1687_v4 = vmul.f32 %v4561_v18, %v4561_v18 }
 0x1a1   : > { %v1893_v30 = vsel %vm1340_vm1, %v1685_v25, 0.0  ;;  %2627 = vst.msk [vmem:[%s3539_s14 + $0x1e0] sm:$0xf] %vm2506_vm0, %v3072_v35 }
 0x1a2   : > { %v1888_v22 = vadd.f32 %v1887_v38, %v1886_v39  ;;  %v1499_v44 = vadd.f32 %v1498_v28, %v1497_v14  ;;  %v1688_v14 = vmul.f32 %v4562_v56, %v4562_v56  ;;  %v3073_v39 = vpack.c.bf16 %v4015_v20, %v4015_v20 }
 0x1a3   : > { %v1897_v13 = vsel %vm1340_vm1, %v1687_v4, 0.0  ;;  %v4565_v4 = vld [vmem:[#allocation7_spill] sm:$0xff] }
 0x1a4   : > { %v1501_v51 = vadd.f32 %v1500_v0, %v1499_v44  ;;  %v1890_v21 = vadd.f32 %v1889_v7, %v1888_v22  ;;  %v1895_v0 = vsel %vm1340_vm1, %v1686_v59, 0.0  ;;  %v1508_v22 = vsel %vm1340_vm1, %v4562_v56, 0.0  ;;  %2628 = vst.msk [vmem:[%s3539_s14 + $0x1e4] sm:$0xf] %vm2506_vm0, %v3073_v39 }
 0x1a5   : > { %v3078_v44 = vpack.c.bf16 %v4042_v60, %v4042_v60  ;;  %v1899_v25 = vsel %vm1340_vm1, %v1688_v14, 0.0  ;;  %v4566_v14 = vld [vmem:[#allocation10_spill] sm:$0xff] }
 0x1a6   : > { %v1892_v36 = vadd.f32 %v1891_v19, %v1890_v21  ;;  %v1503_v47 = vadd.f32 %v1502_v49, %v1501_v51  ;;  %v3076_v19 = vpack.c.bf16 %v4046_v10, %v4046_v10  ;;  %v1689_v51 = vmul.f32 %v4563_v63, %v4563_v63  ;;  %v4564_v49 = vld [vmem:[#allocation5_spill] sm:$0xff] }
 0x1a7   : > { %2633 = vst.msk [vmem:[%s3539_s14 + $0x1f8] sm:$0xf] %vm2506_vm0, %v3078_v44  ;;  %v3079_v21 = vpack.c.bf16 %v4056_v27, %v4056_v27  ;;  %v1690_v35 = vmul.f32 %v4564_v49, %v4564_v49  ;;  %v1512_v18 = vsel %vm1340_vm1, %v4564_v49, 0.0  ;;  %v1692_v39 = vmul.f32 %v4566_v14, %v4566_v14 }
 0x1a8   : > { %v1505_v38 = vadd.f32 %v1504_v41, %v1503_v47  ;;  %v1894_v28 = vadd.f32 %v1893_v30, %v1892_v36  ;;  %2631 = vst.msk [vmem:[%s3539_s14 + $0x1f0] sm:$0xf] %vm2506_vm0, %v3076_v19  ;;  %v1510_v41 = vsel %vm1340_vm1, %v4563_v63, 0.0  ;;  %v3077_v36 = vpack.c.bf16 %v4060_v61, %v4060_v61 }
 0x1a9   : > { %2634 = vst.msk [vmem:[%s3539_s14 + $0x1fc] sm:$0xf] %vm2506_vm0, %v3079_v21  ;;  %v1691_v30 = vmul.f32 %v4565_v4, %v4565_v4  ;;  %v1901_v56 = vsel %vm1340_vm1, %v1689_v51, 0.0  ;;  %v1907_v19 = vsel %vm1340_vm1, %v1692_v39, 0.0  ;;  %v4568_v21 = vld [vmem:[#allocation9_spill] sm:$0xff]  ;;  %v1524_v39 = vsel %vm1340_vm1, %v3783_v24, 0.0 }
 0x1aa   : > { %v1896_v53 = vadd.f32 %v1895_v0, %v1894_v28  ;;  %v1507_v7 = vadd.f32 %v1506_v31, %v1505_v38  ;;  %2632 = vst.msk [vmem:[%s3539_s14 + $0x1f4] sm:$0xf] %vm2506_vm0, %v3077_v36  ;;  %v1903_v0 = vsel %vm1340_vm1, %v1690_v35, 0.0  ;;  %v1514_v31 = vsel %vm1340_vm1, %v4565_v4, 0.0  ;;  %v4569_v36 = vld [vmem:[#allocation11_spill] sm:$0xff] }
 0x1ac   : > { %v1509_v46 = vadd.f32 %v1508_v22, %v1507_v7  ;;  %v1898_v59 = vadd.f32 %v1897_v13, %v1896_v53  ;;  %v1516_v22 = vsel %vm1340_vm1, %v4566_v14, 0.0  ;;  %v1905_v7 = vsel %vm1340_vm1, %v1691_v30, 0.0  ;;  %v4567_v13 = vld [vmem:[#allocation12_spill] sm:$0xff] }
 0x1ad   : > { %v1522_v14 = vsel %vm1340_vm1, %v4569_v36, 0.0 }
 0x1ae   : > { %v1900_v47 = vadd.f32 %v1899_v25, %v1898_v59  ;;  %v1511_v33 = vadd.f32 %v1510_v41, %v1509_v46  ;;  %v1693_v25 = vmul.f32 %v4567_v13, %v4567_v13  ;;  %v1694_v46 = vmul.f32 %v4568_v21, %v4568_v21 }
 0x1af   : > { %v1518_v59 = vsel %vm1340_vm1, %v4567_v13, 0.0  ;;  %v1520_v41 = vsel %vm1340_vm1, %v4568_v21, 0.0  ;;  %v1700_v21 = vmul.f32 %v3815_v26, %v3815_v26 }
 0x1b0   : > { %v1513_v38 = vadd.f32 %v1512_v18, %v1511_v33  ;;  %v1902_v28 = vadd.f32 %v1901_v56, %v1900_v47  ;;  %v1695_v47 = vmul.f32 %v4569_v36, %v4569_v36  ;;  %v1909_v33 = vsel %vm1340_vm1, %v1693_v25, 0.0 }
 0x1b1   : > { %v1696_v18 = vmul.f32 %v3783_v24, %v3783_v24  ;;  %v1911_v56 = vsel %vm1340_vm1, %v1694_v46, 0.0  ;;  %v1528_v24 = vsel %vm1340_vm1, %v3780_v15, 0.0 }
 0x1b2   : > { %v1904_v44 = vadd.f32 %v1903_v0, %v1902_v28  ;;  %v1515_v53 = vadd.f32 %v1514_v31, %v1513_v38  ;;  %v1913_v0 = vsel %vm1340_vm1, %v1695_v47, 0.0  ;;  %v1923_v47 = vsel %vm1340_vm1, %v1700_v21, 0.0 }
 0x1b3   : > { %v1915_v31 = vsel %vm1340_vm1, %v1696_v18, 0.0 }
 0x1b4   : > { %v1517_v63 = vadd.f32 %v1516_v22, %v1515_v53  ;;  %v1906_v51 = vadd.f32 %v1905_v7, %v1904_v44  ;;  %v1697_v22 = vmul.f32 %v3791_v40, %v3791_v40  ;;  %v1698_v7 = vmul.f32 %v3780_v15, %v3780_v15 }
 0x1b6   : > { %v1908_v49 = vadd.f32 %v1907_v19, %v1906_v51  ;;  %v1519_v35 = vadd.f32 %v1518_v59, %v1517_v63  ;;  %v1526_v19 = vsel %vm1340_vm1, %v3791_v40, 0.0  ;;  %v1699_v63 = vmul.f32 %v3788_v29, %v3788_v29 }
 0x1b7   : > { %v1917_v51 = vsel %vm1340_vm1, %v1697_v22, 0.0  ;;  %v1530_v40 = vsel %vm1340_vm1, %v3788_v29, 0.0  ;;  %v1534_v29 = vsel %vm1340_vm1, %v3823_v43, 0.0 }
 0x1b8   : > { %v1521_v4 = vadd.f32 %v1520_v41, %v1519_v35  ;;  %v1910_v30 = vadd.f32 %v1909_v33, %v1908_v49  ;;  %v1919_v49 = vsel %vm1340_vm1, %v1698_v7, 0.0  ;;  %v1532_v35 = vsel %vm1340_vm1, %v3815_v26, 0.0 }
 0x1b9   : > { %v1921_v36 = vsel %vm1340_vm1, %v1699_v63, 0.0  ;;  %v1701_v33 = vmul.f32 %v3823_v43, %v3823_v43  ;;  %v1536_v26 = vsel %vm1340_vm1, %v3812_v11, 0.0  ;;  %v1538_v43 = vsel %vm1340_vm1, %v3820_v32, 0.0 }
 0x1ba   : > { %v1912_v38 = vadd.f32 %v1911_v56, %v1910_v30  ;;  %v1523_v28 = vadd.f32 %v1522_v14, %v1521_v4  ;;  %v1702_v30 = vmul.f32 %v3812_v11, %v3812_v11  ;;  %v1706_v63 = vmul.f32 %v3844_v17, %v3844_v17 }
 0x1bc   : > { %v1525_v44 = vadd.f32 %v1524_v39, %v1523_v28  ;;  %v1914_v53 = vadd.f32 %v1913_v0, %v1912_v38  ;;  %v1703_v39 = vmul.f32 %v3820_v32, %v3820_v32  ;;  %v1925_v38 = vsel %vm1340_vm1, %v1701_v33, 0.0 }
 0x1bd   : > { %v1704_v28 = vmul.f32 %v3847_v34, %v3847_v34  ;;  %v1927_v22 = vsel %vm1340_vm1, %v1702_v30, 0.0  ;;  %v1542_v32 = vsel %vm1340_vm1, %v3855_v58, 0.0 }
 0x1be   : > { %v1916_v13 = vadd.f32 %v1915_v31, %v1914_v53  ;;  %v1527_v25 = vadd.f32 %v1526_v19, %v1525_v44  ;;  %v1540_v44 = vsel %vm1340_vm1, %v3847_v34, 0.0  ;;  %v1929_v7 = vsel %vm1340_vm1, %v1703_v39, 0.0 }
 0x1bf   : > { %v1931_v19 = vsel %vm1340_vm1, %v1704_v28, 0.0  ;;  %v1544_v34 = vsel %vm1340_vm1, %v3844_v17, 0.0 }
 0x1c0   : > { %v1529_v46 = vadd.f32 %v1528_v24, %v1527_v25  ;;  %v1918_v59 = vadd.f32 %v1917_v51, %v1916_v13  ;;  %v1705_v13 = vmul.f32 %v3855_v58, %v3855_v58  ;;  %v1546_v58 = vsel %vm1340_vm1, %v3852_v48, 0.0 }
 0x1c2   : > { %v1920_v41 = vadd.f32 %v1919_v49, %v1918_v59  ;;  %v1531_v15 = vadd.f32 %v1530_v40, %v1529_v46  ;;  %v1707_v46 = vmul.f32 %v3852_v48, %v3852_v48  ;;  %v1933_v59 = vsel %vm1340_vm1, %v1705_v13, 0.0 }
 0x1c3   : > { %v1708_v49 = vmul.f32 %v3879_v62, %v3879_v62  ;;  %v1550_v48 = vsel %vm1340_vm1, %v3887_v2, 0.0  ;;  %v1714_v13 = vmul.f32 %v3908_v16, %v3908_v16 }
 0x1c4   : > { %v1533_v18 = vadd.f32 %v1532_v35, %v1531_v15  ;;  %v1922_v4 = vadd.f32 %v1921_v36, %v1920_v41  ;;  %v1935_v41 = vsel %vm1340_vm1, %v1706_v63, 0.0  ;;  %v1548_v15 = vsel %vm1340_vm1, %v3879_v62, 0.0 }
 0x1c5   : > { %v1939_v33 = vsel %vm1340_vm1, %v1708_v49, 0.0  ;;  %v1552_v62 = vsel %vm1340_vm1, %v3876_v42, 0.0  ;;  %v1715_v63 = vmul.f32 %v3916_v54, %v3916_v54 }
 0x1c6   : > { %v1924_v56 = vadd.f32 %v1923_v47, %v1922_v4  ;;  %v1535_v14 = vadd.f32 %v1534_v29, %v1533_v18  ;;  %v1937_v47 = vsel %vm1340_vm1, %v1707_v46, 0.0  ;;  %v1709_v18 = vmul.f32 %v3887_v2, %v3887_v2 }
 0x1c7   : > { %v1710_v29 = vmul.f32 %v3876_v42, %v3876_v42  ;;  %v1554_v2 = vsel %vm1340_vm1, %v3884_v1, 0.0  ;;  %v1951_v46 = vsel %vm1340_vm1, %v1714_v13, 0.0 }
 0x1c8   : > { %v1537_v0 = vadd.f32 %v1536_v26, %v1535_v14  ;;  %v1926_v31 = vadd.f32 %v1925_v38, %v1924_v56  ;;  %v1711_v26 = vmul.f32 %v3884_v1, %v3884_v1  ;;  %v1941_v39 = vsel %vm1340_vm1, %v1709_v18, 0.0 }
 0x1c9   : > { %v1712_v38 = vmul.f32 %v3911_v50, %v3911_v50  ;;  %v1558_v1 = vsel %vm1340_vm1, %v3919_v5, 0.0 }
 0x1ca   : > { %v1928_v53 = vadd.f32 %v1927_v22, %v1926_v31  ;;  %v1539_v11 = vadd.f32 %v1538_v43, %v1537_v0  ;;  %v1943_v31 = vsel %vm1340_vm1, %v1710_v29, 0.0  ;;  %v1556_v22 = vsel %vm1340_vm1, %v3911_v50, 0.0 }
 0x1cb   : > { %v1560_v50 = vsel %vm1340_vm1, %v3908_v16, 0.0 }
 0x1cc   : > { %v1541_v25 = vadd.f32 %v1540_v44, %v1539_v11  ;;  %v1930_v24 = vadd.f32 %v1929_v7, %v1928_v53  ;;  %v1945_v44 = vsel %vm1340_vm1, %v1711_v26, 0.0  ;;  %v1947_v53 = vsel %vm1340_vm1, %v1712_v38, 0.0 }
 0x1cd   : > { %v1713_v11 = vmul.f32 %v3919_v5, %v3919_v5  ;;  %v1562_v5 = vsel %vm1340_vm1, %v3916_v54, 0.0  ;;  %v1566_v54 = vsel %vm1340_vm1, %v3951_v55, 0.0 }
 0x1ce   : > { %v1932_v51 = vadd.f32 %v1931_v19, %v1930_v24  ;;  %v1543_v21 = vadd.f32 %v1542_v32, %v1541_v25 }
 0x1cf   : > { %v1949_v32 = vsel %vm1340_vm1, %v1713_v11, 0.0 }
 0x1d0   : > { %v1545_v40 = vadd.f32 %v1544_v34, %v1543_v21  ;;  %v1934_v35 = vadd.f32 %v1933_v59, %v1932_v51  ;;  %v1716_v51 = vmul.f32 %v3943_v8, %v3943_v8  ;;  %v1564_v59 = vsel %vm1340_vm1, %v3943_v8, 0.0 }
 0x1d1   : > { %v1568_v8 = vsel %vm1340_vm1, %v3940_v45, 0.0 }
 0x1d2   : > { %v1936_v36 = vadd.f32 %v1935_v41, %v1934_v35  ;;  %v1547_v17 = vadd.f32 %v1546_v58, %v1545_v40  ;;  %v1953_v40 = vsel %vm1340_vm1, %v1715_v63, 0.0  ;;  %v1955_v35 = vsel %vm1340_vm1, %v1716_v51, 0.0 }
 0x1d3   : > { %v1717_v41 = vmul.f32 %v3951_v55, %v3951_v55  ;;  %v1570_v55 = vsel %vm1340_vm1, %v3948_v52, 0.0  ;;  %v1726_v63 = vmul.f32 %v4004_v12, %v4004_v12 }
 0x1d4   : > { %v1549_v4 = vadd.f32 %v1548_v15, %v1547_v17  ;;  %v1938_v30 = vadd.f32 %v1937_v47, %v1936_v36  ;;  %v1718_v36 = vmul.f32 %v3940_v45, %v3940_v45 }
 0x1d5   : > { %v1957_v18 = vsel %vm1340_vm1, %v1717_v41, 0.0 }
 0x1d6   : > { %v1940_v56 = vadd.f32 %v1939_v33, %v1938_v30  ;;  %v1551_v14 = vadd.f32 %v1550_v48, %v1549_v4  ;;  %v1719_v33 = vmul.f32 %v3948_v52, %v3948_v52  ;;  %v1720_v4 = vmul.f32 %v4556_v3, %v4556_v3 }
 0x1d7   : > { %v1959_v48 = vsel %vm1340_vm1, %v1718_v36, 0.0  ;;  %v1574_v52 = vsel %vm1340_vm1, %v4557_v9, 0.0 }
 0x1d8   : > { %v1553_v28 = vadd.f32 %v1552_v62, %v1551_v14  ;;  %v1942_v0 = vadd.f32 %v1941_v39, %v1940_v56  ;;  %v1572_v56 = vsel %vm1340_vm1, %v4556_v3, 0.0  ;;  %v1961_v62 = vsel %vm1340_vm1, %v1719_v33, 0.0 }
 0x1d9   : > { %v1963_v26 = vsel %vm1340_vm1, %v1720_v4, 0.0  ;;  %v1721_v39 = vmul.f32 %v4557_v9, %v4557_v9  ;;  %v1576_v3 = vsel %vm1340_vm1, %v3972_v57, 0.0  ;;  %v1578_v9 = vsel %vm1340_vm1, %v3980_v23, 0.0 }
 0x1da   : > { %v1944_v43 = vadd.f32 %v1943_v31, %v1942_v0  ;;  %v1555_v42 = vadd.f32 %v1554_v2, %v1553_v28  ;;  %v1722_v0 = vmul.f32 %v3972_v57, %v3972_v57 }
 0x1dc   : > { %v1557_v7 = vadd.f32 %v1556_v22, %v1555_v42  ;;  %v1946_v19 = vadd.f32 %v1945_v44, %v1944_v43  ;;  %v1723_v22 = vmul.f32 %v3980_v23, %v3980_v23  ;;  %v1965_v43 = vsel %vm1340_vm1, %v1721_v39, 0.0 }
 0x1dd   : > { %v1724_v42 = vmul.f32 %v4560_v6, %v4560_v6  ;;  %v1967_v11 = vsel %vm1340_vm1, %v1722_v0, 0.0  ;;  %v1582_v23 = vsel %vm1340_vm1, %v4015_v20, 0.0 }
 0x1de   : > { %v1948_v25 = vadd.f32 %v1947_v53, %v1946_v19  ;;  %v1559_v24 = vadd.f32 %v1558_v1, %v1557_v7  ;;  %v1580_v7 = vsel %vm1340_vm1, %v4560_v6, 0.0  ;;  %v1969_v13 = vsel %vm1340_vm1, %v1723_v22, 0.0 }
 0x1df   : > { %v1971_v1 = vsel %vm1340_vm1, %v1724_v42, 0.0  ;;  %v1584_v6 = vsel %vm1340_vm1, %v4004_v12, 0.0 }
 0x1e0   : > { %v1561_v21 = vadd.f32 %v1560_v50, %v1559_v24  ;;  %v1950_v34 = vadd.f32 %v1949_v32, %v1948_v25  ;;  %v1725_v25 = vmul.f32 %v4015_v20, %v4015_v20  ;;  %v1586_v20 = vsel %vm1340_vm1, %v4012_v37, 0.0 }
 0x1e2   : > { %v1952_v49 = vadd.f32 %v1951_v46, %v1950_v34  ;;  %v1563_v16 = vadd.f32 %v1562_v5, %v1561_v21  ;;  %v1727_v21 = vmul.f32 %v4012_v37, %v4012_v37  ;;  %v1973_v34 = vsel %vm1340_vm1, %v1725_v25, 0.0 }
 0x1e3   : > { %v1728_v46 = vmul.f32 %v4046_v10, %v4046_v10  ;;  %v1590_v37 = vsel %vm1340_vm1, %v4060_v61, 0.0 }
 0x1e4   : > { %v1565_v58 = vadd.f32 %v1564_v59, %v1563_v16  ;;  %v1954_v15 = vadd.f32 %v1953_v40, %v1952_v49  ;;  %v1975_v49 = vsel %vm1340_vm1, %v1726_v63, 0.0  ;;  %v1588_v16 = vsel %vm1340_vm1, %v4046_v10, 0.0 }
 0x1e5   : > { %v1979_v41 = vsel %vm1340_vm1, %v1728_v46, 0.0 }
 0x1e6   : > { %v1956_v17 = vadd.f32 %v1955_v35, %v1954_v15  ;;  %v1567_v47 = vadd.f32 %v1566_v54, %v1565_v58  ;;  %v1977_v35 = vsel %vm1340_vm1, %v1727_v21, 0.0  ;;  %v1729_v58 = vmul.f32 %v4060_v61, %v4060_v61 }
 0x1e7   : > { %v1730_v54 = vmul.f32 %v4042_v60, %v4042_v60 }
 0x1e8   : > { %v1569_v30 = vadd.f32 %v1568_v8, %v1567_v47  ;;  %v1958_v29 = vadd.f32 %v1957_v18, %v1956_v17  ;;  %v1592_v47 = vsel %vm1340_vm1, %v4042_v60, 0.0  ;;  %v1731_v8 = vmul.f32 %v4056_v27, %v4056_v27 }
 0x1e9   : > { %v1981_v33 = vsel %vm1340_vm1, %v1729_v58, 0.0 }
 0x1ea   : > { %v1960_v14 = vadd.f32 %v1959_v48, %v1958_v29  ;;  %v1571_v45 = vadd.f32 %v1570_v55, %v1569_v30  ;;  %v1983_v30 = vsel %vm1340_vm1, %v1730_v54, 0.0  ;;  %v1594_v29 = vsel %vm1340_vm1, %v4056_v27, 0.0 }
 0x1eb   : > { %v1985_v55 = vsel %vm1340_vm1, %v1731_v8, 0.0 }
 0x1ec   : > { %v1573_v38 = vadd.f32 %v1572_v56, %v1571_v45  ;;  %v1962_v28 = vadd.f32 %v1961_v62, %v1960_v14 }
 0x1ee   : > { %v1964_v31 = vadd.f32 %v1963_v26, %v1962_v28  ;;  %v1575_v2 = vadd.f32 %v1574_v52, %v1573_v38 }
 0x1f0   : > { %v1577_v44 = vadd.f32 %v1576_v3, %v1575_v2  ;;  %v1966_v53 = vadd.f32 %v1965_v43, %v1964_v31 }
 0x1f2   : > { %v1968_v19 = vadd.f32 %v1967_v11, %v1966_v53  ;;  %v1579_v57 = vadd.f32 %v1578_v9, %v1577_v44 }
 0x1f4   : > { %v1581_v24 = vadd.f32 %v1580_v7, %v1579_v57  ;;  %v1970_v50 = vadd.f32 %v1969_v13, %v1968_v19 }
 0x1f6   : > { %v1972_v32 = vadd.f32 %v1971_v1, %v1970_v50  ;;  %v1583_v51 = vadd.f32 %v1582_v23, %v1581_v24 }
 0x1f8   : > { %v1585_v5 = vadd.f32 %v1584_v6, %v1583_v51  ;;  %v1974_v59 = vadd.f32 %v1973_v34, %v1972_v32 }
 0x1fa   : > { %v1976_v40 = vadd.f32 %v1975_v49, %v1974_v59  ;;  %v1587_v12 = vadd.f32 %v1586_v20, %v1585_v5 }
 0x1fc   : > { %v1589_v15 = vadd.f32 %v1588_v16, %v1587_v12  ;;  %v1978_v36 = vadd.f32 %v1977_v35, %v1976_v40 }
 0x1fe   : > { %v1980_v17 = vadd.f32 %v1979_v41, %v1978_v36  ;;  %v1591_v10 = vadd.f32 %v1590_v37, %v1589_v15 }
 0x200   : > { %v1593_v18 = vadd.f32 %v1592_v47, %v1591_v10  ;;  %v1982_v4 = vadd.f32 %v1981_v33, %v1980_v17 }
 0x202   : > { %v1595_v48 = vadd.f32 %v1594_v29, %v1593_v18  ;;  %v1984_v61 = vadd.f32 %v1983_v30, %v1982_v4 }
 0x204   : > { %v1596_v56 = vrot.slane %v1595_v48, 4  ;;  %v1986_v14 = vadd.f32 %v1985_v55, %v1984_v61 }
 0x206   : > { %v1597_v60 = vadd.f32 %v1596_v56, %v1595_v48  ;;  %v1987_v45 = vrot.slane %v1986_v14, 4 }
 0x208   : > { %v1598_v62 = vrot.slane %v1597_v60, 2  ;;  %v1988_v26 = vadd.f32 %v1987_v45, %v1986_v14 }
 0x20a   : > { %v1599_v39 = vadd.f32 %v1598_v62, %v1597_v60  ;;  %v1989_v38 = vrot.slane %v1988_v26, 2 }
 0x20c   : > { %v1600_v28 = vrot.slane %v1599_v39, 1  ;;  %v1990_v0 = vadd.f32 %v1989_v38, %v1988_v26 }
 0x20e   : > { %v1601_v27 = vadd.f32 %v1600_v28, %v1599_v39  ;;  %v1991_v52 = vrot.slane %v1990_v0, 1 }
 0x210   : > { %1603 = vst.msk [vmem:[%s214_s19] sm:$0x1] %vm1602_vm2, %v1601_v27  ;;  %v1992_v31 = vadd.f32 %v1991_v52, %v1990_v0 }
 0x212   : > { %1993 = vst.msk [vmem:[%s217_s22] sm:$0x1] %vm1602_vm2, %v1992_v31 }
 0x213 PF: > { %s15_s15 = sadd.s32 1, %s3398_s15  }
 0x214   : > { %p12_p5 = scmp.ge.s32.totalorder %s15_s15, 4  }
 0x216   :  { %14 = sbr.rel (!%p12_p5) target bundleno = 1 (0x1), region = 82 }

// kernel: tile.43
= control target key start
LH: loop header
LB: loop body
LE: loop exit
PB: predicated region body
PF: predicated region fallthrough
CT: control target
= control target key end

     0   :  { %s28_s0 = inlined_call_operand.vmem [shape: f32[16], index: 0, kind: input, shape index: {}]   ;;  %s29_s1 = inlined_call_operand.vmem [shape: f32[16,16], index: 1, kind: output, shape index: {}]  }
   0x1   :  { %v4_v0 = vld [vmem:[%s28_s0] ss:$0 sm:$0xff] }
   0x2   :  { %5 = vst [vmem:[%s29_s1] sm:$0xff] %v4_v0  ;;  %8 = vst [vmem:[%s29_s1 + $0x8] sm:$0xff] %v4_v0 }

// kernel: tile.48
= control target key start
LH: loop header
LB: loop body
LE: loop exit
PB: predicated region body
PF: predicated region fallthrough
CT: control target
= control target key end

     0   :  { %s7_s6 = smov 3  ;;  %s21_s9 = smov 3  ;;  %vm4_vm0 = vcmask 130048   ;;  %vm11_vm1 = vcmask 1048448   ;;  %vm18_vm2 = vcmask 917248   ;;  %vm25_vm3 = vcmask 786048   ;;  %s128_s0 = inlined_call_operand.vmem [shape: f32[16,16], index: 0, kind: input, shape index: {}]   ;;  %s129_s1 = inlined_call_operand.vmem [shape: f32[1,256], index: 1, kind: output, shape index: {}]  }
   0x1   :  { %v66_v0 = vld [vmem:[%s128_s0 + $0x7] ss:$8 sm:%s7_s6]   ;;  %s81_s10 = smov 112   ;;  %v68_v1 = vld [vmem:[%s128_s0 + $0x5] ss:$8 sm:%s21_s9]   ;;  %s14_s13 = smov 3 }
   0x2   :  { %9 = vrot.lane.b32.xlu0 %v66_v0, %s81_s10  ;;  %s82_s14 = smov 80   ;;  %v67_v2 = vld [vmem:[%s128_s0 + $0x6] ss:$8 sm:%s14_s13]   ;;  %s28_s17 = smov 3  ;;  %vm32_vm4 = vcmask 654848   ;;  %vm39_vm5 = vcmask 523648  }
   0x3   :  { %23 = vrot.lane.b32.xlu1 %v68_v1, %s82_s14  ;;  %v69_v3 = vld [vmem:[%s128_s0 + $0x4] ss:$8 sm:%s28_s17]   ;;  %s35_s20 = smov 3  ;;  %s42_s21 = smov 3  ;;  %vm46_vm6 = vcmask 392448   ;;  %vm53_vm7 = vcmask 261248  }
   0x4   :  { %s83_s22 = smov 96   ;;  %s84_s23 = smov 64   ;;  %v70_v4 = vld [vmem:[%s128_s0 + $0x3] ss:$8 sm:%s35_s20]   ;;  %v71_v5 = vld [vmem:[%s128_s0 + $0x2] ss:$8 sm:%s42_s21]  }
   0x5   :  { %s2_s26 = smov 3  ;;  %s49_s29 = smov 3 }
   0x6   :  { %16 = vrot.lane.b32.xlu0 %v67_v2, %s83_s22  ;;  %v3_v6 = vld [vmem:[%s128_s0] ss:$8 sm:%s2_s26]   ;;  %s85_s3 = smov 48   ;;  %s86_s4 = smov 32  }
   0x7   :  { %30 = vrot.lane.b32.xlu1 %v69_v3, %s84_s23  ;;  %5 = vst.msk [vmem:[#allocation0] ss:$8 sm:$0x3] %vm4_vm0, %v3_v6   ;;  %v72_v7 = vld [vmem:[%s128_s0 + $0x1] ss:$8 sm:%s49_s29]   ;;  %s87_s0 = smov 16  }
   0xa   :  { %37 = vrot.lane.b32.xlu0 %v70_v4, %s85_s3 }
   0xb   :  { %44 = vrot.lane.b32.xlu1 %v71_v5, %s86_s4 }
   0xe   :  { %51 = vrot.lane.b32.xlu0 %v72_v7, %s87_s0 }
  0x74   :  { %v10_v8 = vpop.permute.xlu0 %9  }
  0x75   :  { %12 = vst.msk [vmem:[#allocation0] ss:$8 sm:$0x3] %vm11_vm1, %v10_v8   ;;  %v24_v9 = vpop.permute.xlu1 %23  }
  0x78   :  { %v17_v10 = vpop.permute.xlu0 %16  }
  0x79   :  { %19 = vst.msk [vmem:[#allocation0] ss:$8 sm:$0x3] %vm18_vm2, %v17_v10   ;;  %v31_v11 = vpop.permute.xlu1 %30  }
  0x7a   :  { %26 = vst.msk [vmem:[#allocation0] ss:$8 sm:$0x3] %vm25_vm3, %v24_v9  }
  0x7b   :  { %33 = vst.msk [vmem:[#allocation0] ss:$8 sm:$0x3] %vm32_vm4, %v31_v11  }
  0x7c   :  { %v38_v12 = vpop.permute.xlu0 %37  }
  0x7d   :  { %40 = vst.msk [vmem:[#allocation0] ss:$8 sm:$0x3] %vm39_vm5, %v38_v12   ;;  %v45_v13 = vpop.permute.xlu1 %44  }
  0x7e   :  { %47 = vst.msk [vmem:[#allocation0] ss:$8 sm:$0x3] %vm46_vm6, %v45_v13  }
  0x80   :  { %v52_v14 = vpop.permute.xlu0 %51  }
  0x81   :  { %54 = vst.msk [vmem:[#allocation0] ss:$8 sm:$0x3] %vm53_vm7, %v52_v14  }
  0x88   :  { %v58_v15 = vld [vmem:[#allocation0] sm:$0x1]  ;;  %v62_v16 = vld [vmem:[#allocation0 + $0x8] sm:$0x1] }
  0x89   :  { %60 = vst [vmem:[%s129_s1] sm:$0x1] %v58_v15  ;;  %73 = vst [vmem:[%s129_s1 + $0x1] sm:$0x1] %v62_v16 }

// kernel: netD_forward.8
= control target key start
LH: loop header
LB: loop body
LE: loop exit
PB: predicated region body
PF: predicated region fallthrough
CT: control target
= control target key end

     0   :  { %v2218_v0 = vmov 0   ;;  %v215_v3 = vlaneseq  ;;  %s3630_s1 = inlined_call_operand.vmem [shape: bf16[256,32], index: 1, kind: input, shape index: {}]   ;;  %s3631_s0 = inlined_call_operand.vmem [shape: bf16[512,256], index: 0, kind: input, shape index: {}]   ;;  %s3632_s2 = inlined_call_operand.vmem [shape: f32[1,256], index: 2, kind: input, shape index: {}]   ;;  %s3633_s3 = inlined_call_operand.vmem [shape: f32[1,256], index: 3, kind: input, shape index: {}]   ;;  %s3634_s4 = inlined_call_operand.vmem [shape: bf16[512,32], index: 4, kind: output, shape index: {0}]   ;;  %s3635_s5 = inlined_call_operand.vmem [shape: f32[1,1,32], index: 5, kind: output, shape index: {1}]   ;;  %s3636_s6 = inlined_call_operand.vmem [shape: f32[1,1,32], index: 6, kind: output, shape index: {2}]  }
   0x1   :  { %1069 = vmatprep.subr.bf16.mxu0 %v2218_v0  ;;  %v2202_v1 = vld [vmem:[%s3630_s1] sm:$0xff]   ;;  %2169 = vmatprep.subr.bf16.mxu1 %v2218_v0  ;;  %v2203_v2 = vld [vmem:[%s3630_s1 + $0x8] sm:$0xff]   ;;  %v2204_v4 = vld [vmem:[%s3630_s1 + $0x10] sm:$0xff]  }
   0x2   :  { %1070 = vmatpush1.bf16.msra.mxu0 %v2202_v1  ;;  %2185 = vmatpush1.bf16.msra.mxu1 %v2202_v1  ;;  %v216_v5 = vshrl.u32 %v215_v3, 7  ;;  %v2205_v6 = vld [vmem:[%s3630_s1 + $0x18] sm:$0xff]   ;;  %v2206_v8 = vld [vmem:[%s3630_s1 + $0x20] sm:$0xff]   ;;  %v22_v11 = vld [vmem:[%s3631_s0 + $0x8] sm:$0xff] }
   0x3   :  { %1071 = vmatprep.subr.bf16.mxu0 %v2218_v0  ;;  %2170 = vmatprep.subr.bf16.mxu1 %v2218_v0  ;;  %v21_v10 = vld [vmem:[%s3631_s0] sm:$0xff]  ;;  %v87_v15 = vunpack.c.l.bf16 %v22_v11  ;;  %v88_v16 = vunpack.c.h.bf16 %v22_v11  ;;  %v23_v18 = vld [vmem:[%s3631_s0 + $0x10] sm:$0xff]  ;;  %v24_v19 = vld [vmem:[%s3631_s0 + $0x18] sm:$0xff] }
   0x4   :  { %v217_v7 = vsub.s32 0, %v216_v5  ;;  %v221_v9 = vsub.s32 1, %v216_v5  ;;  %v213_v12 = vld [vmem:[%s3632_s2] sm:$0x3]  ;;  %v85_v13 = vunpack.c.l.bf16 %v21_v10  ;;  %v86_v14 = vunpack.c.h.bf16 %v21_v10  ;;  %v2207_v20 = vld [vmem:[%s3630_s1 + $0x28] sm:$0xff]   ;;  %v2208_v37 = vld [vmem:[%s3630_s1 + $0x30] sm:$0xff]  }
   0x5   :  { %v353_v17 = vld [vmem:[%s3633_s3] sm:$0x3]  ;;  %v90_v25 = vunpack.c.h.bf16 %v23_v18  ;;  %v92_v26 = vunpack.c.h.bf16 %v24_v19  ;;  %v89_v27 = vunpack.c.l.bf16 %v23_v18  ;;  %v91_v28 = vunpack.c.l.bf16 %v24_v19  ;;  %v2209_v50 = vld [vmem:[%s3630_s1 + $0x38] sm:$0xff]   ;;  %v26_v58 = vld [vmem:[%s3631_s0 + $0x28] sm:$0xff] }
   0x6   :  { %1072 = vmatpush1.bf16.msra.mxu0 %v2203_v2  ;;  %2186 = vmatpush1.bf16.msra.mxu1 %v2203_v2  ;;  %v2300_v21 = vrot.slane %v213_v12, %v217_v7  ;;  %v2302_v22 = vrot.slane %v213_v12, %v221_v9  ;;  %v2304_v23 = vrot.slane %v353_v17, %v217_v7  ;;  %v25_v53 = vld [vmem:[%s3631_s0 + $0x20] sm:$0xff]  ;;  %v27_v7 = vld [vmem:[%s3631_s0 + $0x30] sm:$0xff] }
   0x7   :  { %1073 = vmatprep.subr.bf16.mxu0 %v2218_v0  ;;  %2171 = vmatprep.subr.bf16.mxu1 %v2218_v0  ;;  %v2306_v24 = vrot.slane %v353_v17, %v221_v9  ;;  %v94_v1 = vunpack.c.h.bf16 %v25_v53  ;;  %v2210_v2 = vld [vmem:[%s3630_s1 + $0x40] sm:$0xff]   ;;  %v93_v5 = vunpack.c.l.bf16 %v25_v53  ;;  %v98_v18 = vunpack.c.h.bf16 %v27_v7 }
   0x8   :  { %v226_v29 = vmul.f32 %v2302_v22, %v86_v14  ;;  %v228_v30 = vmul.f32 %v2302_v22, %v88_v16  ;;  %v225_v31 = vmul.f32 %v2300_v21, %v85_v13  ;;  %v227_v32 = vmul.f32 %v2300_v21, %v87_v15 }
   0x9   :  { %v230_v33 = vmul.f32 %v2302_v22, %v90_v25  ;;  %v232_v34 = vmul.f32 %v2302_v22, %v92_v26  ;;  %v229_v35 = vmul.f32 %v2300_v21, %v89_v27  ;;  %v231_v36 = vmul.f32 %v2300_v21, %v91_v28  ;;  %v2211_v25 = vld [vmem:[%s3630_s1 + $0x48] sm:$0xff]  }
   0xa   :  { %1074 = vmatpush1.bf16.msra.mxu0 %v2204_v4  ;;  %2187 = vmatpush1.bf16.msra.mxu1 %v2204_v4  ;;  %v366_v38 = vadd.f32 %v2306_v24, %v226_v29  ;;  %v368_v39 = vadd.f32 %v2306_v24, %v228_v30  ;;  %v365_v40 = vadd.f32 %v2304_v23, %v225_v31  ;;  %v96_v4 = vunpack.c.h.bf16 %v26_v58 }
   0xb   :  { %1075 = vmatprep.subr.bf16.mxu0 %v2218_v0  ;;  %2172 = vmatprep.subr.bf16.mxu1 %v2218_v0  ;;  %v367_v41 = vadd.f32 %v2304_v23, %v227_v32  ;;  %v370_v42 = vadd.f32 %v2306_v24, %v230_v33  ;;  %v372_v43 = vadd.f32 %v2306_v24, %v232_v34 }
   0xc   :  { %v369_v44 = vadd.f32 %v2304_v23, %v229_v35  ;;  %v371_v45 = vadd.f32 %v2304_v23, %v231_v36  ;;  %vm494_vm0 = vcmp.ge.f32.partialorder %v366_v38, 0.0  ;;  %vm496_vm1 = vcmp.ge.f32.partialorder %v368_v39, 0.0 }
   0xd   :  { %v622_v46 = vmul.f32 0.2, %v366_v38  ;;  %v624_v47 = vmul.f32 0.2, %v368_v39  ;;  %vm493_vm2 = vcmp.ge.f32.partialorder %v365_v40, 0.0  ;;  %vm495_vm3 = vcmp.ge.f32.partialorder %v367_v41, 0.0 }
   0xe   :  { %1076 = vmatpush1.bf16.msra.mxu0 %v2205_v6  ;;  %2188 = vmatpush1.bf16.msra.mxu1 %v2205_v6  ;;  %v621_v48 = vmul.f32 0.2, %v365_v40  ;;  %v623_v49 = vmul.f32 0.2, %v367_v41  ;;  %vm498_vm4 = vcmp.ge.f32.partialorder %v370_v42, 0.0  ;;  %vm500_vm5 = vcmp.ge.f32.partialorder %v372_v43, 0.0 }
   0xf   :  { %1077 = vmatprep.subr.bf16.mxu0 %v2218_v0  ;;  %2173 = vmatprep.subr.bf16.mxu1 %v2218_v0  ;;  %v750_v51 = vsel %vm494_vm0, %v366_v38, %v622_v46  ;;  %v752_v52 = vsel %vm496_vm1, %v368_v39, %v624_v47  ;;  %v626_v57 = vmul.f32 0.2, %v370_v42  ;;  %v628_v60 = vmul.f32 0.2, %v372_v43  ;;  %v2212_v38 = vld [vmem:[%s3630_s1 + $0x50] sm:$0xff]  }
  0x10   :  { %v878_v54 = vpack.c.bf16 %v752_v52, %v750_v51  ;;  %v2338_v55 = vsel %vm493_vm2, %v365_v40, %v621_v48  ;;  %v2340_v56 = vsel %vm495_vm3, %v367_v41, %v623_v49  ;;  %vm497_vm6 = vcmp.ge.f32.partialorder %v369_v44, 0.0 }
  0x11   :  { %v877_v59 = vpack.c.bf16 %v2340_v56, %v2338_v55  ;;  %vm499_vm7 = vcmp.ge.f32.partialorder %v371_v45, 0.0  ;;  %v2347_v61 = vsel %vm498_vm4, %v370_v42, %v626_v57  ;;  %v625_v62 = vmul.f32 0.2, %v369_v44  ;;  %v2213_v57 = vld [vmem:[%s3630_s1 + $0x58] sm:$0xff]  }
  0x12   :  { %1078 = vmatpush1.bf16.msra.mxu0 %v2206_v8  ;;  %2189 = vmatpush1.bf16.msra.mxu1 %v2206_v8  ;;  %v627_v63 = vmul.f32 0.2, %v371_v45  ;;  %v2354_v3 = vsel %vm500_vm5, %v372_v43, %v628_v60  ;;  %v95_v6 = vunpack.c.l.bf16 %v26_v58  ;;  %v28_v8 = vld [vmem:[%s3631_s0 + $0x38] sm:$0xff]  ;;  %v234_v12 = vmul.f32 %v2302_v22, %v94_v1  ;;  %v29_v43 = vld [vmem:[%s3631_s0 + $0x40] sm:$0xff]  ;;  %v31_v1 = vld [vmem:[%s3631_s0 + $0x50] sm:$0xff] }
  0x13   :  { %1079 = vmatprep.subr.bf16.mxu0 %v2218_v0  ;;  %2174 = vmatprep.subr.bf16.mxu1 %v2218_v0  ;;  %v880_v9 = vpack.c.bf16 %v2354_v3, %v2347_v61  ;;  %v2366_v10 = vsel %vm497_vm6, %v369_v44, %v625_v62  ;;  %v236_v14 = vmul.f32 %v2302_v22, %v96_v4  ;;  %v100_v19 = vunpack.c.h.bf16 %v28_v8  ;;  %v30_v44 = vld [vmem:[%s3631_s0 + $0x48] sm:$0xff] }
  0x14   :  { %1101 = vmatprep.mubr.bf16.mxu0 %v878_v54  ;;  %v2369_v11 = vsel %vm499_vm7, %v371_v45, %v627_v63  ;;  %v233_v15 = vmul.f32 %v2300_v21, %v93_v5  ;;  %v235_v16 = vmul.f32 %v2300_v21, %v95_v6  ;;  %v374_v17 = vadd.f32 %v2306_v24, %v234_v12 }
  0x15   :  { %v879_v13 = vpack.c.bf16 %v2369_v11, %v2366_v10  ;;  %v376_v26 = vadd.f32 %v2306_v24, %v236_v14  ;;  %v99_v29 = vunpack.c.l.bf16 %v28_v8  ;;  %v238_v31 = vmul.f32 %v2302_v22, %v98_v18  ;;  %v2214_v18 = vld [vmem:[%s3630_s1 + $0x60] sm:$0xff]   ;;  %v55_v10 = vld [vmem:[%s3631_s0 + $0x110] sm:$0xff] }
  0x16   :  { %1080 = vmatpush1.bf16.msra.mxu0 %v2207_v20  ;;  %2190 = vmatpush1.bf16.msra.mxu1 %v2207_v20  ;;  %v97_v20 = vunpack.c.l.bf16 %v27_v7  ;;  %v373_v27 = vadd.f32 %v2304_v23, %v233_v15  ;;  %v375_v28 = vadd.f32 %v2304_v23, %v235_v16  ;;  %vm502_vm8 = vcmp.ge.f32.partialorder %v374_v17, 0.0 }
  0x17   :  { %1081 = vmatprep.subr.bf16.mxu0 %v2218_v0  ;;  %2175 = vmatprep.subr.bf16.mxu1 %v2218_v0  ;;  %v630_v30 = vmul.f32 0.2, %v374_v17  ;;  %v240_v32 = vmul.f32 %v2302_v22, %v100_v19  ;;  %vm504_vm9 = vcmp.ge.f32.partialorder %v376_v26, 0.0  ;;  %v632_v33 = vmul.f32 0.2, %v376_v26 }
  0x18   :  { %vm501_vm10 = vcmp.ge.f32.partialorder %v373_v27, 0.0  ;;  %vm503_vm11 = vcmp.ge.f32.partialorder %v375_v28, 0.0  ;;  %v629_v35 = vmul.f32 0.2, %v373_v27  ;;  %v631_v36 = vmul.f32 0.2, %v375_v28 }
  0x19   :  { %v2388_v34 = vsel %vm502_vm8, %v374_v17, %v630_v30  ;;  %v2395_v39 = vsel %vm504_vm9, %v376_v26, %v632_v33  ;;  %v380_v40 = vadd.f32 %v2306_v24, %v240_v32  ;;  %v237_v41 = vmul.f32 %v2300_v21, %v97_v20 }
  0x1a   :  { %1082 = vmatpush1.bf16.msra.mxu0 %v2208_v37  ;;  %2191 = vmatpush1.bf16.msra.mxu1 %v2208_v37  ;;  %v378_v37 = vadd.f32 %v2306_v24, %v238_v31  ;;  %v239_v42 = vmul.f32 %v2300_v21, %v99_v29  ;;  %v882_v45 = vpack.c.bf16 %v2395_v39, %v2388_v34  ;;  %v102_v53 = vunpack.c.h.bf16 %v29_v43  ;;  %v56_v39 = vld [vmem:[%s3631_s0 + $0x118] sm:$0xff] }
  0x1b   :  { %1083 = vmatprep.subr.bf16.mxu0 %v2218_v0  ;;  %2176 = vmatprep.subr.bf16.mxu1 %v2218_v0  ;;  %v2410_v46 = vsel %vm501_vm10, %v373_v27, %v629_v35  ;;  %v2413_v47 = vsel %vm503_vm11, %v375_v28, %v631_v36  ;;  %vm508_vm13 = vcmp.ge.f32.partialorder %v380_v40, 0.0  ;;  %v377_v51 = vadd.f32 %v2304_v23, %v237_v41  ;;  %v2215_v36 = vld [vmem:[%s3630_s1 + $0x68] sm:$0xff]  }
  0x1c   :  { %vm506_vm12 = vcmp.ge.f32.partialorder %v378_v37, 0.0  ;;  %v881_v48 = vpack.c.bf16 %v2413_v47, %v2410_v46  ;;  %v634_v49 = vmul.f32 0.2, %v378_v37  ;;  %v379_v52 = vadd.f32 %v2304_v23, %v239_v42  ;;  %v33_v42 = vld [vmem:[%s3631_s0 + $0x60] sm:$0xff]  ;;  %v39_v47 = vld [vmem:[%s3631_s0 + $0x90] sm:$0xff] }
  0x1d   :  { %v104_v54 = vunpack.c.h.bf16 %v30_v44  ;;  %v101_v62 = vunpack.c.l.bf16 %v29_v43  ;;  %v103_v63 = vunpack.c.l.bf16 %v30_v44  ;;  %vm505_vm14 = vcmp.ge.f32.partialorder %v377_v51, 0.0 }
  0x1e   :  { %1084 = vmatpush1.bf16.msra.mxu0 %v2209_v50  ;;  %2192 = vmatpush1.bf16.msra.mxu1 %v2209_v50  ;;  %v636_v50 = vmul.f32 0.2, %v380_v40  ;;  %v2423_v58 = vsel %vm506_vm12, %v378_v37, %v634_v49  ;;  %vm507_vm15 = vcmp.ge.f32.partialorder %v379_v52, 0.0  ;;  %v633_v5 = vmul.f32 0.2, %v377_v51 }
  0x1f   :  { %1085 = vmatprep.subr.bf16.mxu0 %v2218_v0  ;;  %2177 = vmatprep.subr.bf16.mxu1 %v2218_v0  ;;  %v635_v6 = vmul.f32 0.2, %v379_v52  ;;  %v242_v7 = vmul.f32 %v2302_v22, %v102_v53  ;;  %v244_v8 = vmul.f32 %v2302_v22, %v104_v54  ;;  %v241_v12 = vmul.f32 %v2300_v21, %v101_v62 }
  0x20   :  { %v2425_v60 = vsel %vm508_vm13, %v380_v40, %v636_v50  ;;  %v2441_v14 = vsel %vm505_vm14, %v377_v51, %v633_v5  ;;  %v243_v15 = vmul.f32 %v2300_v21, %v103_v63  ;;  %v106_v16 = vunpack.c.h.bf16 %v31_v1  ;;  %v34_v51 = vld [vmem:[%s3631_s0 + $0x68] sm:$0xff] }
  0x21   :  { %v884_v4 = vpack.c.bf16 %v2425_v60, %v2423_v58  ;;  %v2449_v19 = vsel %vm507_vm15, %v379_v52, %v635_v6  ;;  %v382_v20 = vadd.f32 %v2306_v24, %v242_v7  ;;  %v381_v26 = vadd.f32 %v2304_v23, %v241_v12 }
  0x22   :  { %1086 = vmatpush1.bf16.msra.mxu0 %v2210_v2  ;;  %2193 = vmatpush1.bf16.msra.mxu1 %v2210_v2  ;;  %v2433_v2 = vld [vmem:[%s3631_s0 + $0x58] sm:$0xff]  ;;  %v883_v27 = vpack.c.bf16 %v2449_v19, %v2441_v14  ;;  %v383_v28 = vadd.f32 %v2304_v23, %v243_v15  ;;  %v246_v29 = vmul.f32 %v2302_v22, %v106_v16  ;;  %v105_v50 = vunpack.c.l.bf16 %v31_v1  ;;  %v2216_v1 = vld [vmem:[%s3630_s1 + $0x70] sm:$0xff]  }
  0x23   :  { %1087 = vmatprep.subr.bf16.mxu0 %v2218_v0  ;;  %2178 = vmatprep.subr.bf16.mxu1 %v2218_v0  ;;  %v108_v17 = vunpack.c.h.bf16 %v2433_v2  ;;  %vm510_vm0 = vcmp.ge.f32.partialorder %v382_v20, 0.0  ;;  %v638_v31 = vmul.f32 0.2, %v382_v20  ;;  %vm509_vm2 = vcmp.ge.f32.partialorder %v381_v26, 0.0 }
  0x24   :  { %vm511_vm3 = vcmp.ge.f32.partialorder %v383_v28, 0.0  ;;  %v637_v33 = vmul.f32 0.2, %v381_v26  ;;  %v639_v35 = vmul.f32 0.2, %v383_v28  ;;  %v386_v40 = vadd.f32 %v2306_v24, %v246_v29 }
  0x25   :  { %v248_v30 = vmul.f32 %v2302_v22, %v108_v17  ;;  %v2464_v37 = vsel %vm510_vm0, %v382_v20, %v638_v31  ;;  %v245_v62 = vmul.f32 %v2300_v21, %v105_v50  ;;  %v110_v63 = vunpack.c.h.bf16 %v33_v42  ;;  %v35_v17 = vld [vmem:[%s3631_s0 + $0x70] sm:$0xff]  ;;  %v2217_v31 = vld [vmem:[%s3630_s1 + $0x78] sm:$0xff]  }
  0x26   :  { %1088 = vmatpush1.bf16.msra.mxu0 %v2211_v25  ;;  %2194 = vmatpush1.bf16.msra.mxu1 %v2211_v25  ;;  %v384_v25 = vadd.f32 %v2306_v24, %v244_v8  ;;  %v2476_v44 = vsel %vm509_vm2, %v381_v26, %v637_v33  ;;  %v2478_v49 = vsel %vm511_vm3, %v383_v28, %v639_v35  ;;  %vm514_vm4 = vcmp.ge.f32.partialorder %v386_v40, 0.0 }
  0x27   :  { %1089 = vmatprep.subr.bf16.mxu0 %v2218_v0  ;;  %2179 = vmatprep.subr.bf16.mxu1 %v2218_v0  ;;  %v388_v41 = vadd.f32 %v2306_v24, %v248_v30  ;;  %v885_v52 = vpack.c.bf16 %v2478_v49, %v2476_v44  ;;  %v642_v53 = vmul.f32 0.2, %v386_v40  ;;  %v112_v6 = vunpack.c.h.bf16 %v34_v51 }
  0x28   :  { %vm512_vm1 = vcmp.ge.f32.partialorder %v384_v25, 0.0  ;;  %v640_v32 = vmul.f32 0.2, %v384_v25  ;;  %v109_v7 = vunpack.c.l.bf16 %v33_v42  ;;  %v111_v8 = vunpack.c.l.bf16 %v34_v51  ;;  %v36_v42 = vld [vmem:[%s3631_s0 + $0x78] sm:$0xff] }
  0x29   :  { %vm516_vm5 = vcmp.ge.f32.partialorder %v388_v41, 0.0  ;;  %v644_v54 = vmul.f32 0.2, %v388_v41  ;;  %v2491_v5 = vsel %vm514_vm4, %v386_v40, %v642_v53  ;;  %v385_v15 = vadd.f32 %v2304_v23, %v245_v62 }
  0x2a   :  { %1090 = vmatpush1.bf16.msra.mxu0 %v2212_v38  ;;  %2195 = vmatpush1.bf16.msra.mxu1 %v2212_v38  ;;  %v2466_v38 = vsel %vm512_vm1, %v384_v25, %v640_v32  ;;  %v250_v16 = vmul.f32 %v2302_v22, %v110_v63  ;;  %v252_v20 = vmul.f32 %v2302_v22, %v112_v6 }
  0x2b   :  { %1091 = vmatprep.subr.bf16.mxu0 %v2218_v0  ;;  %2180 = vmatprep.subr.bf16.mxu1 %v2218_v0  ;;  %v886_v43 = vpack.c.bf16 %v2466_v38, %v2464_v37  ;;  %v2494_v12 = vsel %vm516_vm5, %v388_v41, %v644_v54  ;;  %v249_v25 = vmul.f32 %v2300_v21, %v109_v7  ;;  %vm513_vm6 = vcmp.ge.f32.partialorder %v385_v15, 0.0  ;;  %v58_v37 = vld [vmem:[%s3631_s0 + $0x128] sm:$0xff] }
  0x2c   :  { %v251_v26 = vmul.f32 %v2300_v21, %v111_v8  ;;  %v641_v29 = vmul.f32 0.2, %v385_v15  ;;  %v390_v30 = vadd.f32 %v2306_v24, %v250_v16  ;;  %v392_v32 = vadd.f32 %v2306_v24, %v252_v20  ;;  %v54_v8 = vld [vmem:[%s3631_s0 + $0x108] sm:$0xff] }
  0x2d   :  { %v389_v33 = vadd.f32 %v2304_v23, %v249_v25  ;;  %v116_v7 = vunpack.c.h.bf16 %v36_v42 }
  0x2e   :  { %1092 = vmatpush1.bf16.msra.mxu0 %v2213_v57  ;;  %2196 = vmatpush1.bf16.msra.mxu1 %v2213_v57  ;;  %v107_v57 = vunpack.c.l.bf16 %v2433_v2  ;;  %v391_v35 = vadd.f32 %v2304_v23, %v251_v26  ;;  %v2517_v41 = vsel %vm513_vm6, %v385_v15, %v641_v29  ;;  %vm518_vm8 = vcmp.ge.f32.partialorder %v390_v30, 0.0 }
  0x2f   :  { %1093 = vmatprep.subr.bf16.mxu0 %v2218_v0  ;;  %2181 = vmatprep.subr.bf16.mxu1 %v2218_v0  ;;  %vm520_vm9 = vcmp.ge.f32.partialorder %v392_v32, 0.0  ;;  %v646_v50 = vmul.f32 0.2, %v390_v30  ;;  %v648_v51 = vmul.f32 0.2, %v392_v32  ;;  %vm517_vm10 = vcmp.ge.f32.partialorder %v389_v33, 0.0 }
  0x30   :  { %v247_v2 = vmul.f32 %v2300_v21, %v107_v57  ;;  %vm519_vm11 = vcmp.ge.f32.partialorder %v391_v35, 0.0  ;;  %v645_v54 = vmul.f32 0.2, %v389_v33  ;;  %v647_v57 = vmul.f32 0.2, %v391_v35 }
  0x31   :  { %v2527_v63 = vsel %vm518_vm8, %v390_v30, %v646_v50  ;;  %v2529_v6 = vsel %vm520_vm9, %v392_v32, %v648_v51  ;;  %v256_v25 = vmul.f32 %v2302_v22, %v116_v7  ;;  %v113_v26 = vunpack.c.l.bf16 %v35_v17  ;;  %v37_v7 = vld [vmem:[%s3631_s0 + $0x80] sm:$0xff] }
  0x32   :  { %1094 = vmatpush1.bf16.msra.mxu0 %v2214_v18  ;;  %2197 = vmatpush1.bf16.msra.mxu1 %v2214_v18  ;;  %v888_v18 = vpack.c.bf16 %v2494_v12, %v2491_v5  ;;  %v387_v28 = vadd.f32 %v2304_v23, %v247_v2  ;;  %v2539_v2 = vsel %vm517_vm10, %v389_v33, %v645_v54  ;;  %v151_v33 = vunpack.c.l.bf16 %v54_v8 }
  0x33   :  { %1095 = vmatprep.subr.bf16.mxu0 %v2218_v0  ;;  %2182 = vmatprep.subr.bf16.mxu1 %v2218_v0  ;;  %v2541_v15 = vsel %vm519_vm11, %v391_v35, %v647_v57  ;;  %v396_v35 = vadd.f32 %v2306_v24, %v256_v25 }
  0x34   :  { %vm515_vm7 = vcmp.ge.f32.partialorder %v387_v28, 0.0  ;;  %v643_v40 = vmul.f32 0.2, %v387_v28  ;;  %v889_v20 = vpack.c.bf16 %v2541_v15, %v2539_v2  ;;  %v291_v51 = vmul.f32 %v2300_v21, %v151_v33  ;;  %v61_v2 = vld [vmem:[%s3631_s0 + $0x140] sm:$0xff] }
  0x35   :  { %vm524_vm13 = vcmp.ge.f32.partialorder %v396_v35, 0.0 }
  0x36   :  { %1096 = vmatpush1.bf16.msra.mxu0 %v2215_v36  ;;  %2198 = vmatpush1.bf16.msra.mxu1 %v2215_v36  ;;  %v114_v36 = vunpack.c.h.bf16 %v35_v17  ;;  %v2522_v53 = vsel %vm515_vm7, %v387_v28, %v643_v40  ;;  %v115_v28 = vunpack.c.l.bf16 %v36_v42 }
  0x37   :  { %1097 = vmatprep.subr.bf16.mxu0 %v2218_v0  ;;  %2183 = vmatprep.subr.bf16.mxu1 %v2218_v0  ;;  %v887_v62 = vpack.c.bf16 %v2522_v53, %v2517_v41 }
  0x38   :  { %v254_v16 = vmul.f32 %v2302_v22, %v114_v36  ;;  %v253_v36 = vmul.f32 %v2300_v21, %v113_v26  ;;  %v255_v17 = vmul.f32 %v2300_v21, %v115_v28 }
  0x3a   :  { %1098 = vmatpush1.bf16.msra.mxu0 %v2216_v1  ;;  %2199 = vmatpush1.bf16.msra.mxu1 %v2216_v1  ;;  %v53_v1 = vld [vmem:[%s3631_s0 + $0x100] sm:$0xff]  ;;  %v394_v29 = vadd.f32 %v2306_v24, %v254_v16  ;;  %v393_v42 = vadd.f32 %v2304_v23, %v253_v36  ;;  %v395_v61 = vadd.f32 %v2304_v23, %v255_v17 }
  0x3b   :  { %1099 = vmatprep.subr.bf16.mxu0 %v2218_v0  ;;  %2184 = vmatprep.subr.bf16.mxu1 %v2218_v0  ;;  %v890_v0 = vpack.c.bf16 %v2529_v6, %v2527_v63  ;;  %v149_v30 = vunpack.c.l.bf16 %v53_v1  ;;  %v150_v32 = vunpack.c.h.bf16 %v53_v1  ;;  %v44_v63 = vld [vmem:[%s3631_s0 + $0xb8] sm:$0xff] }
  0x3c   :  { %vm522_vm12 = vcmp.ge.f32.partialorder %v394_v29, 0.0  ;;  %v650_v40 = vmul.f32 0.2, %v394_v29  ;;  %vm521_vm14 = vcmp.ge.f32.partialorder %v393_v42, 0.0  ;;  %vm523_vm15 = vcmp.ge.f32.partialorder %v395_v61, 0.0 }
  0x3d   :  { %v290_v55 = vmul.f32 %v2302_v22, %v150_v32  ;;  %v289_v56 = vmul.f32 %v2300_v21, %v149_v30  ;;  %v649_v57 = vmul.f32 0.2, %v393_v42  ;;  %v38_v30 = vld [vmem:[%s3631_s0 + $0x88] sm:$0xff] }
  0x3e   :  { %1100 = vmatpush1.bf16.msra.mxu0 %v2217_v31  ;;  %2200 = vmatpush1.bf16.msra.mxu1 %v2217_v31  ;;  %v152_v31 = vunpack.c.h.bf16 %v54_v8  ;;  %v2561_v3 = vsel %vm522_vm12, %v394_v29, %v650_v40  ;;  %v651_v8 = vmul.f32 0.2, %v395_v61  ;;  %v431_v29 = vadd.f32 %v2304_v23, %v291_v51 }
  0x3f   :  { %v430_v50 = vadd.f32 %v2306_v24, %v290_v55  ;;  %v2574_v25 = vsel %vm521_vm14, %v393_v42, %v649_v57  ;;  %v429_v28 = vadd.f32 %v2304_v23, %v289_v56  ;;  %v120_v40 = vunpack.c.h.bf16 %v38_v30 }
  0x40   :  { %v2584_v32 = vsel %vm523_vm15, %v395_v61, %v651_v8  ;;  %vm559_vm3 = vcmp.ge.f32.partialorder %v431_v29, 0.0  ;;  %v119_v34 = vunpack.c.l.bf16 %v38_v30  ;;  %v153_v30 = vunpack.c.l.bf16 %v55_v10 }
  0x41   :  { %1102 = vmatmul.mubr.bf16.vlgmr.msra.gmra.mrb[0].mxu0 %v877_v59  ;;  %v652_v59 = vmul.f32 0.2, %v396_v35  ;;  %vm558_vm0 = vcmp.ge.f32.partialorder %v430_v50, 0.0  ;;  %v686_v26 = vmul.f32 0.2, %v430_v50  ;;  %v891_v36 = vpack.c.bf16 %v2584_v32, %v2574_v25 }
  0x42   :  { %1109 = vmatprep.mubr.bf16.mxu0 %v880_v9  ;;  %v292_v9 = vmul.f32 %v2302_v22, %v152_v31  ;;  %vm557_vm2 = vcmp.ge.f32.partialorder %v429_v28, 0.0  ;;  %v687_v31 = vmul.f32 0.2, %v431_v29  ;;  %v260_v61 = vmul.f32 %v2302_v22, %v120_v40 }
  0x43   :  { %v2566_v54 = vsel %vm524_vm13, %v396_v35, %v652_v59  ;;  %v118_v35 = vunpack.c.h.bf16 %v37_v7  ;;  %v814_v17 = vsel %vm558_vm0, %v430_v50, %v686_v26  ;;  %v117_v59 = vunpack.c.l.bf16 %v37_v7 }
  0x44   :  { %v892_v1 = vpack.c.bf16 %v2566_v54, %v2561_v3  ;;  %v432_v16 = vadd.f32 %v2306_v24, %v292_v9  ;;  %v815_v42 = vsel %vm559_vm3, %v431_v29, %v687_v31  ;;  %v154_v9 = vunpack.c.h.bf16 %v55_v10  ;;  %v62_v3 = vld [vmem:[%s3631_s0 + $0x148] sm:$0xff] }
  0x45   :  { %v258_v56 = vmul.f32 %v2302_v22, %v118_v35  ;;  %v257_v57 = vmul.f32 %v2300_v21, %v117_v59  ;;  %v259_v8 = vmul.f32 %v2300_v21, %v119_v34  ;;  %v400_v7 = vadd.f32 %v2306_v24, %v260_v61 }
  0x46   :  { %vm560_vm1 = vcmp.ge.f32.partialorder %v432_v16, 0.0  ;;  %v688_v33 = vmul.f32 0.2, %v432_v16  ;;  %v294_v26 = vmul.f32 %v2302_v22, %v154_v9  ;;  %v293_v34 = vmul.f32 %v2300_v21, %v153_v30  ;;  %v57_v30 = vld [vmem:[%s3631_s0 + $0x120] sm:$0xff] }
  0x47   :  { %v398_v51 = vadd.f32 %v2306_v24, %v258_v56  ;;  %v397_v29 = vadd.f32 %v2304_v23, %v257_v57  ;;  %vm528_vm5 = vcmp.ge.f32.partialorder %v400_v7, 0.0  ;;  %v656_v35 = vmul.f32 0.2, %v400_v7 }
  0x48   :  { %v816_v11 = vsel %vm560_vm1, %v432_v16, %v688_v33  ;;  %v156_v16 = vunpack.c.h.bf16 %v56_v39  ;;  %v399_v33 = vadd.f32 %v2304_v23, %v259_v8  ;;  %v122_v9 = vunpack.c.h.bf16 %v39_v47 }
  0x49   :  { %1110 = vmatmul.mubr.bf16.gmra.mrb[4].mxu0 %v879_v13  ;;  %v685_v13 = vmul.f32 0.2, %v429_v28  ;;  %v910_v55 = vpack.c.bf16 %v816_v11, %v814_v17  ;;  %vm526_vm4 = vcmp.ge.f32.partialorder %v398_v51, 0.0  ;;  %v434_v11 = vadd.f32 %v2306_v24, %v294_v26 }
  0x4a   :  { %1117 = vmatprep.mubr.bf16.mxu0 %v882_v45  ;;  %v296_v17 = vmul.f32 %v2302_v22, %v156_v16  ;;  %vm525_vm6 = vcmp.ge.f32.partialorder %v397_v29, 0.0  ;;  %vm527_vm7 = vcmp.ge.f32.partialorder %v399_v33, 0.0  ;;  %v2616_v31 = vsel %vm528_vm5, %v400_v7, %v656_v35 }
  0x4b   :  { %v813_v45 = vsel %vm557_vm2, %v429_v28, %v685_v13  ;;  %1229 = vmatprep.mubr.bf16.mxu1 %v910_v55  ;;  %v654_v28 = vmul.f32 0.2, %v398_v51  ;;  %v653_v13 = vmul.f32 0.2, %v397_v29  ;;  %v655_v40 = vmul.f32 0.2, %v399_v33 }
  0x4c   :  { %v909_v50 = vpack.c.bf16 %v815_v42, %v813_v45  ;;  %v436_v46 = vadd.f32 %v2306_v24, %v296_v17  ;;  %vm562_vm8 = vcmp.ge.f32.partialorder %v434_v11, 0.0  ;;  %v690_v60 = vmul.f32 0.2, %v434_v11  ;;  %v40_v55 = vld [vmem:[%s3631_s0 + $0x98] sm:$0xff] }
  0x4d   :  { %v2614_v10 = vsel %vm526_vm4, %v398_v51, %v654_v28  ;;  %v2624_v58 = vsel %vm525_vm6, %v397_v29, %v653_v13  ;;  %v2629_v56 = vsel %vm527_vm7, %v399_v33, %v655_v40  ;;  %v124_v51 = vunpack.c.h.bf16 %v40_v55 }
  0x4e   :  { %1230 = vmatmul.mubr.bf16.vlgmr.msra.gmra.mrb[0].mxu1 %v909_v50  ;;  %vm564_vm9 = vcmp.ge.f32.partialorder %v436_v46, 0.0  ;;  %v692_v59 = vmul.f32 0.2, %v436_v46  ;;  %v893_v45 = vpack.c.bf16 %v2629_v56, %v2624_v58  ;;  %v818_v42 = vsel %vm562_vm8, %v434_v11, %v690_v60 }
  0x4f   :  { %v121_v57 = vunpack.c.l.bf16 %v39_v47  ;;  %v262_v16 = vmul.f32 %v2302_v22, %v122_v9  ;;  %v123_v26 = vunpack.c.l.bf16 %v40_v55  ;;  %v264_v29 = vmul.f32 %v2302_v22, %v124_v51  ;;  %v41_v9 = vld [vmem:[%s3631_s0 + $0xa0] sm:$0xff] }
  0x50   :  { %v820_v50 = vsel %vm564_vm9, %v436_v46, %v692_v59 }
  0x51   :  { %1118 = vmatmul.mubr.bf16.gmra.mrb[8].mxu0 %v881_v48  ;;  %v894_v48 = vpack.c.bf16 %v2616_v31, %v2614_v10  ;;  %v912_v8 = vpack.c.bf16 %v820_v50, %v818_v42  ;;  %v261_v33 = vmul.f32 %v2300_v21, %v121_v57  ;;  %v402_v17 = vadd.f32 %v2306_v24, %v262_v16  ;;  %v42_v50 = vld [vmem:[%s3631_s0 + $0xa8] sm:$0xff] }
  0x52   :  { %1125 = vmatprep.mubr.bf16.mxu0 %v884_v4  ;;  %v155_v4 = vunpack.c.l.bf16 %v56_v39  ;;  %v433_v39 = vadd.f32 %v2304_v23, %v293_v34  ;;  %v263_v11 = vmul.f32 %v2300_v21, %v123_v26  ;;  %v404_v14 = vadd.f32 %v2306_v24, %v264_v29  ;;  %v46_v10 = vld [vmem:[%s3631_s0 + $0xc8] sm:$0xff] }
  0x53   :  { %1237 = vmatprep.mubr.bf16.mxu1 %v912_v8  ;;  %v401_v19 = vadd.f32 %v2304_v23, %v261_v33  ;;  %vm530_vm12 = vcmp.ge.f32.partialorder %v402_v17, 0.0  ;;  %v658_v46 = vmul.f32 0.2, %v402_v17  ;;  %v160_v34 = vunpack.c.h.bf16 %v58_v37 }
  0x54   :  { %v295_v61 = vmul.f32 %v2300_v21, %v155_v4  ;;  %vm561_vm10 = vcmp.ge.f32.partialorder %v433_v39, 0.0  ;;  %v689_v28 = vmul.f32 0.2, %v433_v39  ;;  %v403_v47 = vadd.f32 %v2304_v23, %v263_v11 }
  0x55   :  { %vm532_vm13 = vcmp.ge.f32.partialorder %v404_v14, 0.0  ;;  %vm529_vm14 = vcmp.ge.f32.partialorder %v401_v19, 0.0  ;;  %v2657_v60 = vsel %vm530_vm12, %v402_v17, %v658_v46  ;;  %v657_v4 = vmul.f32 0.2, %v401_v19 }
  0x56   :  { %v435_v7 = vadd.f32 %v2304_v23, %v295_v61  ;;  %v817_v13 = vsel %vm561_vm10, %v433_v39, %v689_v28  ;;  %vm531_vm15 = vcmp.ge.f32.partialorder %v403_v47, 0.0  ;;  %v659_v55 = vmul.f32 0.2, %v403_v47 }
  0x57   :  { %v157_v61 = vunpack.c.l.bf16 %v57_v30  ;;  %v2670_v51 = vsel %vm529_vm14, %v401_v19, %v657_v4  ;;  %v159_v8 = vunpack.c.l.bf16 %v58_v37  ;;  %v300_v16 = vmul.f32 %v2302_v22, %v160_v34 }
  0x58   :  { %vm563_vm11 = vcmp.ge.f32.partialorder %v435_v7, 0.0  ;;  %v691_v35 = vmul.f32 0.2, %v435_v7  ;;  %v2672_v57 = vsel %vm531_vm15, %v403_v47, %v659_v55  ;;  %v126_v29 = vunpack.c.h.bf16 %v41_v9 }
  0x59   :  { %1126 = vmatmul.mubr.bf16.gmra.mrb[12].mxu0 %v883_v27  ;;  %v158_v27 = vunpack.c.h.bf16 %v57_v30  ;;  %v297_v30 = vmul.f32 %v2300_v21, %v157_v61  ;;  %v299_v28 = vmul.f32 %v2300_v21, %v159_v8  ;;  %v128_v33 = vunpack.c.h.bf16 %v42_v50 }
  0x5a   :  { %1133 = vmatprep.mubr.bf16.mxu0 %v886_v43  ;;  %v819_v40 = vsel %vm563_vm11, %v435_v7, %v691_v35  ;;  %v660_v43 = vmul.f32 0.2, %v404_v14  ;;  %v895_v7 = vpack.c.bf16 %v2672_v57, %v2670_v51  ;;  %v125_v35 = vunpack.c.l.bf16 %v41_v9 }
  0x5b   :  { %v911_v38 = vpack.c.bf16 %v819_v40, %v817_v13  ;;  %v298_v42 = vmul.f32 %v2302_v22, %v158_v27  ;;  %v440_v44 = vadd.f32 %v2306_v24, %v300_v16  ;;  %v439_v17 = vadd.f32 %v2304_v23, %v299_v28  ;;  %v43_v28 = vld [vmem:[%s3631_s0 + $0xb0] sm:$0xff] }
  0x5c   :  { %v2659_v59 = vsel %vm532_vm13, %v404_v14, %v660_v43  ;;  %v266_v11 = vmul.f32 %v2302_v22, %v126_v29  ;;  %v268_v13 = vmul.f32 %v2302_v22, %v128_v33  ;;  %v127_v14 = vunpack.c.l.bf16 %v42_v50  ;;  %v60_v43 = vld [vmem:[%s3631_s0 + $0x138] sm:$0xff] }
  0x5d   :  { %1238 = vmatmul.mubr.bf16.gmra.mrb[4].mxu1 %v911_v38  ;;  %v896_v39 = vpack.c.bf16 %v2659_v59, %v2657_v60  ;;  %v438_v26 = vadd.f32 %v2306_v24, %v298_v42  ;;  %vm568_vm1 = vcmp.ge.f32.partialorder %v440_v44, 0.0  ;;  %v696_v5 = vmul.f32 0.2, %v440_v44  ;;  %v59_v38 = vld [vmem:[%s3631_s0 + $0x130] sm:$0xff] }
  0x5e   :  { %vm567_vm3 = vcmp.ge.f32.partialorder %v439_v17, 0.0  ;;  %v695_v19 = vmul.f32 0.2, %v439_v17  ;;  %v406_v27 = vadd.f32 %v2306_v24, %v266_v11  ;;  %v408_v46 = vadd.f32 %v2306_v24, %v268_v13 }
  0x5f   :  { %vm566_vm0 = vcmp.ge.f32.partialorder %v438_v26, 0.0  ;;  %v694_v49 = vmul.f32 0.2, %v438_v26  ;;  %v824_v40 = vsel %vm568_vm1, %v440_v44, %v696_v5  ;;  %v265_v47 = vmul.f32 %v2300_v21, %v125_v35 }
  0x60   :  { %v267_v37 = vmul.f32 %v2300_v21, %v127_v14  ;;  %v823_v34 = vsel %vm567_vm3, %v439_v17, %v695_v19  ;;  %vm534_vm4 = vcmp.ge.f32.partialorder %v406_v27, 0.0  ;;  %vm536_vm5 = vcmp.ge.f32.partialorder %v408_v46, 0.0 }
  0x61   :  { %1134 = vmatmul.mubr.bf16.gmra.mrb[16].mxu0 %v885_v52  ;;  %v437_v52 = vadd.f32 %v2304_v23, %v297_v30  ;;  %v822_v12 = vsel %vm566_vm0, %v438_v26, %v694_v49  ;;  %v662_v61 = vmul.f32 0.2, %v406_v27  ;;  %v664_v9 = vmul.f32 0.2, %v408_v46 }
  0x62   :  { %1141 = vmatprep.mubr.bf16.mxu0 %v888_v18  ;;  %v914_v4 = vpack.c.bf16 %v824_v40, %v822_v12  ;;  %v405_v50 = vadd.f32 %v2304_v23, %v265_v47  ;;  %v407_v8 = vadd.f32 %v2304_v23, %v267_v37  ;;  %v162_v16 = vunpack.c.h.bf16 %v59_v38 }
  0x63   :  { %vm565_vm2 = vcmp.ge.f32.partialorder %v437_v52, 0.0  ;;  %v693_v18 = vmul.f32 0.2, %v437_v52  ;;  %v164_v26 = vunpack.c.h.bf16 %v60_v43  ;;  %v2709_v30 = vsel %vm534_vm4, %v406_v27, %v662_v61 }
  0x64   :  { %1245 = vmatprep.mubr.bf16.mxu1 %v914_v4  ;;  %v2711_v41 = vsel %vm536_vm5, %v408_v46, %v664_v9  ;;  %v161_v53 = vunpack.c.l.bf16 %v59_v38  ;;  %vm533_vm6 = vcmp.ge.f32.partialorder %v405_v50, 0.0  ;;  %vm535_vm7 = vcmp.ge.f32.partialorder %v407_v8, 0.0 }
  0x65   :  { %v821_v55 = vsel %vm565_vm2, %v437_v52, %v693_v18  ;;  %v898_v6 = vpack.c.bf16 %v2711_v41, %v2709_v30  ;;  %v663_v29 = vmul.f32 0.2, %v407_v8  ;;  %v302_v33 = vmul.f32 %v2302_v22, %v162_v16 }
  0x66   :  { %v913_v42 = vpack.c.bf16 %v823_v34, %v821_v55  ;;  %v304_v35 = vmul.f32 %v2302_v22, %v164_v26  ;;  %v301_v44 = vmul.f32 %v2300_v21, %v161_v53  ;;  %v130_v17 = vunpack.c.h.bf16 %v43_v28 }
  0x67   :  { %v132_v11 = vunpack.c.h.bf16 %v44_v63  ;;  %v2727_v13 = vsel %vm535_vm7, %v407_v8, %v663_v29  ;;  %v442_v14 = vadd.f32 %v2306_v24, %v302_v33  ;;  %v129_v61 = vunpack.c.l.bf16 %v43_v28 }
  0x68   :  { %1246 = vmatmul.mubr.bf16.gmra.mrb[8].mxu1 %v913_v42  ;;  %v444_v5 = vadd.f32 %v2306_v24, %v304_v35  ;;  %v441_v12 = vadd.f32 %v2304_v23, %v301_v44  ;;  %v270_v27 = vmul.f32 %v2302_v22, %v130_v17  ;;  %v166_v16 = vunpack.c.h.bf16 %v61_v2 }
  0x69   :  { %1142 = vmatmul.mubr.bf16.gmra.mrb[20].mxu0 %v887_v62  ;;  %v163_v62 = vunpack.c.l.bf16 %v60_v43  ;;  %v272_v40 = vmul.f32 %v2302_v22, %v132_v11  ;;  %vm570_vm8 = vcmp.ge.f32.partialorder %v442_v14, 0.0  ;;  %v698_v46 = vmul.f32 0.2, %v442_v14 }
  0x6a   :  { %1149 = vmatprep.mubr.bf16.mxu0 %v890_v0  ;;  %v661_v0 = vmul.f32 0.2, %v405_v50  ;;  %vm572_vm9 = vcmp.ge.f32.partialorder %v444_v5, 0.0  ;;  %v700_v47 = vmul.f32 0.2, %v444_v5  ;;  %vm569_vm10 = vcmp.ge.f32.partialorder %v441_v12, 0.0 }
  0x6b   :  { %v303_v52 = vmul.f32 %v2300_v21, %v163_v62  ;;  %v697_v37 = vmul.f32 0.2, %v441_v12  ;;  %v826_v43 = vsel %vm570_vm8, %v442_v14, %v698_v46  ;;  %v410_v55 = vadd.f32 %v2306_v24, %v270_v27 }
  0x6c   :  { %v2724_v49 = vsel %vm533_vm6, %v405_v50, %v661_v0  ;;  %v828_v4 = vsel %vm572_vm9, %v444_v5, %v700_v47  ;;  %v412_v34 = vadd.f32 %v2306_v24, %v272_v40  ;;  %v131_v50 = vunpack.c.l.bf16 %v44_v63  ;;  %v45_v63 = vld [vmem:[%s3631_s0 + $0xc0] sm:$0xff] }
  0x6d   :  { %v897_v18 = vpack.c.bf16 %v2727_v13, %v2724_v49  ;;  %v443_v19 = vadd.f32 %v2304_v23, %v303_v52  ;;  %v916_v15 = vpack.c.bf16 %v828_v4, %v826_v43  ;;  %vm538_vm12 = vcmp.ge.f32.partialorder %v410_v55, 0.0 }
  0x6e   :  { %vm540_vm13 = vcmp.ge.f32.partialorder %v412_v34, 0.0  ;;  %v668_v9 = vmul.f32 0.2, %v412_v34  ;;  %v269_v8 = vmul.f32 %v2300_v21, %v129_v61  ;;  %v168_v53 = vunpack.c.h.bf16 %v62_v3 }
  0x6f   :  { %vm571_vm11 = vcmp.ge.f32.partialorder %v443_v19, 0.0  ;;  %v699_v38 = vmul.f32 0.2, %v443_v19  ;;  %1253 = vmatprep.mubr.bf16.mxu1 %v916_v15  ;;  %v165_v62 = vunpack.c.l.bf16 %v61_v2  ;;  %v167_v28 = vunpack.c.l.bf16 %v62_v3  ;;  %v64_v2 = vld [vmem:[%s3631_s0 + $0x158] sm:$0xff] }
  0x70   :  { %v2754_v0 = vsel %vm540_vm13, %v412_v34, %v668_v9  ;;  %v271_v29 = vmul.f32 %v2300_v21, %v131_v50  ;;  %v409_v33 = vadd.f32 %v2304_v23, %v269_v8  ;;  %v306_v35 = vmul.f32 %v2302_v22, %v166_v16  ;;  %v63_v34 = vld [vmem:[%s3631_s0 + $0x150] sm:$0xff] }
  0x71   :  { %1150 = vmatmul.mubr.bf16.gmra.mrb[24].mxu0 %v889_v20  ;;  %v825_v20 = vsel %vm569_vm10, %v441_v12, %v697_v37  ;;  %v827_v42 = vsel %vm571_vm11, %v443_v19, %v699_v38  ;;  %v308_v52 = vmul.f32 %v2302_v22, %v168_v53  ;;  %v305_v17 = vmul.f32 %v2300_v21, %v165_v62 }
  0x72   :  { %1157 = vmatprep.mubr.bf16.mxu0 %v892_v1  ;;  %v915_v54 = vpack.c.bf16 %v827_v42, %v825_v20  ;;  %v666_v1 = vmul.f32 0.2, %v410_v55  ;;  %v307_v11 = vmul.f32 %v2300_v21, %v167_v28  ;;  %v411_v14 = vadd.f32 %v2304_v23, %v271_v29 }
  0x73   :  { %vm537_vm14 = vcmp.ge.f32.partialorder %v409_v33, 0.0  ;;  %v665_v5 = vmul.f32 0.2, %v409_v33  ;;  %v446_v25 = vadd.f32 %v2306_v24, %v306_v35  ;;  %v448_v32 = vadd.f32 %v2306_v24, %v308_v52 }
  0x74   :  { %1254 = vmatmul.mubr.bf16.gmra.mrb[12].mxu1 %v915_v54  ;;  %v2752_v26 = vsel %vm538_vm12, %v410_v55, %v666_v1  ;;  %v447_v12 = vadd.f32 %v2304_v23, %v307_v11  ;;  %v134_v19 = vunpack.c.h.bf16 %v45_v63  ;;  %vm539_vm15 = vcmp.ge.f32.partialorder %v411_v14, 0.0 }
  0x75   :  { %v900_v44 = vpack.c.bf16 %v2754_v0, %v2752_v26  ;;  %v667_v27 = vmul.f32 0.2, %v411_v14  ;;  %v2778_v40 = vsel %vm537_vm14, %v409_v33, %v665_v5  ;;  %vm574_vm0 = vcmp.ge.f32.partialorder %v446_v25, 0.0  ;;  %v47_v5 = vld [vmem:[%s3631_s0 + $0xd0] sm:$0xff] }
  0x76   :  { %vm576_vm1 = vcmp.ge.f32.partialorder %v448_v32, 0.0  ;;  %v702_v31 = vmul.f32 0.2, %v446_v25  ;;  %vm575_vm3 = vcmp.ge.f32.partialorder %v447_v12, 0.0  ;;  %v703_v37 = vmul.f32 0.2, %v447_v12 }
  0x77   :  { %v2783_v46 = vsel %vm539_vm15, %v411_v14, %v667_v27  ;;  %v136_v55 = vunpack.c.h.bf16 %v46_v10  ;;  %v274_v61 = vmul.f32 %v2302_v22, %v134_v19  ;;  %v133_v1 = vunpack.c.l.bf16 %v45_v63 }
  0x78   :  { %v899_v38 = vpack.c.bf16 %v2783_v46, %v2778_v40  ;;  %v830_v43 = vsel %vm574_vm0, %v446_v25, %v702_v31  ;;  %v831_v42 = vsel %vm575_vm3, %v447_v12, %v703_v37  ;;  %v135_v9 = vunpack.c.l.bf16 %v46_v10  ;;  %v48_v25 = vld [vmem:[%s3631_s0 + $0xd8] sm:$0xff] }
  0x79   :  { %1158 = vmatmul.mubr.bf16.gmra.mrb[28].mxu0 %v891_v36  ;;  %v445_v36 = vadd.f32 %v2304_v23, %v305_v17  ;;  %v276_v54 = vmul.f32 %v2302_v22, %v136_v55  ;;  %v414_v50 = vadd.f32 %v2306_v24, %v274_v61  ;;  %v170_v8 = vunpack.c.h.bf16 %v63_v34 }
  0x7a   :  { %1165 = vmatprep.mubr.bf16.mxu0 %v894_v48  ;;  %v704_v48 = vmul.f32 0.2, %v448_v32  ;;  %v172_v16 = vunpack.c.h.bf16 %v64_v2  ;;  %v169_v53 = vunpack.c.l.bf16 %v63_v34  ;;  %v273_v58 = vmul.f32 %v2300_v21, %v133_v1 }
  0x7b   :  { %vm573_vm2 = vcmp.ge.f32.partialorder %v445_v36, 0.0  ;;  %v701_v47 = vmul.f32 0.2, %v445_v36  ;;  %v416_v62 = vadd.f32 %v2306_v24, %v276_v54  ;;  %v275_v56 = vmul.f32 %v2300_v21, %v135_v9 }
  0x7c   :  { %v832_v4 = vsel %vm576_vm1, %v448_v32, %v704_v48  ;;  %vm542_vm4 = vcmp.ge.f32.partialorder %v414_v50, 0.0  ;;  %v670_v28 = vmul.f32 0.2, %v414_v50  ;;  %v310_v29 = vmul.f32 %v2302_v22, %v170_v8 }
  0x7d   :  { %v918_v15 = vpack.c.bf16 %v832_v4, %v830_v43  ;;  %v829_v20 = vsel %vm573_vm2, %v445_v36, %v701_v47  ;;  %v312_v60 = vmul.f32 %v2302_v22, %v172_v16  ;;  %vm544_vm5 = vcmp.ge.f32.partialorder %v416_v62, 0.0  ;;  %v65_v4 = vld [vmem:[%s3631_s0 + $0x160] sm:$0xff] }
  0x7e   :  { %v917_v3 = vpack.c.bf16 %v831_v42, %v829_v20  ;;  %v672_v59 = vmul.f32 0.2, %v416_v62  ;;  %v415_v33 = vadd.f32 %v2304_v23, %v275_v56  ;;  %v2809_v35 = vsel %vm542_vm4, %v414_v50, %v670_v28 }
  0x7f   :  { %1261 = vmatprep.mubr.bf16.mxu1 %v918_v15  ;;  %v450_v63 = vadd.f32 %v2306_v24, %v310_v29  ;;  %v452_v52 = vadd.f32 %v2306_v24, %v312_v60  ;;  %v309_v17 = vmul.f32 %v2300_v21, %v169_v53  ;;  %v138_v47 = vunpack.c.h.bf16 %v47_v5 }
  0x80   :  { %1262 = vmatmul.mubr.bf16.gmra.mrb[16].mxu1 %v917_v3  ;;  %v2814_v11 = vsel %vm544_vm5, %v416_v62, %v672_v59  ;;  %vm543_vm7 = vcmp.ge.f32.partialorder %v415_v33, 0.0  ;;  %v671_v36 = vmul.f32 0.2, %v415_v33  ;;  %v140_v37 = vunpack.c.h.bf16 %v48_v25 }
  0x81   :  { %1166 = vmatmul.mubr.bf16.gmra.mrb[32].mxu0 %v893_v45  ;;  %v171_v45 = vunpack.c.l.bf16 %v64_v2  ;;  %v902_v32 = vpack.c.bf16 %v2814_v11, %v2809_v35  ;;  %vm578_vm8 = vcmp.ge.f32.partialorder %v450_v63, 0.0  ;;  %vm580_vm9 = vcmp.ge.f32.partialorder %v452_v52, 0.0 }
  0x82   :  { %1173 = vmatprep.mubr.bf16.mxu0 %v896_v39  ;;  %v413_v39 = vadd.f32 %v2304_v23, %v273_v58  ;;  %v706_v19 = vmul.f32 0.2, %v450_v63  ;;  %v708_v27 = vmul.f32 0.2, %v452_v52  ;;  %v2833_v31 = vsel %vm543_vm7, %v415_v33, %v671_v36 }
  0x83   :  { %v311_v10 = vmul.f32 %v2300_v21, %v171_v45  ;;  %v449_v48 = vadd.f32 %v2304_v23, %v309_v17  ;;  %v278_v41 = vmul.f32 %v2302_v22, %v138_v47  ;;  %v280_v2 = vmul.f32 %v2302_v22, %v140_v37 }
  0x84   :  { %vm541_vm6 = vcmp.ge.f32.partialorder %v413_v39, 0.0  ;;  %v669_v14 = vmul.f32 0.2, %v413_v39  ;;  %v834_v57 = vsel %vm578_vm8, %v450_v63, %v706_v19  ;;  %v137_v15 = vunpack.c.l.bf16 %v47_v5 }
  0x85   :  { %v451_v43 = vadd.f32 %v2304_v23, %v311_v10  ;;  %vm577_vm10 = vcmp.ge.f32.partialorder %v449_v48, 0.0  ;;  %v705_v30 = vmul.f32 0.2, %v449_v48  ;;  %v418_v42 = vadd.f32 %v2306_v24, %v278_v41 }
  0x86   :  { %v2827_v12 = vsel %vm541_vm6, %v413_v39, %v669_v14  ;;  %v139_v61 = vunpack.c.l.bf16 %v48_v25  ;;  %v174_v3 = vunpack.c.h.bf16 %v65_v4  ;;  %v420_v1 = vadd.f32 %v2306_v24, %v280_v2 }
  0x87   :  { %v901_v51 = vpack.c.bf16 %v2833_v31, %v2827_v12  ;;  %vm579_vm11 = vcmp.ge.f32.partialorder %v451_v43, 0.0  ;;  %v707_v34 = vmul.f32 0.2, %v451_v43  ;;  %v833_v20 = vsel %vm577_vm10, %v449_v48, %v705_v30 }
  0x88   :  { %v277_v9 = vmul.f32 %v2300_v21, %v137_v15  ;;  %vm546_vm12 = vcmp.ge.f32.partialorder %v418_v42, 0.0  ;;  %v674_v16 = vmul.f32 0.2, %v418_v42  ;;  %v279_v53 = vmul.f32 %v2300_v21, %v139_v61 }
  0x89   :  { %1174 = vmatmul.mubr.bf16.gmra.mrb[36].mxu0 %v895_v7  ;;  %v836_v7 = vsel %vm580_vm9, %v452_v52, %v708_v27  ;;  %v835_v54 = vsel %vm579_vm11, %v451_v43, %v707_v34  ;;  %vm548_vm13 = vcmp.ge.f32.partialorder %v420_v1, 0.0  ;;  %v676_v62 = vmul.f32 0.2, %v420_v1  ;;  %v50_v52 = vld [vmem:[%s3631_s0 + $0xe8] sm:$0xff] }
  0x8a   :  { %1181 = vmatprep.mubr.bf16.mxu0 %v898_v6  ;;  %v920_v55 = vpack.c.bf16 %v836_v7, %v834_v57  ;;  %v66_v6 = vld [vmem:[%s3631_s0 + $0x168] sm:$0xff]  ;;  %v919_v8 = vpack.c.bf16 %v835_v54, %v833_v20  ;;  %v417_v58 = vadd.f32 %v2304_v23, %v277_v9  ;;  %v314_v56 = vmul.f32 %v2302_v22, %v174_v3 }
  0x8b   :  { %v176_v50 = vunpack.c.h.bf16 %v66_v6  ;;  %v2859_v45 = vsel %vm546_vm12, %v418_v42, %v674_v16  ;;  %v419_v28 = vadd.f32 %v2304_v23, %v279_v53  ;;  %v173_v60 = vunpack.c.l.bf16 %v65_v4  ;;  %v68_v42 = vld [vmem:[%s3631_s0 + $0x178] sm:$0xff] }
  0x8c   :  { %1269 = vmatprep.mubr.bf16.mxu1 %v920_v55  ;;  %v2863_v49 = vsel %vm548_vm13, %v420_v1, %v676_v62  ;;  %vm545_vm14 = vcmp.ge.f32.partialorder %v417_v58, 0.0  ;;  %v673_v13 = vmul.f32 0.2, %v417_v58  ;;  %v175_v63 = vunpack.c.l.bf16 %v66_v6  ;;  %v67_v55 = vld [vmem:[%s3631_s0 + $0x170] sm:$0xff] }
  0x8d   :  { %1270 = vmatmul.mubr.bf16.gmra.mrb[20].mxu1 %v919_v8  ;;  %v316_v29 = vmul.f32 %v2302_v22, %v176_v50  ;;  %v904_v59 = vpack.c.bf16 %v2863_v49, %v2859_v45  ;;  %vm547_vm15 = vcmp.ge.f32.partialorder %v419_v28, 0.0  ;;  %v675_v26 = vmul.f32 0.2, %v419_v28  ;;  %v51_v62 = vld [vmem:[%s3631_s0 + $0xf0] sm:$0xff] }
  0x8e   :  { %v2872_v39 = vsel %vm545_vm14, %v417_v58, %v673_v13  ;;  %v313_v5 = vmul.f32 %v2300_v21, %v173_v60  ;;  %v315_v19 = vmul.f32 %v2300_v21, %v175_v63  ;;  %v144_v47 = vunpack.c.h.bf16 %v50_v52  ;;  %v52_v58 = vld [vmem:[%s3631_s0 + $0xf8] sm:$0xff] }
  0x8f   :  { %v456_v0 = vadd.f32 %v2306_v24, %v316_v29  ;;  %v2877_v17 = vsel %vm547_vm15, %v419_v28, %v675_v26  ;;  %v143_v4 = vunpack.c.l.bf16 %v50_v52  ;;  %v178_v35 = vunpack.c.h.bf16 %v67_v55 }
  0x90   :  { %v903_v25 = vpack.c.bf16 %v2877_v17, %v2872_v39  ;;  %v453_v48 = vadd.f32 %v2304_v23, %v313_v5  ;;  %v455_v7 = vadd.f32 %v2304_v23, %v315_v19  ;;  %v284_v41 = vmul.f32 %v2302_v22, %v144_v47 }
  0x91   :  { %1182 = vmatmul.mubr.bf16.gmra.mrb[40].mxu0 %v897_v18  ;;  %v454_v18 = vadd.f32 %v2306_v24, %v314_v56  ;;  %vm584_vm1 = vcmp.ge.f32.partialorder %v456_v0, 0.0  ;;  %v712_v14 = vmul.f32 0.2, %v456_v0  ;;  %v283_v6 = vmul.f32 %v2300_v21, %v143_v4 }
  0x92   :  { %1189 = vmatprep.mubr.bf16.mxu0 %v900_v44  ;;  %v49_v44 = vld [vmem:[%s3631_s0 + $0xe0] sm:$0xff]  ;;  %vm581_vm2 = vcmp.ge.f32.partialorder %v453_v48, 0.0  ;;  %v709_v30 = vmul.f32 0.2, %v453_v48  ;;  %vm583_vm3 = vcmp.ge.f32.partialorder %v455_v7, 0.0  ;;  %v424_v2 = vadd.f32 %v2306_v24, %v284_v41 }
  0x93   :  { %vm582_vm0 = vcmp.ge.f32.partialorder %v454_v18, 0.0  ;;  %v710_v33 = vmul.f32 0.2, %v454_v18  ;;  %v142_v27 = vunpack.c.h.bf16 %v49_v44  ;;  %v840_v10 = vsel %vm584_vm1, %v456_v0, %v712_v14 }
  0x94   :  { %v141_v37 = vunpack.c.l.bf16 %v49_v44  ;;  %v711_v46 = vmul.f32 0.2, %v455_v7  ;;  %v837_v34 = vsel %vm581_vm2, %v453_v48, %v709_v30  ;;  %v423_v20 = vadd.f32 %v2304_v23, %v283_v6 }
  0x95   :  { %v838_v36 = vsel %vm582_vm0, %v454_v18, %v710_v33  ;;  %v282_v43 = vmul.f32 %v2302_v22, %v142_v27  ;;  %vm552_vm5 = vcmp.ge.f32.partialorder %v424_v2, 0.0  ;;  %v680_v3 = vmul.f32 0.2, %v424_v2 }
  0x96   :  { %v922_v57 = vpack.c.bf16 %v840_v10, %v838_v36  ;;  %v281_v40 = vmul.f32 %v2300_v21, %v141_v37  ;;  %v839_v11 = vsel %vm583_vm3, %v455_v7, %v711_v46  ;;  %vm551_vm7 = vcmp.ge.f32.partialorder %v423_v20, 0.0  ;;  %v69_v7 = vld [vmem:[%s3631_s0 + $0x180] sm:$0xff] }
  0x97   :  { %v921_v61 = vpack.c.bf16 %v839_v11, %v837_v34  ;;  %v679_v9 = vmul.f32 0.2, %v423_v20  ;;  %v808_v50 = vsel %vm552_vm5, %v424_v2, %v680_v3  ;;  %v180_v8 = vunpack.c.h.bf16 %v68_v42  ;;  %v72_v11 = vld [vmem:[%s3631_s0 + $0x198] sm:$0xff] }
  0x98   :  { %1277 = vmatprep.mubr.bf16.mxu1 %v922_v57  ;;  %v421_v15 = vadd.f32 %v2304_v23, %v281_v40  ;;  %v318_v16 = vmul.f32 %v2302_v22, %v178_v35  ;;  %v177_v53 = vunpack.c.l.bf16 %v67_v55  ;;  %v179_v60 = vunpack.c.l.bf16 %v68_v42  ;;  %v71_v35 = vld [vmem:[%s3631_s0 + $0x190] sm:$0xff] }
  0x99   :  { %1190 = vmatmul.mubr.bf16.gmra.mrb[44].mxu0 %v899_v38  ;;  %v422_v38 = vadd.f32 %v2306_v24, %v282_v43  ;;  %1278 = vmatmul.mubr.bf16.gmra.mrb[24].mxu1 %v921_v61  ;;  %v2917_v29 = vsel %vm551_vm7, %v423_v20, %v679_v9  ;;  %v320_v18 = vmul.f32 %v2302_v22, %v180_v8  ;;  %v148_v0 = vunpack.c.h.bf16 %v52_v58  ;;  %v70_v43 = vld [vmem:[%s3631_s0 + $0x188] sm:$0xff] }
  0x9a   :  { %1197 = vmatprep.mubr.bf16.mxu0 %v902_v32  ;;  %vm549_vm6 = vcmp.ge.f32.partialorder %v421_v15, 0.0  ;;  %v677_v1 = vmul.f32 0.2, %v421_v15  ;;  %v458_v26 = vadd.f32 %v2306_v24, %v318_v16  ;;  %v317_v12 = vmul.f32 %v2300_v21, %v177_v53 }
  0x9b   :  { %vm550_vm4 = vcmp.ge.f32.partialorder %v422_v38, 0.0  ;;  %v678_v32 = vmul.f32 0.2, %v422_v38  ;;  %v319_v31 = vmul.f32 %v2300_v21, %v179_v60  ;;  %v145_v44 = vunpack.c.l.bf16 %v51_v62 }
  0x9c   :  { %v2915_v28 = vsel %vm549_vm6, %v421_v15, %v677_v1  ;;  %v460_v33 = vadd.f32 %v2306_v24, %v320_v18  ;;  %vm586_vm8 = vcmp.ge.f32.partialorder %v458_v26, 0.0  ;;  %v714_v63 = vmul.f32 0.2, %v458_v26 }
  0x9d   :  { %v806_v54 = vsel %vm550_vm4, %v422_v38, %v678_v32  ;;  %v905_v13 = vpack.c.bf16 %v2917_v29, %v2915_v28  ;;  %v457_v45 = vadd.f32 %v2304_v23, %v317_v12  ;;  %v459_v49 = vadd.f32 %v2304_v23, %v319_v31 }
  0x9e   :  { %v906_v56 = vpack.c.bf16 %v808_v50, %v806_v54  ;;  %v288_v52 = vmul.f32 %v2302_v22, %v148_v0  ;;  %v147_v14 = vunpack.c.l.bf16 %v52_v58  ;;  %vm588_vm9 = vcmp.ge.f32.partialorder %v460_v33, 0.0 }
  0x9f   :  { %v716_v5 = vmul.f32 0.2, %v460_v33  ;;  %v842_v36 = vsel %vm586_vm8, %v458_v26, %v714_v63  ;;  %vm585_vm10 = vcmp.ge.f32.partialorder %v457_v45, 0.0  ;;  %vm587_vm11 = vcmp.ge.f32.partialorder %v459_v49, 0.0 }
  0xa0   :  { %v713_v19 = vmul.f32 0.2, %v457_v45  ;;  %v715_v27 = vmul.f32 0.2, %v459_v49  ;;  %v428_v47 = vadd.f32 %v2306_v24, %v288_v52  ;;  %v285_v37 = vmul.f32 %v2300_v21, %v145_v44  ;;  %v74_v52 = vld [vmem:[%s3631_s0 + $0x1a8] sm:$0xff] }
  0xa1   :  { %1198 = vmatmul.mubr.bf16.gmra.mrb[48].mxu0 %v901_v51  ;;  %v146_v51 = vunpack.c.h.bf16 %v51_v62  ;;  %v844_v48 = vsel %vm588_vm9, %v460_v33, %v716_v5  ;;  %v287_v57 = vmul.f32 %v2300_v21, %v147_v14  ;;  %v182_v34 = vunpack.c.h.bf16 %v69_v7 }
  0xa2   :  { %1205 = vmatprep.mubr.bf16.mxu0 %v904_v59  ;;  %v924_v4 = vpack.c.bf16 %v844_v48, %v842_v36  ;;  %v841_v55 = vsel %vm585_vm10, %v457_v45, %v713_v19  ;;  %v843_v30 = vsel %vm587_vm11, %v459_v49, %v715_v27  ;;  %vm556_vm13 = vcmp.ge.f32.partialorder %v428_v47, 0.0 }
  0xa3   :  { %v286_v59 = vmul.f32 %v2302_v22, %v146_v51  ;;  %v923_v41 = vpack.c.bf16 %v843_v30, %v841_v55  ;;  %v684_v46 = vmul.f32 0.2, %v428_v47  ;;  %v425_v38 = vadd.f32 %v2304_v23, %v285_v37  ;;  %v75_v30 = vld [vmem:[%s3631_s0 + $0x1b0] sm:$0xff] }
  0xa4   :  { %1285 = vmatprep.mubr.bf16.mxu1 %v924_v4  ;;  %v427_v6 = vadd.f32 %v2304_v23, %v287_v57  ;;  %v184_v2 = vunpack.c.h.bf16 %v70_v43  ;;  %v181_v17 = vunpack.c.l.bf16 %v69_v7  ;;  %v322_v61 = vmul.f32 %v2302_v22, %v182_v34 }
  0xa5   :  { %v426_v10 = vadd.f32 %v2306_v24, %v286_v59  ;;  %1286 = vmatmul.mubr.bf16.gmra.mrb[28].mxu1 %v923_v41  ;;  %v812_v39 = vsel %vm556_vm13, %v428_v47, %v684_v46  ;;  %vm553_vm14 = vcmp.ge.f32.partialorder %v425_v38, 0.0  ;;  %v681_v20 = vmul.f32 0.2, %v425_v38 }
  0xa6   :  { %vm555_vm15 = vcmp.ge.f32.partialorder %v427_v6, 0.0  ;;  %v683_v42 = vmul.f32 0.2, %v427_v6  ;;  %v324_v3 = vmul.f32 %v2302_v22, %v184_v2  ;;  %v321_v54 = vmul.f32 %v2300_v21, %v181_v17 }
  0xa7   :  { %vm554_vm12 = vcmp.ge.f32.partialorder %v426_v10, 0.0  ;;  %v682_v40 = vmul.f32 0.2, %v426_v10  ;;  %v809_v1 = vsel %vm553_vm14, %v425_v38, %v681_v20  ;;  %v186_v50 = vunpack.c.h.bf16 %v71_v35 }
  0xa8   :  { %v188_v8 = vunpack.c.h.bf16 %v72_v11  ;;  %v811_v16 = vsel %vm555_vm15, %v427_v6, %v683_v42  ;;  %v462_v53 = vadd.f32 %v2306_v24, %v322_v61  ;;  %v464_v62 = vadd.f32 %v2306_v24, %v324_v3 }
  0xa9   :  { %1206 = vmatmul.mubr.bf16.gmra.mrb[52].mxu0 %v903_v25  ;;  %v810_v15 = vsel %vm554_vm12, %v426_v10, %v682_v40  ;;  %v183_v25 = vunpack.c.l.bf16 %v70_v43  ;;  %v461_v58 = vadd.f32 %v2304_v23, %v321_v54  ;;  %v326_v18 = vmul.f32 %v2302_v22, %v186_v50 }
  0xaa   :  { %1213 = vmatprep.mubr.bf16.mxu0 %v906_v56  ;;  %v908_v32 = vpack.c.bf16 %v812_v39, %v810_v15  ;;  %v907_v56 = vpack.c.bf16 %v811_v16, %v809_v1  ;;  %v328_v26 = vmul.f32 %v2302_v22, %v188_v8  ;;  %vm590_vm0 = vcmp.ge.f32.partialorder %v462_v53, 0.0  ;;  %v77_v16 = vld [vmem:[%s3631_s0 + $0x1c0] sm:$0xff] }
  0xab   :  { %v323_v9 = vmul.f32 %v2300_v21, %v183_v25  ;;  %vm592_vm1 = vcmp.ge.f32.partialorder %v464_v62, 0.0  ;;  %v718_v12 = vmul.f32 0.2, %v462_v53  ;;  %v720_v31 = vmul.f32 0.2, %v464_v62 }
  0xac   :  { %vm589_vm2 = vcmp.ge.f32.partialorder %v461_v58, 0.0  ;;  %v717_v51 = vmul.f32 0.2, %v461_v58  ;;  %v466_v28 = vadd.f32 %v2306_v24, %v326_v18  ;;  %v468_v29 = vadd.f32 %v2306_v24, %v328_v26 }
  0xad   :  { %v463_v60 = vadd.f32 %v2304_v23, %v323_v9  ;;  %v846_v44 = vsel %vm590_vm0, %v462_v53, %v718_v12  ;;  %v848_v33 = vsel %vm592_vm1, %v464_v62, %v720_v31  ;;  %v185_v59 = vunpack.c.l.bf16 %v71_v35  ;;  %v78_v53 = vld [vmem:[%s3631_s0 + $0x1c8] sm:$0xff] }
  0xae   :  { %v926_v63 = vpack.c.bf16 %v848_v33, %v846_v44  ;;  %v845_v45 = vsel %vm589_vm2, %v461_v58, %v717_v51  ;;  %vm594_vm4 = vcmp.ge.f32.partialorder %v466_v28, 0.0  ;;  %vm596_vm5 = vcmp.ge.f32.partialorder %v468_v29, 0.0 }
  0xaf   :  { %vm591_vm3 = vcmp.ge.f32.partialorder %v463_v60, 0.0  ;;  %v719_v0 = vmul.f32 0.2, %v463_v60  ;;  %v722_v5 = vmul.f32 0.2, %v466_v28  ;;  %v187_v19 = vunpack.c.l.bf16 %v72_v11 }
  0xb0   :  { %1293 = vmatprep.mubr.bf16.mxu1 %v926_v63  ;;  %v724_v36 = vmul.f32 0.2, %v468_v29  ;;  %v325_v27 = vmul.f32 %v2300_v21, %v185_v59  ;;  %v192_v47 = vunpack.c.h.bf16 %v74_v52  ;;  %v191_v57 = vunpack.c.l.bf16 %v74_v52 }
  0xb1   :  { %1214 = vmatmul.mubr.bf16.gmra.mrb[56].mxu0 %v905_v13  ;;  %v73_v13 = vld [vmem:[%s3631_s0 + $0x1a0] sm:$0xff]  ;;  %v847_v49 = vsel %vm591_vm3, %v463_v60, %v719_v0  ;;  %v850_v48 = vsel %vm594_vm4, %v466_v28, %v722_v5  ;;  %v327_v43 = vmul.f32 %v2300_v21, %v187_v19  ;;  %v194_v25 = vunpack.c.h.bf16 %v75_v30 }
  0xb2   :  { %1221 = vmatprep.mubr.bf16.mxu0 %v908_v32  ;;  %v925_v14 = vpack.c.bf16 %v847_v49, %v845_v45  ;;  %v190_v10 = vunpack.c.h.bf16 %v73_v13  ;;  %v189_v37 = vunpack.c.l.bf16 %v73_v13  ;;  %v852_v7 = vsel %vm596_vm5, %v468_v29, %v724_v36  ;;  %v76_v32 = vld [vmem:[%s3631_s0 + $0x1b8] sm:$0xff] }
  0xb3   :  { %v465_v4 = vadd.f32 %v2304_v23, %v325_v27  ;;  %v928_v41 = vpack.c.bf16 %v852_v7, %v850_v48  ;;  %v332_v40 = vmul.f32 %v2302_v22, %v192_v47  ;;  %v331_v38 = vmul.f32 %v2300_v21, %v191_v57  ;;  %v80_v57 = vld [vmem:[%s3631_s0 + $0x1d8] sm:$0xff] }
  0xb4   :  { %1294 = vmatmul.mubr.bf16.gmra.mrb[32].mxu1 %v925_v14  ;;  %v330_v55 = vmul.f32 %v2302_v22, %v190_v10  ;;  %v329_v46 = vmul.f32 %v2300_v21, %v189_v37  ;;  %v467_v6 = vadd.f32 %v2304_v23, %v327_v43  ;;  %v196_v8 = vunpack.c.h.bf16 %v76_v32  ;;  %v79_v37 = vld [vmem:[%s3631_s0 + $0x1d0] sm:$0xff] }
  0xb5   :  { %vm593_vm6 = vcmp.ge.f32.partialorder %v465_v4, 0.0  ;;  %v721_v34 = vmul.f32 0.2, %v465_v4  ;;  %1301 = vmatprep.mubr.bf16.mxu1 %v928_v41  ;;  %v472_v15 = vadd.f32 %v2306_v24, %v332_v40  ;;  %v471_v17 = vadd.f32 %v2304_v23, %v331_v38 }
  0xb6   :  { %v470_v2 = vadd.f32 %v2306_v24, %v330_v55  ;;  %v469_v39 = vadd.f32 %v2304_v23, %v329_v46  ;;  %vm595_vm7 = vcmp.ge.f32.partialorder %v467_v6, 0.0  ;;  %v723_v35 = vmul.f32 0.2, %v467_v6 }
  0xb7   :  { %v849_v11 = vsel %vm593_vm6, %v465_v4, %v721_v34  ;;  %vm600_vm9 = vcmp.ge.f32.partialorder %v472_v15, 0.0  ;;  %v728_v42 = vmul.f32 0.2, %v472_v15  ;;  %vm599_vm11 = vcmp.ge.f32.partialorder %v471_v17, 0.0 }
  0xb8   :  { %vm598_vm8 = vcmp.ge.f32.partialorder %v470_v2, 0.0  ;;  %v726_v20 = vmul.f32 0.2, %v470_v2  ;;  %vm597_vm10 = vcmp.ge.f32.partialorder %v469_v39, 0.0  ;;  %v851_v61 = vsel %vm595_vm7, %v467_v6, %v723_v35 }
  0xb9   :  { %1222 = vmatmul.mubr.bf16.gmra.mrb[60].mxu0 %v907_v56  ;;  %v725_v3 = vmul.f32 0.2, %v469_v39  ;;  %v727_v54 = vmul.f32 0.2, %v471_v17  ;;  %v927_v1 = vpack.c.bf16 %v851_v61, %v849_v11  ;;  %v856_v50 = vsel %vm600_vm9, %v472_v15, %v728_v42  ;;  %v82_v11 = vld [vmem:[%s3631_s0 + $0x1e8] sm:$0xff] }
  0xba   :  { %v854_v9 = vsel %vm598_vm8, %v470_v2, %v726_v20  ;;  %v334_v60 = vmul.f32 %v2302_v22, %v194_v25  ;;  %v336_v26 = vmul.f32 %v2302_v22, %v196_v8  ;;  %v193_v12 = vunpack.c.l.bf16 %v75_v30 }
  0xbb   :  { %v930_v62 = vpack.c.bf16 %v856_v50, %v854_v9  ;;  %v853_v58 = vsel %vm597_vm10, %v469_v39, %v725_v3  ;;  %v855_v56 = vsel %vm599_vm11, %v471_v17, %v727_v54  ;;  %v195_v31 = vunpack.c.l.bf16 %v76_v32  ;;  %v81_v39 = vld [vmem:[%s3631_s0 + $0x1e0] sm:$0xff] }
  0xbc   :  { %1302 = vmatmul.mubr.bf16.gmra.mrb[36].mxu1 %v927_v1  ;;  %v929_v18 = vpack.c.bf16 %v855_v56, %v853_v58  ;;  %v474_v51 = vadd.f32 %v2306_v24, %v334_v60  ;;  %v198_v0 = vunpack.c.h.bf16 %v77_v16  ;;  %v200_v44 = vunpack.c.h.bf16 %v78_v53 }
  0xbd   :  { %1309 = vmatprep.mubr.bf16.mxu1 %v930_v62  ;;  %v197_v33 = vunpack.c.l.bf16 %v77_v16  ;;  %v476_v28 = vadd.f32 %v2306_v24, %v336_v26  ;;  %v333_v29 = vmul.f32 %v2300_v21, %v193_v12  ;;  %v335_v13 = vmul.f32 %v2300_v21, %v195_v31 }
  0xbe   :  { %v199_v63 = vunpack.c.l.bf16 %v78_v53  ;;  %vm602_vm12 = vcmp.ge.f32.partialorder %v474_v51, 0.0  ;;  %v730_v45 = vmul.f32 0.2, %v474_v51  ;;  %v338_v49 = vmul.f32 %v2302_v22, %v198_v0 }
  0xbf   :  { %v340_v59 = vmul.f32 %v2302_v22, %v200_v44  ;;  %vm604_vm13 = vcmp.ge.f32.partialorder %v476_v28, 0.0  ;;  %v732_v52 = vmul.f32 0.2, %v476_v28  ;;  %v473_v14 = vadd.f32 %v2304_v23, %v333_v29 }
  0xc0   :  { %v475_v5 = vadd.f32 %v2304_v23, %v335_v13  ;;  %v858_v36 = vsel %vm602_vm12, %v474_v51, %v730_v45  ;;  %v478_v19 = vadd.f32 %v2306_v24, %v338_v49  ;;  %v337_v10 = vmul.f32 %v2300_v21, %v197_v33 }
  0xc1   :  { %v480_v27 = vadd.f32 %v2306_v24, %v340_v59  ;;  %v860_v48 = vsel %vm604_vm13, %v476_v28, %v732_v52  ;;  %vm601_vm14 = vcmp.ge.f32.partialorder %v473_v14, 0.0  ;;  %v729_v47 = vmul.f32 0.2, %v473_v14  ;;  %v84_v52 = vld [vmem:[%s3631_s0 + $0x1f8] sm:$0xff] }
  0xc2   :  { %vm603_vm15 = vcmp.ge.f32.partialorder %v475_v5, 0.0  ;;  %v932_v7 = vpack.c.bf16 %v860_v48, %v858_v36  ;;  %v731_v43 = vmul.f32 0.2, %v475_v5  ;;  %vm606_vm0 = vcmp.ge.f32.partialorder %v478_v19, 0.0 }
  0xc3   :  { %vm608_vm1 = vcmp.ge.f32.partialorder %v480_v27, 0.0  ;;  %v857_v4 = vsel %vm601_vm14, %v473_v14, %v729_v47  ;;  %v734_v55 = vmul.f32 0.2, %v478_v19  ;;  %v736_v30 = vmul.f32 0.2, %v480_v27 }
  0xc4   :  { %1310 = vmatmul.mubr.bf16.gmra.mrb[40].mxu1 %v929_v18  ;;  %v339_v41 = vmul.f32 %v2300_v21, %v199_v63  ;;  %v859_v40 = vsel %vm603_vm15, %v475_v5, %v731_v43  ;;  %v477_v46 = vadd.f32 %v2304_v23, %v337_v10  ;;  %v202_v38 = vunpack.c.h.bf16 %v79_v37  ;;  %v83_v63 = vld [vmem:[%s3631_s0 + $0x1f0] sm:$0xff] }
  0xc5   :  { %1317 = vmatprep.mubr.bf16.mxu1 %v932_v7  ;;  %v204_v6 = vunpack.c.h.bf16 %v80_v57  ;;  %v862_v34 = vsel %vm606_vm0, %v478_v19, %v734_v55  ;;  %v864_v2 = vsel %vm608_vm1, %v480_v27, %v736_v30  ;;  %v931_v17 = vpack.c.bf16 %v859_v40, %v857_v4 }
  0xc6   :  { %v479_v15 = vadd.f32 %v2304_v23, %v339_v41  ;;  %vm605_vm2 = vcmp.ge.f32.partialorder %v477_v46, 0.0  ;;  %v733_v25 = vmul.f32 0.2, %v477_v46  ;;  %v342_v35 = vmul.f32 %v2302_v22, %v202_v38 }
  0xc7   :  { %v344_v20 = vmul.f32 %v2302_v22, %v204_v6  ;;  %v201_v42 = vunpack.c.l.bf16 %v79_v37  ;;  %v934_v61 = vpack.c.bf16 %v864_v2, %v862_v34  ;;  %v203_v54 = vunpack.c.l.bf16 %v80_v57 }
  0xc8   :  { %vm607_vm3 = vcmp.ge.f32.partialorder %v479_v15, 0.0  ;;  %v735_v32 = vmul.f32 0.2, %v479_v15  ;;  %v482_v3 = vadd.f32 %v2306_v24, %v342_v35  ;;  %v206_v1 = vunpack.c.h.bf16 %v81_v39 }
  0xc9   :  { %v861_v9 = vsel %vm605_vm2, %v477_v46, %v733_v25  ;;  %v484_v50 = vadd.f32 %v2306_v24, %v344_v20  ;;  %v341_v8 = vmul.f32 %v2300_v21, %v201_v42  ;;  %v208_v16 = vunpack.c.h.bf16 %v82_v11 }
  0xca   :  { %v863_v53 = vsel %vm607_vm3, %v479_v15, %v735_v32  ;;  %vm610_vm4 = vcmp.ge.f32.partialorder %v482_v3, 0.0  ;;  %v738_v62 = vmul.f32 0.2, %v482_v3  ;;  %v343_v58 = vmul.f32 %v2300_v21, %v203_v54 }
  0xcb   :  { %vm612_vm5 = vcmp.ge.f32.partialorder %v484_v50, 0.0  ;;  %v740_v56 = vmul.f32 0.2, %v484_v50  ;;  %v481_v60 = vadd.f32 %v2304_v23, %v341_v8  ;;  %v346_v18 = vmul.f32 %v2302_v22, %v206_v1 }
  0xcc   :  { %1318 = vmatmul.mubr.bf16.gmra.mrb[44].mxu1 %v931_v17  ;;  %v866_v26 = vsel %vm610_vm4, %v482_v3, %v738_v62  ;;  %v483_v12 = vadd.f32 %v2304_v23, %v343_v58  ;;  %v348_v31 = vmul.f32 %v2302_v22, %v208_v16  ;;  %v205_v51 = vunpack.c.l.bf16 %v81_v39 }
  0xcd   :  { %1325 = vmatprep.mubr.bf16.mxu1 %v934_v61  ;;  %v933_v0 = vpack.c.bf16 %v863_v53, %v861_v9  ;;  %v868_v44 = vsel %vm612_vm5, %v484_v50, %v740_v56  ;;  %v486_v33 = vadd.f32 %v2306_v24, %v346_v18  ;;  %vm609_vm6 = vcmp.ge.f32.partialorder %v481_v60, 0.0 }
  0xce   :  { %v737_v28 = vmul.f32 0.2, %v481_v60  ;;  %v739_v29 = vmul.f32 0.2, %v483_v12  ;;  %v488_v13 = vadd.f32 %v2306_v24, %v348_v31  ;;  %v936_v45 = vpack.c.bf16 %v868_v44, %v866_v26 }
  0xcf   :  { %vm611_vm7 = vcmp.ge.f32.partialorder %v483_v12, 0.0  ;;  %v742_v49 = vmul.f32 0.2, %v486_v33  ;;  %v207_v59 = vunpack.c.l.bf16 %v82_v11  ;;  %vm614_vm8 = vcmp.ge.f32.partialorder %v486_v33, 0.0 }
  0xd0   :  { %vm616_vm9 = vcmp.ge.f32.partialorder %v488_v13, 0.0  ;;  %v744_v14 = vmul.f32 0.2, %v488_v13  ;;  %v345_v5 = vmul.f32 %v2300_v21, %v205_v51  ;;  %v210_v19 = vunpack.c.h.bf16 %v83_v63 }
  0xd1   :  { %v347_v36 = vmul.f32 %v2300_v21, %v207_v59  ;;  %v865_v27 = vsel %vm609_vm6, %v481_v60, %v737_v28  ;;  %v867_v10 = vsel %vm611_vm7, %v483_v12, %v739_v29  ;;  %v212_v48 = vunpack.c.h.bf16 %v84_v52 }
  0xd2   :  { %v870_v47 = vsel %vm614_vm8, %v486_v33, %v742_v49  ;;  %v872_v37 = vsel %vm616_vm9, %v488_v13, %v744_v14  ;;  %v485_v57 = vadd.f32 %v2304_v23, %v345_v5  ;;  %v350_v7 = vmul.f32 %v2302_v22, %v210_v19 }
  0xd3   :  { %v487_v43 = vadd.f32 %v2304_v23, %v347_v36  ;;  %v352_v4 = vmul.f32 %v2302_v22, %v212_v48  ;;  %v209_v55 = vunpack.c.l.bf16 %v83_v63  ;;  %v211_v30 = vunpack.c.l.bf16 %v84_v52 }
  0xd4   :  { %1326 = vmatmul.mubr.bf16.gmra.mrb[48].mxu1 %v933_v0  ;;  %v490_v41 = vadd.f32 %v2306_v24, %v350_v7  ;;  %v935_v46 = vpack.c.bf16 %v867_v10, %v865_v27  ;;  %v938_v38 = vpack.c.bf16 %v872_v37, %v870_v47  ;;  %v741_v6 = vmul.f32 0.2, %v485_v57 }
  0xd5   :  { %1333 = vmatprep.mubr.bf16.mxu1 %v936_v45  ;;  %v492_v40 = vadd.f32 %v2306_v24, %v352_v4  ;;  %v743_v34 = vmul.f32 0.2, %v487_v43  ;;  %v349_v2 = vmul.f32 %v2300_v21, %v209_v55  ;;  %v351_v15 = vmul.f32 %v2300_v21, %v211_v30 }
  0xd6   :  { %vm613_vm10 = vcmp.ge.f32.partialorder %v485_v57, 0.0  ;;  %vm615_vm11 = vcmp.ge.f32.partialorder %v487_v43, 0.0  ;;  %v746_v39 = vmul.f32 0.2, %v490_v41  ;;  %vm618_vm12 = vcmp.ge.f32.partialorder %v490_v41, 0.0 }
  0xd7   :  { %v748_v17 = vmul.f32 0.2, %v492_v40  ;;  %vm620_vm13 = vcmp.ge.f32.partialorder %v492_v40, 0.0  ;;  %v869_v22 = vsel %vm613_vm10, %v485_v57, %v741_v6  ;;  %v871_v25 = vsel %vm615_vm11, %v487_v43, %v743_v34 }
  0xd8   :  { %v489_v24 = vadd.f32 %v2304_v23, %v349_v2  ;;  %v491_v35 = vadd.f32 %v2304_v23, %v351_v15  ;;  %v874_v11 = vsel %vm618_vm12, %v490_v41, %v746_v39  ;;  %v937_v20 = vpack.c.bf16 %v871_v25, %v869_v22 }
  0xd9   :  { %v876_v32 = vsel %vm620_vm13, %v492_v40, %v748_v17  ;;  %vm1358_vm0 = vcmask 261120   ;;  %vm1948_vm1 = vcmask 257024   ;;  %vm1492_vm2 = vcmask 253952  }
  0xda   :  { %v940_v42 = vpack.c.bf16 %v876_v32, %v874_v11  ;;  %v745_v61 = vmul.f32 0.2, %v489_v24  ;;  %v747_v21 = vmul.f32 0.2, %v491_v35  ;;  %vm617_vm14 = vcmp.ge.f32.partialorder %v489_v24, 0.0 }
  0xdb   :  { %vm619_vm15 = vcmp.ge.f32.partialorder %v491_v35, 0.0 }
  0xdc   :  { %1334 = vmatmul.mubr.bf16.gmra.mrb[52].mxu1 %v935_v46  ;;  %v873_v3 = vsel %vm617_vm14, %v489_v24, %v745_v61  ;;  %v875_v54 = vsel %vm619_vm15, %v491_v35, %v747_v21 }
  0xdd   :  { %1341 = vmatprep.mubr.bf16.mxu1 %v938_v38  ;;  %v939_v1 = vpack.c.bf16 %v875_v54, %v873_v3 }
  0xe4   :  { %1342 = vmatmul.mubr.bf16.gmra.mrb[56].mxu1 %v937_v20 }
  0xe5   :  { %1349 = vmatprep.mubr.bf16.mxu1 %v940_v42 }
  0xec   :  { %1350 = vmatmul.mubr.bf16.gmra.mrb[60].mxu1 %v939_v1 }
 0x114   :  { %v1103_v9 = vpop.f32.mrb[0].mxu0 }
 0x115   :  { %v1494_v50 = vmul.f32 %v1103_v9, %v1103_v9  ;;  %v2105_v8 = vpack.c.bf16 %v1103_v9, %v1103_v9  ;;  %v1105_v23 = vpop.f32.mrb[1].mxu0  ;;  %v1359_v53 = vsel %vm1358_vm0, %v1103_v9, 0.0 }
 0x116   :  { %v1106_v16 = vpop.f32.mrb[2].mxu0 }
 0x117   :  { %1949 = vst.msk [vmem:[%s3634_s4] sm:$0xf] %vm1948_vm1, %v2105_v8  ;;  %v1360_v62 = vsel %vm1358_vm0, %v1106_v16, 0.0  ;;  %v1495_v58 = vmul.f32 %v1106_v16, %v1106_v16  ;;  %v2106_v56 = vpack.c.bf16 %v1106_v16, %v1106_v16  ;;  %v1108_v60 = vpop.f32.mrb[3].mxu0  ;;  %v1558_v26 = vsel %vm1358_vm0, %v1494_v50, 0.0 }
 0x118   :  { %v1361_v18 = vadd.f32 %v1360_v62, %v1359_v53 }
 0x119   :  { %v1559_v12 = vsel %vm1358_vm0, %v1495_v58, 0.0  ;;  %1950 = vst.msk [vmem:[%s3634_s4 + $0x4] sm:$0xf] %vm1948_vm1, %v2106_v56 }
 0x11a   :  { %v1560_v31 = vadd.f32 %v1559_v12, %v1558_v26 }
 0x11c   :  { %v1111_v51 = vpop.f32.mrb[4].mxu0 }
 0x11d   :  { %v1362_v0 = vsel %vm1358_vm0, %v1111_v51, 0.0  ;;  %v1496_v44 = vmul.f32 %v1111_v51, %v1111_v51  ;;  %v2107_v33 = vpack.c.bf16 %v1111_v51, %v1111_v51  ;;  %v1113_v28 = vpop.f32.mrb[5].mxu0 }
 0x11e   :  { %v1363_v29 = vadd.f32 %v1362_v0, %v1361_v18  ;;  %v1114_v13 = vpop.f32.mrb[6].mxu0 }
 0x11f   :  { %v1561_v63 = vsel %vm1358_vm0, %v1496_v44, 0.0  ;;  %1951 = vst.msk [vmem:[%s3634_s4 + $0x8] sm:$0xf] %vm1948_vm1, %v2107_v33  ;;  %v1364_v45 = vsel %vm1358_vm0, %v1114_v13, 0.0  ;;  %v1497_v49 = vmul.f32 %v1114_v13, %v1114_v13  ;;  %v2108_v59 = vpack.c.bf16 %v1114_v13, %v1114_v13  ;;  %v1116_v52 = vpop.f32.mrb[7].mxu0 }
 0x120   :  { %v1562_v14 = vadd.f32 %v1561_v63, %v1560_v31  ;;  %v1365_v5 = vadd.f32 %v1364_v45, %v1363_v29 }
 0x121   :  { %v1563_v36 = vsel %vm1358_vm0, %v1497_v49, 0.0  ;;  %1952 = vst.msk [vmem:[%s3634_s4 + $0xc] sm:$0xf] %vm1948_vm1, %v2108_v59  ;;  %v3082_v27 = vpop.f32.mrb[0].mxu1 }
 0x122   :  { %v1564_v19 = vadd.f32 %v1563_v36, %v1562_v14  ;;  %v2137_v48 = vpack.c.bf16 %v3082_v27, %v3082_v27  ;;  %v1233_v47 = vpop.f32.mrb[1].mxu1 }
 0x123   :  { %v3087_v4 = vpop.f32.mrb[2].mxu1 }
 0x124   :  { %v1119_v10 = vpop.f32.mrb[8].mxu0  ;;  %1981 = vst.msk [vmem:[%s3634_s4 + $0x80] sm:$0xf] %vm1948_vm1, %v2137_v48  ;;  %v1236_v41 = vpop.f32.mrb[3].mxu1  ;;  %v2138_v39 = vpack.c.bf16 %v3087_v4, %v3087_v4 }
 0x125   :  { %v1366_v37 = vsel %vm1358_vm0, %v1119_v10, 0.0  ;;  %v1498_v57 = vmul.f32 %v1119_v10, %v1119_v10  ;;  %v2109_v7 = vpack.c.bf16 %v1119_v10, %v1119_v10  ;;  %v1121_v43 = vpop.f32.mrb[9].mxu0 }
 0x126   :  { %v1367_v55 = vadd.f32 %v1366_v37, %v1365_v5  ;;  %v1122_v30 = vpop.f32.mrb[10].mxu0  ;;  %1982 = vst.msk [vmem:[%s3634_s4 + $0x84] sm:$0xf] %vm1948_vm1, %v2138_v39 }
 0x127   :  { %v1565_v40 = vsel %vm1358_vm0, %v1498_v57, 0.0  ;;  %1953 = vst.msk [vmem:[%s3634_s4 + $0x10] sm:$0xf] %vm1948_vm1, %v2109_v7  ;;  %v1368_v46 = vsel %vm1358_vm0, %v1122_v30, 0.0  ;;  %v1499_v38 = vmul.f32 %v1122_v30, %v1122_v30  ;;  %v2110_v6 = vpack.c.bf16 %v1122_v30, %v1122_v30  ;;  %v1124_v34 = vpop.f32.mrb[11].mxu0 }
 0x128   :  { %v1566_v2 = vadd.f32 %v1565_v40, %v1564_v19  ;;  %v1369_v15 = vadd.f32 %v1368_v46, %v1367_v55 }
 0x129   :  { %v1567_v17 = vsel %vm1358_vm0, %v1499_v38, 0.0  ;;  %1954 = vst.msk [vmem:[%s3634_s4 + $0x14] sm:$0xf] %vm1948_vm1, %v2110_v6 }
 0x12a   :  { %v1568_v22 = vadd.f32 %v1567_v17, %v1566_v2 }
 0x12c   :  { %v1127_v25 = vpop.f32.mrb[12].mxu0 }
 0x12d   :  { %v1370_v24 = vsel %vm1358_vm0, %v1127_v25, 0.0  ;;  %v1500_v35 = vmul.f32 %v1127_v25, %v1127_v25  ;;  %v2111_v11 = vpack.c.bf16 %v1127_v25, %v1127_v25  ;;  %v1129_v32 = vpop.f32.mrb[13].mxu0 }
 0x12e   :  { %v1371_v20 = vadd.f32 %v1370_v24, %v1369_v15  ;;  %v1130_v42 = vpop.f32.mrb[14].mxu0 }
 0x12f   :  { %v1569_v61 = vsel %vm1358_vm0, %v1500_v35, 0.0  ;;  %1955 = vst.msk [vmem:[%s3634_s4 + $0x18] sm:$0xf] %vm1948_vm1, %v2111_v11  ;;  %v1372_v21 = vsel %vm1358_vm0, %v1130_v42, 0.0  ;;  %v1501_v3 = vmul.f32 %v1130_v42, %v1130_v42  ;;  %v2112_v54 = vpack.c.bf16 %v1130_v42, %v1130_v42  ;;  %v1132_v1 = vpop.f32.mrb[15].mxu0 }
 0x130   :  { %v1570_v9 = vadd.f32 %v1569_v61, %v1568_v22  ;;  %v1373_v50 = vadd.f32 %v1372_v21, %v1371_v20  ;;  %v3122_v16 = vpop.f32.mrb[4].mxu1 }
 0x131   :  { %v1571_v8 = vsel %vm1358_vm0, %v1501_v3, 0.0  ;;  %1956 = vst.msk [vmem:[%s3634_s4 + $0x1c] sm:$0xf] %vm1948_vm1, %v2112_v54  ;;  %v2139_v53 = vpack.c.bf16 %v3122_v16, %v3122_v16  ;;  %v1241_v62 = vpop.f32.mrb[5].mxu1 }
 0x132   :  { %v1572_v23 = vadd.f32 %v1571_v8, %v1570_v9  ;;  %v3126_v56 = vpop.f32.mrb[6].mxu1 }
 0x133   :  { %1983 = vst.msk [vmem:[%s3634_s4 + $0x88] sm:$0xf] %vm1948_vm1, %v2139_v53  ;;  %v1244_v31 = vpop.f32.mrb[7].mxu1  ;;  %v2140_v44 = vpack.c.bf16 %v3126_v56, %v3126_v56 }
 0x134   :  { %v1135_v58 = vpop.f32.mrb[16].mxu0 }
 0x135   :  { %v1374_v60 = vsel %vm1358_vm0, %v1135_v58, 0.0  ;;  %v1502_v18 = vmul.f32 %v1135_v58, %v1135_v58  ;;  %v2113_v26 = vpack.c.bf16 %v1135_v58, %v1135_v58  ;;  %v1137_v12 = vpop.f32.mrb[17].mxu0  ;;  %1984 = vst.msk [vmem:[%s3634_s4 + $0x8c] sm:$0xf] %vm1948_vm1, %v2140_v44 }
 0x136   :  { %v1375_v51 = vadd.f32 %v1374_v60, %v1373_v50  ;;  %v1138_v0 = vpop.f32.mrb[18].mxu0 }
 0x137   :  { %v1573_v33 = vsel %vm1358_vm0, %v1502_v18, 0.0  ;;  %1957 = vst.msk [vmem:[%s3634_s4 + $0x20] sm:$0xf] %vm1948_vm1, %v2113_v26  ;;  %v1376_v28 = vsel %vm1358_vm0, %v1138_v0, 0.0  ;;  %v1503_v29 = vmul.f32 %v1138_v0, %v1138_v0  ;;  %v2114_v13 = vpack.c.bf16 %v1138_v0, %v1138_v0  ;;  %v1140_v63 = vpop.f32.mrb[19].mxu0 }
 0x138   :  { %v1574_v45 = vadd.f32 %v1573_v33, %v1572_v23  ;;  %v1377_v49 = vadd.f32 %v1376_v28, %v1375_v51 }
 0x139   :  { %v1575_v59 = vsel %vm1358_vm0, %v1503_v29, 0.0  ;;  %1958 = vst.msk [vmem:[%s3634_s4 + $0x24] sm:$0xf] %vm1948_vm1, %v2114_v13 }
 0x13a   :  { %v1576_v52 = vadd.f32 %v1575_v59, %v1574_v45 }
 0x13b   :  { %v3151_v37 = vpop.f32.mrb[8].mxu1 }
 0x13c   :  { %v1143_v14 = vpop.f32.mrb[20].mxu0  ;;  %v1249_v41 = vpop.f32.mrb[9].mxu1  ;;  %v2141_v34 = vpack.c.bf16 %v3151_v37, %v3151_v37 }
 0x13d   :  { %v1378_v5 = vsel %vm1358_vm0, %v1143_v14, 0.0  ;;  %v1504_v36 = vmul.f32 %v1143_v14, %v1143_v14  ;;  %v2115_v19 = vpack.c.bf16 %v1143_v14, %v1143_v14  ;;  %v1145_v10 = vpop.f32.mrb[21].mxu0  ;;  %v3159_v38 = vpop.f32.mrb[10].mxu1 }
 0x13e   :  { %v1379_v48 = vadd.f32 %v1378_v5, %v1377_v49  ;;  %v1146_v47 = vpop.f32.mrb[22].mxu0  ;;  %v1252_v2 = vpop.f32.mrb[11].mxu1  ;;  %v2142_v39 = vpack.c.bf16 %v3159_v38, %v3159_v38  ;;  %1985 = vst.msk [vmem:[%s3634_s4 + $0x90] sm:$0xf] %vm1948_vm1, %v2141_v34 }
 0x13f   :  { %v1577_v57 = vsel %vm1358_vm0, %v1504_v36, 0.0  ;;  %1959 = vst.msk [vmem:[%s3634_s4 + $0x28] sm:$0xf] %vm1948_vm1, %v2115_v19  ;;  %v1380_v7 = vsel %vm1358_vm0, %v1146_v47, 0.0  ;;  %v1505_v43 = vmul.f32 %v1146_v47, %v1146_v47  ;;  %v2116_v55 = vpack.c.bf16 %v1146_v47, %v1146_v47  ;;  %v1148_v30 = vpop.f32.mrb[23].mxu0 }
 0x140   :  { %v1578_v40 = vadd.f32 %v1577_v57, %v1576_v52  ;;  %v1381_v46 = vadd.f32 %v1380_v7, %v1379_v48  ;;  %1986 = vst.msk [vmem:[%s3634_s4 + $0x94] sm:$0xf] %vm1948_vm1, %v2142_v39 }
 0x141   :  { %v1579_v6 = vsel %vm1358_vm0, %v1505_v43, 0.0  ;;  %1960 = vst.msk [vmem:[%s3634_s4 + $0x2c] sm:$0xf] %vm1948_vm1, %v2116_v55 }
 0x142   :  { %v1580_v15 = vadd.f32 %v1579_v6, %v1578_v40 }
 0x144   :  { %v1151_v17 = vpop.f32.mrb[24].mxu0 }
 0x145   :  { %v1382_v22 = vsel %vm1358_vm0, %v1151_v17, 0.0  ;;  %v1506_v25 = vmul.f32 %v1151_v17, %v1151_v17  ;;  %v2117_v24 = vpack.c.bf16 %v1151_v17, %v1151_v17  ;;  %v1153_v35 = vpop.f32.mrb[25].mxu0 }
 0x146   :  { %v1383_v11 = vadd.f32 %v1382_v22, %v1381_v46  ;;  %v1154_v32 = vpop.f32.mrb[26].mxu0 }
 0x147   :  { %v1581_v20 = vsel %vm1358_vm0, %v1506_v25, 0.0  ;;  %1961 = vst.msk [vmem:[%s3634_s4 + $0x30] sm:$0xf] %vm1948_vm1, %v2117_v24  ;;  %v1384_v42 = vsel %vm1358_vm0, %v1154_v32, 0.0  ;;  %v1507_v61 = vmul.f32 %v1154_v32, %v1154_v32  ;;  %v2118_v21 = vpack.c.bf16 %v1154_v32, %v1154_v32  ;;  %v1156_v3 = vpop.f32.mrb[27].mxu0  ;;  %v3190_v8 = vpop.f32.mrb[12].mxu1 }
 0x148   :  { %v1582_v54 = vadd.f32 %v1581_v20, %v1580_v15  ;;  %v1385_v1 = vadd.f32 %v1384_v42, %v1383_v11  ;;  %v2143_v23 = vpack.c.bf16 %v3190_v8, %v3190_v8  ;;  %v1257_v53 = vpop.f32.mrb[13].mxu1 }
 0x149   :  { %v1583_v9 = vsel %vm1358_vm0, %v1507_v61, 0.0  ;;  %1962 = vst.msk [vmem:[%s3634_s4 + $0x34] sm:$0xf] %vm1948_vm1, %v2118_v21  ;;  %v3194_v58 = vpop.f32.mrb[14].mxu1 }
 0x14a   :  { %v1584_v50 = vadd.f32 %v1583_v9, %v1582_v54  ;;  %1987 = vst.msk [vmem:[%s3634_s4 + $0x98] sm:$0xf] %vm1948_vm1, %v2143_v23  ;;  %v1260_v31 = vpop.f32.mrb[15].mxu1  ;;  %v2144_v44 = vpack.c.bf16 %v3194_v58, %v3194_v58 }
 0x14c   :  { %v1159_v62 = vpop.f32.mrb[28].mxu0  ;;  %1988 = vst.msk [vmem:[%s3634_s4 + $0x9c] sm:$0xf] %vm1948_vm1, %v2144_v44 }
 0x14d   :  { %v1386_v60 = vsel %vm1358_vm0, %v1159_v62, 0.0  ;;  %v1508_v18 = vmul.f32 %v1159_v62, %v1159_v62  ;;  %v2119_v26 = vpack.c.bf16 %v1159_v62, %v1159_v62  ;;  %v1161_v12 = vpop.f32.mrb[29].mxu0 }
 0x14e   :  { %v1387_v51 = vadd.f32 %v1386_v60, %v1385_v1  ;;  %v1162_v0 = vpop.f32.mrb[30].mxu0 }
 0x14f   :  { %v1585_v33 = vsel %vm1358_vm0, %v1508_v18, 0.0  ;;  %1963 = vst.msk [vmem:[%s3634_s4 + $0x38] sm:$0xf] %vm1948_vm1, %v2119_v26  ;;  %v1388_v28 = vsel %vm1358_vm0, %v1162_v0, 0.0  ;;  %v1509_v29 = vmul.f32 %v1162_v0, %v1162_v0  ;;  %v2120_v13 = vpack.c.bf16 %v1162_v0, %v1162_v0  ;;  %v1164_v63 = vpop.f32.mrb[31].mxu0 }
 0x150   :  { %v1586_v45 = vadd.f32 %v1585_v33, %v1584_v50  ;;  %v1389_v49 = vadd.f32 %v1388_v28, %v1387_v51 }
 0x151   :  { %v1587_v59 = vsel %vm1358_vm0, %v1509_v29, 0.0  ;;  %1964 = vst.msk [vmem:[%s3634_s4 + $0x3c] sm:$0xf] %vm1948_vm1, %v2120_v13 }
 0x152   :  { %v1588_v52 = vadd.f32 %v1587_v59, %v1586_v45 }
 0x153   :  { %v3219_v57 = vpop.f32.mrb[16].mxu1 }
 0x154   :  { %v1167_v14 = vpop.f32.mrb[32].mxu0  ;;  %v1265_v40 = vpop.f32.mrb[17].mxu1  ;;  %v2145_v15 = vpack.c.bf16 %v3219_v57, %v3219_v57 }
 0x155   :  { %v1390_v5 = vsel %vm1358_vm0, %v1167_v14, 0.0  ;;  %v1510_v36 = vmul.f32 %v1167_v14, %v1167_v14  ;;  %v2121_v19 = vpack.c.bf16 %v1167_v14, %v1167_v14  ;;  %v1169_v10 = vpop.f32.mrb[33].mxu0  ;;  %v3227_v34 = vpop.f32.mrb[18].mxu1 }
 0x156   :  { %v1391_v48 = vadd.f32 %v1390_v5, %v1389_v49  ;;  %v1170_v47 = vpop.f32.mrb[34].mxu0  ;;  %v1268_v39 = vpop.f32.mrb[19].mxu1  ;;  %v2146_v22 = vpack.c.bf16 %v3227_v34, %v3227_v34  ;;  %1989 = vst.msk [vmem:[%s3634_s4 + $0xa0] sm:$0xf] %vm1948_vm1, %v2145_v15 }
 0x157   :  { %v1589_v7 = vsel %vm1358_vm0, %v1510_v36, 0.0  ;;  %1965 = vst.msk [vmem:[%s3634_s4 + $0x40] sm:$0xf] %vm1948_vm1, %v2121_v19  ;;  %v1392_v43 = vsel %vm1358_vm0, %v1170_v47, 0.0  ;;  %v1511_v55 = vmul.f32 %v1170_v47, %v1170_v47  ;;  %v2122_v30 = vpack.c.bf16 %v1170_v47, %v1170_v47  ;;  %v1172_v41 = vpop.f32.mrb[35].mxu0 }
 0x158   :  { %v1590_v46 = vadd.f32 %v1589_v7, %v1588_v52  ;;  %v1393_v6 = vadd.f32 %v1392_v43, %v1391_v48  ;;  %1990 = vst.msk [vmem:[%s3634_s4 + $0xa4] sm:$0xf] %vm1948_vm1, %v2146_v22 }
 0x159   :  { %v1591_v2 = vsel %vm1358_vm0, %v1511_v55, 0.0  ;;  %1966 = vst.msk [vmem:[%s3634_s4 + $0x44] sm:$0xf] %vm1948_vm1, %v2122_v30 }
 0x15a   :  { %v1592_v17 = vadd.f32 %v1591_v2, %v1590_v46 }
 0x15c   :  { %v1175_v25 = vpop.f32.mrb[36].mxu0 }
 0x15d   :  { %v1394_v24 = vsel %vm1358_vm0, %v1175_v25, 0.0  ;;  %v1512_v35 = vmul.f32 %v1175_v25, %v1175_v25  ;;  %v2123_v11 = vpack.c.bf16 %v1175_v25, %v1175_v25  ;;  %v1177_v32 = vpop.f32.mrb[37].mxu0 }
 0x15e   :  { %v1395_v20 = vadd.f32 %v1394_v24, %v1393_v6  ;;  %v1178_v42 = vpop.f32.mrb[38].mxu0 }
 0x15f   :  { %v1593_v61 = vsel %vm1358_vm0, %v1512_v35, 0.0  ;;  %1967 = vst.msk [vmem:[%s3634_s4 + $0x48] sm:$0xf] %vm1948_vm1, %v2123_v11  ;;  %v1396_v21 = vsel %vm1358_vm0, %v1178_v42, 0.0  ;;  %v1513_v3 = vmul.f32 %v1178_v42, %v1178_v42  ;;  %v2124_v54 = vpack.c.bf16 %v1178_v42, %v1178_v42  ;;  %v1180_v1 = vpop.f32.mrb[39].mxu0 }
 0x160   :  { %v1594_v9 = vadd.f32 %v1593_v61, %v1592_v17  ;;  %v1397_v50 = vadd.f32 %v1396_v21, %v1395_v20  ;;  %v3259_v31 = vpop.f32.mrb[20].mxu1 }
 0x161   :  { %v1595_v23 = vsel %vm1358_vm0, %v1513_v3, 0.0  ;;  %1968 = vst.msk [vmem:[%s3634_s4 + $0x4c] sm:$0xf] %vm1948_vm1, %v2124_v54  ;;  %v2147_v44 = vpack.c.bf16 %v3259_v31, %v3259_v31  ;;  %v1273_v33 = vpop.f32.mrb[21].mxu1 }
 0x162   :  { %v1596_v53 = vadd.f32 %v1595_v23, %v1594_v9  ;;  %v3269_v49 = vpop.f32.mrb[22].mxu1 }
 0x163   :  { %1991 = vst.msk [vmem:[%s3634_s4 + $0xa8] sm:$0xf] %vm1948_vm1, %v2147_v44  ;;  %v1276_v14 = vpop.f32.mrb[23].mxu1  ;;  %v2148_v36 = vpack.c.bf16 %v3269_v49, %v3269_v49 }
 0x164   :  { %v1183_v62 = vpop.f32.mrb[40].mxu0 }
 0x165   :  { %v1398_v60 = vsel %vm1358_vm0, %v1183_v62, 0.0  ;;  %v1514_v18 = vmul.f32 %v1183_v62, %v1183_v62  ;;  %v2125_v26 = vpack.c.bf16 %v1183_v62, %v1183_v62  ;;  %v1185_v12 = vpop.f32.mrb[41].mxu0  ;;  %1992 = vst.msk [vmem:[%s3634_s4 + $0xac] sm:$0xf] %vm1948_vm1, %v2148_v36 }
 0x166   :  { %v1399_v51 = vadd.f32 %v1398_v60, %v1397_v50  ;;  %v1186_v0 = vpop.f32.mrb[42].mxu0 }
 0x167   :  { %v1597_v28 = vsel %vm1358_vm0, %v1514_v18, 0.0  ;;  %1969 = vst.msk [vmem:[%s3634_s4 + $0x50] sm:$0xf] %vm1948_vm1, %v2125_v26  ;;  %v1400_v29 = vsel %vm1358_vm0, %v1186_v0, 0.0  ;;  %v1515_v13 = vmul.f32 %v1186_v0, %v1186_v0  ;;  %v2126_v63 = vpack.c.bf16 %v1186_v0, %v1186_v0  ;;  %v1188_v45 = vpop.f32.mrb[43].mxu0 }
 0x168   :  { %v1598_v59 = vadd.f32 %v1597_v28, %v1596_v53  ;;  %v1401_v52 = vadd.f32 %v1400_v29, %v1399_v51 }
 0x169   :  { %v1599_v5 = vsel %vm1358_vm0, %v1515_v13, 0.0  ;;  %1970 = vst.msk [vmem:[%s3634_s4 + $0x54] sm:$0xf] %vm1948_vm1, %v2126_v63 }
 0x16a   :  { %v1600_v19 = vadd.f32 %v1599_v5, %v1598_v59 }
 0x16c   :  { %v1191_v10 = vpop.f32.mrb[44].mxu0  ;;  %v3298_v25 = vpop.f32.mrb[24].mxu1 }
 0x16d   :  { %v1402_v48 = vsel %vm1358_vm0, %v1191_v10, 0.0  ;;  %v1516_v47 = vmul.f32 %v1191_v10, %v1191_v10  ;;  %v2127_v7 = vpack.c.bf16 %v1191_v10, %v1191_v10  ;;  %v1193_v43 = vpop.f32.mrb[45].mxu0  ;;  %v2149_v35 = vpack.c.bf16 %v3298_v25, %v3298_v25  ;;  %v1281_v11 = vpop.f32.mrb[25].mxu1 }
 0x16e   :  { %v1403_v55 = vadd.f32 %v1402_v48, %v1401_v52  ;;  %v1194_v30 = vpop.f32.mrb[46].mxu0  ;;  %v3303_v21 = vpop.f32.mrb[26].mxu1 }
 0x16f   :  { %v1601_v41 = vsel %vm1358_vm0, %v1516_v47, 0.0  ;;  %1971 = vst.msk [vmem:[%s3634_s4 + $0x58] sm:$0xf] %vm1948_vm1, %v2127_v7  ;;  %v1404_v40 = vsel %vm1358_vm0, %v1194_v30, 0.0  ;;  %v1517_v46 = vmul.f32 %v1194_v30, %v1194_v30  ;;  %v2128_v6 = vpack.c.bf16 %v1194_v30, %v1194_v30  ;;  %v1196_v2 = vpop.f32.mrb[47].mxu0  ;;  %v1284_v1 = vpop.f32.mrb[27].mxu1 }
 0x170   :  { %v1602_v15 = vadd.f32 %v1601_v41, %v1600_v19  ;;  %v1405_v39 = vadd.f32 %v1404_v40, %v1403_v55  ;;  %1993 = vst.msk [vmem:[%s3634_s4 + $0xb0] sm:$0xf] %vm1948_vm1, %v2149_v35  ;;  %v2150_v26 = vpack.c.bf16 %v3303_v21, %v3303_v21 }
 0x171   :  { %v1603_v17 = vsel %vm1358_vm0, %v1517_v46, 0.0  ;;  %1972 = vst.msk [vmem:[%s3634_s4 + $0x5c] sm:$0xf] %vm1948_vm1, %v2128_v6 }
 0x172   :  { %v1604_v22 = vadd.f32 %v1603_v17, %v1602_v15  ;;  %1994 = vst.msk [vmem:[%s3634_s4 + $0xb4] sm:$0xf] %vm1948_vm1, %v2150_v26  ;;  %v1526_v26 = vmul.f32 %v3082_v27, %v3082_v27 }
 0x174   :  { %v1199_v24 = vpop.f32.mrb[48].mxu0 }
 0x175   :  { %v1406_v32 = vsel %vm1358_vm0, %v1199_v24, 0.0  ;;  %v1518_v20 = vmul.f32 %v1199_v24, %v1199_v24  ;;  %v2129_v42 = vpack.c.bf16 %v1199_v24, %v1199_v24  ;;  %v1201_v61 = vpop.f32.mrb[49].mxu0 }
 0x176   :  { %v1407_v3 = vadd.f32 %v1406_v32, %v1405_v39  ;;  %v1202_v54 = vpop.f32.mrb[50].mxu0 }
 0x177   :  { %v1605_v9 = vsel %vm1358_vm0, %v1518_v20, 0.0  ;;  %1973 = vst.msk [vmem:[%s3634_s4 + $0x60] sm:$0xf] %vm1948_vm1, %v2129_v42  ;;  %v1408_v50 = vsel %vm1358_vm0, %v1202_v54, 0.0  ;;  %v1519_v23 = vmul.f32 %v1202_v54, %v1202_v54  ;;  %v2130_v53 = vpack.c.bf16 %v1202_v54, %v1202_v54  ;;  %v1204_v62 = vpop.f32.mrb[51].mxu0 }
 0x178   :  { %v1606_v60 = vadd.f32 %v1605_v9, %v1604_v22  ;;  %v1409_v18 = vadd.f32 %v1408_v50, %v1407_v3  ;;  %v3333_v36 = vpop.f32.mrb[28].mxu1 }
 0x179   :  { %v1607_v12 = vsel %vm1358_vm0, %v1519_v23, 0.0  ;;  %1974 = vst.msk [vmem:[%s3634_s4 + $0x64] sm:$0xf] %vm1948_vm1, %v2130_v53  ;;  %v1289_v48 = vpop.f32.mrb[29].mxu1  ;;  %v2151_v7 = vpack.c.bf16 %v3333_v36, %v3333_v36 }
 0x17a   :  { %v1608_v51 = vadd.f32 %v1607_v12, %v1606_v60  ;;  %v3342_v43 = vpop.f32.mrb[30].mxu1  ;;  %v1621_v48 = vsel %vm1358_vm0, %v1526_v26, 0.0 }
 0x17b   :  { %v1292_v30 = vpop.f32.mrb[31].mxu1  ;;  %1995 = vst.msk [vmem:[%s3634_s4 + $0xb8] sm:$0xf] %vm1948_vm1, %v2151_v7  ;;  %v2152_v41 = vpack.c.bf16 %v3342_v43, %v3342_v43 }
 0x17c   :  { %v1207_v0 = vpop.f32.mrb[52].mxu0 }
 0x17d   :  { %v1410_v44 = vsel %vm1358_vm0, %v1207_v0, 0.0  ;;  %v1520_v33 = vmul.f32 %v1207_v0, %v1207_v0  ;;  %v2131_v28 = vpack.c.bf16 %v1207_v0, %v1207_v0  ;;  %v1209_v29 = vpop.f32.mrb[53].mxu0  ;;  %1996 = vst.msk [vmem:[%s3634_s4 + $0xbc] sm:$0xf] %vm1948_vm1, %v2152_v41  ;;  %v1426_v41 = vsel %vm1358_vm0, %v3122_v16, 0.0 }
 0x17e   :  { %v1411_v13 = vadd.f32 %v1410_v44, %v1409_v18  ;;  %v1210_v63 = vpop.f32.mrb[54].mxu0 }
 0x17f   :  { %v1609_v45 = vsel %vm1358_vm0, %v1520_v33, 0.0  ;;  %1975 = vst.msk [vmem:[%s3634_s4 + $0x68] sm:$0xf] %vm1948_vm1, %v2131_v28  ;;  %v1412_v59 = vsel %vm1358_vm0, %v1210_v63, 0.0  ;;  %v1521_v52 = vmul.f32 %v1210_v63, %v1210_v63  ;;  %v2132_v14 = vpack.c.bf16 %v1210_v63, %v1210_v63  ;;  %v1212_v5 = vpop.f32.mrb[55].mxu0 }
 0x180   :  { %v1610_v19 = vadd.f32 %v1609_v45, %v1608_v51  ;;  %v1413_v10 = vadd.f32 %v1412_v59, %v1411_v13 }
 0x181   :  { %v1611_v47 = vsel %vm1358_vm0, %v1521_v52, 0.0  ;;  %1976 = vst.msk [vmem:[%s3634_s4 + $0x6c] sm:$0xf] %vm1948_vm1, %v2132_v14  ;;  %v1422_v52 = vsel %vm1358_vm0, %v3082_v27, 0.0  ;;  %v1527_v14 = vmul.f32 %v3087_v4, %v3087_v4  ;;  %v1424_v27 = vsel %vm1358_vm0, %v3087_v4, 0.0 }
 0x182   :  { %v1612_v55 = vadd.f32 %v1611_v47, %v1610_v19  ;;  %v1528_v47 = vmul.f32 %v3122_v16, %v3122_v16 }
 0x183   :  { %v1623_v30 = vsel %vm1358_vm0, %v1527_v14, 0.0 }
 0x184   :  { %v1215_v40 = vpop.f32.mrb[56].mxu0  ;;  %v1625_v4 = vsel %vm1358_vm0, %v1528_v47, 0.0 }
 0x185   :  { %v1414_v46 = vsel %vm1358_vm0, %v1215_v40, 0.0  ;;  %v1522_v6 = vmul.f32 %v1215_v40, %v1215_v40  ;;  %v2133_v2 = vpack.c.bf16 %v1215_v40, %v1215_v40  ;;  %v1217_v15 = vpop.f32.mrb[57].mxu0  ;;  %v1529_v40 = vmul.f32 %v3126_v56, %v3126_v56 }
 0x186   :  { %v1415_v39 = vadd.f32 %v1414_v46, %v1413_v10  ;;  %v1218_v17 = vpop.f32.mrb[58].mxu0 }
 0x187   :  { %v1613_v22 = vsel %vm1358_vm0, %v1522_v6, 0.0  ;;  %1977 = vst.msk [vmem:[%s3634_s4 + $0x70] sm:$0xf] %vm1948_vm1, %v2133_v2  ;;  %v1416_v24 = vsel %vm1358_vm0, %v1218_v17, 0.0  ;;  %v1523_v35 = vmul.f32 %v1218_v17, %v1218_v17  ;;  %v2134_v11 = vpack.c.bf16 %v1218_v17, %v1218_v17  ;;  %v1220_v32 = vpop.f32.mrb[59].mxu0  ;;  %v3366_v54 = vpop.f32.mrb[32].mxu1 }
 0x188   :  { %v1614_v20 = vadd.f32 %v1613_v22, %v1612_v55  ;;  %v1417_v42 = vadd.f32 %v1416_v24, %v1415_v39  ;;  %v2153_v9 = vpack.c.bf16 %v3366_v54, %v3366_v54  ;;  %v1297_v50 = vpop.f32.mrb[33].mxu1  ;;  %v1428_v39 = vsel %vm1358_vm0, %v3126_v56, 0.0 }
 0x189   :  { %v1615_v61 = vsel %vm1358_vm0, %v1523_v35, 0.0  ;;  %1978 = vst.msk [vmem:[%s3634_s4 + $0x74] sm:$0xf] %vm1948_vm1, %v2134_v11  ;;  %v3371_v18 = vpop.f32.mrb[34].mxu1  ;;  %v1530_v17 = vmul.f32 %v3151_v37, %v3151_v37  ;;  %v1627_v32 = vsel %vm1358_vm0, %v1529_v40, 0.0 }
 0x18a   :  { %v1616_v3 = vadd.f32 %v1615_v61, %v1614_v20  ;;  %1997 = vst.msk [vmem:[%s3634_s4 + $0xc0] sm:$0xf] %vm1948_vm1, %v2153_v9  ;;  %v1300_v0 = vpop.f32.mrb[35].mxu1  ;;  %v2154_v59 = vpack.c.bf16 %v3371_v18, %v3371_v18  ;;  %v1430_v20 = vsel %vm1358_vm0, %v3151_v37, 0.0  ;;  %v1432_v9 = vsel %vm1358_vm0, %v3159_v38, 0.0 }
 0x18b   :  { %v1532_v37 = vmul.f32 %v3190_v8, %v3190_v8 }
 0x18c   :  { %v1223_v1 = vpop.f32.mrb[60].mxu0  ;;  %1998 = vst.msk [vmem:[%s3634_s4 + $0xc4] sm:$0xf] %vm1948_vm1, %v2154_v59  ;;  %v1438_v59 = vsel %vm1358_vm0, %v3219_v57, 0.0 }
 0x18d   :  { %v1418_v23 = vsel %vm1358_vm0, %v1223_v1, 0.0  ;;  %v1524_v53 = vmul.f32 %v1223_v1, %v1223_v1  ;;  %v2135_v62 = vpack.c.bf16 %v1223_v1, %v1223_v1  ;;  %v1225_v60 = vpop.f32.mrb[61].mxu0  ;;  %v1629_v1 = vsel %vm1358_vm0, %v1530_v17, 0.0 }
 0x18e   :  { %v1419_v12 = vadd.f32 %v1418_v23, %v1417_v42  ;;  %v1226_v51 = vpop.f32.mrb[62].mxu0  ;;  %v1531_v42 = vmul.f32 %v3159_v38, %v3159_v38  ;;  %v1533_v60 = vmul.f32 %v3194_v58, %v3194_v58  ;;  %v1633_v0 = vsel %vm1358_vm0, %v1532_v37, 0.0 }
 0x18f   :  { %v1617_v44 = vsel %vm1358_vm0, %v1524_v53, 0.0  ;;  %1979 = vst.msk [vmem:[%s3634_s4 + $0x78] sm:$0xf] %vm1948_vm1, %v2135_v62  ;;  %v1420_v33 = vsel %vm1358_vm0, %v1226_v51, 0.0  ;;  %v1525_v28 = vmul.f32 %v1226_v51, %v1226_v51  ;;  %v2136_v29 = vpack.c.bf16 %v1226_v51, %v1226_v51  ;;  %v1228_v13 = vpop.f32.mrb[63].mxu0  ;;  %v3410_v46 = vpop.f32.mrb[36].mxu1 }
 0x190   :  { %v1618_v63 = vadd.f32 %v1617_v44, %v1616_v3  ;;  %v1421_v45 = vadd.f32 %v1420_v33, %v1419_v12  ;;  %v1305_v15 = vpop.f32.mrb[37].mxu1  ;;  %v2155_v22 = vpack.c.bf16 %v3410_v46, %v3410_v46  ;;  %v1631_v53 = vsel %vm1358_vm0, %v1531_v42, 0.0 }
 0x191   :  { %v1619_v5 = vsel %vm1358_vm0, %v1525_v28, 0.0  ;;  %1980 = vst.msk [vmem:[%s3634_s4 + $0x7c] sm:$0xf] %vm1948_vm1, %v2136_v29  ;;  %v3419_v16 = vpop.f32.mrb[38].mxu1  ;;  %v1434_v62 = vsel %vm1358_vm0, %v3190_v8, 0.0  ;;  %v1436_v44 = vsel %vm1358_vm0, %v3194_v58, 0.0  ;;  %v1534_v33 = vmul.f32 %v3219_v57, %v3219_v57 }
 0x192   :  { %v1423_v19 = vadd.f32 %v1422_v52, %v1421_v45  ;;  %v1620_v10 = vadd.f32 %v1619_v5, %v1618_v63  ;;  %v1308_v11 = vpop.f32.mrb[39].mxu1  ;;  %1999 = vst.msk [vmem:[%s3634_s4 + $0xc8] sm:$0xf] %vm1948_vm1, %v2155_v22  ;;  %v2156_v56 = vpack.c.bf16 %v3419_v16, %v3419_v16  ;;  %v1635_v45 = vsel %vm1358_vm0, %v1533_v60, 0.0 }
 0x193   :  { %v1535_v52 = vmul.f32 %v3227_v34, %v3227_v34  ;;  %v1536_v57 = vmul.f32 %v3259_v31, %v3259_v31  ;;  %v1538_v15 = vmul.f32 %v3298_v25, %v3298_v25  ;;  %v1539_v11 = vmul.f32 %v3303_v21, %v3303_v21 }
 0x194   :  { %v1425_v7 = vadd.f32 %v1424_v27, %v1423_v19  ;;  %v1622_v55 = vadd.f32 %v1621_v48, %v1620_v10  ;;  %2000 = vst.msk [vmem:[%s3634_s4 + $0xcc] sm:$0xf] %vm1948_vm1, %v2156_v56  ;;  %v1637_v19 = vsel %vm1358_vm0, %v1534_v33, 0.0  ;;  %v1440_v10 = vsel %vm1358_vm0, %v3227_v34, 0.0 }
 0x195   :  { %v1639_v47 = vsel %vm1358_vm0, %v1535_v52, 0.0  ;;  %v1645_v42 = vsel %vm1358_vm0, %v1538_v15, 0.0  ;;  %v1448_v56 = vsel %vm1358_vm0, %v3303_v21, 0.0  ;;  %v1541_v37 = vmul.f32 %v3342_v43, %v3342_v43 }
 0x196   :  { %v1427_v6 = vadd.f32 %v1426_v41, %v1425_v7  ;;  %v1624_v2 = vadd.f32 %v1623_v30, %v1622_v55  ;;  %v1442_v7 = vsel %vm1358_vm0, %v3259_v31, 0.0  ;;  %v1537_v55 = vmul.f32 %v3269_v49, %v3269_v49 }
 0x197   :  { %v3446_v26 = vpop.f32.mrb[40].mxu1  ;;  %v1452_v60 = vsel %vm1358_vm0, %v3342_v43, 0.0  ;;  %v1651_v33 = vsel %vm1358_vm0, %v1541_v37, 0.0 }
 0x198   :  { %v1429_v24 = vadd.f32 %v1428_v39, %v1427_v6  ;;  %v1626_v35 = vadd.f32 %v1625_v4, %v1624_v2  ;;  %v1313_v51 = vpop.f32.mrb[41].mxu1  ;;  %v2157_v28 = vpack.c.bf16 %v3446_v26, %v3446_v26  ;;  %v1641_v6 = vsel %vm1358_vm0, %v1536_v57, 0.0 }
 0x199   :  { %v3455_v8 = vpop.f32.mrb[42].mxu1  ;;  %v1444_v2 = vsel %vm1358_vm0, %v3269_v49, 0.0 }
 0x19a   :  { %v1431_v61 = vadd.f32 %v1430_v20, %v1429_v24  ;;  %v1628_v3 = vadd.f32 %v1627_v32, %v1626_v35  ;;  %v1316_v63 = vpop.f32.mrb[43].mxu1  ;;  %2001 = vst.msk [vmem:[%s3634_s4 + $0xd0] sm:$0xf] %vm1948_vm1, %v2157_v28  ;;  %v2158_v58 = vpack.c.bf16 %v3455_v8, %v3455_v8  ;;  %v1643_v24 = vsel %vm1358_vm0, %v1537_v55, 0.0 }
 0x19b   :  { %v1446_v35 = vsel %vm1358_vm0, %v3298_v25, 0.0  ;;  %v1540_v25 = vmul.f32 %v3333_v36, %v3333_v36  ;;  %v1454_v28 = vsel %vm1358_vm0, %v3366_v54, 0.0  ;;  %v1547_v15 = vmul.f32 %v3455_v8, %v3455_v8 }
 0x19c   :  { %v1433_v50 = vadd.f32 %v1432_v9, %v1431_v61  ;;  %v1630_v23 = vadd.f32 %v1629_v1, %v1628_v3  ;;  %2002 = vst.msk [vmem:[%s3634_s4 + $0xd4] sm:$0xf] %vm1948_vm1, %v2158_v58  ;;  %v1647_v1 = vsel %vm1358_vm0, %v1539_v11, 0.0  ;;  %v1450_v9 = vsel %vm1358_vm0, %v3333_v36, 0.0 }
 0x19d   :  { %v1663_v11 = vsel %vm1358_vm0, %v1547_v15, 0.0 }
 0x19e   :  { %v1435_v38 = vadd.f32 %v1434_v62, %v1433_v50  ;;  %v1632_v12 = vadd.f32 %v1631_v53, %v1630_v23  ;;  %v1649_v62 = vsel %vm1358_vm0, %v1540_v25, 0.0 }
 0x19f   :  { %v3482_v30 = vpop.f32.mrb[44].mxu1 }
 0x1a0   :  { %v1437_v29 = vadd.f32 %v1436_v44, %v1435_v38  ;;  %v1634_v13 = vadd.f32 %v1633_v0, %v1632_v12  ;;  %v1321_v40 = vpop.f32.mrb[45].mxu1  ;;  %v2159_v4 = vpack.c.bf16 %v3482_v30, %v3482_v30  ;;  %v1542_v38 = vmul.f32 %v3366_v54, %v3366_v54 }
 0x1a1   :  { %v3491_v31 = vpop.f32.mrb[46].mxu1  ;;  %v1544_v54 = vmul.f32 %v3410_v46, %v3410_v46 }
 0x1a2   :  { %v1636_v14 = vadd.f32 %v1635_v45, %v1634_v13  ;;  %v1439_v5 = vadd.f32 %v1438_v59, %v1437_v29  ;;  %v1324_v22 = vpop.f32.mrb[47].mxu1  ;;  %2003 = vst.msk [vmem:[%s3634_s4 + $0xd8] sm:$0xf] %vm1948_vm1, %v2159_v4  ;;  %v2160_v49 = vpack.c.bf16 %v3491_v31, %v3491_v31  ;;  %v1543_v29 = vmul.f32 %v3371_v18, %v3371_v18 }
 0x1a3   :  { %v1653_v45 = vsel %vm1358_vm0, %v1542_v38, 0.0  ;;  %v1456_v59 = vsel %vm1358_vm0, %v3371_v18, 0.0  ;;  %v1464_v22 = vsel %vm1358_vm0, %v3455_v8, 0.0 }
 0x1a4   :  { %v1441_v48 = vadd.f32 %v1440_v10, %v1439_v5  ;;  %v1638_v27 = vadd.f32 %v1637_v19, %v1636_v14  ;;  %2004 = vst.msk [vmem:[%s3634_s4 + $0xdc] sm:$0xf] %vm1948_vm1, %v2160_v49  ;;  %v1655_v14 = vsel %vm1358_vm0, %v1543_v29, 0.0  ;;  %v1458_v5 = vsel %vm1358_vm0, %v3410_v46, 0.0 }
 0x1a5   :  { %v1545_v19 = vmul.f32 %v3419_v16, %v3419_v16  ;;  %v1466_v49 = vsel %vm1358_vm0, %v3482_v30, 0.0 }
 0x1a6   :  { %v1443_v34 = vadd.f32 %v1442_v7, %v1441_v48  ;;  %v1640_v41 = vadd.f32 %v1639_v47, %v1638_v27  ;;  %v1657_v27 = vsel %vm1358_vm0, %v1544_v54, 0.0  ;;  %v1460_v47 = vsel %vm1358_vm0, %v3419_v16, 0.0 }
 0x1a7   :  { %v3518_v50 = vpop.f32.mrb[48].mxu1  ;;  %v1546_v7 = vmul.f32 %v3446_v26, %v3446_v26 }
 0x1a8   :  { %v1445_v39 = vadd.f32 %v1444_v2, %v1443_v34  ;;  %v1642_v17 = vadd.f32 %v1641_v6, %v1640_v41  ;;  %v1329_v53 = vpop.f32.mrb[49].mxu1  ;;  %v2161_v12 = vpack.c.bf16 %v3518_v50, %v3518_v50  ;;  %v1659_v6 = vsel %vm1358_vm0, %v1545_v19, 0.0 }
 0x1a9   :  { %v3527_v36 = vpop.f32.mrb[50].mxu1  ;;  %v1462_v2 = vsel %vm1358_vm0, %v3446_v26, 0.0  ;;  %v1470_v53 = vsel %vm1358_vm0, %v3518_v50, 0.0 }
 0x1aa   :  { %v1447_v32 = vadd.f32 %v1446_v35, %v1445_v39  ;;  %v1644_v20 = vadd.f32 %v1643_v24, %v1642_v17  ;;  %v1332_v44 = vpop.f32.mrb[51].mxu1  ;;  %2005 = vst.msk [vmem:[%s3634_s4 + $0xe0] sm:$0xf] %vm1948_vm1, %v2161_v12  ;;  %v2162_v43 = vpack.c.bf16 %v3527_v36, %v3527_v36  ;;  %v1661_v17 = vsel %vm1358_vm0, %v1546_v7, 0.0 }
 0x1ab   :  { %v1548_v24 = vmul.f32 %v3482_v30, %v3482_v30 }
 0x1ac   :  { %v1449_v61 = vadd.f32 %v1448_v56, %v1447_v32  ;;  %v1646_v3 = vadd.f32 %v1645_v42, %v1644_v20  ;;  %2006 = vst.msk [vmem:[%s3634_s4 + $0xe4] sm:$0xf] %vm1948_vm1, %v2162_v43  ;;  %v1549_v32 = vmul.f32 %v3491_v31, %v3491_v31 }
 0x1ad   :  { %v1665_v25 = vsel %vm1358_vm0, %v1548_v24, 0.0 }
 0x1ae   :  { %v1451_v21 = vadd.f32 %v1450_v9, %v1449_v61  ;;  %v1648_v23 = vadd.f32 %v1647_v1, %v1646_v3  ;;  %v1468_v61 = vsel %vm1358_vm0, %v3491_v31, 0.0  ;;  %v1550_v3 = vmul.f32 %v3518_v50, %v3518_v50 }
 0x1af   :  { %v1335_v10 = vpop.f32.mrb[52].mxu1 }
 0x1b0   :  { %v1453_v51 = vadd.f32 %v1452_v60, %v1451_v21  ;;  %v1650_v0 = vadd.f32 %v1649_v62, %v1648_v23  ;;  %v1337_v48 = vpop.f32.mrb[53].mxu1  ;;  %v2163_v55 = vpack.c.bf16 %v1335_v10, %v1335_v10  ;;  %v1667_v23 = vsel %vm1358_vm0, %v1549_v32, 0.0 }
 0x1b1   :  { %v1338_v34 = vpop.f32.mrb[54].mxu1  ;;  %v1551_v62 = vmul.f32 %v3527_v36, %v3527_v36  ;;  %v1669_v12 = vsel %vm1358_vm0, %v1550_v3, 0.0  ;;  %v1474_v29 = vsel %vm1358_vm0, %v1335_v10, 0.0 }
 0x1b2   :  { %v1455_v13 = vadd.f32 %v1454_v28, %v1453_v51  ;;  %v1652_v63 = vadd.f32 %v1651_v33, %v1650_v0  ;;  %v1340_v46 = vpop.f32.mrb[55].mxu1  ;;  %2007 = vst.msk [vmem:[%s3634_s4 + $0xe8] sm:$0xf] %vm1948_vm1, %v2163_v55  ;;  %v2164_v16 = vpack.c.bf16 %v1338_v34, %v1338_v34  ;;  %v1472_v51 = vsel %vm1358_vm0, %v3527_v36, 0.0 }
 0x1b3   :  { %v1552_v0 = vmul.f32 %v1335_v10, %v1335_v10  ;;  %v1553_v33 = vmul.f32 %v1338_v34, %v1338_v34  ;;  %v1671_v28 = vsel %vm1358_vm0, %v1551_v62, 0.0  ;;  %v1476_v36 = vsel %vm1358_vm0, %v1338_v34, 0.0 }
 0x1b4   :  { %v1654_v52 = vadd.f32 %v1653_v45, %v1652_v63  ;;  %v1457_v58 = vadd.f32 %v1456_v59, %v1455_v13  ;;  %2008 = vst.msk [vmem:[%s3634_s4 + $0xec] sm:$0xf] %vm1948_vm1, %v2164_v16 }
 0x1b5   :  { %v1673_v59 = vsel %vm1358_vm0, %v1552_v0, 0.0  ;;  %v1675_v19 = vsel %vm1358_vm0, %v1553_v33, 0.0 }
 0x1b6   :  { %v1656_v18 = vadd.f32 %v1655_v14, %v1654_v52  ;;  %v1459_v57 = vadd.f32 %v1458_v5, %v1457_v58 }
 0x1b7   :  { %v1343_v20 = vpop.f32.mrb[56].mxu1 }
 0x1b8   :  { %v1658_v41 = vadd.f32 %v1657_v27, %v1656_v18  ;;  %v1461_v40 = vadd.f32 %v1460_v47, %v1459_v57  ;;  %v1345_v56 = vpop.f32.mrb[57].mxu1  ;;  %v2165_v1 = vpack.c.bf16 %v1343_v20, %v1343_v20  ;;  %v1554_v54 = vmul.f32 %v1343_v20, %v1343_v20 }
 0x1b9   :  { %v1346_v9 = vpop.f32.mrb[58].mxu1  ;;  %v1478_v57 = vsel %vm1358_vm0, %v1343_v20, 0.0 }
 0x1ba   :  { %v1660_v4 = vadd.f32 %v1659_v6, %v1658_v41  ;;  %v1463_v39 = vadd.f32 %v1462_v2, %v1461_v40  ;;  %v1348_v30 = vpop.f32.mrb[59].mxu1  ;;  %2009 = vst.msk [vmem:[%s3634_s4 + $0xf0] sm:$0xf] %vm1948_vm1, %v2165_v1  ;;  %v2166_v31 = vpack.c.bf16 %v1346_v9, %v1346_v9  ;;  %v1555_v48 = vmul.f32 %v1346_v9, %v1346_v9 }
 0x1bb   :  { %v1677_v55 = vsel %vm1358_vm0, %v1554_v54, 0.0  ;;  %v1480_v34 = vsel %vm1358_vm0, %v1346_v9, 0.0 }
 0x1bc   :  { %v1662_v26 = vadd.f32 %v1661_v17, %v1660_v4  ;;  %v1465_v35 = vadd.f32 %v1464_v22, %v1463_v39  ;;  %2010 = vst.msk [vmem:[%s3634_s4 + $0xf4] sm:$0xf] %vm1948_vm1, %v2166_v31  ;;  %v1679_v6 = vsel %vm1358_vm0, %v1555_v48, 0.0 }
 0x1be   :  { %v1664_v8 = vadd.f32 %v1663_v11, %v1662_v26  ;;  %v1467_v42 = vadd.f32 %v1466_v49, %v1465_v35 }
 0x1bf   :  { %v1351_v43 = vpop.f32.mrb[60].mxu1 }
 0x1c0   :  { %v1666_v37 = vadd.f32 %v1665_v25, %v1664_v8  ;;  %v1469_v21 = vadd.f32 %v1468_v61, %v1467_v42  ;;  %v1353_v45 = vpop.f32.mrb[61].mxu1  ;;  %v2167_v52 = vpack.c.bf16 %v1351_v43, %v1351_v43  ;;  %v1556_v10 = vmul.f32 %v1351_v43, %v1351_v43 }
 0x1c1   :  { %v1354_v58 = vpop.f32.mrb[62].mxu1  ;;  %v1482_v41 = vsel %vm1358_vm0, %v1351_v43, 0.0 }
 0x1c2   :  { %v1668_v60 = vadd.f32 %v1667_v23, %v1666_v37  ;;  %v1471_v38 = vadd.f32 %v1470_v53, %v1469_v21  ;;  %v1356_v18 = vpop.f32.mrb[63].mxu1  ;;  %2011 = vst.msk [vmem:[%s3634_s4 + $0xf8] sm:$0xf] %vm1948_vm1, %v2167_v52  ;;  %v2168_v27 = vpack.c.bf16 %v1354_v58, %v1354_v58  ;;  %v1681_v2 = vsel %vm1358_vm0, %v1556_v10, 0.0 }
 0x1c3   :  { %v1557_v15 = vmul.f32 %v1354_v58, %v1354_v58  ;;  %v1484_v39 = vsel %vm1358_vm0, %v1354_v58, 0.0 }
 0x1c4   :  { %v1670_v50 = vadd.f32 %v1669_v12, %v1668_v60  ;;  %v1473_v44 = vadd.f32 %v1472_v51, %v1471_v38  ;;  %2012 = vst.msk [vmem:[%s3634_s4 + $0xfc] sm:$0xf] %vm1948_vm1, %v2168_v27 }
 0x1c5   :  { %v1683_v24 = vsel %vm1358_vm0, %v1557_v15, 0.0 }
 0x1c6   :  { %v1672_v13 = vadd.f32 %v1671_v28, %v1670_v50  ;;  %v1475_v63 = vadd.f32 %v1474_v29, %v1473_v44 }
 0x1c8   :  { %v1674_v14 = vadd.f32 %v1673_v59, %v1672_v13  ;;  %v1477_v5 = vadd.f32 %v1476_v36, %v1475_v63 }
 0x1ca   :  { %v1676_v47 = vadd.f32 %v1675_v19, %v1674_v14  ;;  %v1479_v7 = vadd.f32 %v1478_v57, %v1477_v5 }
 0x1cc   :  { %v1678_v40 = vadd.f32 %v1677_v55, %v1676_v47  ;;  %v1481_v46 = vadd.f32 %v1480_v34, %v1479_v7 }
 0x1ce   :  { %v1680_v16 = vadd.f32 %v1679_v6, %v1678_v40  ;;  %v1483_v4 = vadd.f32 %v1482_v41, %v1481_v46 }
 0x1d0   :  { %v1682_v17 = vadd.f32 %v1681_v2, %v1680_v16  ;;  %v1485_v22 = vadd.f32 %v1484_v39, %v1483_v4 }
 0x1d2   :  { %v1486_v26 = vrot.slane %v1485_v22, 4  ;;  %v1684_v35 = vadd.f32 %v1683_v24, %v1682_v17 }
 0x1d4   :  { %v1487_v11 = vadd.f32 %v1486_v26, %v1485_v22  ;;  %v1685_v49 = vrot.slane %v1684_v35, 4 }
 0x1d6   :  { %v1488_v32 = vrot.slane %v1487_v11, 2  ;;  %v1686_v20 = vadd.f32 %v1685_v49, %v1684_v35 }
 0x1d8   :  { %v1489_v8 = vadd.f32 %v1488_v32, %v1487_v11  ;;  %v1687_v42 = vrot.slane %v1686_v20, 2 }
 0x1da   :  { %v1490_v56 = vrot.slane %v1489_v8, 1  ;;  %v1688_v25 = vadd.f32 %v1687_v42, %v1686_v20 }
 0x1dc   :  { %v1491_v61 = vadd.f32 %v1490_v56, %v1489_v8  ;;  %v1689_v3 = vrot.slane %v1688_v25, 1 }
 0x1de   :  { %1493 = vst.msk [vmem:[%s3635_s5] sm:$0x1] %vm1492_vm2, %v1491_v61  ;;  %v1690_v1 = vadd.f32 %v1689_v3, %v1688_v25 }
 0x1e0   :  { %1691 = vst.msk [vmem:[%s3636_s6] sm:$0x1] %vm1492_vm2, %v1690_v1 }

// kernel: tile.53
= control target key start
LH: loop header
LB: loop body
LE: loop exit
PB: predicated region body
PF: predicated region fallthrough
CT: control target
= control target key end

     0   :  { %s28_s0 = inlined_call_operand.vmem [shape: f32[32], index: 0, kind: input, shape index: {}]   ;;  %s29_s1 = inlined_call_operand.vmem [shape: f32[16,32], index: 1, kind: output, shape index: {}]  }
   0x1   :  { %v4_v0 = vld [vmem:[%s28_s0] ss:$0 sm:$0xff] }
   0x2   :  { %5 = vst [vmem:[%s29_s1] sm:$0xff] %v4_v0  ;;  %8 = vst [vmem:[%s29_s1 + $0x8] sm:$0xff] %v4_v0 }

// kernel: tile.58
= control target key start
LH: loop header
LB: loop body
LE: loop exit
PB: predicated region body
PF: predicated region fallthrough
CT: control target
= control target key end

     0   :  { %s57_s8 = smov 96   ;;  %vm3_vm0 = vcmask 261120   ;;  %s59_s15 = smov 64   ;;  %vm9_vm1 = vcmask 1048320   ;;  %vm15_vm2 = vcmask 785920   ;;  %vm21_vm3 = vcmask 523520   ;;  %s94_s0 = inlined_call_operand.vmem [shape: f32[16,32], index: 0, kind: input, shape index: {}]   ;;  %s95_s1 = inlined_call_operand.vmem [shape: f32[1,512], index: 1, kind: output, shape index: {}]  }
   0x1   :  { %v48_v0 = vld [vmem:[%s94_s0 + $0x3] ss:$4 sm:$0xf]   ;;  %v49_v1 = vld [vmem:[%s94_s0 + $0x2] ss:$4 sm:$0xf]  }
   0x2   :  { %7 = vrot.lane.b32.xlu0 %v48_v0, %s57_s8  ;;  %v50_v2 = vld [vmem:[%s94_s0 + $0x1] ss:$4 sm:$0xf]   ;;  %v2_v3 = vld [vmem:[%s94_s0] ss:$4 sm:$0xf]  }
   0x3   :  { %s58_s0 = smov 32   ;;  %4 = vst.msk [vmem:[#allocation0] ss:$8 sm:$0xf] %vm3_vm0, %v2_v3  }
   0x4   :  { %19 = vrot.lane.b32.xlu1 %v50_v2, %s58_s0 }
   0x6   :  { %13 = vrot.lane.b32.xlu0 %v49_v1, %s59_s15 }
  0x74   :  { %v8_v4 = vpop.permute.xlu0 %7  }
  0x75   :  { %10 = vst.msk [vmem:[#allocation0] ss:$8 sm:$0xf] %vm9_vm1, %v8_v4  }
  0x76   :  { %v20_v5 = vpop.permute.xlu1 %19  }
  0x78   :  { %v14_v6 = vpop.permute.xlu0 %13  }
  0x79   :  { %16 = vst.msk [vmem:[#allocation0] ss:$8 sm:$0xf] %vm15_vm2, %v14_v6  }
  0x7a   :  { %22 = vst.msk [vmem:[#allocation0] ss:$8 sm:$0xf] %vm21_vm3, %v20_v5  }
  0x81   :  { %v26_v7 = vld [vmem:[#allocation0] sm:$0x1]  ;;  %v30_v8 = vld [vmem:[#allocation0 + $0x8] sm:$0x1]  ;;  %v35_v9 = vld [vmem:[#allocation0 + $0x10] sm:$0x1] }
  0x82   :  { %28 = vst [vmem:[%s95_s1] sm:$0x1] %v26_v7  ;;  %51 = vst [vmem:[%s95_s1 + $0x1] sm:$0x1] %v30_v8  ;;  %v41_v10 = vld [vmem:[#allocation0 + $0x18] sm:$0x1] }
  0x83   :  { %52 = vst [vmem:[%s95_s1 + $0x2] sm:$0x1] %v35_v9  ;;  %53 = vst [vmem:[%s95_s1 + $0x3] sm:$0x1] %v41_v10 }

// kernel: netD_forward.9
= control target key start
LH: loop header
LB: loop body
LE: loop exit
PB: predicated region body
PF: predicated region fallthrough
CT: control target
= control target key end

     0   :  { %v119_v23 = vlaneseq  ;;  %s1865_s1 = inlined_call_operand.vmem [shape: bf16[512,64], index: 1, kind: input, shape index: {}]   ;;  %s1866_s0 = inlined_call_operand.vmem [shape: bf16[128,512], index: 0, kind: input, shape index: {}]   ;;  %s1867_s2 = inlined_call_operand.vmem [shape: f32[1,512], index: 2, kind: input, shape index: {}]   ;;  %s1868_s3 = inlined_call_operand.vmem [shape: f32[1,512], index: 3, kind: input, shape index: {}]   ;;  %s1869_s4 = inlined_call_operand.vmem [shape: bf16[128,64], index: 4, kind: output, shape index: {0}]   ;;  %s1870_s5 = inlined_call_operand.vmem [shape: f32[1,1,64], index: 5, kind: output, shape index: {1}]   ;;  %s1871_s6 = inlined_call_operand.vmem [shape: f32[1,1,64], index: 6, kind: output, shape index: {2}]  }
   0x1   :  { %v1342_v0 = vld [vmem:[%s1865_s1 + $0x40] sm:$0xff]   ;;  %v1346_v4 = vld [vmem:[%s1865_s1 + $0x48] sm:$0xff]   ;;  %v1350_v8 = vld [vmem:[%s1865_s1 + $0x50] sm:$0xff]  }
   0x2   :  { %v1343_v1 = vld [vmem:[%s1865_s1 + $0xc0] sm:$0xff]   ;;  %1214 = vmatprep.subr.bf16.mxu0 %v1342_v0  ;;  %v1347_v5 = vld [vmem:[%s1865_s1 + $0xc8] sm:$0xff]   ;;  %v1351_v9 = vld [vmem:[%s1865_s1 + $0xd0] sm:$0xff]   ;;  %v120_v28 = vshrl.u32 %v119_v23, 7 }
   0x3   :  { %v1344_v2 = vld [vmem:[%s1865_s1] sm:$0xff]   ;;  %1278 = vmatprep.subr.bf16.mxu1 %v1343_v1  ;;  %v1348_v6 = vld [vmem:[%s1865_s1 + $0x8] sm:$0xff]   ;;  %v1352_v10 = vld [vmem:[%s1865_s1 + $0x10] sm:$0xff]  }
   0x4   :  { %v1345_v3 = vld [vmem:[%s1865_s1 + $0x80] sm:$0xff]   ;;  %1215 = vmatpush3.bf16.msra.mxu0 %v1344_v2  ;;  %v1349_v7 = vld [vmem:[%s1865_s1 + $0x88] sm:$0xff]   ;;  %v1353_v11 = vld [vmem:[%s1865_s1 + $0x90] sm:$0xff]   ;;  %v125_v33 = vsub.s32 1, %v120_v28  ;;  %v133_v35 = vsub.s32 3, %v120_v28  ;;  %v121_v39 = vsub.s32 0, %v120_v28 }
   0x5   :  { %1279 = vmatpush3.bf16.msra.mxu1 %v1345_v3  ;;  %1216 = vmatprep.subr.bf16.mxu0 %v1346_v4  ;;  %v1354_v12 = vld [vmem:[%s1865_s1 + $0x58] sm:$0xff]   ;;  %v1358_v16 = vld [vmem:[%s1865_s1 + $0x60] sm:$0xff]   ;;  %v1362_v20 = vld [vmem:[%s1865_s1 + $0x68] sm:$0xff]   ;;  %v129_v40 = vsub.s32 2, %v120_v28 }
   0x6   :  { %1280 = vmatprep.subr.bf16.mxu1 %v1347_v5  ;;  %v1355_v13 = vld [vmem:[%s1865_s1 + $0xd8] sm:$0xff]   ;;  %v1359_v17 = vld [vmem:[%s1865_s1 + $0xe0] sm:$0xff]   ;;  %v1363_v21 = vld [vmem:[%s1865_s1 + $0xe8] sm:$0xff]  }
   0x7   :  { %v1356_v14 = vld [vmem:[%s1865_s1 + $0x18] sm:$0xff]   ;;  %v1360_v18 = vld [vmem:[%s1865_s1 + $0x20] sm:$0xff]   ;;  %v1364_v22 = vld [vmem:[%s1865_s1 + $0x28] sm:$0xff]  }
   0x8   :  { %1217 = vmatpush3.bf16.msra.mxu0 %v1348_v6  ;;  %v1357_v15 = vld [vmem:[%s1865_s1 + $0x98] sm:$0xff]   ;;  %v1361_v19 = vld [vmem:[%s1865_s1 + $0xa0] sm:$0xff]   ;;  %v1365_v24 = vld [vmem:[%s1865_s1 + $0xa8] sm:$0xff]  }
   0x9   :  { %1281 = vmatpush3.bf16.msra.mxu1 %v1349_v7  ;;  %1218 = vmatprep.subr.bf16.mxu0 %v1350_v8  ;;  %v1366_v25 = vld [vmem:[%s1865_s1 + $0x70] sm:$0xff]   ;;  %v1370_v30 = vld [vmem:[%s1865_s1 + $0x78] sm:$0xff]   ;;  %v21_v36 = vld [vmem:[%s1866_s0] sm:$0xff] }
   0xa   :  { %1282 = vmatprep.subr.bf16.mxu1 %v1351_v9  ;;  %v1367_v26 = vld [vmem:[%s1865_s1 + $0xf0] sm:$0xff]   ;;  %v1371_v31 = vld [vmem:[%s1865_s1 + $0xf8] sm:$0xff]   ;;  %v117_v38 = vld [vmem:[%s1867_s2] sm:$0xf]  ;;  %v53_v41 = vunpack.c.l.bf16 %v21_v36  ;;  %v54_v42 = vunpack.c.h.bf16 %v21_v36 }
   0xb   :  { %v1368_v27 = vld [vmem:[%s1865_s1 + $0x30] sm:$0xff]   ;;  %v1372_v32 = vld [vmem:[%s1865_s1 + $0x38] sm:$0xff]   ;;  %v203_v45 = vld [vmem:[%s1868_s3] sm:$0xf]  ;;  %v1523_v48 = vrot.slane %v117_v38, %v125_v33  ;;  %v1527_v54 = vrot.slane %v117_v38, %v133_v35  ;;  %v1533_v58 = vrot.slane %v117_v38, %v121_v39  ;;  %v1539_v62 = vrot.slane %v117_v38, %v129_v40 }
   0xc   :  { %1219 = vmatpush3.bf16.msra.mxu0 %v1352_v10  ;;  %v1369_v29 = vld [vmem:[%s1865_s1 + $0xb0] sm:$0xff]   ;;  %v1373_v34 = vld [vmem:[%s1865_s1 + $0xb8] sm:$0xff]   ;;  %v22_v46 = vld [vmem:[%s1866_s0 + $0x8] sm:$0xff]  ;;  %v1525_v49 = vrot.slane %v203_v45, %v125_v33  ;;  %v1529_v55 = vrot.slane %v203_v45, %v133_v35  ;;  %v1535_v59 = vrot.slane %v203_v45, %v121_v39  ;;  %v1541_v63 = vrot.slane %v203_v45, %v129_v40 }
   0xd   :  { %1283 = vmatpush3.bf16.msra.mxu1 %v1353_v11  ;;  %1220 = vmatprep.subr.bf16.mxu0 %v1354_v12  ;;  %v23_v37 = vld [vmem:[%s1866_s0 + $0x10] sm:$0xff]  ;;  %v24_v47 = vld [vmem:[%s1866_s0 + $0x18] sm:$0xff]  ;;  %v55_v50 = vunpack.c.l.bf16 %v22_v46  ;;  %v56_v51 = vunpack.c.h.bf16 %v22_v46  ;;  %v140_v56 = vmul.f32 %v1523_v48, %v54_v42  ;;  %v139_v2 = vmul.f32 %v1533_v58, %v53_v41 }
   0xe   :  { %1284 = vmatprep.subr.bf16.mxu1 %v1355_v13  ;;  %v57_v43 = vunpack.c.l.bf16 %v23_v37  ;;  %v58_v44 = vunpack.c.h.bf16 %v23_v37  ;;  %v59_v52 = vunpack.c.l.bf16 %v24_v47  ;;  %v60_v53 = vunpack.c.h.bf16 %v24_v47  ;;  %v28_v28 = vld [vmem:[%s1866_s0 + $0x38] sm:$0xff] }
   0xf   :  { %v142_v60 = vmul.f32 %v1527_v54, %v56_v51  ;;  %v226_v0 = vadd.f32 %v1525_v49, %v140_v56  ;;  %v141_v6 = vmul.f32 %v1539_v62, %v55_v50  ;;  %v68_v39 = vunpack.c.h.bf16 %v28_v28 }
  0x10   :  { %1221 = vmatpush3.bf16.msra.mxu0 %v1356_v14  ;;  %v144_v57 = vmul.f32 %v1523_v48, %v58_v44  ;;  %v146_v61 = vmul.f32 %v1527_v54, %v60_v53  ;;  %v143_v3 = vmul.f32 %v1533_v58, %v57_v43  ;;  %v145_v7 = vmul.f32 %v1539_v62, %v59_v52 }
  0x11   :  { %1285 = vmatpush3.bf16.msra.mxu1 %v1357_v15  ;;  %1222 = vmatprep.subr.bf16.mxu0 %v1358_v16  ;;  %v228_v4 = vadd.f32 %v1529_v55, %v142_v60  ;;  %vm290_vm0 = vcmp.ge.f32.partialorder %v226_v0, 0.0  ;;  %v354_v8 = vmul.f32 0.2, %v226_v0  ;;  %v225_v14 = vadd.f32 %v1535_v59, %v139_v2 }
  0x12   :  { %1286 = vmatprep.subr.bf16.mxu1 %v1359_v17  ;;  %v230_v1 = vadd.f32 %v1525_v49, %v144_v57  ;;  %v232_v5 = vadd.f32 %v1529_v55, %v146_v61  ;;  %v229_v15 = vadd.f32 %v1535_v59, %v143_v3  ;;  %v154_v47 = vmul.f32 %v1527_v54, %v68_v39 }
  0x13   :  { %vm292_vm2 = vcmp.ge.f32.partialorder %v228_v4, 0.0  ;;  %v356_v10 = vmul.f32 0.2, %v228_v4  ;;  %v418_v12 = vsel %vm290_vm0, %v226_v0, %v354_v8  ;;  %vm289_vm4 = vcmp.ge.f32.partialorder %v225_v14, 0.0 }
  0x14   :  { %1223 = vmatpush3.bf16.msra.mxu0 %v1360_v18  ;;  %vm294_vm1 = vcmp.ge.f32.partialorder %v230_v1, 0.0  ;;  %v358_v9 = vmul.f32 0.2, %v230_v1  ;;  %vm296_vm3 = vcmp.ge.f32.partialorder %v232_v5, 0.0  ;;  %v360_v11 = vmul.f32 0.2, %v232_v5 }
  0x15   :  { %1287 = vmatpush3.bf16.msra.mxu1 %v1361_v19  ;;  %1224 = vmatprep.subr.bf16.mxu0 %v1362_v20  ;;  %v420_v17 = vsel %vm292_vm2, %v228_v4, %v356_v10  ;;  %v227_v19 = vadd.f32 %v1541_v63, %v141_v6  ;;  %v25_v20 = vld [vmem:[%s1866_s0 + $0x20] sm:$0xff]  ;;  %vm293_vm5 = vcmp.ge.f32.partialorder %v229_v15, 0.0  ;;  %v240_v60 = vadd.f32 %v1529_v55, %v154_v47 }
  0x16   :  { %1288 = vmatprep.subr.bf16.mxu1 %v1363_v21  ;;  %v422_v13 = vsel %vm294_vm1, %v230_v1, %v358_v9  ;;  %v424_v18 = vsel %vm296_vm3, %v232_v5, %v360_v11  ;;  %v27_v21 = vld [vmem:[%s1866_s0 + $0x30] sm:$0xff]  ;;  %v61_v42 = vunpack.c.l.bf16 %v25_v20  ;;  %v67_v4 = vunpack.c.l.bf16 %v28_v28  ;;  %v29_v5 = vld [vmem:[%s1866_s0 + $0x40] sm:$0xff] }
  0x17   :  { %v482_v16 = vpack.c.bf16 %v422_v13, %v418_v12  ;;  %v484_v23 = vpack.c.bf16 %v424_v18, %v420_v17  ;;  %vm291_vm6 = vcmp.ge.f32.partialorder %v227_v19, 0.0  ;;  %v65_v43 = vunpack.c.l.bf16 %v27_v21  ;;  %v31_v9 = vld [vmem:[%s1866_s0 + $0x50] sm:$0xff]  ;;  %v32_v17 = vld [vmem:[%s1866_s0 + $0x58] sm:$0xff] }
  0x18   :  { %1225 = vmatpush3.bf16.msra.mxu0 %v1364_v22  ;;  %v1563_v22 = vld [vmem:[%s1866_s0 + $0x28] sm:$0xff]  ;;  %v147_v51 = vmul.f32 %v1533_v58, %v61_v42  ;;  %vm304_vm11 = vcmp.ge.f32.partialorder %v240_v60, 0.0  ;;  %v76_v28 = vunpack.c.h.bf16 %v32_v17 }
  0x19   :  { %1289 = vmatpush3.bf16.msra.mxu1 %v1365_v24  ;;  %1226 = vmatprep.subr.bf16.mxu0 %v1366_v25  ;;  %v353_v24 = vmul.f32 0.2, %v225_v14  ;;  %v357_v25 = vmul.f32 0.2, %v229_v15  ;;  %v151_v52 = vmul.f32 %v1533_v58, %v65_v43  ;;  %v63_v53 = vunpack.c.l.bf16 %v1563_v22 }
  0x1a   :  { %1290 = vmatprep.subr.bf16.mxu1 %v1367_v26  ;;  %801 = vmatprep.mubr.bf16.mxu0 %v482_v16  ;;  %v231_v26 = vadd.f32 %v1541_v63, %v145_v7  ;;  %v233_v0 = vadd.f32 %v1535_v59, %v147_v51  ;;  %v368_v7 = vmul.f32 0.2, %v240_v60  ;;  %v30_v16 = vld [vmem:[%s1866_s0 + $0x48] sm:$0xff]  ;;  %v75_v51 = vunpack.c.l.bf16 %v32_v17 }
  0x1b   :  { %898 = vmatprep.mubr.bf16.mxu1 %v484_v23  ;;  %v421_v33 = vsel %vm293_vm5, %v229_v15, %v357_v25  ;;  %v237_v3 = vadd.f32 %v1535_v59, %v151_v52  ;;  %v149_v13 = vmul.f32 %v1539_v62, %v63_v53  ;;  %v70_v15 = vunpack.c.h.bf16 %v29_v5 }
  0x1c   :  { %1227 = vmatpush3.bf16.msra.mxu0 %v1368_v27  ;;  %v355_v27 = vmul.f32 0.2, %v227_v19  ;;  %vm295_vm7 = vcmp.ge.f32.partialorder %v231_v26, 0.0  ;;  %vm297_vm12 = vcmp.ge.f32.partialorder %v233_v0, 0.0  ;;  %v361_v10 = vmul.f32 0.2, %v233_v0 }
  0x1d   :  { %1291 = vmatpush3.bf16.msra.mxu1 %v1369_v29  ;;  %1228 = vmatprep.subr.bf16.mxu0 %v1370_v30  ;;  %v417_v29 = vsel %vm289_vm4, %v225_v14, %v353_v24  ;;  %v62_v30 = vunpack.c.h.bf16 %v25_v20  ;;  %vm301_vm13 = vcmp.ge.f32.partialorder %v237_v3, 0.0  ;;  %v365_v11 = vmul.f32 0.2, %v237_v3 }
  0x1e   :  { %1292 = vmatprep.subr.bf16.mxu1 %v1371_v31  ;;  %v66_v31 = vunpack.c.h.bf16 %v27_v21  ;;  %v419_v35 = vsel %vm291_vm6, %v227_v19, %v355_v27  ;;  %v481_v36 = vpack.c.bf16 %v421_v33, %v417_v29  ;;  %v432_v12 = vsel %vm304_vm11, %v240_v60, %v368_v7 }
  0x1f   :  { %v148_v37 = vmul.f32 %v1523_v48, %v62_v30  ;;  %v153_v14 = vmul.f32 %v1539_v62, %v67_v4  ;;  %v425_v19 = vsel %vm297_vm12, %v233_v0, %v361_v10  ;;  %v429_v20 = vsel %vm301_vm13, %v237_v3, %v365_v11  ;;  %v35_v4 = vld [vmem:[%s1866_s0 + $0x70] sm:$0xff] }
  0x20   :  { %1229 = vmatpush3.bf16.msra.mxu0 %v1372_v32  ;;  %v64_v32 = vunpack.c.h.bf16 %v1563_v22  ;;  %v152_v38 = vmul.f32 %v1523_v48, %v66_v31  ;;  %v74_v21 = vunpack.c.h.bf16 %v31_v9  ;;  %v485_v22 = vpack.c.bf16 %v429_v20, %v425_v19 }
  0x21   :  { %1293 = vmatpush3.bf16.msra.mxu1 %v1373_v34  ;;  %v359_v34 = vmul.f32 0.2, %v231_v26  ;;  %v234_v45 = vadd.f32 %v1525_v49, %v148_v37  ;;  %v235_v23 = vadd.f32 %v1541_v63, %v149_v13  ;;  %v239_v24 = vadd.f32 %v1541_v63, %v153_v14  ;;  %v36_v13 = vld [vmem:[%s1866_s0 + $0x78] sm:$0xff] }
  0x22   :  { %v150_v41 = vmul.f32 %v1527_v54, %v64_v32  ;;  %v238_v46 = vadd.f32 %v1525_v49, %v152_v38  ;;  %v156_v25 = vmul.f32 %v1523_v48, %v70_v15  ;;  %v72_v27 = vunpack.c.h.bf16 %v30_v16 }
  0x23   :  { %v423_v40 = vsel %vm295_vm7, %v231_v26, %v359_v34  ;;  %802 = vmatmul.mubr.bf16.vlgmr.msra.gmra.mrb[0].mxu0 %v481_v36  ;;  %vm298_vm8 = vcmp.ge.f32.partialorder %v234_v45, 0.0  ;;  %v362_v56 = vmul.f32 0.2, %v234_v45  ;;  %v160_v26 = vmul.f32 %v1523_v48, %v74_v21 }
  0x24   :  { %v483_v44 = vpack.c.bf16 %v423_v40, %v419_v35  ;;  %v236_v50 = vadd.f32 %v1529_v55, %v150_v41  ;;  %vm302_vm9 = vcmp.ge.f32.partialorder %v238_v46, 0.0  ;;  %v366_v57 = vmul.f32 0.2, %v238_v46 }
  0x25   :  { %v426_v1 = vsel %vm298_vm8, %v234_v45, %v362_v56  ;;  %v69_v29 = vunpack.c.l.bf16 %v29_v5  ;;  %vm299_vm14 = vcmp.ge.f32.partialorder %v235_v23, 0.0  ;;  %vm303_vm15 = vcmp.ge.f32.partialorder %v239_v24, 0.0  ;;  %v33_v56 = vld [vmem:[%s1866_s0 + $0x60] sm:$0xff]  ;;  %v1622_v5 = vld [vmem:[%s1866_s0 + $0x68] sm:$0xff] }
  0x26   :  { %899 = vmatmul.mubr.bf16.vlgmr.msra.gmra.mrb[0].mxu1 %v483_v44  ;;  %vm300_vm10 = vcmp.ge.f32.partialorder %v236_v50, 0.0  ;;  %v364_v61 = vmul.f32 0.2, %v236_v50  ;;  %v430_v2 = vsel %vm302_vm9, %v238_v46, %v366_v57  ;;  %v363_v30 = vmul.f32 0.2, %v235_v23 }
  0x27   :  { %v486_v6 = vpack.c.bf16 %v430_v2, %v426_v1  ;;  %v367_v31 = vmul.f32 0.2, %v239_v24  ;;  %v242_v32 = vadd.f32 %v1525_v49, %v156_v25  ;;  %v246_v33 = vadd.f32 %v1525_v49, %v160_v26 }
  0x28   :  { %v428_v8 = vsel %vm300_vm10, %v236_v50, %v364_v61  ;;  %v158_v34 = vmul.f32 %v1527_v54, %v72_v27  ;;  %v162_v35 = vmul.f32 %v1527_v54, %v76_v28  ;;  %v427_v36 = vsel %vm299_vm14, %v235_v23, %v363_v30 }
  0x29   :  { %809 = vmatprep.mubr.bf16.mxu0 %v486_v6  ;;  %v488_v18 = vpack.c.bf16 %v432_v12, %v428_v8  ;;  %v431_v37 = vsel %vm303_vm15, %v239_v24, %v367_v31  ;;  %v73_v38 = vunpack.c.l.bf16 %v31_v9  ;;  %v155_v39 = vmul.f32 %v1533_v58, %v69_v29 }
  0x2a   :  { %v487_v40 = vpack.c.bf16 %v431_v37, %v427_v36  ;;  %vm306_vm0 = vcmp.ge.f32.partialorder %v242_v32, 0.0  ;;  %vm310_vm1 = vcmp.ge.f32.partialorder %v246_v33, 0.0  ;;  %v370_v41 = vmul.f32 0.2, %v242_v32 }
  0x2b   :  { %906 = vmatprep.mubr.bf16.mxu1 %v488_v18  ;;  %810 = vmatmul.mubr.bf16.gmra.mrb[4].mxu0 %v485_v22  ;;  %v374_v42 = vmul.f32 0.2, %v246_v33  ;;  %v244_v43 = vadd.f32 %v1529_v55, %v158_v34  ;;  %v248_v44 = vadd.f32 %v1529_v55, %v162_v35  ;;  %v159_v45 = vmul.f32 %v1533_v58, %v73_v38 }
  0x2c   :  { %v434_v46 = vsel %vm306_vm0, %v242_v32, %v370_v41  ;;  %v241_v47 = vadd.f32 %v1535_v59, %v155_v39  ;;  %v71_v50 = vunpack.c.l.bf16 %v30_v16  ;;  %v161_v3 = vmul.f32 %v1539_v62, %v75_v51  ;;  %v39_v51 = vld [vmem:[%s1866_s0 + $0x90] sm:$0xff] }
  0x2d   :  { %v438_v52 = vsel %vm310_vm1, %v246_v33, %v374_v42  ;;  %vm308_vm2 = vcmp.ge.f32.partialorder %v244_v43, 0.0  ;;  %vm312_vm3 = vcmp.ge.f32.partialorder %v248_v44, 0.0  ;;  %v372_v53 = vmul.f32 0.2, %v244_v43 }
  0x2e   :  { %907 = vmatmul.mubr.bf16.gmra.mrb[4].mxu1 %v487_v40  ;;  %v490_v57 = vpack.c.bf16 %v438_v52, %v434_v46  ;;  %v376_v60 = vmul.f32 0.2, %v248_v44  ;;  %v245_v61 = vadd.f32 %v1535_v59, %v159_v45  ;;  %vm305_vm4 = vcmp.ge.f32.partialorder %v241_v47, 0.0  ;;  %v37_v45 = vld [vmem:[%s1866_s0 + $0x80] sm:$0xff] }
  0x2f   :  { %v436_v0 = vsel %vm308_vm2, %v244_v43, %v372_v53  ;;  %v369_v1 = vmul.f32 0.2, %v241_v47  ;;  %v157_v2 = vmul.f32 %v1539_v62, %v71_v50  ;;  %v78_v8 = vunpack.c.h.bf16 %v33_v56 }
  0x30   :  { %817 = vmatprep.mubr.bf16.mxu0 %v490_v57  ;;  %v440_v6 = vsel %vm312_vm3, %v248_v44, %v376_v60  ;;  %vm309_vm5 = vcmp.ge.f32.partialorder %v245_v61, 0.0  ;;  %v373_v7 = vmul.f32 0.2, %v245_v61  ;;  %v247_v12 = vadd.f32 %v1541_v63, %v161_v3 }
  0x31   :  { %v492_v9 = vpack.c.bf16 %v440_v6, %v436_v0  ;;  %v433_v10 = vsel %vm305_vm4, %v241_v47, %v369_v1  ;;  %v243_v11 = vadd.f32 %v1541_v63, %v157_v2  ;;  %v82_v15 = vunpack.c.h.bf16 %v35_v4  ;;  %v38_v0 = vld [vmem:[%s1866_s0 + $0x88] sm:$0xff]  ;;  %v40_v1 = vld [vmem:[%s1866_s0 + $0x98] sm:$0xff] }
  0x32   :  { %v437_v14 = vsel %vm309_vm5, %v245_v61, %v373_v7  ;;  %v164_v16 = vmul.f32 %v1523_v48, %v78_v8  ;;  %v80_v17 = vunpack.c.h.bf16 %v1622_v5  ;;  %vm311_vm7 = vcmp.ge.f32.partialorder %v247_v12, 0.0 }
  0x33   :  { %914 = vmatprep.mubr.bf16.mxu1 %v492_v9  ;;  %v489_v18 = vpack.c.bf16 %v437_v14, %v433_v10  ;;  %vm307_vm6 = vcmp.ge.f32.partialorder %v243_v11, 0.0  ;;  %v371_v19 = vmul.f32 0.2, %v243_v11  ;;  %v375_v20 = vmul.f32 0.2, %v247_v12 }
  0x34   :  { %v168_v21 = vmul.f32 %v1523_v48, %v82_v15  ;;  %v250_v22 = vadd.f32 %v1525_v49, %v164_v16  ;;  %v84_v23 = vunpack.c.h.bf16 %v36_v13  ;;  %v166_v25 = vmul.f32 %v1527_v54, %v80_v17 }
  0x35   :  { %818 = vmatmul.mubr.bf16.gmra.mrb[8].mxu0 %v489_v18  ;;  %v435_v24 = vsel %vm307_vm6, %v243_v11, %v371_v19  ;;  %v77_v26 = vunpack.c.l.bf16 %v33_v56  ;;  %v81_v27 = vunpack.c.l.bf16 %v35_v4  ;;  %v439_v28 = vsel %vm311_vm7, %v247_v12, %v375_v20 }
  0x36   :  { %v254_v29 = vadd.f32 %v1525_v49, %v168_v21  ;;  %vm314_vm8 = vcmp.ge.f32.partialorder %v250_v22, 0.0  ;;  %v378_v30 = vmul.f32 0.2, %v250_v22  ;;  %v491_v31 = vpack.c.bf16 %v439_v28, %v435_v24 }
  0x37   :  { %v170_v32 = vmul.f32 %v1527_v54, %v84_v23  ;;  %v252_v33 = vadd.f32 %v1529_v55, %v166_v25  ;;  %v163_v34 = vmul.f32 %v1533_v58, %v77_v26  ;;  %v167_v37 = vmul.f32 %v1533_v58, %v81_v27 }
  0x38   :  { %vm318_vm9 = vcmp.ge.f32.partialorder %v254_v29, 0.0  ;;  %v382_v35 = vmul.f32 0.2, %v254_v29  ;;  %v442_v36 = vsel %vm314_vm8, %v250_v22, %v378_v30  ;;  %915 = vmatmul.mubr.bf16.gmra.mrb[8].mxu1 %v491_v31  ;;  %v79_v43 = vunpack.c.l.bf16 %v1622_v5 }
  0x39   :  { %v256_v38 = vadd.f32 %v1529_v55, %v170_v32  ;;  %vm316_vm10 = vcmp.ge.f32.partialorder %v252_v33, 0.0  ;;  %v380_v39 = vmul.f32 0.2, %v252_v33  ;;  %v249_v40 = vadd.f32 %v1535_v59, %v163_v34 }
  0x3a   :  { %v446_v41 = vsel %vm318_vm9, %v254_v29, %v382_v35  ;;  %v253_v42 = vadd.f32 %v1535_v59, %v167_v37  ;;  %v83_v44 = vunpack.c.l.bf16 %v36_v13  ;;  %v165_v57 = vmul.f32 %v1539_v62, %v79_v43 }
  0x3b   :  { %v494_v46 = vpack.c.bf16 %v446_v41, %v442_v36  ;;  %vm320_vm11 = vcmp.ge.f32.partialorder %v256_v38, 0.0  ;;  %v384_v47 = vmul.f32 0.2, %v256_v38  ;;  %v444_v50 = vsel %vm316_vm10, %v252_v33, %v380_v39  ;;  %v41_v36 = vld [vmem:[%s1866_s0 + $0xa0] sm:$0xff] }
  0x3c   :  { %vm313_vm12 = vcmp.ge.f32.partialorder %v249_v40, 0.0  ;;  %vm317_vm13 = vcmp.ge.f32.partialorder %v253_v42, 0.0  ;;  %v377_v52 = vmul.f32 0.2, %v249_v40  ;;  %v381_v53 = vmul.f32 0.2, %v253_v42 }
  0x3d   :  { %825 = vmatprep.mubr.bf16.mxu0 %v494_v46  ;;  %v448_v56 = vsel %vm320_vm11, %v256_v38, %v384_v47  ;;  %v169_v60 = vmul.f32 %v1539_v62, %v83_v44  ;;  %v86_v61 = vunpack.c.h.bf16 %v37_v45  ;;  %v90_v5 = vunpack.c.h.bf16 %v39_v51  ;;  %v43_v44 = vld [vmem:[%s1866_s0 + $0xb0] sm:$0xff] }
  0x3e   :  { %v496_v2 = vpack.c.bf16 %v448_v56, %v444_v50  ;;  %v441_v3 = vsel %vm313_vm12, %v249_v40, %v377_v52  ;;  %v445_v4 = vsel %vm317_vm13, %v253_v42, %v381_v53  ;;  %v251_v7 = vadd.f32 %v1541_v63, %v165_v57  ;;  %v44_v57 = vld [vmem:[%s1866_s0 + $0xb8] sm:$0xff] }
  0x3f   :  { %v493_v6 = vpack.c.bf16 %v445_v4, %v441_v3  ;;  %v255_v8 = vadd.f32 %v1541_v63, %v169_v60  ;;  %v172_v9 = vmul.f32 %v1523_v48, %v86_v61  ;;  %v176_v10 = vmul.f32 %v1523_v48, %v90_v5 }
  0x40   :  { %922 = vmatprep.mubr.bf16.mxu1 %v496_v2  ;;  %v88_v11 = vunpack.c.h.bf16 %v38_v0  ;;  %v92_v12 = vunpack.c.h.bf16 %v40_v1  ;;  %v85_v13 = vunpack.c.l.bf16 %v37_v45  ;;  %vm315_vm14 = vcmp.ge.f32.partialorder %v251_v7, 0.0  ;;  %v1682_v45 = vld [vmem:[%s1866_s0 + $0xa8] sm:$0xff] }
  0x41   :  { %826 = vmatmul.mubr.bf16.gmra.mrb[12].mxu0 %v493_v6  ;;  %vm319_vm15 = vcmp.ge.f32.partialorder %v255_v8, 0.0  ;;  %v379_v14 = vmul.f32 0.2, %v251_v7  ;;  %v383_v15 = vmul.f32 0.2, %v255_v8  ;;  %v258_v16 = vadd.f32 %v1525_v49, %v172_v9 }
  0x42   :  { %v262_v17 = vadd.f32 %v1525_v49, %v176_v10  ;;  %v174_v18 = vmul.f32 %v1527_v54, %v88_v11  ;;  %v178_v19 = vmul.f32 %v1527_v54, %v92_v12  ;;  %v89_v22 = vunpack.c.l.bf16 %v39_v51 }
  0x43   :  { %v443_v20 = vsel %vm315_vm14, %v251_v7, %v379_v14  ;;  %v447_v21 = vsel %vm319_vm15, %v255_v8, %v383_v15  ;;  %v171_v23 = vmul.f32 %v1533_v58, %v85_v13  ;;  %vm322_vm0 = vcmp.ge.f32.partialorder %v258_v16, 0.0 }
  0x44   :  { %v495_v24 = vpack.c.bf16 %v447_v21, %v443_v20  ;;  %vm326_vm1 = vcmp.ge.f32.partialorder %v262_v17, 0.0  ;;  %v386_v25 = vmul.f32 0.2, %v258_v16  ;;  %v390_v26 = vmul.f32 0.2, %v262_v17 }
  0x45   :  { %v260_v27 = vadd.f32 %v1529_v55, %v174_v18  ;;  %v264_v28 = vadd.f32 %v1529_v55, %v178_v19  ;;  %v175_v29 = vmul.f32 %v1533_v58, %v89_v22  ;;  %v257_v31 = vadd.f32 %v1535_v59, %v171_v23 }
  0x46   :  { %923 = vmatmul.mubr.bf16.gmra.mrb[12].mxu1 %v495_v24  ;;  %v450_v30 = vsel %vm322_vm0, %v258_v16, %v386_v25  ;;  %v87_v32 = vunpack.c.l.bf16 %v38_v0  ;;  %v91_v33 = vunpack.c.l.bf16 %v40_v1  ;;  %v454_v34 = vsel %vm326_vm1, %v262_v17, %v390_v26 }
  0x47   :  { %vm324_vm2 = vcmp.ge.f32.partialorder %v260_v27, 0.0  ;;  %vm328_vm3 = vcmp.ge.f32.partialorder %v264_v28, 0.0  ;;  %v388_v35 = vmul.f32 0.2, %v260_v27  ;;  %v498_v37 = vpack.c.bf16 %v454_v34, %v450_v30 }
  0x48   :  { %v392_v38 = vmul.f32 0.2, %v264_v28  ;;  %v261_v39 = vadd.f32 %v1535_v59, %v175_v29  ;;  %vm321_vm4 = vcmp.ge.f32.partialorder %v257_v31, 0.0  ;;  %v385_v41 = vmul.f32 0.2, %v257_v31  ;;  %v45_v29 = vld [vmem:[%s1866_s0 + $0xc0] sm:$0xff] }
  0x49   :  { %v452_v40 = vsel %vm324_vm2, %v260_v27, %v388_v35  ;;  %v173_v42 = vmul.f32 %v1539_v62, %v87_v32  ;;  %v177_v43 = vmul.f32 %v1539_v62, %v91_v33  ;;  %833 = vmatprep.mubr.bf16.mxu0 %v498_v37  ;;  %v94_v50 = vunpack.c.h.bf16 %v41_v36  ;;  %v47_v33 = vld [vmem:[%s1866_s0 + $0xd0] sm:$0xff] }
  0x4a   :  { %v456_v46 = vsel %vm328_vm3, %v264_v28, %v392_v38  ;;  %vm325_vm5 = vcmp.ge.f32.partialorder %v261_v39, 0.0  ;;  %v389_v47 = vmul.f32 0.2, %v261_v39  ;;  %v449_v52 = vsel %vm321_vm4, %v257_v31, %v385_v41  ;;  %v48_v41 = vld [vmem:[%s1866_s0 + $0xd8] sm:$0xff] }
  0x4b   :  { %v500_v51 = vpack.c.bf16 %v456_v46, %v452_v40  ;;  %v259_v53 = vadd.f32 %v1541_v63, %v173_v42  ;;  %v263_v56 = vadd.f32 %v1541_v63, %v177_v43  ;;  %v98_v61 = vunpack.c.h.bf16 %v43_v44  ;;  %v46_v40 = vld [vmem:[%s1866_s0 + $0xc8] sm:$0xff] }
  0x4c   :  { %v453_v60 = vsel %vm325_vm5, %v261_v39, %v389_v47  ;;  %v180_v0 = vmul.f32 %v1523_v48, %v94_v50  ;;  %v96_v1 = vunpack.c.h.bf16 %v1682_v45  ;;  %v100_v7 = vunpack.c.h.bf16 %v44_v57 }
  0x4d   :  { %930 = vmatprep.mubr.bf16.mxu1 %v500_v51  ;;  %v497_v2 = vpack.c.bf16 %v453_v60, %v449_v52  ;;  %vm323_vm6 = vcmp.ge.f32.partialorder %v259_v53, 0.0  ;;  %vm327_vm7 = vcmp.ge.f32.partialorder %v263_v56, 0.0  ;;  %v387_v3 = vmul.f32 0.2, %v259_v53 }
  0x4e   :  { %v391_v4 = vmul.f32 0.2, %v263_v56  ;;  %v184_v5 = vmul.f32 %v1523_v48, %v98_v61  ;;  %v266_v6 = vadd.f32 %v1525_v49, %v180_v0  ;;  %v182_v9 = vmul.f32 %v1527_v54, %v96_v1 }
  0x4f   :  { %834 = vmatmul.mubr.bf16.gmra.mrb[16].mxu0 %v497_v2  ;;  %v451_v8 = vsel %vm323_vm6, %v259_v53, %v387_v3  ;;  %v93_v10 = vunpack.c.l.bf16 %v41_v36  ;;  %v97_v11 = vunpack.c.l.bf16 %v43_v44  ;;  %v186_v16 = vmul.f32 %v1527_v54, %v100_v7 }
  0x50   :  { %v455_v12 = vsel %vm327_vm7, %v263_v56, %v391_v4  ;;  %v270_v13 = vadd.f32 %v1525_v49, %v184_v5  ;;  %vm330_vm8 = vcmp.ge.f32.partialorder %v266_v6, 0.0  ;;  %v394_v14 = vmul.f32 0.2, %v266_v6 }
  0x51   :  { %v499_v15 = vpack.c.bf16 %v455_v12, %v451_v8  ;;  %v268_v17 = vadd.f32 %v1529_v55, %v182_v9  ;;  %v179_v18 = vmul.f32 %v1533_v58, %v93_v10  ;;  %v183_v21 = vmul.f32 %v1533_v58, %v97_v11 }
  0x52   :  { %vm334_vm9 = vcmp.ge.f32.partialorder %v270_v13, 0.0  ;;  %v398_v19 = vmul.f32 0.2, %v270_v13  ;;  %v458_v20 = vsel %vm330_vm8, %v266_v6, %v394_v14  ;;  %v272_v22 = vadd.f32 %v1529_v55, %v186_v16 }
  0x53   :  { %931 = vmatmul.mubr.bf16.gmra.mrb[16].mxu1 %v499_v15  ;;  %vm332_vm10 = vcmp.ge.f32.partialorder %v268_v17, 0.0  ;;  %v396_v23 = vmul.f32 0.2, %v268_v17  ;;  %v265_v24 = vadd.f32 %v1535_v59, %v179_v18  ;;  %v269_v26 = vadd.f32 %v1535_v59, %v183_v21 }
  0x54   :  { %v462_v25 = vsel %vm334_vm9, %v270_v13, %v398_v19  ;;  %v95_v27 = vunpack.c.l.bf16 %v1682_v45  ;;  %v99_v28 = vunpack.c.l.bf16 %v44_v57  ;;  %vm336_vm11 = vcmp.ge.f32.partialorder %v272_v22, 0.0 }
  0x55   :  { %v502_v30 = vpack.c.bf16 %v462_v25, %v458_v20  ;;  %v400_v31 = vmul.f32 0.2, %v272_v22  ;;  %v460_v32 = vsel %vm332_vm10, %v268_v17, %v396_v23  ;;  %vm329_vm12 = vcmp.ge.f32.partialorder %v265_v24, 0.0  ;;  %v49_v20 = vld [vmem:[%s1866_s0 + $0xe0] sm:$0xff] }
  0x56   :  { %vm333_vm13 = vcmp.ge.f32.partialorder %v269_v26, 0.0  ;;  %v393_v34 = vmul.f32 0.2, %v265_v24  ;;  %v397_v35 = vmul.f32 0.2, %v269_v26  ;;  %v181_v37 = vmul.f32 %v1539_v62, %v95_v27 }
  0x57   :  { %841 = vmatprep.mubr.bf16.mxu0 %v502_v30  ;;  %v464_v36 = vsel %vm336_vm11, %v272_v22, %v400_v31  ;;  %v185_v38 = vmul.f32 %v1539_v62, %v99_v28  ;;  %v102_v39 = vunpack.c.h.bf16 %v45_v29  ;;  %v106_v45 = vunpack.c.h.bf16 %v47_v33  ;;  %v51_v28 = vld [vmem:[%s1866_s0 + $0xf0] sm:$0xff] }
  0x58   :  { %v504_v42 = vpack.c.bf16 %v464_v36, %v460_v32  ;;  %v457_v43 = vsel %vm329_vm12, %v265_v24, %v393_v34  ;;  %v461_v44 = vsel %vm333_vm13, %v269_v26, %v397_v35  ;;  %v267_v47 = vadd.f32 %v1541_v63, %v181_v37  ;;  %v52_v37 = vld [vmem:[%s1866_s0 + $0xf8] sm:$0xff] }
  0x59   :  { %v501_v46 = vpack.c.bf16 %v461_v44, %v457_v43  ;;  %v271_v50 = vadd.f32 %v1541_v63, %v185_v38  ;;  %v188_v51 = vmul.f32 %v1523_v48, %v102_v39  ;;  %v192_v52 = vmul.f32 %v1523_v48, %v106_v45 }
  0x5a   :  { %938 = vmatprep.mubr.bf16.mxu1 %v504_v42  ;;  %v104_v53 = vunpack.c.h.bf16 %v46_v40  ;;  %v108_v56 = vunpack.c.h.bf16 %v48_v41  ;;  %v101_v57 = vunpack.c.l.bf16 %v45_v29  ;;  %vm331_vm14 = vcmp.ge.f32.partialorder %v267_v47, 0.0  ;;  %v50_v29 = vld [vmem:[%s1866_s0 + $0xe8] sm:$0xff] }
  0x5b   :  { %842 = vmatmul.mubr.bf16.gmra.mrb[20].mxu0 %v501_v46  ;;  %vm335_vm15 = vcmp.ge.f32.partialorder %v271_v50, 0.0  ;;  %v395_v60 = vmul.f32 0.2, %v267_v47  ;;  %v399_v61 = vmul.f32 0.2, %v271_v50  ;;  %v274_v0 = vadd.f32 %v1525_v49, %v188_v51 }
  0x5c   :  { %v278_v1 = vadd.f32 %v1525_v49, %v192_v52  ;;  %v190_v2 = vmul.f32 %v1527_v54, %v104_v53  ;;  %v194_v3 = vmul.f32 %v1527_v54, %v108_v56  ;;  %v105_v6 = vunpack.c.l.bf16 %v47_v33 }
  0x5d   :  { %v459_v4 = vsel %vm331_vm14, %v267_v47, %v395_v60  ;;  %v463_v5 = vsel %vm335_vm15, %v271_v50, %v399_v61  ;;  %v187_v7 = vmul.f32 %v1533_v58, %v101_v57  ;;  %vm338_vm0 = vcmp.ge.f32.partialorder %v274_v0, 0.0 }
  0x5e   :  { %v503_v8 = vpack.c.bf16 %v463_v5, %v459_v4  ;;  %vm342_vm1 = vcmp.ge.f32.partialorder %v278_v1, 0.0  ;;  %v402_v9 = vmul.f32 0.2, %v274_v0  ;;  %v406_v10 = vmul.f32 0.2, %v278_v1 }
  0x5f   :  { %v276_v11 = vadd.f32 %v1529_v55, %v190_v2  ;;  %v280_v12 = vadd.f32 %v1529_v55, %v194_v3  ;;  %v191_v13 = vmul.f32 %v1533_v58, %v105_v6  ;;  %v273_v15 = vadd.f32 %v1535_v59, %v187_v7 }
  0x60   :  { %939 = vmatmul.mubr.bf16.gmra.mrb[20].mxu1 %v503_v8  ;;  %v466_v14 = vsel %vm338_vm0, %v274_v0, %v402_v9  ;;  %v103_v16 = vunpack.c.l.bf16 %v46_v40  ;;  %v107_v17 = vunpack.c.l.bf16 %v48_v41  ;;  %v470_v18 = vsel %vm342_vm1, %v278_v1, %v406_v10 }
  0x61   :  { %vm340_vm2 = vcmp.ge.f32.partialorder %v276_v11, 0.0  ;;  %vm344_vm3 = vcmp.ge.f32.partialorder %v280_v12, 0.0  ;;  %v404_v19 = vmul.f32 0.2, %v276_v11  ;;  %v506_v21 = vpack.c.bf16 %v470_v18, %v466_v14 }
  0x62   :  { %v408_v22 = vmul.f32 0.2, %v280_v12  ;;  %v277_v23 = vadd.f32 %v1535_v59, %v191_v13  ;;  %vm337_vm4 = vcmp.ge.f32.partialorder %v273_v15, 0.0  ;;  %v401_v25 = vmul.f32 0.2, %v273_v15 }
  0x63   :  { %v468_v24 = vsel %vm340_vm2, %v276_v11, %v404_v19  ;;  %v189_v26 = vmul.f32 %v1539_v62, %v103_v16  ;;  %v193_v27 = vmul.f32 %v1539_v62, %v107_v17  ;;  %849 = vmatprep.mubr.bf16.mxu0 %v506_v21  ;;  %v110_v32 = vunpack.c.h.bf16 %v49_v20 }
  0x64   :  { %v472_v30 = vsel %vm344_vm3, %v280_v12, %v408_v22  ;;  %vm341_vm5 = vcmp.ge.f32.partialorder %v277_v23, 0.0  ;;  %v405_v31 = vmul.f32 0.2, %v277_v23  ;;  %v465_v34 = vsel %vm337_vm4, %v273_v15, %v401_v25 }
  0x65   :  { %v508_v33 = vpack.c.bf16 %v472_v30, %v468_v24  ;;  %v275_v35 = vadd.f32 %v1541_v63, %v189_v26  ;;  %v279_v36 = vadd.f32 %v1541_v63, %v193_v27  ;;  %v114_v39 = vunpack.c.h.bf16 %v51_v28 }
  0x66   :  { %v469_v38 = vsel %vm341_vm5, %v277_v23, %v405_v31  ;;  %v196_v40 = vmul.f32 %v1523_v48, %v110_v32  ;;  %v112_v41 = vunpack.c.h.bf16 %v50_v29  ;;  %v116_v47 = vunpack.c.h.bf16 %v52_v37 }
  0x67   :  { %946 = vmatprep.mubr.bf16.mxu1 %v508_v33  ;;  %v505_v42 = vpack.c.bf16 %v469_v38, %v465_v34  ;;  %vm339_vm6 = vcmp.ge.f32.partialorder %v275_v35, 0.0  ;;  %vm343_vm7 = vcmp.ge.f32.partialorder %v279_v36, 0.0  ;;  %v403_v43 = vmul.f32 0.2, %v275_v35 }
  0x68   :  { %v407_v44 = vmul.f32 0.2, %v279_v36  ;;  %v200_v45 = vmul.f32 %v1523_v48, %v114_v39  ;;  %v282_v46 = vadd.f32 %v1525_v49, %v196_v40  ;;  %v198_v51 = vmul.f32 %v1527_v54, %v112_v41 }
  0x69   :  { %850 = vmatmul.mubr.bf16.gmra.mrb[24].mxu0 %v505_v42  ;;  %v467_v50 = vsel %vm339_vm6, %v275_v35, %v403_v43  ;;  %v109_v52 = vunpack.c.l.bf16 %v49_v20  ;;  %v113_v53 = vunpack.c.l.bf16 %v51_v28  ;;  %v202_v0 = vmul.f32 %v1527_v54, %v116_v47 }
  0x6a   :  { %v471_v56 = vsel %vm343_vm7, %v279_v36, %v407_v44  ;;  %v286_v57 = vadd.f32 %v1525_v49, %v200_v45  ;;  %vm346_vm8 = vcmp.ge.f32.partialorder %v282_v46, 0.0  ;;  %v410_v60 = vmul.f32 0.2, %v282_v46 }
  0x6b   :  { %v507_v61 = vpack.c.bf16 %v471_v56, %v467_v50  ;;  %v284_v1 = vadd.f32 %v1529_v55, %v198_v51  ;;  %v195_v48 = vmul.f32 %v1533_v58, %v109_v52  ;;  %v199_v4 = vmul.f32 %v1533_v58, %v113_v53 }
  0x6c   :  { %vm350_vm9 = vcmp.ge.f32.partialorder %v286_v57, 0.0  ;;  %v414_v2 = vmul.f32 0.2, %v286_v57  ;;  %v474_v3 = vsel %vm346_vm8, %v282_v46, %v410_v60  ;;  %v288_v5 = vadd.f32 %v1529_v55, %v202_v0 }
  0x6d   :  { %947 = vmatmul.mubr.bf16.gmra.mrb[24].mxu1 %v507_v61  ;;  %vm348_vm10 = vcmp.ge.f32.partialorder %v284_v1, 0.0  ;;  %v412_v6 = vmul.f32 0.2, %v284_v1  ;;  %v281_v49 = vadd.f32 %v1535_v59, %v195_v48  ;;  %v285_v8 = vadd.f32 %v1535_v59, %v199_v4 }
  0x6e   :  { %v478_v7 = vsel %vm350_vm9, %v286_v57, %v414_v2  ;;  %v111_v54 = vunpack.c.l.bf16 %v50_v29  ;;  %v115_v9 = vunpack.c.l.bf16 %v52_v37  ;;  %vm352_vm11 = vcmp.ge.f32.partialorder %v288_v5, 0.0 }
  0x6f   :  { %v510_v10 = vpack.c.bf16 %v478_v7, %v474_v3  ;;  %v416_v11 = vmul.f32 0.2, %v288_v5  ;;  %v476_v12 = vsel %vm348_vm10, %v284_v1, %v412_v6  ;;  %vm345_vm12 = vcmp.ge.f32.partialorder %v281_v49, 0.0 }
  0x70   :  { %vm349_vm13 = vcmp.ge.f32.partialorder %v285_v8, 0.0  ;;  %v409_v13 = vmul.f32 0.2, %v281_v49  ;;  %v413_v58 = vmul.f32 0.2, %v285_v8  ;;  %v197_v55 = vmul.f32 %v1539_v62, %v111_v54 }
  0x71   :  { %857 = vmatprep.mubr.bf16.mxu0 %v510_v10  ;;  %v480_v14 = vsel %vm352_vm11, %v288_v5, %v416_v11  ;;  %v201_v15 = vmul.f32 %v1539_v62, %v115_v9  ;;  %vm963_vm0 = vcmask 523264   ;;  %vm1121_vm1 = vcmask 519168  }
  0x72   :  { %v512_v16 = vpack.c.bf16 %v480_v14, %v476_v12  ;;  %v473_v17 = vsel %vm345_vm12, %v281_v49, %v409_v13  ;;  %v477_v18 = vsel %vm349_vm13, %v285_v8, %v413_v58  ;;  %v283_v19 = vadd.f32 %v1541_v63, %v197_v55 }
  0x73   :  { %v509_v59 = vpack.c.bf16 %v477_v18, %v473_v17  ;;  %v287_v20 = vadd.f32 %v1541_v63, %v201_v15  ;;  %vm1001_vm2 = vcmask 516096  }
  0x74   :  { %954 = vmatprep.mubr.bf16.mxu1 %v512_v16  ;;  %vm347_vm14 = vcmp.ge.f32.partialorder %v283_v19, 0.0  ;;  %v411_v21 = vmul.f32 0.2, %v283_v19 }
  0x75   :  { %858 = vmatmul.mubr.bf16.gmra.mrb[28].mxu0 %v509_v59  ;;  %vm351_vm15 = vcmp.ge.f32.partialorder %v287_v20, 0.0  ;;  %v415_v22 = vmul.f32 0.2, %v287_v20 }
  0x76   :  { %v475_v23 = vsel %vm347_vm14, %v283_v19, %v411_v21 }
  0x77   :  { %v479_v24 = vsel %vm351_vm15, %v287_v20, %v415_v22 }
  0x78   :  { %v511_v25 = vpack.c.bf16 %v479_v24, %v475_v23 }
  0x7a   :  { %955 = vmatmul.mubr.bf16.gmra.mrb[28].mxu1 %v511_v25 }
  0xf6   :  { %v1230_v26 = vpop.f32.mrb[0].mxu0 }
  0xf7   :  { %v1231_v62 = vpop.f32.mrb[1].mxu0 }
  0xf8   :  { %v1232_v28 = vadd.f32 %v1231_v62, %v1230_v26  ;;  %v1233_v29 = vpop.f32.mrb[2].mxu0 }
  0xf9   :  { %v1294_v27 = vpop.f32.mrb[0].mxu1  ;;  %v1234_v31 = vpop.f32.mrb[3].mxu0 }
  0xfa   :  { %v1295_v30 = vpop.f32.mrb[1].mxu1  ;;  %v1235_v63 = vadd.f32 %v1234_v31, %v1233_v29 }
  0xfb   :  { %v1296_v32 = vadd.f32 %v1295_v30, %v1294_v27  ;;  %v1297_v33 = vpop.f32.mrb[2].mxu1 }
  0xfc   :  { %v1298_v34 = vpop.f32.mrb[3].mxu1 }
  0xfd   :  { %v901_v35 = vadd.f32 %v1296_v32, %v1232_v28  ;;  %v1299_v36 = vadd.f32 %v1298_v34, %v1297_v33 }
  0xfe   :  { %v1236_v45 = vpop.f32.mrb[4].mxu0 }
  0xff   :  { %v1003_v37 = vmul.f32 %v901_v35, %v901_v35  ;;  %v1198_v38 = vpack.c.bf16 %v901_v35, %v901_v35  ;;  %v904_v39 = vadd.f32 %v1299_v36, %v1235_v63  ;;  %v964_v40 = vsel %vm963_vm0, %v901_v35, 0.0  ;;  %v1237_v50 = vpop.f32.mrb[5].mxu0 }
 0x100   :  { %v1238_v52 = vadd.f32 %v1237_v50, %v1236_v45  ;;  %v1239_v53 = vpop.f32.mrb[6].mxu0 }
 0x101   :  { %1122 = vst.msk [vmem:[%s1869_s4] sm:$0xf] %vm1121_vm1, %v1198_v38  ;;  %v965_v41 = vsel %vm963_vm0, %v904_v39, 0.0  ;;  %v1004_v42 = vmul.f32 %v904_v39, %v904_v39  ;;  %v1199_v43 = vpack.c.bf16 %v904_v39, %v904_v39  ;;  %v1019_v46 = vsel %vm963_vm0, %v1003_v37, 0.0  ;;  %v1240_v56 = vpop.f32.mrb[7].mxu0  ;;  %v1300_v60 = vpop.f32.mrb[4].mxu1 }
 0x102   :  { %v966_v44 = vadd.f32 %v965_v41, %v964_v40  ;;  %v1241_v57 = vadd.f32 %v1240_v56, %v1239_v53  ;;  %v1301_v61 = vpop.f32.mrb[5].mxu1 }
 0x103   :  { %v1020_v47 = vsel %vm963_vm0, %v1004_v42, 0.0  ;;  %1123 = vst.msk [vmem:[%s1869_s4 + $0x4] sm:$0xf] %vm1121_vm1, %v1199_v43  ;;  %v1302_v0 = vadd.f32 %v1301_v61, %v1300_v60  ;;  %v1303_v1 = vpop.f32.mrb[6].mxu1 }
 0x104   :  { %v1021_v51 = vadd.f32 %v1020_v47, %v1019_v46  ;;  %v1304_v48 = vpop.f32.mrb[7].mxu1 }
 0x105   :  { %v909_v2 = vadd.f32 %v1302_v0, %v1238_v52  ;;  %v1305_v3 = vadd.f32 %v1304_v48, %v1303_v1 }
 0x107   :  { %v967_v4 = vsel %vm963_vm0, %v909_v2, 0.0  ;;  %v1005_v5 = vmul.f32 %v909_v2, %v909_v2  ;;  %v1200_v6 = vpack.c.bf16 %v909_v2, %v909_v2  ;;  %v912_v49 = vadd.f32 %v1305_v3, %v1241_v57 }
 0x108   :  { %v968_v7 = vadd.f32 %v967_v4, %v966_v44  ;;  %v1242_v13 = vpop.f32.mrb[8].mxu0 }
 0x109   :  { %v1022_v8 = vsel %vm963_vm0, %v1005_v5, 0.0  ;;  %1124 = vst.msk [vmem:[%s1869_s4 + $0x8] sm:$0xf] %vm1121_vm1, %v1200_v6  ;;  %v969_v54 = vsel %vm963_vm0, %v912_v49, 0.0  ;;  %v1006_v9 = vmul.f32 %v912_v49, %v912_v49  ;;  %v1201_v10 = vpack.c.bf16 %v912_v49, %v912_v49  ;;  %v1243_v14 = vpop.f32.mrb[9].mxu0 }
 0x10a   :  { %v1023_v11 = vadd.f32 %v1022_v8, %v1021_v51  ;;  %v970_v12 = vadd.f32 %v969_v54, %v968_v7  ;;  %v1244_v15 = vadd.f32 %v1243_v14, %v1242_v13  ;;  %v1245_v16 = vpop.f32.mrb[10].mxu0 }
 0x10b   :  { %v1024_v58 = vsel %vm963_vm0, %v1006_v9, 0.0  ;;  %1125 = vst.msk [vmem:[%s1869_s4 + $0xc] sm:$0xf] %vm1121_vm1, %v1201_v10  ;;  %v1246_v17 = vpop.f32.mrb[11].mxu0  ;;  %v1306_v18 = vpop.f32.mrb[8].mxu1 }
 0x10c   :  { %v1025_v55 = vadd.f32 %v1024_v58, %v1023_v11  ;;  %v1247_v59 = vadd.f32 %v1246_v17, %v1245_v16  ;;  %v1307_v19 = vpop.f32.mrb[9].mxu1 }
 0x10d   :  { %v1308_v20 = vadd.f32 %v1307_v19, %v1306_v18  ;;  %v1309_v21 = vpop.f32.mrb[10].mxu1 }
 0x10e   :  { %v1310_v22 = vpop.f32.mrb[11].mxu1 }
 0x10f   :  { %v917_v23 = vadd.f32 %v1308_v20, %v1244_v15  ;;  %v1311_v24 = vadd.f32 %v1310_v22, %v1309_v21 }
 0x111   :  { %v971_v25 = vsel %vm963_vm0, %v917_v23, 0.0  ;;  %v1007_v26 = vmul.f32 %v917_v23, %v917_v23  ;;  %v1202_v62 = vpack.c.bf16 %v917_v23, %v917_v23  ;;  %v920_v27 = vadd.f32 %v1311_v24, %v1247_v59 }
 0x112   :  { %v972_v28 = vadd.f32 %v971_v25, %v970_v12 }
 0x113   :  { %v1026_v29 = vsel %vm963_vm0, %v1007_v26, 0.0  ;;  %1126 = vst.msk [vmem:[%s1869_s4 + $0x10] sm:$0xf] %vm1121_vm1, %v1202_v62  ;;  %v973_v30 = vsel %vm963_vm0, %v920_v27, 0.0  ;;  %v1008_v31 = vmul.f32 %v920_v27, %v920_v27  ;;  %v1203_v32 = vpack.c.bf16 %v920_v27, %v920_v27 }
 0x114   :  { %v1248_v33 = vpop.f32.mrb[12].mxu0  ;;  %v1027_v63 = vadd.f32 %v1026_v29, %v1025_v55  ;;  %v974_v34 = vadd.f32 %v973_v30, %v972_v28 }
 0x115   :  { %v1249_v35 = vpop.f32.mrb[13].mxu0  ;;  %v1028_v36 = vsel %vm963_vm0, %v1008_v31, 0.0  ;;  %1127 = vst.msk [vmem:[%s1869_s4 + $0x14] sm:$0xf] %vm1121_vm1, %v1203_v32 }
 0x116   :  { %v1250_v37 = vadd.f32 %v1249_v35, %v1248_v33  ;;  %v1251_v38 = vpop.f32.mrb[14].mxu0  ;;  %v1029_v39 = vadd.f32 %v1028_v36, %v1027_v63 }
 0x117   :  { %v1252_v40 = vpop.f32.mrb[15].mxu0 }
 0x118   :  { %v1253_v41 = vadd.f32 %v1252_v40, %v1251_v38 }
 0x119   :  { %v1312_v42 = vpop.f32.mrb[12].mxu1 }
 0x11a   :  { %v1313_v43 = vpop.f32.mrb[13].mxu1 }
 0x11b   :  { %v1314_v44 = vadd.f32 %v1313_v43, %v1312_v42  ;;  %v1315_v45 = vpop.f32.mrb[14].mxu1 }
 0x11c   :  { %v1316_v46 = vpop.f32.mrb[15].mxu1 }
 0x11d   :  { %v925_v47 = vadd.f32 %v1314_v44, %v1250_v37  ;;  %v1317_v50 = vadd.f32 %v1316_v46, %v1315_v45 }
 0x11f   :  { %v975_v51 = vsel %vm963_vm0, %v925_v47, 0.0  ;;  %v1009_v52 = vmul.f32 %v925_v47, %v925_v47  ;;  %v1204_v53 = vpack.c.bf16 %v925_v47, %v925_v47  ;;  %v928_v56 = vadd.f32 %v1317_v50, %v1253_v41 }
 0x120   :  { %v976_v57 = vadd.f32 %v975_v51, %v974_v34 }
 0x121   :  { %v1030_v60 = vsel %vm963_vm0, %v1009_v52, 0.0  ;;  %1128 = vst.msk [vmem:[%s1869_s4 + $0x18] sm:$0xf] %vm1121_vm1, %v1204_v53  ;;  %v977_v61 = vsel %vm963_vm0, %v928_v56, 0.0  ;;  %v1010_v0 = vmul.f32 %v928_v56, %v928_v56  ;;  %v1205_v1 = vpack.c.bf16 %v928_v56, %v928_v56 }
 0x122   :  { %v1031_v48 = vadd.f32 %v1030_v60, %v1029_v39  ;;  %v978_v2 = vadd.f32 %v977_v61, %v976_v57  ;;  %v1254_v3 = vpop.f32.mrb[16].mxu0 }
 0x123   :  { %v1032_v4 = vsel %vm963_vm0, %v1010_v0, 0.0  ;;  %1129 = vst.msk [vmem:[%s1869_s4 + $0x1c] sm:$0xf] %vm1121_vm1, %v1205_v1  ;;  %v1255_v5 = vpop.f32.mrb[17].mxu0 }
 0x124   :  { %v1033_v6 = vadd.f32 %v1032_v4, %v1031_v48  ;;  %v1256_v49 = vadd.f32 %v1255_v5, %v1254_v3  ;;  %v1257_v7 = vpop.f32.mrb[18].mxu0 }
 0x125   :  { %v1258_v8 = vpop.f32.mrb[19].mxu0 }
 0x126   :  { %v1318_v54 = vpop.f32.mrb[16].mxu1  ;;  %v1259_v9 = vadd.f32 %v1258_v8, %v1257_v7 }
 0x127   :  { %v1319_v10 = vpop.f32.mrb[17].mxu1 }
 0x128   :  { %v1320_v11 = vadd.f32 %v1319_v10, %v1318_v54  ;;  %v1321_v12 = vpop.f32.mrb[18].mxu1 }
 0x129   :  { %v1322_v13 = vpop.f32.mrb[19].mxu1 }
 0x12a   :  { %v933_v58 = vadd.f32 %v1320_v11, %v1256_v49  ;;  %v1323_v14 = vadd.f32 %v1322_v13, %v1321_v12 }
 0x12c   :  { %v979_v55 = vsel %vm963_vm0, %v933_v58, 0.0  ;;  %v1011_v15 = vmul.f32 %v933_v58, %v933_v58  ;;  %v1206_v16 = vpack.c.bf16 %v933_v58, %v933_v58  ;;  %v936_v17 = vadd.f32 %v1323_v14, %v1259_v9 }
 0x12d   :  { %v980_v18 = vadd.f32 %v979_v55, %v978_v2 }
 0x12e   :  { %v1034_v59 = vsel %vm963_vm0, %v1011_v15, 0.0  ;;  %1130 = vst.msk [vmem:[%s1869_s4 + $0x20] sm:$0xf] %vm1121_vm1, %v1206_v16  ;;  %v981_v19 = vsel %vm963_vm0, %v936_v17, 0.0  ;;  %v1012_v20 = vmul.f32 %v936_v17, %v936_v17  ;;  %v1207_v21 = vpack.c.bf16 %v936_v17, %v936_v17  ;;  %v1260_v22 = vpop.f32.mrb[20].mxu0 }
 0x12f   :  { %v1035_v23 = vadd.f32 %v1034_v59, %v1033_v6  ;;  %v982_v24 = vadd.f32 %v981_v19, %v980_v18  ;;  %v1261_v25 = vpop.f32.mrb[21].mxu0 }
 0x130   :  { %v1036_v26 = vsel %vm963_vm0, %v1012_v20, 0.0  ;;  %1131 = vst.msk [vmem:[%s1869_s4 + $0x24] sm:$0xf] %vm1121_vm1, %v1207_v21  ;;  %v1262_v62 = vadd.f32 %v1261_v25, %v1260_v22  ;;  %v1263_v27 = vpop.f32.mrb[22].mxu0 }
 0x131   :  { %v1037_v28 = vadd.f32 %v1036_v26, %v1035_v23  ;;  %v1264_v29 = vpop.f32.mrb[23].mxu0 }
 0x132   :  { %v1265_v30 = vadd.f32 %v1264_v29, %v1263_v27 }
 0x133   :  { %v1324_v31 = vpop.f32.mrb[20].mxu1 }
 0x134   :  { %v1325_v32 = vpop.f32.mrb[21].mxu1 }
 0x135   :  { %v1326_v33 = vadd.f32 %v1325_v32, %v1324_v31  ;;  %v1327_v63 = vpop.f32.mrb[22].mxu1 }
 0x136   :  { %v1328_v34 = vpop.f32.mrb[23].mxu1 }
 0x137   :  { %v941_v35 = vadd.f32 %v1326_v33, %v1262_v62  ;;  %v1329_v36 = vadd.f32 %v1328_v34, %v1327_v63 }
 0x139   :  { %v983_v37 = vsel %vm963_vm0, %v941_v35, 0.0  ;;  %v1013_v38 = vmul.f32 %v941_v35, %v941_v35  ;;  %v1208_v39 = vpack.c.bf16 %v941_v35, %v941_v35  ;;  %v944_v40 = vadd.f32 %v1329_v36, %v1265_v30 }
 0x13a   :  { %v984_v41 = vadd.f32 %v983_v37, %v982_v24 }
 0x13b   :  { %v1038_v42 = vsel %vm963_vm0, %v1013_v38, 0.0  ;;  %1132 = vst.msk [vmem:[%s1869_s4 + $0x28] sm:$0xf] %vm1121_vm1, %v1208_v39  ;;  %v985_v43 = vsel %vm963_vm0, %v944_v40, 0.0  ;;  %v1014_v44 = vmul.f32 %v944_v40, %v944_v40  ;;  %v1209_v45 = vpack.c.bf16 %v944_v40, %v944_v40 }
 0x13c   :  { %v1039_v46 = vadd.f32 %v1038_v42, %v1037_v28  ;;  %v986_v47 = vadd.f32 %v985_v43, %v984_v41  ;;  %v1266_v50 = vpop.f32.mrb[24].mxu0 }
 0x13d   :  { %v1040_v51 = vsel %vm963_vm0, %v1014_v44, 0.0  ;;  %1133 = vst.msk [vmem:[%s1869_s4 + $0x2c] sm:$0xf] %vm1121_vm1, %v1209_v45  ;;  %v1267_v52 = vpop.f32.mrb[25].mxu0 }
 0x13e   :  { %v1041_v53 = vadd.f32 %v1040_v51, %v1039_v46  ;;  %v1268_v56 = vadd.f32 %v1267_v52, %v1266_v50  ;;  %v1269_v57 = vpop.f32.mrb[26].mxu0 }
 0x13f   :  { %v1270_v60 = vpop.f32.mrb[27].mxu0 }
 0x140   :  { %v1330_v61 = vpop.f32.mrb[24].mxu1  ;;  %v1271_v0 = vadd.f32 %v1270_v60, %v1269_v57 }
 0x141   :  { %v1331_v1 = vpop.f32.mrb[25].mxu1 }
 0x142   :  { %v1332_v48 = vadd.f32 %v1331_v1, %v1330_v61  ;;  %v1333_v2 = vpop.f32.mrb[26].mxu1 }
 0x143   :  { %v1334_v3 = vpop.f32.mrb[27].mxu1 }
 0x144   :  { %v949_v4 = vadd.f32 %v1332_v48, %v1268_v56  ;;  %v1335_v5 = vadd.f32 %v1334_v3, %v1333_v2 }
 0x146   :  { %v987_v6 = vsel %vm963_vm0, %v949_v4, 0.0  ;;  %v1015_v49 = vmul.f32 %v949_v4, %v949_v4  ;;  %v1210_v7 = vpack.c.bf16 %v949_v4, %v949_v4  ;;  %v952_v8 = vadd.f32 %v1335_v5, %v1271_v0 }
 0x147   :  { %v988_v54 = vadd.f32 %v987_v6, %v986_v47 }
 0x148   :  { %v1042_v9 = vsel %vm963_vm0, %v1015_v49, 0.0  ;;  %1134 = vst.msk [vmem:[%s1869_s4 + $0x30] sm:$0xf] %vm1121_vm1, %v1210_v7  ;;  %v989_v10 = vsel %vm963_vm0, %v952_v8, 0.0  ;;  %v1016_v11 = vmul.f32 %v952_v8, %v952_v8  ;;  %v1211_v12 = vpack.c.bf16 %v952_v8, %v952_v8  ;;  %v1272_v13 = vpop.f32.mrb[28].mxu0 }
 0x149   :  { %v1043_v58 = vadd.f32 %v1042_v9, %v1041_v53  ;;  %v990_v14 = vadd.f32 %v989_v10, %v988_v54  ;;  %v1273_v55 = vpop.f32.mrb[29].mxu0 }
 0x14a   :  { %v1044_v15 = vsel %vm963_vm0, %v1016_v11, 0.0  ;;  %1135 = vst.msk [vmem:[%s1869_s4 + $0x34] sm:$0xf] %vm1121_vm1, %v1211_v12  ;;  %v1274_v16 = vadd.f32 %v1273_v55, %v1272_v13  ;;  %v1275_v17 = vpop.f32.mrb[30].mxu0 }
 0x14b   :  { %v1045_v18 = vadd.f32 %v1044_v15, %v1043_v58  ;;  %v1276_v59 = vpop.f32.mrb[31].mxu0 }
 0x14c   :  { %v1277_v19 = vadd.f32 %v1276_v59, %v1275_v17 }
 0x14d   :  { %v1336_v20 = vpop.f32.mrb[28].mxu1 }
 0x14e   :  { %v1337_v21 = vpop.f32.mrb[29].mxu1 }
 0x14f   :  { %v1338_v22 = vadd.f32 %v1337_v21, %v1336_v20  ;;  %v1339_v23 = vpop.f32.mrb[30].mxu1 }
 0x150   :  { %v1340_v24 = vpop.f32.mrb[31].mxu1 }
 0x151   :  { %v957_v25 = vadd.f32 %v1338_v22, %v1274_v16  ;;  %v1341_v26 = vadd.f32 %v1340_v24, %v1339_v23 }
 0x153   :  { %v991_v62 = vsel %vm963_vm0, %v957_v25, 0.0  ;;  %v1017_v27 = vmul.f32 %v957_v25, %v957_v25  ;;  %v1212_v28 = vpack.c.bf16 %v957_v25, %v957_v25  ;;  %v960_v29 = vadd.f32 %v1341_v26, %v1277_v19 }
 0x154   :  { %v992_v30 = vadd.f32 %v991_v62, %v990_v14 }
 0x155   :  { %v1046_v31 = vsel %vm963_vm0, %v1017_v27, 0.0  ;;  %1136 = vst.msk [vmem:[%s1869_s4 + $0x38] sm:$0xf] %vm1121_vm1, %v1212_v28  ;;  %v993_v32 = vsel %vm963_vm0, %v960_v29, 0.0  ;;  %v1018_v33 = vmul.f32 %v960_v29, %v960_v29  ;;  %v1213_v63 = vpack.c.bf16 %v960_v29, %v960_v29 }
 0x156   :  { %v1047_v34 = vadd.f32 %v1046_v31, %v1045_v18  ;;  %v994_v35 = vadd.f32 %v993_v32, %v992_v30 }
 0x157   :  { %v1048_v36 = vsel %vm963_vm0, %v1018_v33, 0.0  ;;  %1137 = vst.msk [vmem:[%s1869_s4 + $0x3c] sm:$0xf] %vm1121_vm1, %v1213_v63 }
 0x158   :  { %v995_v37 = vrot.slane %v994_v35, 4  ;;  %v1049_v38 = vadd.f32 %v1048_v36, %v1047_v34 }
 0x15a   :  { %v996_v39 = vadd.f32 %v995_v37, %v994_v35  ;;  %v1050_v40 = vrot.slane %v1049_v38, 4 }
 0x15c   :  { %v997_v41 = vrot.slane %v996_v39, 2  ;;  %v1051_v42 = vadd.f32 %v1050_v40, %v1049_v38 }
 0x15e   :  { %v998_v43 = vadd.f32 %v997_v41, %v996_v39  ;;  %v1052_v44 = vrot.slane %v1051_v42, 2 }
 0x160   :  { %v999_v45 = vrot.slane %v998_v43, 1  ;;  %v1053_v46 = vadd.f32 %v1052_v44, %v1051_v42 }
 0x162   :  { %v1000_v47 = vadd.f32 %v999_v45, %v998_v43  ;;  %v1054_v50 = vrot.slane %v1053_v46, 1 }
 0x164   :  { %1002 = vst.msk [vmem:[%s1870_s5] sm:$0x1] %vm1001_vm2, %v1000_v47  ;;  %v1055_v51 = vadd.f32 %v1054_v50, %v1053_v46 }
 0x166   :  { %1056 = vst.msk [vmem:[%s1871_s6] sm:$0x1] %vm1001_vm2, %v1055_v51 }

// kernel: tile.63
= control target key start
LH: loop header
LB: loop body
LE: loop exit
PB: predicated region body
PF: predicated region fallthrough
CT: control target
= control target key end

     0   :  { %s28_s0 = inlined_call_operand.vmem [shape: f32[64], index: 0, kind: input, shape index: {}]   ;;  %s29_s1 = inlined_call_operand.vmem [shape: f32[16,64], index: 1, kind: output, shape index: {}]  }
   0x1   :  { %v4_v0 = vld [vmem:[%s28_s0] ss:$0 sm:$0xff] }
   0x2   :  { %5 = vst [vmem:[%s29_s1] sm:$0xff] %v4_v0  ;;  %8 = vst [vmem:[%s29_s1 + $0x8] sm:$0xff] %v4_v0 }

// kernel: tile.68
= control target key start
LH: loop header
LB: loop body
LE: loop exit
PB: predicated region body
PF: predicated region fallthrough
CT: control target
= control target key end

     0   :  { %vm3_vm0 = vcmask 523264   ;;  %vm10_vm1 = vcmask 1048064   ;;  %s116_s0 = inlined_call_operand.vmem [shape: f32[16,64], index: 0, kind: input, shape index: {}]   ;;  %s117_s1 = inlined_call_operand.vmem [shape: f32[1,1024], index: 1, kind: output, shape index: {}]  }
   0x1   :  { %v66_v0 = vld [vmem:[%s116_s0 + $0x1] ss:$2 sm:$0xff]   ;;  %v2_v1 = vld [vmem:[%s116_s0] ss:$2 sm:$0xff]   ;;  %s75_s0 = smov 64  }
   0x2   :  { %8 = vrot.lane.b32.xlu0 %v66_v0, %s75_s0  ;;  %4 = vst.msk [vmem:[#allocation0] ss:$8 sm:$0xf] %vm3_vm0, %v2_v1   ;;  %5 = vst.msk [vmem:[#allocation0] ss:$8 sm:$0xf0] %vm3_vm0, %v2_v1  }
  0x74   :  { %v9_v2 = vpop.permute.xlu0 %8  }
  0x75   :  { %11 = vst.msk [vmem:[#allocation0] ss:$8 sm:$0xf] %vm10_vm1, %v9_v2   ;;  %12 = vst.msk [vmem:[#allocation0] ss:$8 sm:$0xf0] %vm10_vm1, %v9_v2  }
  0x7c   :  { %v16_v3 = vld [vmem:[#allocation0] sm:$0x1]  ;;  %v20_v4 = vld [vmem:[#allocation0 + $0x8] sm:$0x1]  ;;  %v25_v5 = vld [vmem:[#allocation0 + $0x10] sm:$0x1] }
  0x7d   :  { %18 = vst [vmem:[%s117_s1] sm:$0x1] %v16_v3  ;;  %67 = vst [vmem:[%s117_s1 + $0x1] sm:$0x1] %v20_v4  ;;  %v31_v6 = vld [vmem:[#allocation0 + $0x18] sm:$0x1] }
  0x7e   :  { %68 = vst [vmem:[%s117_s1 + $0x2] sm:$0x1] %v25_v5  ;;  %v37_v7 = vld [vmem:[#allocation0 + $0x20] sm:$0x1]  ;;  %v43_v8 = vld [vmem:[#allocation0 + $0x28] sm:$0x1] }
  0x7f   :  { %69 = vst [vmem:[%s117_s1 + $0x3] sm:$0x1] %v31_v6  ;;  %70 = vst [vmem:[%s117_s1 + $0x4] sm:$0x1] %v37_v7  ;;  %v49_v9 = vld [vmem:[#allocation0 + $0x30] sm:$0x1] }
  0x80   :  { %71 = vst [vmem:[%s117_s1 + $0x5] sm:$0x1] %v43_v8  ;;  %v55_v10 = vld [vmem:[#allocation0 + $0x38] sm:$0x1]  ;;  %72 = vst [vmem:[%s117_s1 + $0x6] sm:$0x1] %v49_v9 }
  0x81   :  { %73 = vst [vmem:[%s117_s1 + $0x7] sm:$0x1] %v55_v10 }

// kernel: tile.73
= control target key start
LH: loop header
LB: loop body
LE: loop exit
PB: predicated region body
PF: predicated region fallthrough
CT: control target
= control target key end

     0   :  { %s28_s0 = inlined_call_operand.vmem [shape: f32[128], index: 0, kind: input, shape index: {}]   ;;  %s29_s1 = inlined_call_operand.vmem [shape: f32[16,128], index: 1, kind: output, shape index: {}]  }
   0x1   :  { %v4_v0 = vld [vmem:[%s28_s0] ss:$0 sm:$0xff] }
   0x2   :  { %5 = vst [vmem:[%s29_s1] sm:$0xff] %v4_v0  ;;  %8 = vst [vmem:[%s29_s1 + $0x8] sm:$0xff] %v4_v0 }

// kernel: netD_forward.10
= control target key start
LH: loop header
LB: loop body
LE: loop exit
PB: predicated region body
PF: predicated region fallthrough
CT: control target
= control target key end

     0   :  { %v71_v23 = vlaneseq  ;;  %s1791_s1 = inlined_call_operand.vmem [shape: bf16[1024,128], index: 1, kind: input, shape index: {}]   ;;  %s1792_s0 = inlined_call_operand.vmem [shape: bf16[32,1024], index: 0, kind: input, shape index: {}]   ;;  %s1793_s2 = inlined_call_operand.vmem [shape: f32[1,1024], index: 2, kind: input, shape index: {}]   ;;  %s1794_s3 = inlined_call_operand.vmem [shape: f32[1,1024], index: 3, kind: input, shape index: {}]   ;;  %s1795_s4 = inlined_call_operand.vmem [shape: bf16[32,128], index: 4, kind: output, shape index: {0}]   ;;  %s1796_s5 = inlined_call_operand.vmem [shape: f32[1,1,128], index: 5, kind: output, shape index: {1}]   ;;  %s1797_s6 = inlined_call_operand.vmem [shape: f32[1,1,128], index: 6, kind: output, shape index: {2}]  }
   0x1   :  { %v1288_v0 = vld [vmem:[%s1791_s1 + $0x40] sm:$0xff]   ;;  %v1292_v4 = vld [vmem:[%s1791_s1 + $0x48] sm:$0xff]   ;;  %v1296_v8 = vld [vmem:[%s1791_s1 + $0x50] sm:$0xff]  }
   0x2   :  { %v1289_v1 = vld [vmem:[%s1791_s1 + $0xc0] sm:$0xff]   ;;  %1176 = vmatprep.subr.bf16.mxu0 %v1288_v0  ;;  %v1293_v5 = vld [vmem:[%s1791_s1 + $0xc8] sm:$0xff]   ;;  %v1297_v9 = vld [vmem:[%s1791_s1 + $0xd0] sm:$0xff]   ;;  %v1468_v28 = vshrl.u32 %v71_v23, 7 }
   0x3   :  { %v1290_v2 = vld [vmem:[%s1791_s1] sm:$0xff]   ;;  %1204 = vmatprep.subr.bf16.mxu1 %v1289_v1  ;;  %v1294_v6 = vld [vmem:[%s1791_s1 + $0x8] sm:$0xff]   ;;  %v1298_v10 = vld [vmem:[%s1791_s1 + $0x10] sm:$0xff]  }
   0x4   :  { %v1291_v3 = vld [vmem:[%s1791_s1 + $0x80] sm:$0xff]   ;;  %1177 = vmatpush3.bf16.msra.mxu0 %v1290_v2  ;;  %v1295_v7 = vld [vmem:[%s1791_s1 + $0x88] sm:$0xff]   ;;  %v1299_v11 = vld [vmem:[%s1791_s1 + $0x90] sm:$0xff]   ;;  %v77_v33 = vsub.s32 1, %v1468_v28  ;;  %v85_v35 = vsub.s32 3, %v1468_v28  ;;  %v73_v39 = vsub.s32 0, %v1468_v28 }
   0x5   :  { %1205 = vmatpush3.bf16.msra.mxu1 %v1291_v3  ;;  %1178 = vmatprep.subr.bf16.mxu0 %v1292_v4  ;;  %v1300_v12 = vld [vmem:[%s1791_s1 + $0x58] sm:$0xff]   ;;  %v1304_v16 = vld [vmem:[%s1791_s1 + $0x60] sm:$0xff]   ;;  %v1308_v20 = vld [vmem:[%s1791_s1 + $0x68] sm:$0xff]   ;;  %v81_v40 = vsub.s32 2, %v1468_v28 }
   0x6   :  { %1206 = vmatprep.subr.bf16.mxu1 %v1293_v5  ;;  %v1301_v13 = vld [vmem:[%s1791_s1 + $0xd8] sm:$0xff]   ;;  %v1305_v17 = vld [vmem:[%s1791_s1 + $0xe0] sm:$0xff]   ;;  %v1309_v21 = vld [vmem:[%s1791_s1 + $0xe8] sm:$0xff]  }
   0x7   :  { %v1302_v14 = vld [vmem:[%s1791_s1 + $0x18] sm:$0xff]   ;;  %v1306_v18 = vld [vmem:[%s1791_s1 + $0x20] sm:$0xff]   ;;  %v1310_v22 = vld [vmem:[%s1791_s1 + $0x28] sm:$0xff]  }
   0x8   :  { %1179 = vmatpush3.bf16.msra.mxu0 %v1294_v6  ;;  %v1303_v15 = vld [vmem:[%s1791_s1 + $0x98] sm:$0xff]   ;;  %v1307_v19 = vld [vmem:[%s1791_s1 + $0xa0] sm:$0xff]   ;;  %v1311_v24 = vld [vmem:[%s1791_s1 + $0xa8] sm:$0xff]  }
   0x9   :  { %1207 = vmatpush3.bf16.msra.mxu1 %v1295_v7  ;;  %1180 = vmatprep.subr.bf16.mxu0 %v1296_v8  ;;  %v1312_v25 = vld [vmem:[%s1791_s1 + $0x70] sm:$0xff]   ;;  %v1316_v30 = vld [vmem:[%s1791_s1 + $0x78] sm:$0xff]   ;;  %v21_v36 = vld [vmem:[%s1792_s0] sm:$0xff] }
   0xa   :  { %1208 = vmatprep.subr.bf16.mxu1 %v1297_v9  ;;  %v1313_v26 = vld [vmem:[%s1791_s1 + $0xf0] sm:$0xff]   ;;  %v1317_v31 = vld [vmem:[%s1791_s1 + $0xf8] sm:$0xff]   ;;  %v25_v37 = vld [vmem:[%s1792_s0 + $0x20] sm:$0xff]  ;;  %v37_v41 = vunpack.c.l.bf16 %v21_v36  ;;  %v38_v42 = vunpack.c.h.bf16 %v21_v36 }
   0xb   :  { %v1314_v27 = vld [vmem:[%s1791_s1 + $0x30] sm:$0xff]   ;;  %v1318_v32 = vld [vmem:[%s1791_s1 + $0x38] sm:$0xff]   ;;  %v1496_v38 = vld [vmem:[%s1793_s2] sm:$0xff]  ;;  %v45_v43 = vunpack.c.l.bf16 %v25_v37  ;;  %v46_v44 = vunpack.c.h.bf16 %v25_v37 }
   0xc   :  { %1181 = vmatpush3.bf16.msra.mxu0 %v1298_v10  ;;  %v1315_v29 = vld [vmem:[%s1791_s1 + $0xb0] sm:$0xff]   ;;  %v1319_v34 = vld [vmem:[%s1791_s1 + $0xb8] sm:$0xff]   ;;  %v1503_v45 = vld [vmem:[%s1794_s3] sm:$0xff]  ;;  %v1512_v48 = vrot.slane %v1496_v38, %v77_v33  ;;  %v1521_v55 = vrot.slane %v1496_v38, %v85_v35  ;;  %v1532_v60 = vrot.slane %v1496_v38, %v73_v39  ;;  %v1540_v0 = vrot.slane %v1496_v38, %v81_v40 }
   0xd   :  { %1209 = vmatpush3.bf16.msra.mxu1 %v1299_v11  ;;  %1182 = vmatprep.subr.bf16.mxu0 %v1300_v12  ;;  %v22_v46 = vld [vmem:[%s1792_s0 + $0x8] sm:$0xff]  ;;  %v1515_v49 = vrot.slane %v1503_v45, %v77_v33  ;;  %v1320_v52 = vld [vmem:[%s1791_s1 + $0x140] sm:$0xff]   ;;  %v1524_v56 = vrot.slane %v1503_v45, %v85_v35  ;;  %v1535_v61 = vrot.slane %v1503_v45, %v73_v39 }
   0xe   :  { %1210 = vmatprep.subr.bf16.mxu1 %v1301_v13  ;;  %v26_v47 = vld [vmem:[%s1792_s0 + $0x28] sm:$0xff]  ;;  %v39_v50 = vunpack.c.l.bf16 %v22_v46  ;;  %v40_v51 = vunpack.c.h.bf16 %v22_v46  ;;  %v1321_v57 = vld [vmem:[%s1791_s1 + $0x1c0] sm:$0xff]   ;;  %v112_v58 = vmul.f32 %v1512_v48, %v38_v42  ;;  %v120_v59 = vmul.f32 %v1512_v48, %v46_v44  ;;  %v1328_v42 = vld [vmem:[%s1791_s1 + $0x150] sm:$0xff]  }
   0xf   :  { %v47_v53 = vunpack.c.l.bf16 %v26_v47  ;;  %v48_v54 = vunpack.c.h.bf16 %v26_v47  ;;  %v1543_v1 = vrot.slane %v1503_v45, %v81_v40  ;;  %v111_v4 = vmul.f32 %v1532_v60, %v37_v41  ;;  %v1323_v33 = vld [vmem:[%s1791_s1 + $0x180] sm:$0xff]   ;;  %v1324_v35 = vld [vmem:[%s1791_s1 + $0x148] sm:$0xff]   ;;  %v1330_v44 = vld [vmem:[%s1791_s1 + $0x110] sm:$0xff]  }
  0x10   :  { %1183 = vmatpush3.bf16.msra.mxu0 %v1302_v14  ;;  %v114_v62 = vmul.f32 %v1521_v55, %v40_v51  ;;  %v186_v2 = vadd.f32 %v1515_v49, %v112_v58  ;;  %v194_v3 = vadd.f32 %v1515_v49, %v120_v59  ;;  %v119_v5 = vmul.f32 %v1532_v60, %v45_v43  ;;  %v1325_v37 = vld [vmem:[%s1791_s1 + $0x1c8] sm:$0xff]   ;;  %v1329_v43 = vld [vmem:[%s1791_s1 + $0x1d0] sm:$0xff]   ;;  %v1332_v47 = vld [vmem:[%s1791_s1 + $0x158] sm:$0xff]  }
  0x11   :  { %1211 = vmatpush3.bf16.msra.mxu1 %v1303_v15  ;;  %1184 = vmatprep.subr.bf16.mxu0 %v1304_v16  ;;  %v122_v63 = vmul.f32 %v1521_v55, %v48_v54  ;;  %v113_v8 = vmul.f32 %v1540_v0, %v39_v50  ;;  %v121_v9 = vmul.f32 %v1540_v0, %v47_v53  ;;  %v1326_v40 = vld [vmem:[%s1791_s1 + $0x108] sm:$0xff]   ;;  %v1331_v46 = vld [vmem:[%s1791_s1 + $0x190] sm:$0xff]   ;;  %v1333_v50 = vld [vmem:[%s1791_s1 + $0x1d8] sm:$0xff]   ;;  %v89_v53 = vsub.s32 4, %v1468_v28 }
  0x12   :  { %1212 = vmatprep.subr.bf16.mxu1 %v1305_v17  ;;  %v188_v6 = vadd.f32 %v1524_v56, %v114_v62  ;;  %vm218_vm0 = vcmp.ge.f32.partialorder %v186_v2, 0.0  ;;  %vm226_vm1 = vcmp.ge.f32.partialorder %v194_v3, 0.0  ;;  %v250_v10 = vmul.f32 0.2, %v186_v2  ;;  %v1327_v41 = vld [vmem:[%s1791_s1 + $0x188] sm:$0xff]   ;;  %v1334_v51 = vld [vmem:[%s1791_s1 + $0x118] sm:$0xff]  }
  0x13   :  { %v196_v7 = vadd.f32 %v1524_v56, %v122_v63  ;;  %v258_v11 = vmul.f32 0.2, %v194_v3  ;;  %v185_v16 = vadd.f32 %v1535_v61, %v111_v4  ;;  %v193_v17 = vadd.f32 %v1535_v61, %v119_v5  ;;  %v30_v59 = vld [vmem:[%s1792_s0 + $0x48] sm:$0xff]  ;;  %v1335_v4 = vld [vmem:[%s1791_s1 + $0x198] sm:$0xff]  }
  0x14   :  { %1185 = vmatpush3.bf16.msra.mxu0 %v1306_v18  ;;  %vm220_vm2 = vcmp.ge.f32.partialorder %v188_v6, 0.0  ;;  %v252_v12 = vmul.f32 0.2, %v188_v6  ;;  %v282_v14 = vsel %vm218_vm0, %v186_v2, %v250_v10  ;;  %v93_v54 = vsub.s32 5, %v1468_v28  ;;  %v34_v62 = vld [vmem:[%s1792_s0 + $0x68] sm:$0xff] }
  0x15   :  { %1213 = vmatpush3.bf16.msra.mxu1 %v1307_v19  ;;  %1186 = vmatprep.subr.bf16.mxu0 %v1308_v20  ;;  %vm228_vm3 = vcmp.ge.f32.partialorder %v196_v7, 0.0  ;;  %v260_v13 = vmul.f32 0.2, %v196_v7  ;;  %v290_v15 = vsel %vm226_vm1, %v194_v3, %v258_v11  ;;  %vm217_vm4 = vcmp.ge.f32.partialorder %v185_v16, 0.0 }
  0x16   :  { %1214 = vmatprep.subr.bf16.mxu1 %v1309_v21  ;;  %v314_v18 = vpack.c.bf16 %v290_v15, %v282_v14  ;;  %v284_v19 = vsel %vm220_vm2, %v188_v6, %v252_v12  ;;  %v187_v21 = vadd.f32 %v1543_v1, %v113_v8  ;;  %vm225_vm5 = vcmp.ge.f32.partialorder %v193_v17, 0.0  ;;  %v1337_v14 = vld [vmem:[%s1791_s1 + $0x1e0] sm:$0xff]  }
  0x17   :  { %v292_v20 = vsel %vm228_vm3, %v196_v7, %v260_v13  ;;  %v249_v23 = vmul.f32 0.2, %v185_v16  ;;  %v97_v2 = vsub.s32 6, %v1468_v28  ;;  %v101_v3 = vsub.s32 7, %v1468_v28  ;;  %v28_v28 = vld [vmem:[%s1792_s0 + $0x38] sm:$0xff] }
  0x18   :  { %1187 = vmatpush3.bf16.msra.mxu0 %v1310_v22  ;;  %v316_v22 = vpack.c.bf16 %v292_v20, %v284_v19  ;;  %873 = vmatprep.mubr.bf16.mxu0 %v314_v18  ;;  %vm219_vm6 = vcmp.ge.f32.partialorder %v187_v21, 0.0  ;;  %v56_v6 = vunpack.c.h.bf16 %v30_v59  ;;  %v64_v7 = vunpack.c.h.bf16 %v34_v62  ;;  %v1338_v19 = vld [vmem:[%s1791_s1 + $0x120] sm:$0xff]  }
  0x19   :  { %1215 = vmatpush3.bf16.msra.mxu1 %v1311_v24  ;;  %1188 = vmatprep.subr.bf16.mxu0 %v1312_v25  ;;  %v257_v24 = vmul.f32 0.2, %v193_v17  ;;  %v195_v25 = vadd.f32 %v1543_v1, %v121_v9  ;;  %v1336_v9 = vld [vmem:[%s1791_s1 + $0x160] sm:$0xff]   ;;  %v55_v12 = vunpack.c.l.bf16 %v30_v59  ;;  %v63_v13 = vunpack.c.l.bf16 %v34_v62 }
  0x1a   :  { %1216 = vmatprep.subr.bf16.mxu1 %v1313_v26  ;;  %v251_v26 = vmul.f32 0.2, %v187_v21  ;;  %922 = vmatprep.mubr.bf16.mxu1 %v316_v22  ;;  %v1673_v59 = vrot.slane %v1496_v38, %v89_v53 }
  0x1b   :  { %vm227_vm7 = vcmp.ge.f32.partialorder %v195_v25, 0.0  ;;  %v129_v22 = vmul.f32 %v1540_v0, %v55_v12  ;;  %v1720_v12 = vrot.slane %v1503_v45, %v97_v2 }
  0x1c   :  { %1189 = vmatpush3.bf16.msra.mxu0 %v1314_v27  ;;  %v1322_v27 = vld [vmem:[%s1791_s1 + $0x100] sm:$0xff]  }
  0x1d   :  { %1217 = vmatpush3.bf16.msra.mxu1 %v1315_v29  ;;  %1190 = vmatprep.subr.bf16.mxu0 %v1316_v30  ;;  %v281_v29 = vsel %vm217_vm4, %v185_v16, %v249_v23  ;;  %v289_v30 = vsel %vm225_vm5, %v193_v17, %v257_v24  ;;  %v130_v16 = vmul.f32 %v1521_v55, %v56_v6 }
  0x1e   :  { %1218 = vmatprep.subr.bf16.mxu1 %v1317_v31  ;;  %v259_v31 = vmul.f32 0.2, %v195_v25  ;;  %v138_v17 = vmul.f32 %v1521_v55, %v64_v7  ;;  %v137_v23 = vmul.f32 %v1540_v0, %v63_v13  ;;  %v1691_v6 = vrot.slane %v1496_v38, %v97_v2  ;;  %v1349_v7 = vld [vmem:[%s1791_s1 + $0x1f8] sm:$0xff]  }
  0x20   :  { %1191 = vmatpush3.bf16.msra.mxu0 %v1318_v32  ;;  %v283_v32 = vsel %vm219_vm6, %v187_v21, %v251_v26  ;;  %v291_v36 = vsel %vm227_vm7, %v195_v25, %v259_v31  ;;  %v212_v24 = vadd.f32 %v1524_v56, %v138_v17  ;;  %v1340_v25 = vld [vmem:[%s1791_s1 + $0x168] sm:$0xff]   ;;  %v52_v17 = vunpack.c.h.bf16 %v28_v28 }
  0x21   :  { %1219 = vmatpush3.bf16.msra.mxu1 %v1319_v34  ;;  %1232 = vmatprep.subr.bf16.mxu0 %v1320_v52  ;;  %v313_v34 = vpack.c.bf16 %v289_v30, %v281_v29  ;;  %v315_v39 = vpack.c.bf16 %v291_v36, %v283_v32  ;;  %v29_v52 = vld [vmem:[%s1792_s0 + $0x40] sm:$0xff]  ;;  %v1344_v32 = vld [vmem:[%s1791_s1 + $0x170] sm:$0xff]   ;;  %v203_v36 = vadd.f32 %v1543_v1, %v129_v22 }
  0x22   :  { %1260 = vmatprep.subr.bf16.mxu1 %v1321_v57  ;;  %v33_v57 = vld [vmem:[%s1792_s0 + $0x60] sm:$0xff]  ;;  %v54_v58 = vunpack.c.h.bf16 %v29_v52  ;;  %v53_v63 = vunpack.c.l.bf16 %v29_v52  ;;  %vm244_vm12 = vcmp.ge.f32.partialorder %v212_v24, 0.0  ;;  %v276_v31 = vmul.f32 0.2, %v212_v24  ;;  %v1346_v52 = vld [vmem:[%s1791_s1 + $0x130] sm:$0xff]  }
  0x23   :  { %874 = vmatmul.mubr.bf16.vlgmr.msra.gmra.mrb[0].mxu0 %v313_v34  ;;  %v62_v5 = vunpack.c.h.bf16 %v33_v57  ;;  %v61_v8 = vunpack.c.l.bf16 %v33_v57  ;;  %vm235_vm14 = vcmp.ge.f32.partialorder %v203_v36, 0.0 }
  0x24   :  { %1233 = vmatpush3.bf16.msra.mxu0 %v1322_v27  ;;  %923 = vmatmul.mubr.bf16.vlgmr.msra.gmra.mrb[0].mxu1 %v315_v39  ;;  %v128_v10 = vmul.f32 %v1512_v48, %v54_v58  ;;  %v127_v11 = vmul.f32 %v1532_v60, %v53_v63  ;;  %v1341_v27 = vld [vmem:[%s1791_s1 + $0x1e8] sm:$0xff]   ;;  %v1348_v58 = vld [vmem:[%s1791_s1 + $0x178] sm:$0xff]   ;;  %v1347_v63 = vld [vmem:[%s1791_s1 + $0x1b0] sm:$0xff]  }
  0x25   :  { %1234 = vmatprep.subr.bf16.mxu0 %v1324_v35  ;;  %1261 = vmatpush3.bf16.msra.mxu1 %v1323_v33  ;;  %v136_v15 = vmul.f32 %v1512_v48, %v62_v5  ;;  %v135_v18 = vmul.f32 %v1532_v60, %v61_v8  ;;  %v1339_v48 = vld [vmem:[%s1791_s1 + $0x1a0] sm:$0xff]   ;;  %v204_v60 = vadd.f32 %v1524_v56, %v130_v16  ;;  %v1342_v56 = vld [vmem:[%s1791_s1 + $0x128] sm:$0xff]   ;;  %v23_v8 = vld [vmem:[%s1792_s0 + $0x10] sm:$0xff]  ;;  %v51_v16 = vunpack.c.l.bf16 %v28_v28 }
  0x26   :  { %1262 = vmatprep.subr.bf16.mxu1 %v1325_v37  ;;  %v202_v20 = vadd.f32 %v1515_v49, %v128_v10  ;;  %v201_v21 = vadd.f32 %v1535_v61, %v127_v11  ;;  %v1343_v37 = vld [vmem:[%s1791_s1 + $0x1a8] sm:$0xff]   ;;  %v1686_v5 = vrot.slane %v1503_v45, %v93_v54  ;;  %v1710_v10 = vrot.slane %v1503_v45, %v101_v3 }
  0x27   :  { %v210_v55 = vadd.f32 %v1515_v49, %v136_v15  ;;  %v209_v26 = vadd.f32 %v1535_v61, %v135_v18  ;;  %vm236_vm11 = vcmp.ge.f32.partialorder %v204_v60, 0.0  ;;  %v268_v30 = vmul.f32 0.2, %v204_v60  ;;  %v1351_v18 = vld [vmem:[%s1791_s1 + $0x1b8] sm:$0xff]  }
  0x28   :  { %1235 = vmatpush3.bf16.msra.mxu0 %v1326_v40  ;;  %vm234_vm8 = vcmp.ge.f32.partialorder %v202_v20, 0.0  ;;  %v266_v0 = vmul.f32 0.2, %v202_v20  ;;  %vm233_vm9 = vcmp.ge.f32.partialorder %v201_v21, 0.0  ;;  %v265_v29 = vmul.f32 0.2, %v201_v21 }
  0x29   :  { %1236 = vmatprep.subr.bf16.mxu0 %v1328_v42  ;;  %1263 = vmatpush3.bf16.msra.mxu1 %v1327_v41  ;;  %vm242_vm10 = vcmp.ge.f32.partialorder %v210_v55, 0.0  ;;  %v274_v49 = vmul.f32 0.2, %v210_v55  ;;  %vm241_vm13 = vcmp.ge.f32.partialorder %v209_v26, 0.0  ;;  %v273_v34 = vmul.f32 0.2, %v209_v26 }
  0x2a   :  { %1264 = vmatprep.subr.bf16.mxu1 %v1329_v43  ;;  %v298_v61 = vsel %vm234_vm8, %v202_v20, %v266_v0  ;;  %v297_v35 = vsel %vm233_vm9, %v201_v21, %v265_v29  ;;  %v300_v40 = vsel %vm236_vm11, %v204_v60, %v268_v30  ;;  %v308_v41 = vsel %vm244_vm12, %v212_v24, %v276_v31 }
  0x2b   :  { %v306_v33 = vsel %vm242_vm10, %v210_v55, %v274_v49  ;;  %v211_v42 = vadd.f32 %v1543_v1, %v137_v23  ;;  %v324_v43 = vpack.c.bf16 %v308_v41, %v300_v40  ;;  %v1715_v11 = vrot.slane %v1503_v45, %v89_v53  ;;  %v24_v53 = vld [vmem:[%s1792_s0 + $0x18] sm:$0xff]  ;;  %v35_v41 = vld [vmem:[%s1792_s0 + $0x70] sm:$0xff] }
  0x2c   :  { %1237 = vmatpush3.bf16.msra.mxu0 %v1330_v44  ;;  %v322_v39 = vpack.c.bf16 %v306_v33, %v298_v61  ;;  %v305_v44 = vsel %vm241_vm13, %v209_v26, %v273_v34  ;;  %v41_v13 = vunpack.c.l.bf16 %v23_v8  ;;  %v43_v45 = vunpack.c.l.bf16 %v24_v53 }
  0x2d   :  { %1238 = vmatprep.subr.bf16.mxu0 %v1332_v47  ;;  %1265 = vmatpush3.bf16.msra.mxu1 %v1331_v46  ;;  %v267_v46 = vmul.f32 0.2, %v203_v36  ;;  %v1345_v47 = vld [vmem:[%s1791_s1 + $0x1f0] sm:$0xff]   ;;  %vm243_vm15 = vcmp.ge.f32.partialorder %v211_v42, 0.0  ;;  %v44_v2 = vunpack.c.h.bf16 %v24_v53  ;;  %v125_v55 = vmul.f32 %v1691_v6, %v51_v16 }
  0x2e   :  { %1266 = vmatprep.subr.bf16.mxu1 %v1333_v50  ;;  %881 = vmatprep.mubr.bf16.mxu0 %v322_v39  ;;  %v321_v50 = vpack.c.bf16 %v305_v44, %v297_v35  ;;  %v117_v23 = vmul.f32 %v1691_v6, %v43_v45  ;;  %v31_v35 = vld [vmem:[%s1792_s0 + $0x50] sm:$0xff]  ;;  %v65_v28 = vunpack.c.l.bf16 %v35_v41 }
  0x2f   :  { %930 = vmatprep.mubr.bf16.mxu1 %v324_v43  ;;  %v299_v1 = vsel %vm235_vm14, %v203_v36, %v267_v46  ;;  %v36_v43 = vld [vmem:[%s1792_s0 + $0x78] sm:$0xff]  ;;  %v57_v53 = vunpack.c.l.bf16 %v31_v35 }
  0x30   :  { %1239 = vmatpush3.bf16.msra.mxu0 %v1334_v51  ;;  %v275_v51 = vmul.f32 0.2, %v211_v42  ;;  %v191_v49 = vadd.f32 %v1720_v12, %v117_v23 }
  0x31   :  { %1240 = vmatprep.subr.bf16.mxu0 %v1336_v9  ;;  %1267 = vmatpush3.bf16.msra.mxu1 %v1335_v4  ;;  %v1681_v4 = vrot.slane %v1496_v38, %v93_v54  ;;  %v27_v9 = vld [vmem:[%s1792_s0 + $0x30] sm:$0xff]  ;;  %v1705_v54 = vrot.slane %v1496_v38, %v101_v3  ;;  %v1350_v38 = vld [vmem:[%s1791_s1 + $0x138] sm:$0xff]  }
  0x32   :  { %1268 = vmatprep.subr.bf16.mxu1 %v1337_v14  ;;  %882 = vmatmul.mubr.bf16.gmra.mrb[4].mxu0 %v321_v50  ;;  %v307_v57 = vsel %vm243_vm15, %v211_v42, %v275_v51  ;;  %v42_v14 = vunpack.c.h.bf16 %v23_v8  ;;  %v49_v3 = vunpack.c.l.bf16 %v27_v9  ;;  %v50_v15 = vunpack.c.h.bf16 %v27_v9  ;;  %v32_v42 = vld [vmem:[%s1792_s0 + $0x58] sm:$0xff] }
  0x33   :  { %v323_v62 = vpack.c.bf16 %v307_v57, %v299_v1  ;;  %v126_v60 = vmul.f32 %v1705_v54, %v52_v17  ;;  %vm223_vm6 = vcmp.ge.f32.partialorder %v191_v49, 0.0  ;;  %v255_v50 = vmul.f32 0.2, %v191_v49 }
  0x34   :  { %1241 = vmatpush3.bf16.msra.mxu0 %v1338_v19  ;;  %v115_v19 = vmul.f32 %v1673_v59, %v41_v13  ;;  %v116_v20 = vmul.f32 %v1681_v4, %v42_v14  ;;  %v123_v21 = vmul.f32 %v1673_v59, %v49_v3  ;;  %v124_v22 = vmul.f32 %v1681_v4, %v50_v15 }
  0x35   :  { %1242 = vmatprep.subr.bf16.mxu0 %v1340_v25  ;;  %1269 = vmatpush3.bf16.msra.mxu1 %v1339_v48  ;;  %v118_v48 = vmul.f32 %v1705_v54, %v44_v2  ;;  %v200_v29 = vadd.f32 %v1710_v10, %v126_v60  ;;  %v66_v57 = vunpack.c.h.bf16 %v35_v41  ;;  %v59_v45 = vunpack.c.l.bf16 %v32_v42 }
  0x36   :  { %1270 = vmatprep.subr.bf16.mxu1 %v1341_v27  ;;  %931 = vmatmul.mubr.bf16.gmra.mrb[4].mxu1 %v323_v62  ;;  %v190_v24 = vadd.f32 %v1686_v5, %v116_v20  ;;  %v198_v25 = vadd.f32 %v1686_v5, %v124_v22  ;;  %v189_v26 = vadd.f32 %v1715_v11, %v115_v19  ;;  %v68_v62 = vunpack.c.h.bf16 %v36_v43 }
  0x37   :  { %v197_v0 = vadd.f32 %v1715_v11, %v123_v21  ;;  %v192_v27 = vadd.f32 %v1710_v10, %v118_v48  ;;  %vm232_vm3 = vcmp.ge.f32.partialorder %v200_v29, 0.0  ;;  %v140_v13 = vmul.f32 %v1681_v4, %v66_v57 }
  0x38   :  { %1243 = vmatpush3.bf16.msra.mxu0 %v1342_v56  ;;  %v199_v56 = vadd.f32 %v1720_v12, %v125_v55  ;;  %vm222_vm0 = vcmp.ge.f32.partialorder %v190_v24, 0.0  ;;  %vm230_vm1 = vcmp.ge.f32.partialorder %v198_v25, 0.0  ;;  %v254_v61 = vmul.f32 0.2, %v190_v24 }
  0x39   :  { %1244 = vmatprep.subr.bf16.mxu0 %v1344_v32  ;;  %1271 = vmatpush3.bf16.msra.mxu1 %v1343_v37  ;;  %v262_v30 = vmul.f32 0.2, %v198_v25  ;;  %vm224_vm2 = vcmp.ge.f32.partialorder %v192_v27, 0.0  ;;  %v256_v31 = vmul.f32 0.2, %v192_v27  ;;  %vm221_vm4 = vcmp.ge.f32.partialorder %v189_v26, 0.0 }
  0x3a   :  { %1272 = vmatprep.subr.bf16.mxu1 %v1345_v47  ;;  %v264_v32 = vmul.f32 0.2, %v200_v29  ;;  %v286_v33 = vsel %vm222_vm0, %v190_v24, %v254_v61  ;;  %vm229_vm5 = vcmp.ge.f32.partialorder %v197_v0, 0.0  ;;  %v253_v40 = vmul.f32 0.2, %v189_v26 }
  0x3b   :  { %v294_v34 = vsel %vm230_vm1, %v198_v25, %v262_v30  ;;  %v288_v37 = vsel %vm224_vm2, %v192_v27, %v256_v31  ;;  %v261_v46 = vmul.f32 0.2, %v197_v0  ;;  %vm231_vm7 = vcmp.ge.f32.partialorder %v199_v56, 0.0 }
  0x3c   :  { %1245 = vmatpush3.bf16.msra.mxu0 %v1346_v52  ;;  %v318_v36 = vpack.c.bf16 %v294_v34, %v286_v33  ;;  %v296_v39 = vsel %vm232_vm3, %v200_v29, %v264_v32  ;;  %v285_v47 = vsel %vm221_vm4, %v189_v26, %v253_v40  ;;  %v263_v51 = vmul.f32 0.2, %v199_v56 }
  0x3d   :  { %1246 = vmatprep.subr.bf16.mxu0 %v1348_v58  ;;  %1273 = vmatpush3.bf16.msra.mxu1 %v1347_v63  ;;  %v320_v44 = vpack.c.bf16 %v296_v39, %v288_v37  ;;  %v58_v52 = vunpack.c.h.bf16 %v31_v35  ;;  %v293_v1 = vsel %vm229_vm5, %v197_v0, %v261_v46  ;;  %v60_v58 = vunpack.c.h.bf16 %v32_v42 }
  0x3e   :  { %1274 = vmatprep.subr.bf16.mxu1 %v1349_v7  ;;  %971 = vmatprep.mubr.bf16.mxu0 %v318_v36  ;;  %v317_v63 = vpack.c.bf16 %v293_v1, %v285_v47  ;;  %v287_v7 = vsel %vm223_vm6, %v191_v49, %v255_v50  ;;  %v295_v8 = vsel %vm231_vm7, %v199_v56, %v263_v51 }
  0x3f   :  { %1020 = vmatprep.mubr.bf16.mxu1 %v320_v44  ;;  %v132_v9 = vmul.f32 %v1681_v4, %v58_v52  ;;  %v134_v14 = vmul.f32 %v1705_v54, %v60_v58  ;;  %v142_v3 = vmul.f32 %v1705_v54, %v68_v62  ;;  %v214_v2 = vadd.f32 %v1686_v5, %v140_v13 }
  0x40   :  { %1247 = vmatpush3.bf16.msra.mxu0 %v1350_v38  ;;  %v319_v38 = vpack.c.bf16 %v295_v8, %v287_v7  ;;  %v131_v19 = vmul.f32 %v1673_v59, %v57_v53  ;;  %v139_v54 = vmul.f32 %v1673_v59, %v65_v28 }
  0x41   :  { %1275 = vmatpush3.bf16.msra.mxu1 %v1351_v18  ;;  %v206_v15 = vadd.f32 %v1686_v5, %v132_v9  ;;  %v208_v16 = vadd.f32 %v1710_v10, %v134_v14  ;;  %v216_v17 = vadd.f32 %v1710_v10, %v142_v3  ;;  %v67_v18 = vunpack.c.l.bf16 %v36_v43 }
  0x42   :  { %vm246_vm9 = vcmp.ge.f32.partialorder %v214_v2, 0.0  ;;  %v278_v20 = vmul.f32 0.2, %v214_v2  ;;  %v205_v5 = vadd.f32 %v1715_v11, %v131_v19  ;;  %v213_v55 = vadd.f32 %v1715_v11, %v139_v54 }
  0x43   :  { %972 = vmatmul.mubr.bf16.vlgmr.msra.gmra.mrb[8].mxu0 %v317_v63  ;;  %vm238_vm8 = vcmp.ge.f32.partialorder %v206_v15, 0.0  ;;  %v270_v4 = vmul.f32 0.2, %v206_v15  ;;  %vm240_vm10 = vcmp.ge.f32.partialorder %v208_v16, 0.0  ;;  %vm248_vm11 = vcmp.ge.f32.partialorder %v216_v17, 0.0 }
  0x44   :  { %1021 = vmatmul.mubr.bf16.vlgmr.msra.gmra.mrb[8].mxu1 %v319_v38  ;;  %v272_v22 = vmul.f32 0.2, %v208_v16  ;;  %v280_v23 = vmul.f32 0.2, %v216_v17  ;;  %v310_v48 = vsel %vm246_vm9, %v214_v2, %v278_v20  ;;  %v133_v10 = vmul.f32 %v1691_v6, %v59_v45 }
  0x45   :  { %v302_v21 = vsel %vm238_vm8, %v206_v15, %v270_v4  ;;  %v141_v60 = vmul.f32 %v1691_v6, %v67_v18  ;;  %vm237_vm12 = vcmp.ge.f32.partialorder %v205_v5, 0.0  ;;  %vm245_vm13 = vcmp.ge.f32.partialorder %v213_v55, 0.0 }
  0x46   :  { %v326_v24 = vpack.c.bf16 %v310_v48, %v302_v21  ;;  %v304_v25 = vsel %vm240_vm10, %v208_v16, %v272_v22  ;;  %v312_v26 = vsel %vm248_vm11, %v216_v17, %v280_v23  ;;  %v269_v0 = vmul.f32 0.2, %v205_v5 }
  0x47   :  { %v328_v59 = vpack.c.bf16 %v312_v26, %v304_v25  ;;  %v277_v27 = vmul.f32 0.2, %v213_v55  ;;  %v207_v29 = vadd.f32 %v1720_v12, %v133_v10  ;;  %v215_v49 = vadd.f32 %v1720_v12, %v141_v60 }
  0x48   :  { %979 = vmatprep.mubr.bf16.mxu0 %v326_v24  ;;  %v301_v56 = vsel %vm237_vm12, %v205_v5, %v269_v0 }
  0x49   :  { %1028 = vmatprep.mubr.bf16.mxu1 %v328_v59  ;;  %v309_v11 = vsel %vm245_vm13, %v213_v55, %v277_v27  ;;  %vm239_vm14 = vcmp.ge.f32.partialorder %v207_v29, 0.0  ;;  %vm247_vm15 = vcmp.ge.f32.partialorder %v215_v49, 0.0  ;;  %v271_v6 = vmul.f32 0.2, %v207_v29 }
  0x4a   :  { %v325_v61 = vpack.c.bf16 %v309_v11, %v301_v56  ;;  %v279_v30 = vmul.f32 0.2, %v215_v49 }
  0x4b   :  { %v303_v31 = vsel %vm239_vm14, %v207_v29, %v271_v6 }
  0x4c   :  { %980 = vmatmul.mubr.bf16.gmra.mrb[12].mxu0 %v325_v61  ;;  %v311_v32 = vsel %vm247_vm15, %v215_v49, %v279_v30 }
  0x4d   :  { %v327_v33 = vpack.c.bf16 %v311_v32, %v303_v31 }
  0x4f   :  { %1029 = vmatmul.mubr.bf16.gmra.mrb[12].mxu1 %v327_v33 }
  0xf6   :  { %v1192_v34 = vpop.f32.mrb[0].mxu0 }
  0xf7   :  { %v1193_v35 = vpop.f32.mrb[1].mxu0  ;;  %v1220_v36 = vpop.f32.mrb[0].mxu1 }
  0xf8   :  { %v1194_v37 = vadd.f32 %v1193_v35, %v1192_v34  ;;  %v1195_v39 = vpop.f32.mrb[2].mxu0  ;;  %v1221_v40 = vpop.f32.mrb[1].mxu1 }
  0xf9   :  { %v1196_v12 = vpop.f32.mrb[3].mxu0  ;;  %v1222_v41 = vadd.f32 %v1221_v40, %v1220_v36  ;;  %v1223_v42 = vpop.f32.mrb[2].mxu1 }
  0xfa   :  { %v1197_v43 = vadd.f32 %v1196_v12, %v1195_v39  ;;  %v1224_v44 = vpop.f32.mrb[3].mxu1 }
  0xfb   :  { %v925_v46 = vadd.f32 %v1222_v41, %v1194_v37  ;;  %v1225_v47 = vadd.f32 %v1224_v44, %v1223_v42 }
  0xfd   :  { %v928_v50 = vadd.f32 %v1225_v47, %v1197_v43 }
 0x105   :  { %v1198_v51 = vpop.f32.mrb[4].mxu0 }
 0x106   :  { %v1199_v52 = vpop.f32.mrb[5].mxu0 }
 0x107   :  { %v1200_v1 = vadd.f32 %v1199_v52, %v1198_v51  ;;  %v1201_v57 = vpop.f32.mrb[6].mxu0 }
 0x108   :  { %v1202_v62 = vpop.f32.mrb[7].mxu0 }
 0x109   :  { %v1226_v58 = vpop.f32.mrb[4].mxu1  ;;  %v1203_v7 = vadd.f32 %v1202_v62, %v1201_v57 }
 0x10a   :  { %v1227_v63 = vpop.f32.mrb[5].mxu1 }
 0x10b   :  { %v1228_v8 = vadd.f32 %v1227_v63, %v1226_v58  ;;  %v1229_v9 = vpop.f32.mrb[6].mxu1 }
 0x10c   :  { %v1230_v38 = vpop.f32.mrb[7].mxu1 }
 0x10d   :  { %v933_v13 = vadd.f32 %v1228_v8, %v1200_v1  ;;  %v1231_v14 = vadd.f32 %v1230_v38, %v1229_v9 }
 0x10f   :  { %v936_v3 = vadd.f32 %v1231_v14, %v1203_v7 }
 0x116   :  { %v1248_v15 = vpop.f32.mrb[8].mxu0 }
 0x117   :  { %v1276_v53 = vpop.f32.mrb[8].mxu1  ;;  %v1249_v28 = vpop.f32.mrb[9].mxu0 }
 0x118   :  { %v1250_v45 = vadd.f32 %v1249_v28, %v1248_v15  ;;  %v1277_v2 = vpop.f32.mrb[9].mxu1  ;;  %v1251_v16 = vpop.f32.mrb[10].mxu0 }
 0x119   :  { %v1278_v17 = vadd.f32 %v1277_v2, %v1276_v53  ;;  %v1279_v18 = vpop.f32.mrb[10].mxu1  ;;  %v1252_v4 = vpop.f32.mrb[11].mxu0 }
 0x11a   :  { %v974_v19 = vadd.f32 %v1250_v45, %v925_v46  ;;  %v1253_v54 = vadd.f32 %v1252_v4, %v1251_v16  ;;  %v1280_v20 = vpop.f32.mrb[11].mxu1 }
 0x11b   :  { %v1281_v21 = vadd.f32 %v1280_v20, %v1279_v18 }
 0x11c   :  { %v1023_v22 = vadd.f32 %v1278_v17, %v974_v19  ;;  %v977_v23 = vadd.f32 %v1253_v54, %v928_v50 }
 0x11e   :  { %v1026_v5 = vadd.f32 %v1281_v21, %v977_v23  ;;  %v1047_v48 = vmul.f32 %v1023_v22, %v1023_v22 }
 0x11f   :  { %v1254_v25 = vpop.f32.mrb[12].mxu0 }
 0x120   :  { %v1037_v55 = vadd.f32 %v1026_v5, %v1023_v22  ;;  %v1048_v10 = vmul.f32 %v1026_v5, %v1026_v5  ;;  %v1168_v60 = vpack.c.bf16 %v1026_v5, %v1023_v22  ;;  %v1255_v26 = vpop.f32.mrb[13].mxu0 }
 0x121   :  { %v1256_v59 = vadd.f32 %v1255_v26, %v1254_v25  ;;  %v1257_v0 = vpop.f32.mrb[14].mxu0 }
 0x122   :  { %v1051_v24 = vadd.f32 %v1048_v10, %v1047_v48  ;;  %1169 = vst [vmem:[%s1795_s4] sm:$0xff] %v1168_v60   ;;  %v1258_v27 = vpop.f32.mrb[15].mxu0  ;;  %v1282_v29 = vpop.f32.mrb[12].mxu1 }
 0x123   :  { %v982_v49 = vadd.f32 %v1256_v59, %v933_v13  ;;  %v1259_v56 = vadd.f32 %v1258_v27, %v1257_v0  ;;  %v1283_v11 = vpop.f32.mrb[13].mxu1 }
 0x124   :  { %v1284_v61 = vadd.f32 %v1283_v11, %v1282_v29  ;;  %v1285_v6 = vpop.f32.mrb[14].mxu1 }
 0x125   :  { %v985_v30 = vadd.f32 %v1259_v56, %v936_v3  ;;  %v1286_v31 = vpop.f32.mrb[15].mxu1 }
 0x126   :  { %v1031_v32 = vadd.f32 %v1284_v61, %v982_v49  ;;  %v1287_v33 = vadd.f32 %v1286_v31, %v1285_v6 }
 0x128   :  { %v1038_v34 = vadd.f32 %v1037_v55, %v1031_v32  ;;  %v1049_v35 = vmul.f32 %v1031_v32, %v1031_v32  ;;  %v1034_v36 = vadd.f32 %v1287_v33, %v985_v30 }
 0x12a   :  { %v1052_v37 = vadd.f32 %v1051_v24, %v1049_v35  ;;  %v1039_v39 = vadd.f32 %v1038_v34, %v1034_v36  ;;  %v1050_v40 = vmul.f32 %v1034_v36, %v1034_v36  ;;  %v1173_v12 = vpack.c.bf16 %v1034_v36, %v1031_v32 }
 0x12c   :  { %v1040_v41 = vrot.slane %v1039_v39, 4  ;;  %v1053_v42 = vadd.f32 %v1052_v37, %v1050_v40  ;;  %1175 = vst [vmem:[%s1795_s4 + $0x8] sm:$0xff] %v1173_v12  }
 0x12e   :  { %v1041_v43 = vadd.f32 %v1040_v41, %v1039_v39  ;;  %v1054_v44 = vrot.slane %v1053_v42, 4 }
 0x130   :  { %v1042_v46 = vrot.slane %v1041_v43, 2  ;;  %v1055_v47 = vadd.f32 %v1054_v44, %v1053_v42 }
 0x132   :  { %v1043_v50 = vadd.f32 %v1042_v46, %v1041_v43  ;;  %v1056_v51 = vrot.slane %v1055_v47, 2 }
 0x134   :  { %v1044_v52 = vrot.slane %v1043_v50, 1  ;;  %v1057_v1 = vadd.f32 %v1056_v51, %v1055_v47 }
 0x136   :  { %v1045_v57 = vadd.f32 %v1044_v52, %v1043_v50  ;;  %v1058_v58 = vrot.slane %v1057_v1, 1 }
 0x138   :  { %1046 = vst [vmem:[%s1796_s5] sm:$0x1] %v1045_v57  ;;  %v1059_v62 = vadd.f32 %v1058_v58, %v1057_v1 }
 0x13a   :  { %1060 = vst [vmem:[%s1797_s6] sm:$0x1] %v1059_v62 }

// kernel: netD_forward.11
= control target key start
LH: loop header
LB: loop body
LE: loop exit
PB: predicated region body
PF: predicated region fallthrough
CT: control target
= control target key end

     0   :  { %v28_v20 = vlaneseq  ;;  %v2221_v27 = vmov 1983009808   ;;  %vm1778_vm4 = vcmask 1024   ;;  %s2771_s1 = inlined_call_operand.vmem [shape: bf16[2048,1], index: 1, kind: input, shape index: {}]   ;;  %s2772_s2 = inlined_call_operand.vmem [shape: f32[1,2048], index: 2, kind: input, shape index: {}]   ;;  %s2773_s0 = inlined_call_operand.vmem [shape: bf16[2,2048], index: 0, kind: input, shape index: {}]   ;;  %s2774_s3 = inlined_call_operand.vmem [shape: f32[1,2048], index: 3, kind: input, shape index: {}]   ;;  %s2775_s4 = inlined_call_operand.vmem [shape: f32[2,1], index: 4, kind: output, shape index: {}]  }
   0x1   :  { %v2089_v0 = vld [vmem:[%s2771_s1 + $0x40] sm:$0xff]   ;;  %v2093_v4 = vld [vmem:[%s2771_s1 + $0x48] sm:$0xff]   ;;  %v2097_v8 = vld [vmem:[%s2771_s1 + $0x50] sm:$0xff]   ;;  %v95_v28 = vunpack.c.l.s4 %v2221_v27 }
   0x2   :  { %v2090_v1 = vld [vmem:[%s2771_s1 + $0xc0] sm:$0xff]   ;;  %1912 = vmatprep.subr.bf16.mxu0 %v2089_v0  ;;  %v2094_v5 = vld [vmem:[%s2771_s1 + $0xc8] sm:$0xff]   ;;  %v2098_v9 = vld [vmem:[%s2771_s1 + $0xd0] sm:$0xff]   ;;  %v29_v25 = vshrl.u32 %v28_v20, 7 }
   0x3   :  { %v2091_v2 = vld [vmem:[%s2771_s1] sm:$0xff]   ;;  %1934 = vmatprep.subr.bf16.mxu1 %v2090_v1  ;;  %v2095_v6 = vld [vmem:[%s2771_s1 + $0x8] sm:$0xff]   ;;  %v2099_v10 = vld [vmem:[%s2771_s1 + $0x10] sm:$0xff]   ;;  %v96_v35 = vunpack.c.0.s8 %v95_v28 }
   0x4   :  { %v2092_v3 = vld [vmem:[%s2771_s1 + $0x80] sm:$0xff]   ;;  %1913 = vmatpush3.bf16.msra.mxu0 %v2091_v2  ;;  %v2096_v7 = vld [vmem:[%s2771_s1 + $0x88] sm:$0xff]   ;;  %v2100_v11 = vld [vmem:[%s2771_s1 + $0x90] sm:$0xff]   ;;  %v2331_v32 = vsub.s32 0, %v29_v25  ;;  %v2336_v34 = vsub.s32 1, %v29_v25  ;;  %v2341_v37 = vsub.s32 2, %v29_v25 }
   0x5   :  { %1935 = vmatpush3.bf16.msra.mxu1 %v2092_v3  ;;  %1914 = vmatprep.subr.bf16.mxu0 %v2093_v4  ;;  %v2101_v12 = vld [vmem:[%s2771_s1 + $0x58] sm:$0xff]   ;;  %v2105_v16 = vld [vmem:[%s2771_s1 + $0x60] sm:$0xff]   ;;  %v2109_v21 = vld [vmem:[%s2771_s1 + $0x68] sm:$0xff]   ;;  %v2346_v39 = vsub.s32 3, %v29_v25  ;;  %v2354_v42 = vsub.s32 %v96_v35, %v29_v25  ;;  %v2356_v43 = vsub.s32 4, %v29_v25  ;;  %v2368_v48 = vsub.s32 5, %v29_v25 }
   0x6   :  { %1936 = vmatprep.subr.bf16.mxu1 %v2094_v5  ;;  %v2102_v13 = vld [vmem:[%s2771_s1 + $0xd8] sm:$0xff]   ;;  %v2106_v17 = vld [vmem:[%s2771_s1 + $0xe0] sm:$0xff]   ;;  %v2110_v22 = vld [vmem:[%s2771_s1 + $0xe8] sm:$0xff]   ;;  %v2370_v49 = vsub.s32 6, %v29_v25  ;;  %v2384_v59 = vsub.s32 7, %v29_v25 }
   0x7   :  { %v2103_v14 = vld [vmem:[%s2771_s1 + $0x18] sm:$0xff]   ;;  %v2107_v18 = vld [vmem:[%s2771_s1 + $0x20] sm:$0xff]   ;;  %v2111_v23 = vld [vmem:[%s2771_s1 + $0x28] sm:$0xff]  }
   0x8   :  { %1915 = vmatpush3.bf16.msra.mxu0 %v2095_v6  ;;  %v2104_v15 = vld [vmem:[%s2771_s1 + $0x98] sm:$0xff]   ;;  %v2108_v19 = vld [vmem:[%s2771_s1 + $0xa0] sm:$0xff]   ;;  %v2112_v24 = vld [vmem:[%s2771_s1 + $0xa8] sm:$0xff]  }
   0x9   :  { %1937 = vmatpush3.bf16.msra.mxu1 %v2096_v7  ;;  %1916 = vmatprep.subr.bf16.mxu0 %v2097_v8  ;;  %v2113_v26 = vld [vmem:[%s2771_s1 + $0x70] sm:$0xff]   ;;  %v2117_v33 = vld [vmem:[%s2771_s1 + $0x78] sm:$0xff]   ;;  %v24_v41 = vld [vmem:[%s2772_s2] sm:$0xff] }
   0xa   :  { %1938 = vmatprep.subr.bf16.mxu1 %v2098_v9  ;;  %v2114_v29 = vld [vmem:[%s2771_s1 + $0xf0] sm:$0xff]   ;;  %v2118_v36 = vld [vmem:[%s2771_s1 + $0xf8] sm:$0xff]   ;;  %v2361_v44 = vld [vmem:[%s2773_s0] sm:$0xff]  ;;  %v31_v45 = vrot.slane %v24_v41, %v2331_v32  ;;  %v35_v46 = vrot.slane %v24_v41, %v2336_v34  ;;  %v39_v50 = vrot.slane %v24_v41, %v2341_v37  ;;  %v43_v51 = vrot.slane %v24_v41, %v2346_v39 }
   0xb   :  { %v2115_v30 = vld [vmem:[%s2771_s1 + $0x30] sm:$0xff]   ;;  %v2119_v38 = vld [vmem:[%s2771_s1 + $0x38] sm:$0xff]   ;;  %v168_v47 = vld [vmem:[%s2774_s3] sm:$0xff]  ;;  %v20_v0 = vunpack.c.l.bf16 %v2361_v44  ;;  %v47_v3 = vrot.slane %v24_v41, %v2356_v43  ;;  %v51_v5 = vrot.slane %v24_v41, %v2368_v48  ;;  %v55_v6 = vrot.slane %v24_v41, %v2370_v49 }
   0xc   :  { %1917 = vmatpush3.bf16.msra.mxu0 %v2099_v10  ;;  %v2116_v31 = vld [vmem:[%s2771_s1 + $0xb0] sm:$0xff]   ;;  %v2120_v40 = vld [vmem:[%s2771_s1 + $0xb8] sm:$0xff]   ;;  %v175_v52 = vrot.slane %v168_v47, %v2331_v32  ;;  %v179_v53 = vrot.slane %v168_v47, %v2336_v34  ;;  %v2121_v54 = vld [vmem:[%s2771_s1 + $0x140] sm:$0xff]   ;;  %v92_v55 = vcombine.low %v31_v45, %v35_v46  ;;  %v183_v56 = vrot.slane %v168_v47, %v2341_v37 }
   0xd   :  { %1939 = vmatpush3.bf16.msra.mxu1 %v2100_v11  ;;  %1918 = vmatprep.subr.bf16.mxu0 %v2101_v12  ;;  %v187_v57 = vrot.slane %v168_v47, %v2346_v39  ;;  %v2122_v58 = vld [vmem:[%s2771_s1 + $0x1c0] sm:$0xff]   ;;  %v93_v60 = vcombine.low %v39_v50, %v43_v51  ;;  %v59_v7 = vrot.slane %v24_v41, %v2384_v59  ;;  %v21_v27 = vunpack.c.h.bf16 %v2361_v44  ;;  %v2427_v45 = vld [vmem:[%s2773_s0 + $0x8] sm:$0xff] }
   0xe   :  { %1940 = vmatprep.subr.bf16.mxu1 %v2102_v13  ;;  %v236_v61 = vcombine.low %v175_v52, %v179_v53  ;;  %v100_v62 = vrot.slane %v92_v55, %v2354_v42  ;;  %v191_v11 = vrot.slane %v168_v47, %v2356_v43  ;;  %v195_v12 = vrot.slane %v168_v47, %v2368_v48 }
   0xf   :  { %v237_v63 = vcombine.low %v183_v56, %v187_v57  ;;  %v107_v1 = vrot.slane %v93_v60, %v2354_v42  ;;  %v109_v13 = vcombine.low %v47_v3, %v51_v5  ;;  %v23_v55 = vunpack.c.h.bf16 %v2427_v45  ;;  %v2129_v5 = vld [vmem:[%s2771_s1 + $0x150] sm:$0xff]  }
  0x10   :  { %1919 = vmatpush3.bf16.msra.mxu0 %v2103_v14  ;;  %v244_v2 = vrot.slane %v236_v61, %v2354_v42  ;;  %v110_v14 = vcombine.low %v55_v6, %v59_v7  ;;  %v253_v20 = vcombine.low %v191_v11, %v195_v12  ;;  %v2131_v11 = vld [vmem:[%s2771_s1 + $0x110] sm:$0xff]  }
  0x11   :  { %1941 = vmatpush3.bf16.msra.mxu1 %v2104_v15  ;;  %1920 = vmatprep.subr.bf16.mxu0 %v2105_v16  ;;  %v251_v4 = vrot.slane %v237_v63, %v2354_v42  ;;  %v108_v8 = vcombine.low %v100_v62, %v107_v1  ;;  %v199_v15 = vrot.slane %v168_v47, %v2370_v49  ;;  %v2124_v63 = vld [vmem:[%s2771_s1 + $0x180] sm:$0xff]  }
  0x12   :  { %1942 = vmatprep.subr.bf16.mxu1 %v2106_v17  ;;  %v203_v16 = vrot.slane %v168_v47, %v2384_v59 }
  0x13   :  { %v252_v9 = vcombine.low %v244_v2, %v251_v4  ;;  %v164_v10 = vmul.f32 %v108_v8, %v20_v0  ;;  %v2126_v0 = vld [vmem:[%s2771_s1 + $0x1c8] sm:$0xff]  }
  0x14   :  { %1921 = vmatpush3.bf16.msra.mxu0 %v2107_v18  ;;  %v2402_v18 = vld [vmem:[%s2772_s2 + $0x8] sm:$0xff] }
  0x15   :  { %1943 = vmatpush3.bf16.msra.mxu1 %v2108_v19  ;;  %1922 = vmatprep.subr.bf16.mxu0 %v2109_v21  ;;  %v308_v17 = vadd.f32 %v252_v9, %v164_v10  ;;  %v117_v21 = vrot.slane %v109_v13, %v2354_v42  ;;  %v79_v25 = vrot.slane %v2402_v18, %v2356_v43  ;;  %v2128_v8 = vld [vmem:[%s2771_s1 + $0x188] sm:$0xff]   ;;  %v2130_v9 = vld [vmem:[%s2771_s1 + $0x1d0] sm:$0xff]   ;;  %v2133_v13 = vld [vmem:[%s2771_s1 + $0x158] sm:$0xff]  }
  0x16   :  { %1944 = vmatprep.subr.bf16.mxu1 %v2110_v22  ;;  %v124_v22 = vrot.slane %v110_v14, %v2354_v42 }
  0x17   :  { %vm312_vm0 = vcmp.ge.f32.partialorder %v308_v17, 0.0  ;;  %v316_v19 = vmul.f32 0.2, %v308_v17 }
  0x18   :  { %1923 = vmatpush3.bf16.msra.mxu0 %v2111_v23  ;;  %v254_v23 = vcombine.low %v199_v15, %v203_v16  ;;  %v125_v41 = vcombine.low %v117_v21, %v124_v22  ;;  %v2132_v15 = vld [vmem:[%s2771_s1 + $0x190] sm:$0xff]   ;;  %v2134_v16 = vld [vmem:[%s2771_s1 + $0x1d8] sm:$0xff]   ;;  %v2138_v22 = vld [vmem:[%s2771_s1 + $0x1e0] sm:$0xff]  }
  0x19   :  { %1945 = vmatpush3.bf16.msra.mxu1 %v2112_v24  ;;  %1924 = vmatprep.subr.bf16.mxu0 %v2113_v26  ;;  %v320_v24 = vsel %vm312_vm0, %v308_v17, %v316_v19  ;;  %v83_v26 = vrot.slane %v2402_v18, %v2368_v48  ;;  %v2135_v17 = vld [vmem:[%s2771_s1 + $0x118] sm:$0xff]  }
  0x1a   :  { %1946 = vmatprep.subr.bf16.mxu1 %v2114_v29  ;;  %v335_v28 = vrot.slane %v320_v24, %v2354_v42  ;;  %v328_v29 = vcombine.high %v320_v24, %v320_v24  ;;  %v268_v44 = vrot.slane %v254_v23, %v2354_v42  ;;  %v2136_v19 = vld [vmem:[%s2771_s1 + $0x198] sm:$0xff]   ;;  %v2139_v24 = vld [vmem:[%s2771_s1 + $0x120] sm:$0xff]  }
  0x1b   :  { %v143_v35 = vcombine.low %v79_v25, %v83_v26 }
  0x1c   :  { %1925 = vmatpush3.bf16.msra.mxu0 %v2115_v30  ;;  %v261_v30 = vrot.slane %v253_v20, %v2354_v42  ;;  %v412_v46 = vpack.c.bf16 %v335_v28, %v335_v28  ;;  %v2137_v20 = vld [vmem:[%s2771_s1 + $0x160] sm:$0xff]  }
  0x1d   :  { %1947 = vmatpush3.bf16.msra.mxu1 %v2116_v31  ;;  %1926 = vmatprep.subr.bf16.mxu0 %v2117_v33  ;;  %v87_v31 = vrot.slane %v2402_v18, %v2370_v49  ;;  %v91_v33 = vrot.slane %v2402_v18, %v2384_v59  ;;  %v151_v50 = vrot.slane %v143_v35, %v2354_v42 }
  0x1e   :  { %1948 = vmatprep.subr.bf16.mxu1 %v2118_v36  ;;  %v2420_v36 = vld [vmem:[%s2774_s3 + $0x8] sm:$0xff]  ;;  %v269_v3 = vcombine.low %v261_v30, %v268_v44  ;;  %v67_v35 = vrot.slane %v2402_v18, %v2336_v34  ;;  %v71_v44 = vrot.slane %v2402_v18, %v2341_v37 }
  0x1f   :  { %v144_v47 = vcombine.low %v87_v31, %v91_v33  ;;  %v223_v51 = vrot.slane %v2420_v36, %v2356_v43  ;;  %v227_v56 = vrot.slane %v2420_v36, %v2368_v48  ;;  %v231_v43 = vrot.slane %v2420_v36, %v2370_v49  ;;  %v2127_v49 = vld [vmem:[%s2771_s1 + $0x108] sm:$0xff]  }
  0x20   :  { %1927 = vmatpush3.bf16.msra.mxu0 %v2119_v38  ;;  %v343_v38 = vcombine.high %v335_v28, %v335_v28  ;;  %v235_v61 = vrot.slane %v2420_v36, %v2384_v59  ;;  %v165_v59 = vmul.f32 %v125_v41, %v21_v27  ;;  %v2141_v27 = vld [vmem:[%s2771_s1 + $0x168] sm:$0xff]   ;;  %v2140_v28 = vld [vmem:[%s2771_s1 + $0x1a0] sm:$0xff]   ;;  %v63_v33 = vrot.slane %v2402_v18, %v2331_v32 }
  0x21   :  { %1949 = vmatpush3.bf16.msra.mxu1 %v2120_v40  ;;  %1956 = vmatprep.subr.bf16.mxu0 %v2121_v54  ;;  %v342_v40 = vrot.slane %v328_v29, %v2354_v42  ;;  %v2123_v54 = vld [vmem:[%s2771_s1 + $0x100] sm:$0xff]   ;;  %v158_v60 = vrot.slane %v144_v47, %v2354_v42  ;;  %v287_v48 = vcombine.low %v223_v51, %v227_v56  ;;  %v2142_v31 = vld [vmem:[%s2771_s1 + $0x1e8] sm:$0xff]   ;;  %v2145_v47 = vld [vmem:[%s2771_s1 + $0x170] sm:$0xff]  }
  0x22   :  { %1978 = vmatprep.subr.bf16.mxu1 %v2122_v58  ;;  %v413_v52 = vpack.c.bf16 %v343_v38, %v343_v38  ;;  %v2125_v58 = vld [vmem:[%s2771_s1 + $0x148] sm:$0xff]   ;;  %v288_v2 = vcombine.low %v231_v43, %v235_v61  ;;  %v309_v12 = vadd.f32 %v269_v3, %v165_v59 }
  0x23   :  { %v344_v53 = vcombine.high %v342_v40, %v342_v40  ;;  %v414_v57 = vpack.c.bf16 %v342_v40, %v342_v40  ;;  %v159_v1 = vcombine.low %v151_v50, %v158_v60  ;;  %v295_v4 = vrot.slane %v287_v48, %v2354_v42  ;;  %v2143_v38 = vld [vmem:[%s2771_s1 + $0x128] sm:$0xff]   ;;  %v2150_v60 = vld [vmem:[%s2771_s1 + $0x1f8] sm:$0xff]  }
  0x24   :  { %1484 = vmatprep.mubr.bf16.mxu0 %v413_v52  ;;  %v302_v7 = vrot.slane %v288_v2, %v2354_v42  ;;  %vm313_vm1 = vcmp.ge.f32.partialorder %v309_v12, 0.0  ;;  %v317_v21 = vmul.f32 0.2, %v309_v12  ;;  %v2144_v50 = vld [vmem:[%s2771_s1 + $0x1a8] sm:$0xff]   ;;  %v2146_v52 = vld [vmem:[%s2771_s1 + $0x1f0] sm:$0xff]   ;;  %v22_v2 = vunpack.c.l.bf16 %v2427_v45 }
  0x25   :  { %v415_v62 = vpack.c.bf16 %v344_v53, %v344_v53  ;;  %1485 = vmatmul.mubr.bf16.vlgmr.msra.gmra.mrb[0].mxu0 %v412_v46  ;;  %v167_v6 = vmul.f32 %v159_v1, %v23_v55  ;;  %v75_v46 = vrot.slane %v2402_v18, %v2346_v39  ;;  %v126_v53 = vcombine.low %v63_v33, %v67_v35  ;;  %v2147_v55 = vld [vmem:[%s2771_s1 + $0x130] sm:$0xff]   ;;  %v2155_v1 = vld [vmem:[%s2771_s1 + $0x200] sm:$0xff]   ;;  %v2158_v45 = vld [vmem:[%s2771_s1 + $0x2c8] sm:$0xff]  }
  0x26   :  { %1957 = vmatpush3.bf16.msra.mxu0 %v2123_v54  ;;  %v303_v10 = vcombine.low %v295_v4, %v302_v7  ;;  %v321_v23 = vsel %vm313_vm1, %v309_v12, %v317_v21  ;;  %v207_v18 = vrot.slane %v2420_v36, %v2331_v32  ;;  %v211_v54 = vrot.slane %v2420_v36, %v2336_v34  ;;  %v2149_v32 = vld [vmem:[%s2771_s1 + $0x178] sm:$0xff]   ;;  %v2148_v34 = vld [vmem:[%s2771_s1 + $0x1b0] sm:$0xff]   ;;  %v2159_v7 = vld [vmem:[%s2771_s1 + $0x208] sm:$0xff]  }
  0x27   :  { %1524 = vmatprep.mubr.bf16.mxu1 %v415_v62  ;;  %1958 = vmatprep.subr.bf16.mxu0 %v2125_v58  ;;  %v2496_v25 = vrot.slane %v321_v23, %v2354_v42  ;;  %v345_v26 = vcombine.high %v321_v23, %v321_v23  ;;  %v127_v56 = vcombine.low %v71_v44, %v75_v46  ;;  %v2153_v62 = vld [vmem:[%s2771_s1 + $0x240] sm:$0xff]   ;;  %v2162_v12 = vld [vmem:[%s2771_s1 + $0x2d0] sm:$0xff]   ;;  %v2168_v21 = vld [vmem:[%s2771_s1 + $0x298] sm:$0xff]  }
  0x28   :  { %1525 = vmatmul.mubr.bf16.vlgmr.msra.gmra.mrb[0].mxu1 %v414_v57  ;;  %v2472_v14 = vadd.f32 %v303_v10, %v167_v6  ;;  %v215_v57 = vrot.slane %v2420_v36, %v2341_v37  ;;  %v219_v58 = vrot.slane %v2420_v36, %v2346_v39  ;;  %v2151_v37 = vld [vmem:[%s2771_s1 + $0x138] sm:$0xff]   ;;  %v134_v39 = vrot.slane %v126_v53, %v2354_v42  ;;  %v2156_v6 = vld [vmem:[%s2771_s1 + $0x280] sm:$0xff]   ;;  %v2161_v10 = vld [vmem:[%s2771_s1 + $0x250] sm:$0xff]  }
  0x29   :  { %1979 = vmatpush3.bf16.msra.mxu1 %v2124_v63  ;;  %v360_v29 = vcombine.high %v2496_v25, %v2496_v25  ;;  %v2507_v30 = vrot.slane %v345_v26, %v2354_v42  ;;  %v141_v36 = vrot.slane %v127_v56, %v2354_v42  ;;  %v270_v43 = vcombine.low %v207_v18, %v211_v54  ;;  %v2152_v63 = vld [vmem:[%s2771_s1 + $0x1b8] sm:$0xff]   ;;  %v2171_v26 = vld [vmem:[%s2771_s1 + $0x220] sm:$0xff]   ;;  %v2174_v35 = vld [vmem:[%s2771_s1 + $0x2e8] sm:$0xff]  }
  0x2a   :  { %1980 = vmatprep.subr.bf16.mxu1 %v2126_v0  ;;  %1959 = vmatpush3.bf16.msra.mxu0 %v2127_v49  ;;  %v271_v61 = vcombine.low %v215_v57, %v219_v58  ;;  %v416_v48 = vpack.c.bf16 %v2496_v25, %v2496_v25  ;;  %v2154_v0 = vld [vmem:[%s2771_s1 + $0x2c0] sm:$0xff]   ;;  %v2177_v44 = vld [vmem:[%s2771_s1 + $0x270] sm:$0xff]   ;;  %v2176_v46 = vld [vmem:[%s2771_s1 + $0x2a8] sm:$0xff]   ;;  %vm315_vm3 = vcmp.ge.f32.partialorder %v2472_v14, 0.0 }
  0x2b   :  { %1960 = vmatprep.subr.bf16.mxu0 %v2129_v5  ;;  %v417_v40 = vpack.c.bf16 %v360_v29, %v360_v29  ;;  %v361_v41 = vcombine.high %v2507_v30, %v2507_v30  ;;  %v142_v49 = vcombine.low %v134_v39, %v141_v36  ;;  %v278_v59 = vrot.slane %v270_v43, %v2354_v42  ;;  %v2157_v5 = vld [vmem:[%s2771_s1 + $0x248] sm:$0xff]   ;;  %v2180_v53 = vld [vmem:[%s2771_s1 + $0x2b0] sm:$0xff]   ;;  %v2182_v18 = vld [vmem:[%s2771_s1 + $0x2f8] sm:$0xff]  }
  0x2c   :  { %v285_v3 = vrot.slane %v271_v61, %v2354_v42  ;;  %v418_v4 = vpack.c.bf16 %v2507_v30, %v2507_v30  ;;  %v2173_v29 = vld [vmem:[%s2771_s1 + $0x268] sm:$0xff]   ;;  %v2172_v30 = vld [vmem:[%s2771_s1 + $0x2a0] sm:$0xff]   ;;  %v2183_v54 = vld [vmem:[%s2771_s1 + $0x238] sm:$0xff]  }
  0x2d   :  { %1981 = vmatpush3.bf16.msra.mxu1 %v2128_v8  ;;  %1564 = vmatprep.mubr.bf16.mxu0 %v417_v40  ;;  %v419_v51 = vpack.c.bf16 %v361_v41, %v361_v41  ;;  %v166_v8 = vmul.f32 %v142_v49, %v22_v2  ;;  %v2184_v56 = vld [vmem:[%s2771_s1 + $0x2b8] sm:$0xff]   ;;  %v2186_v58 = vld [vmem:[%s2771_s1 + $0x3c0] sm:$0xff]   ;;  %v2190_v39 = vld [vmem:[%s2771_s1 + $0x3c8] sm:$0xff]  }
  0x2e   :  { %1982 = vmatprep.subr.bf16.mxu1 %v2130_v9  ;;  %1961 = vmatpush3.bf16.msra.mxu0 %v2131_v11  ;;  %v286_v9 = vcombine.low %v278_v59, %v285_v3  ;;  %v2160_v11 = vld [vmem:[%s2771_s1 + $0x288] sm:$0xff]   ;;  %v2193_v43 = vld [vmem:[%s2771_s1 + $0x350] sm:$0xff]   ;;  %v2199_v2 = vld [vmem:[%s2771_s1 + $0x318] sm:$0xff]   ;;  %v319_v59 = vmul.f32 0.2, %v2472_v14 }
  0x2f   :  { %1962 = vmatprep.subr.bf16.mxu0 %v2133_v13  ;;  %1604 = vmatprep.mubr.bf16.mxu1 %v419_v51  ;;  %v2163_v13 = vld [vmem:[%s2771_s1 + $0x210] sm:$0xff]   ;;  %v2191_v36 = vld [vmem:[%s2771_s1 + $0x308] sm:$0xff]   ;;  %v2201_v49 = vld [vmem:[%s2771_s1 + $0x360] sm:$0xff]  }
  0x30   :  { %v2179_v51 = vld [vmem:[%s2771_s1 + $0x230] sm:$0xff]   ;;  %v2192_v61 = vld [vmem:[%s2771_s1 + $0x388] sm:$0xff]   ;;  %v2200_v3 = vld [vmem:[%s2771_s1 + $0x398] sm:$0xff]  }
  0x31   :  { %1983 = vmatpush3.bf16.msra.mxu1 %v2132_v15  ;;  %v310_v15 = vadd.f32 %v286_v9, %v166_v8  ;;  %v2205_v8 = vld [vmem:[%s2771_s1 + $0x368] sm:$0xff]   ;;  %v2204_v9 = vld [vmem:[%s2771_s1 + $0x3a0] sm:$0xff]  }
  0x32   :  { %1984 = vmatprep.subr.bf16.mxu1 %v2134_v16  ;;  %1963 = vmatpush3.bf16.msra.mxu0 %v2135_v17  ;;  %v2165_v16 = vld [vmem:[%s2771_s1 + $0x258] sm:$0xff]   ;;  %v2164_v17 = vld [vmem:[%s2771_s1 + $0x290] sm:$0xff]  }
  0x33   :  { %1964 = vmatprep.subr.bf16.mxu0 %v2137_v20  ;;  %v2167_v20 = vld [vmem:[%s2771_s1 + $0x218] sm:$0xff]   ;;  %vm314_vm2 = vcmp.ge.f32.partialorder %v310_v15, 0.0  ;;  %v318_v23 = vmul.f32 0.2, %v310_v15 }
  0x35   :  { %1985 = vmatpush3.bf16.msra.mxu1 %v2136_v19  ;;  %v2166_v19 = vld [vmem:[%s2771_s1 + $0x2d8] sm:$0xff]   ;;  %v322_v25 = vsel %vm314_vm2, %v310_v15, %v318_v23 }
  0x36   :  { %1986 = vmatprep.subr.bf16.mxu1 %v2138_v22  ;;  %1965 = vmatpush3.bf16.msra.mxu0 %v2139_v24  ;;  %v2169_v22 = vld [vmem:[%s2771_s1 + $0x260] sm:$0xff]   ;;  %v2214_v23 = vld [vmem:[%s2771_s1 + $0x3f8] sm:$0xff]  }
  0x37   :  { %1966 = vmatprep.subr.bf16.mxu0 %v2141_v27  ;;  %v2170_v24 = vld [vmem:[%s2771_s1 + $0x2e0] sm:$0xff]   ;;  %v369_v27 = vrot.slane %v322_v25, %v2354_v42 }
  0x39   :  { %1987 = vmatpush3.bf16.msra.mxu1 %v2140_v28  ;;  %v362_v28 = vcombine.high %v322_v25, %v322_v25  ;;  %v420_v57 = vpack.c.bf16 %v369_v27, %v369_v27  ;;  %v2216_v25 = vld [vmem:[%s2771_s1 + $0x3b8] sm:$0xff]  }
  0x3a   :  { %1988 = vmatprep.subr.bf16.mxu1 %v2142_v31  ;;  %1967 = vmatpush3.bf16.msra.mxu0 %v2143_v38  ;;  %v377_v31 = vcombine.high %v369_v27, %v369_v27  ;;  %v2175_v38 = vld [vmem:[%s2771_s1 + $0x228] sm:$0xff]  }
  0x3b   :  { %1968 = vmatprep.subr.bf16.mxu0 %v2145_v47  ;;  %v376_v33 = vrot.slane %v362_v28, %v2354_v42 }
  0x3c   :  { %v421_v40 = vpack.c.bf16 %v377_v31, %v377_v31 }
  0x3d   :  { %1989 = vmatpush3.bf16.msra.mxu1 %v2144_v50  ;;  %v378_v41 = vcombine.high %v376_v33, %v376_v33  ;;  %v2178_v50 = vld [vmem:[%s2771_s1 + $0x2f0] sm:$0xff]  }
  0x3e   :  { %1990 = vmatprep.subr.bf16.mxu1 %v2146_v52  ;;  %1969 = vmatpush3.bf16.msra.mxu0 %v2147_v55  ;;  %v2181_v52 = vld [vmem:[%s2771_s1 + $0x278] sm:$0xff]   ;;  %v2185_v55 = vld [vmem:[%s2771_s1 + $0x340] sm:$0xff]  }
  0x3f   :  { %1970 = vmatprep.subr.bf16.mxu0 %v2149_v32  ;;  %v423_v47 = vpack.c.bf16 %v378_v41, %v378_v41  ;;  %v2187_v32 = vld [vmem:[%s2771_s1 + $0x300] sm:$0xff]  }
  0x41   :  { %1991 = vmatpush3.bf16.msra.mxu1 %v2148_v34  ;;  %v422_v34 = vpack.c.bf16 %v376_v33, %v376_v33 }
  0x42   :  { %1992 = vmatprep.subr.bf16.mxu1 %v2150_v60  ;;  %1971 = vmatpush3.bf16.msra.mxu0 %v2151_v37  ;;  %v2189_v60 = vld [vmem:[%s2771_s1 + $0x348] sm:$0xff]   ;;  %v2188_v37 = vld [vmem:[%s2771_s1 + $0x380] sm:$0xff]  }
  0x43   :  { %2000 = vmatprep.subr.bf16.mxu0 %v2153_v62  ;;  %v2194_v62 = vld [vmem:[%s2771_s1 + $0x3d0] sm:$0xff]  }
  0x45   :  { %1993 = vmatpush3.bf16.msra.mxu1 %v2152_v63  ;;  %1565 = vmatmul.mubr.bf16.vlgmr.msra.gmra.mrb[4].mxu0 %v416_v48  ;;  %v2195_v63 = vld [vmem:[%s2771_s1 + $0x310] sm:$0xff]   ;;  %v2197_v48 = vld [vmem:[%s2771_s1 + $0x358] sm:$0xff]  }
  0x46   :  { %2022 = vmatprep.subr.bf16.mxu1 %v2154_v0  ;;  %2001 = vmatpush3.bf16.msra.mxu0 %v2155_v1  ;;  %v2196_v0 = vld [vmem:[%s2771_s1 + $0x390] sm:$0xff]   ;;  %v2198_v1 = vld [vmem:[%s2771_s1 + $0x3d8] sm:$0xff]  }
  0x47   :  { %2002 = vmatprep.subr.bf16.mxu0 %v2157_v5  ;;  %1644 = vmatprep.mubr.bf16.mxu0 %v421_v40  ;;  %v323_v5 = vsel %vm315_vm3, %v2472_v14, %v319_v59 }
  0x48   :  { %1605 = vmatmul.mubr.bf16.vlgmr.msra.gmra.mrb[4].mxu1 %v418_v4  ;;  %v2202_v4 = vld [vmem:[%s2771_s1 + $0x3e0] sm:$0xff]  }
  0x49   :  { %2023 = vmatpush3.bf16.msra.mxu1 %v2156_v6  ;;  %1684 = vmatprep.mubr.bf16.mxu1 %v423_v47  ;;  %v2203_v6 = vld [vmem:[%s2771_s1 + $0x320] sm:$0xff]  }
  0x4a   :  { %2024 = vmatprep.subr.bf16.mxu1 %v2158_v45  ;;  %2003 = vmatpush3.bf16.msra.mxu0 %v2159_v7  ;;  %v386_v45 = vrot.slane %v323_v5, %v2354_v42  ;;  %v379_v7 = vcombine.high %v323_v5, %v323_v5 }
  0x4b   :  { %2004 = vmatprep.subr.bf16.mxu0 %v2161_v10 }
  0x4c   :  { %v394_v10 = vcombine.high %v386_v45, %v386_v45  ;;  %v393_v14 = vrot.slane %v379_v7, %v2354_v42  ;;  %v2208_v42 = vld [vmem:[%s2771_s1 + $0x3a8] sm:$0xff]  }
  0x4d   :  { %2025 = vmatpush3.bf16.msra.mxu1 %v2160_v11  ;;  %v2206_v11 = vld [vmem:[%s2771_s1 + $0x3e8] sm:$0xff]  }
  0x4e   :  { %2026 = vmatprep.subr.bf16.mxu1 %v2162_v12  ;;  %2005 = vmatpush3.bf16.msra.mxu0 %v2163_v13  ;;  %v2207_v12 = vld [vmem:[%s2771_s1 + $0x328] sm:$0xff]   ;;  %v425_v13 = vpack.c.bf16 %v394_v10, %v394_v10  ;;  %v395_v15 = vcombine.high %v393_v14, %v393_v14  ;;  %v426_v27 = vpack.c.bf16 %v393_v14, %v393_v14 }
  0x4f   :  { %2006 = vmatprep.subr.bf16.mxu0 %v2165_v16  ;;  %v2209_v16 = vld [vmem:[%s2771_s1 + $0x370] sm:$0xff]  }
  0x51   :  { %2027 = vmatpush3.bf16.msra.mxu1 %v2164_v17  ;;  %v427_v17 = vpack.c.bf16 %v395_v15, %v395_v15 }
  0x52   :  { %2028 = vmatprep.subr.bf16.mxu1 %v2166_v19  ;;  %2007 = vmatpush3.bf16.msra.mxu0 %v2167_v20  ;;  %v2210_v19 = vld [vmem:[%s2771_s1 + $0x3f0] sm:$0xff]  }
  0x53   :  { %2008 = vmatprep.subr.bf16.mxu0 %v2169_v22  ;;  %v2211_v20 = vld [vmem:[%s2771_s1 + $0x330] sm:$0xff]  }
  0x54   :  { %v2212_v22 = vld [vmem:[%s2771_s1 + $0x3b0] sm:$0xff]  }
  0x55   :  { %2029 = vmatpush3.bf16.msra.mxu1 %v2168_v21  ;;  %v2213_v21 = vld [vmem:[%s2771_s1 + $0x378] sm:$0xff]  }
  0x56   :  { %2030 = vmatprep.subr.bf16.mxu1 %v2170_v24  ;;  %2009 = vmatpush3.bf16.msra.mxu0 %v2171_v26  ;;  %v2215_v24 = vld [vmem:[%s2771_s1 + $0x338] sm:$0xff]   ;;  %v424_v26 = vpack.c.bf16 %v386_v45, %v386_v45 }
  0x57   :  { %2010 = vmatprep.subr.bf16.mxu0 %v2173_v29 }
  0x59   :  { %2031 = vmatpush3.bf16.msra.mxu1 %v2172_v30 }
  0x5a   :  { %2032 = vmatprep.subr.bf16.mxu1 %v2174_v35  ;;  %2011 = vmatpush3.bf16.msra.mxu0 %v2175_v38 }
  0x5b   :  { %2012 = vmatprep.subr.bf16.mxu0 %v2177_v44 }
  0x5d   :  { %2033 = vmatpush3.bf16.msra.mxu1 %v2176_v46 }
  0x5e   :  { %2034 = vmatprep.subr.bf16.mxu1 %v2178_v50  ;;  %2013 = vmatpush3.bf16.msra.mxu0 %v2179_v51 }
  0x5f   :  { %2014 = vmatprep.subr.bf16.mxu0 %v2181_v52 }
  0x61   :  { %2035 = vmatpush3.bf16.msra.mxu1 %v2180_v53 }
  0x62   :  { %2036 = vmatprep.subr.bf16.mxu1 %v2182_v18  ;;  %2015 = vmatpush3.bf16.msra.mxu0 %v2183_v54 }
  0x63   :  { %2044 = vmatprep.subr.bf16.mxu0 %v2185_v55 }
  0x65   :  { %2037 = vmatpush3.bf16.msra.mxu1 %v2184_v56  ;;  %1645 = vmatmul.mubr.bf16.vlgmr.msra.gmra.mrb[8].mxu0 %v420_v57 }
  0x66   :  { %2066 = vmatprep.subr.bf16.mxu1 %v2186_v58  ;;  %2045 = vmatpush3.bf16.msra.mxu0 %v2187_v32 }
  0x67   :  { %2046 = vmatprep.subr.bf16.mxu0 %v2189_v60  ;;  %1724 = vmatprep.mubr.bf16.mxu0 %v425_v13 }
  0x68   :  { %1685 = vmatmul.mubr.bf16.vlgmr.msra.gmra.mrb[8].mxu1 %v422_v34 }
  0x69   :  { %2067 = vmatpush3.bf16.msra.mxu1 %v2188_v37  ;;  %1764 = vmatprep.mubr.bf16.mxu1 %v427_v17 }
  0x6a   :  { %2068 = vmatprep.subr.bf16.mxu1 %v2190_v39  ;;  %2047 = vmatpush3.bf16.msra.mxu0 %v2191_v36 }
  0x6b   :  { %2048 = vmatprep.subr.bf16.mxu0 %v2193_v43 }
  0x6d   :  { %2069 = vmatpush3.bf16.msra.mxu1 %v2192_v61 }
  0x6e   :  { %2070 = vmatprep.subr.bf16.mxu1 %v2194_v62  ;;  %2049 = vmatpush3.bf16.msra.mxu0 %v2195_v63 }
  0x6f   :  { %2050 = vmatprep.subr.bf16.mxu0 %v2197_v48 }
  0x71   :  { %2071 = vmatpush3.bf16.msra.mxu1 %v2196_v0 }
  0x72   :  { %2072 = vmatprep.subr.bf16.mxu1 %v2198_v1  ;;  %2051 = vmatpush3.bf16.msra.mxu0 %v2199_v2 }
  0x73   :  { %2052 = vmatprep.subr.bf16.mxu0 %v2201_v49 }
  0x75   :  { %2073 = vmatpush3.bf16.msra.mxu1 %v2200_v3 }
  0x76   :  { %2074 = vmatprep.subr.bf16.mxu1 %v2202_v4  ;;  %2053 = vmatpush3.bf16.msra.mxu0 %v2203_v6 }
  0x77   :  { %2054 = vmatprep.subr.bf16.mxu0 %v2205_v8 }
  0x79   :  { %2075 = vmatpush3.bf16.msra.mxu1 %v2204_v9 }
  0x7a   :  { %2076 = vmatprep.subr.bf16.mxu1 %v2206_v11  ;;  %2055 = vmatpush3.bf16.msra.mxu0 %v2207_v12 }
  0x7b   :  { %2056 = vmatprep.subr.bf16.mxu0 %v2209_v16 }
  0x7d   :  { %2077 = vmatpush3.bf16.msra.mxu1 %v2208_v42 }
  0x7e   :  { %2078 = vmatprep.subr.bf16.mxu1 %v2210_v19  ;;  %2057 = vmatpush3.bf16.msra.mxu0 %v2211_v20 }
  0x7f   :  { %2058 = vmatprep.subr.bf16.mxu0 %v2213_v21 }
  0x81   :  { %2079 = vmatpush3.bf16.msra.mxu1 %v2212_v22 }
  0x82   :  { %2080 = vmatprep.subr.bf16.mxu1 %v2214_v23  ;;  %2059 = vmatpush3.bf16.msra.mxu0 %v2215_v24 }
  0x85   :  { %2081 = vmatpush3.bf16.msra.mxu1 %v2216_v25  ;;  %1725 = vmatmul.mubr.bf16.vlgmr.msra.gmra.mrb[12].mxu0 %v424_v26 }
  0x88   :  { %1765 = vmatmul.mubr.bf16.vlgmr.msra.gmra.mrb[12].mxu1 %v426_v27 }
  0xf8   :  { %v1928_v28 = vpop.f32.mrb[0].mxu0 }
  0xf9   :  { %v1929_v29 = vpop.f32.mrb[1].mxu0 }
  0xfa   :  { %v1930_v31 = vadd.f32 %v1929_v29, %v1928_v28  ;;  %v1931_v33 = vpop.f32.mrb[2].mxu0 }
  0xfb   :  { %v1950_v30 = vpop.f32.mrb[0].mxu1  ;;  %v1932_v38 = vpop.f32.mrb[3].mxu0 }
  0xfc   :  { %v1951_v35 = vpop.f32.mrb[1].mxu1 }
  0xfd   :  { %v1952_v40 = vadd.f32 %v1951_v35, %v1950_v30  ;;  %v1953_v41 = vpop.f32.mrb[2].mxu1 }
  0xfe   :  { %v1954_v44 = vpop.f32.mrb[3].mxu1 }
  0xff   :  { %v1527_v46 = vadd.f32 %v1952_v40, %v1930_v31 }
 0x118   :  { %v1972_v47 = vpop.f32.mrb[4].mxu0 }
 0x119   :  { %v1973_v50 = vpop.f32.mrb[5].mxu0 }
 0x11a   :  { %v1974_v52 = vadd.f32 %v1973_v50, %v1972_v47  ;;  %v1975_v53 = vpop.f32.mrb[6].mxu0 }
 0x11b   :  { %v1994_v51 = vpop.f32.mrb[4].mxu1  ;;  %v1976_v54 = vpop.f32.mrb[7].mxu0 }
 0x11c   :  { %v1995_v18 = vpop.f32.mrb[5].mxu1  ;;  %v1567_v55 = vadd.f32 %v1974_v52, %v1527_v46 }
 0x11d   :  { %v1996_v56 = vadd.f32 %v1995_v18, %v1994_v51  ;;  %v1997_v57 = vpop.f32.mrb[6].mxu1 }
 0x11e   :  { %v1998_v58 = vpop.f32.mrb[7].mxu1 }
 0x11f   :  { %v1607_v32 = vadd.f32 %v1996_v56, %v1567_v55 }
 0x138   :  { %v2016_v34 = vpop.f32.mrb[8].mxu0 }
 0x139   :  { %v2017_v60 = vpop.f32.mrb[9].mxu0 }
 0x13a   :  { %v2018_v39 = vadd.f32 %v2017_v60, %v2016_v34  ;;  %v2019_v36 = vpop.f32.mrb[10].mxu0 }
 0x13b   :  { %v2038_v37 = vpop.f32.mrb[8].mxu1  ;;  %v2020_v61 = vpop.f32.mrb[11].mxu0 }
 0x13c   :  { %v2039_v43 = vpop.f32.mrb[9].mxu1  ;;  %v1647_v62 = vadd.f32 %v2018_v39, %v1607_v32 }
 0x13d   :  { %v2040_v63 = vadd.f32 %v2039_v43, %v2038_v37  ;;  %v2041_v48 = vpop.f32.mrb[10].mxu1 }
 0x13e   :  { %v2042_v0 = vpop.f32.mrb[11].mxu1 }
 0x13f   :  { %v1687_v1 = vadd.f32 %v2040_v63, %v1647_v62 }
 0x158   :  { %v2060_v2 = vpop.f32.mrb[12].mxu0 }
 0x159   :  { %v2061_v49 = vpop.f32.mrb[13].mxu0 }
 0x15a   :  { %v2062_v3 = vadd.f32 %v2061_v49, %v2060_v2  ;;  %v2063_v4 = vpop.f32.mrb[14].mxu0 }
 0x15b   :  { %v2082_v59 = vpop.f32.mrb[12].mxu1  ;;  %v2064_v6 = vpop.f32.mrb[15].mxu0 }
 0x15c   :  { %v2083_v5 = vpop.f32.mrb[13].mxu1  ;;  %v1727_v45 = vadd.f32 %v2062_v3, %v1687_v1 }
 0x15d   :  { %v2084_v7 = vadd.f32 %v2083_v5, %v2082_v59  ;;  %v2085_v8 = vpop.f32.mrb[14].mxu1 }
 0x15e   :  { %v2086_v9 = vpop.f32.mrb[15].mxu1 }
 0x15f   :  { %v1767_v10 = vadd.f32 %v2084_v7, %v1727_v45 }
 0x161   :  { %v1772_v14 = vsub.f32 0.0, %v1767_v10 }
 0x163   :  { %v1773_v11 = vmul.f32 1.442695, %v1772_v14 }
 0x165   :  { %2217 = vpow2.f32 %v1773_v11 }
 0x16f   :  { %v2218_v12 = vpop.eup %2217 }
 0x170   :  { %v1775_v13 = vadd.f32 1.0, %v2218_v12 }
 0x172   :  { %2219 = vrcp.f32 %v1775_v13 }
 0x17c   :  { %v2220_v15 = vpop.eup %2219 }
 0x17d   :  { %1779 = vst.msk [vmem:[%s2775_s4] sm:$0x3] %vm1778_vm4, %v2220_v15 }

</bundles_post_ra>
